<compile_context>
chip_gen: v7x
topology: tpu7x:2x2x1
jax: 0.10.0
libtpu: 0.0.40
codegen_flags: <defaults>
</compile_context>

<pallas_src>
import math
from functools import partial

import jax
import jax.numpy as jnp
from jax.experimental import pallas as pl
from jax.experimental.pallas import tpu as pltpu

BF16 = jnp.bfloat16
NEG = -1e9                       # finite "masked" value
_VMEM_LIMIT = 64 * 1024 * 1024   # explicit scoped-VMEM budget (safe on v5e/v6e/v7x)


def _cparams(sem):
    return pltpu.CompilerParams(dimension_semantics=sem, vmem_limit_bytes=_VMEM_LIMIT)


# ----------------------------- in-kernel helpers ----------------------------

def _ln(x, g, b, eps):
    mean = jnp.mean(x, axis=-1, keepdims=True)
    xc = x - mean
    var = jnp.mean(xc * xc, axis=-1, keepdims=True)
    return xc * jax.lax.rsqrt(var + eps) * g + b


def _gelu(x):
    # exact (erf-based) GELU == torch.nn.GELU() default
    return 0.5 * x * (1.0 + jax.lax.erf(x * (1.0 / math.sqrt(2.0))))


def _mha_into(scr_ref, q, k, v, bias, num_heads, scale):
    """Multi-head attention.  q:(Lq,D) k,v:(Lk,D), bias:(Lq,Lk) fp32 or None.
    Each head's output is written straight into its lane slice of scr_ref (no concat)."""
    Dh = q.shape[-1] // num_heads
    qb, kb, vb = q.astype(BF16), k.astype(BF16), v.astype(BF16)
    for h in range(num_heads):
        lo = h * Dh
        # q @ k^T without an explicit transpose: contract last axis with last axis.
        s = jax.lax.dot_general(qb[:, lo:lo + Dh], kb[:, lo:lo + Dh],
                                (((1,), (1,)), ((), ())),
                                preferred_element_type=jnp.float32) * scale
        if bias is not None:
            s = s + bias
        m = jnp.max(s, axis=-1, keepdims=True)
        p = jnp.exp(s - m)
        p = p * pl.reciprocal(jnp.sum(p, axis=-1, keepdims=True), approx=True)
        scr_ref[:, pl.ds(lo, Dh)] = jnp.dot(p.astype(BF16), vb[:, lo:lo + Dh],
                                            preferred_element_type=jnp.float32)
    return scr_ref[...]


# ----------------------------- Pallas kernels -------------------------------

def _enc_stack_kernel(x_ref, pos_ref, pre_g_ref, pre_b_ref,
                      ln1_g_ref, ln1_b_ref, wqkv_ref, bqkv_ref, wo_ref, bo_ref,
                      ln2_g_ref, ln2_b_ref, w1_ref, b1_ref, w2_ref, b2_ref,
                      o_ref, attn_scr, *, num_heads, eps):
    """Whole ViT encoder stack; grid = (batch, layer).  Residual stream stays in VMEM."""
    l = pl.program_id(1)

    @pl.when(l == 0)
    def _():
        # fused: + positional embedding, then ln_pre  (once per image)
        o_ref[0] = _ln(x_ref[0] + pos_ref[...], pre_g_ref[...], pre_b_ref[...], eps)

    x = o_ref[0]                                    # (L, D) fp32 residual stream
    D = x.shape[-1]
    scale = 1.0 / math.sqrt(D // num_heads)

    # --- self-attention sub-layer (no mask in the ViT encoder) ---
    x2 = _ln(x, ln1_g_ref[0], ln1_b_ref[0], eps)
    qkv = jnp.dot(x2.astype(BF16), wqkv_ref[0],
                  preferred_element_type=jnp.float32) + bqkv_ref[0]
    a = _mha_into(attn_scr, qkv[:, :D], qkv[:, D:2 * D], qkv[:, 2 * D:],
                  None, num_heads, scale)
    x = x + jnp.dot(a.astype(BF16), wo_ref[0],
                    preferred_element_type=jnp.float32) + bo_ref[0]

    # --- MLP sub-layer ---
    x2 = _ln(x, ln2_g_ref[0], ln2_b_ref[0], eps)
    h = _gelu(jnp.dot(x2.astype(BF16), w1_ref[0],
                      preferred_element_type=jnp.float32) + b1_ref[0])
    x = x + jnp.dot(h.astype(BF16), w2_ref[0],
                    preferred_element_type=jnp.float32) + b2_ref[0]

    o_ref[0] = x


def _dec_stack_kernel(x_ref, pe_ref, e_ref, sb_ref, cb_ref,
                      ln1_g_ref, ln1_b_ref, wqkv_ref, bqkv_ref, wo1_ref, bo1_ref,
                      ln2_g_ref, ln2_b_ref, wq_ref, bq_ref, wkv_ref, bkv_ref, wo2_ref, bo2_ref,
                      ln3_g_ref, ln3_b_ref, w1_ref, b1_ref, w2_ref, b2_ref,
                      o_ref, attn_scr, *, num_heads, eps, embed_scale):
    """Whole decoder stack; grid = (batch, layer)."""
    l = pl.program_id(1)

    @pl.when(l == 0)
    def _():
        # fused: Embeddings * sqrt(d_model) + PositionalEncoding add (once per sequence)
        o_ref[0] = x_ref[0] * embed_scale + pe_ref[...]

    x = o_ref[0]                                    # (L, D) fp32 residual stream
    D = x.shape[-1]
    scale = 1.0 / math.sqrt(D // num_heads)

    # --- masked self-attention ---
    x2 = _ln(x, ln1_g_ref[0], ln1_b_ref[0], eps)
    qkv = jnp.dot(x2.astype(BF16), wqkv_ref[0],
                  preferred_element_type=jnp.float32) + bqkv_ref[0]
    a = _mha_into(attn_scr, qkv[:, :D], qkv[:, D:2 * D], qkv[:, 2 * D:],
                  sb_ref[0, 0], num_heads, scale)
    x = x + jnp.dot(a.astype(BF16), wo1_ref[0],
                    preferred_element_type=jnp.float32) + bo1_ref[0]

    # --- cross-attention over encoder outputs ---
    x2 = _ln(x, ln2_g_ref[0], ln2_b_ref[0], eps)
    q = jnp.dot(x2.astype(BF16), wq_ref[0],
                preferred_element_type=jnp.float32) + bq_ref[0]
    kv = jnp.dot(e_ref[0].astype(BF16), wkv_ref[0],
                 preferred_element_type=jnp.float32) + bkv_ref[0]
    a = _mha_into(attn_scr, q, kv[:, :D], kv[:, D:],
                  cb_ref[0, 0], num_heads, scale)
    x = x + jnp.dot(a.astype(BF16), wo2_ref[0],
                    preferred_element_type=jnp.float32) + bo2_ref[0]

    # --- feed-forward ---
    x2 = _ln(x, ln3_g_ref[0], ln3_b_ref[0], eps)
    h = _gelu(jnp.dot(x2.astype(BF16), w1_ref[0],
                      preferred_element_type=jnp.float32) + b1_ref[0])
    x = x + jnp.dot(h.astype(BF16), w2_ref[0],
                    preferred_element_type=jnp.float32) + b2_ref[0]

    o_ref[0] = x


def _lnpost_proj_kernel(x_ref, g_ref, b_ref, w_ref, o_ref, *, eps):
    """CLS-token drop + ln_post + (x @ proj), fused (no bias in PyTorch)."""
    full = x_ref[0]                                 # (1+P, D)
    x = full[1:, :]                                 # drop CLS token in-kernel
    x2 = _ln(x, g_ref[...], b_ref[...], eps)
    o_ref[0] = jnp.dot(x2.astype(BF16), w_ref[...], preferred_element_type=jnp.float32)


def _head_kernel(x_ref, g_ref, b_ref, w_ref, bias_ref, o_ref, *, eps):
    """Final decoder LN + vocab projection + LogSoftmax, row-folded (B*L rows)."""
    # TODO(synk): N-tile the vocab axis with a streaming logsumexp for production vocab sizes.
    x2 = _ln(x_ref[...], g_ref[...], b_ref[...], eps)
    y = jnp.dot(x2.astype(BF16), w_ref[...],
                preferred_element_type=jnp.float32) + bias_ref[...]
    m = jnp.max(y, axis=-1, keepdims=True)
    lse = jnp.log(jnp.sum(jnp.exp(y - m), axis=-1, keepdims=True)) + m
    o_ref[...] = y - lse


def _linear_kernel(x_ref, w_ref, b_ref, o_ref):
    o_ref[...] = jnp.dot(x_ref[...], w_ref[...],
                         preferred_element_type=jnp.float32) + b_ref[...]


# ----------------------------- BlockSpec helpers ----------------------------

def _spec_layer(*dims):       # per-layer stacked weight, selected by layer grid index
    nd = len(dims)
    return pl.BlockSpec((1,) + dims, lambda b, l: (l,) + (0,) * nd)


def _spec_shared(*dims):      # shared across the whole grid (fetched once)
    nd = len(dims)
    return pl.BlockSpec(dims, lambda b, l: (0,) * nd)


def _spec_batch(*dims):       # per-batch-element, constant across the layer axis
    nd = len(dims)
    return pl.BlockSpec((1,) + dims, lambda b, l: (b,) + (0,) * nd)


# ----------------------------- pallas_call wrappers -------------------------

def encoder_stack(x, ep, num_heads, eps=1e-5):
    """x: (B, 1+P, width).  One pallas_call for pos-add + ln_pre + all ViT blocks."""
    B, L, D = x.shape
    NL = ep["ln1_g"].shape[0]
    in_specs = [
        _spec_batch(L, D),                 # x (patch embeddings + CLS)
        _spec_shared(L, D),                # positional embedding
        _spec_shared(1, D),                # ln_pre gamma
        _spec_shared(1, D),                # ln_pre beta
        _spec_layer(1, D), _spec_layer(1, D),            # ln1
        _spec_layer(D, 3 * D), _spec_layer(1, 3 * D),    # fused qkv
        _spec_layer(D, D), _spec_layer(1, D),            # out proj
        _spec_layer(1, D), _spec_layer(1, D),            # ln2
        _spec_layer(D, 4 * D), _spec_layer(1, 4 * D),    # mlp fc
        _spec_layer(4 * D, D), _spec_layer(1, D),        # mlp proj
    ]
    return pl.pallas_call(
        partial(_enc_stack_kernel, num_heads=num_heads, eps=eps),
        out_shape=jax.ShapeDtypeStruct((B, L, D), jnp.float32),
        grid=(B, NL),
        in_specs=in_specs,
        out_specs=pl.BlockSpec((1, L, D), lambda b, l: (b, 0, 0)),
        scratch_shapes=[pltpu.VMEM((L, D), jnp.float32)],
        compiler_params=_cparams(("parallel", "arbitrary")),
    )(x, ep["positional_embedding"],
      ep["ln_pre_g"].reshape(1, D), ep["ln_pre_b"].reshape(1, D),
      ep["ln1_g"], ep["ln1_b"], ep["w_qkv"], ep["b_qkv"], ep["wo"], ep["bo"],
      ep["ln2_g"], ep["ln2_b"], ep["fc_w"], ep["fc_b"], ep["pj_w"], ep["pj_b"])


def decoder_stack(x, pe, e_out, self_bias, cross_bias, dp, num_heads, eps=1e-5):
    """x: raw token embeddings (B, L, D).  One pallas_call for the whole decoder stack."""
    B, L, D = x.shape
    Lk = e_out.shape[1]
    NL = dp["ln1_g"].shape[0]
    F = dp["ff1_w"].shape[-1]
    in_specs = [
        _spec_batch(L, D),                 # x (raw embeddings)
        _spec_shared(L, D),                # positional encoding table slice
        _spec_batch(Lk, D),                # encoder outputs
        _spec_batch(1, L, L),              # self-attn bias
        _spec_batch(1, L, Lk),             # cross-attn bias
        _spec_layer(1, D), _spec_layer(1, D),            # ln1
        _spec_layer(D, 3 * D), _spec_layer(1, 3 * D),    # fused qkv
        _spec_layer(D, D), _spec_layer(1, D),            # out proj 1
        _spec_layer(1, D), _spec_layer(1, D),            # ln2
        _spec_layer(D, D), _spec_layer(1, D),            # q proj
        _spec_layer(D, 2 * D), _spec_layer(1, 2 * D),    # fused kv
        _spec_layer(D, D), _spec_layer(1, D),            # out proj 2
        _spec_layer(1, D), _spec_layer(1, D),            # ln3
        _spec_layer(D, F), _spec_layer(1, F),            # ff1
        _spec_layer(F, D), _spec_layer(1, D),            # ff2
    ]
    return pl.pallas_call(
        partial(_dec_stack_kernel, num_heads=num_heads, eps=eps,
                embed_scale=math.sqrt(D)),
        out_shape=jax.ShapeDtypeStruct((B, L, D), jnp.float32),
        grid=(B, NL),
        in_specs=in_specs,
        out_specs=pl.BlockSpec((1, L, D), lambda b, l: (b, 0, 0)),
        scratch_shapes=[pltpu.VMEM((L, D), jnp.float32)],
        compiler_params=_cparams(("parallel", "arbitrary")),
    )(x, pe, e_out, self_bias, cross_bias,
      dp["ln1_g"], dp["ln1_b"], dp["w_qkv"], dp["b_qkv"], dp["wo1"], dp["bo1"],
      dp["ln2_g"], dp["ln2_b"], dp["wq"], dp["bq"], dp["w_kv"], dp["b_kv"],
      dp["wo2"], dp["bo2"],
      dp["ln3_g"], dp["ln3_b"], dp["ff1_w"], dp["ff1_b"], dp["ff2_w"], dp["ff2_b"])


def lnpost_proj(x, g, b, w, eps=1e-5):
    """ViT epilogue: drop CLS + ln_post + proj, fused; x: (B, 1+P, width)."""
    B, L1, Din = x.shape
    P, Dout = L1 - 1, w.shape[1]
    return pl.pallas_call(
        partial(_lnpost_proj_kernel, eps=eps),
        out_shape=jax.ShapeDtypeStruct((B, P, Dout), jnp.float32),
        grid=(B,),
        in_specs=[pl.BlockSpec((1, L1, Din), lambda i: (i, 0, 0)),
                  pl.BlockSpec((1, Din), lambda i: (0, 0)),
                  pl.BlockSpec((1, Din), lambda i: (0, 0)),
                  pl.BlockSpec((Din, Dout), lambda i: (0, 0))],
        out_specs=pl.BlockSpec((1, P, Dout), lambda i: (i, 0, 0)),
        compiler_params=_cparams(("parallel",)),
    )(x, g.reshape(1, Din), b.reshape(1, Din), w)


def _pick_row_tile(M, target=256):
    if M <= target:
        return M
    for tm in range(target, 7, -8):
        if M % tm == 0:
            return tm
    return M


def head(x, g, b, w, bias, eps=1e-5):
    """Final LN + vocab Linear + LogSoftmax over row-folded (B*L, D) -> (B*L, V)."""
    M, D = x.shape
    V = w.shape[1]
    tm = _pick_row_tile(M)
    return pl.pallas_call(
        partial(_head_kernel, eps=eps),
        out_shape=jax.ShapeDtypeStruct((M, V), jnp.float32),
        grid=(M // tm,),
        in_specs=[pl.BlockSpec((tm, D), lambda i: (i, 0)),
                  pl.BlockSpec((1, D), lambda i: (0, 0)),
                  pl.BlockSpec((1, D), lambda i: (0, 0)),
                  pl.BlockSpec((D, V), lambda i: (0, 0)),
                  pl.BlockSpec((1, V), lambda i: (0, 0))],
        out_specs=pl.BlockSpec((tm, V), lambda i: (i, 0)),
        compiler_params=_cparams(("parallel",)),
    )(x, g.reshape(1, D), b.reshape(1, D), w, bias.reshape(1, V))


def linear(x, w, b):
    """Plain x:(M,K) @ w:(K,N) + b, row-tiled (used for the conv1 patch embedding)."""
    M, K = x.shape
    N = w.shape[1]
    tm = _pick_row_tile(M)
    return pl.pallas_call(
        _linear_kernel,
        out_shape=jax.ShapeDtypeStruct((M, N), jnp.float32),
        grid=(M // tm,),
        in_specs=[pl.BlockSpec((tm, K), lambda i: (i, 0)),
                  pl.BlockSpec((K, N), lambda i: (0, 0)),
                  pl.BlockSpec((1, N), lambda i: (0, 0))],
        out_specs=pl.BlockSpec((tm, N), lambda i: (i, 0)),
        compiler_params=_cparams(("parallel",)),
    )(x, w, b.reshape(1, N))


# ----------------------------- model building blocks ------------------------

def make_bias(B, Lq, Lk, key_padding_mask=None, attn_mask=None):
    """Additive mask (B, 1, Lq, Lk); shared across heads."""
    bias = jnp.zeros((B, 1, Lq, Lk), jnp.float32)
    if key_padding_mask is not None:   # (B, Lk) bool, True == pad (ignore key)
        bias = bias + jnp.where(key_padding_mask[:, None, None, :], NEG, 0.0)
    if attn_mask is not None:          # (Lq, Lk) bool, True == disallowed
        bias = bias + jnp.where(attn_mask[None, None, :, :], NEG, 0.0)
    return bias


def encoder_vit(src, ep, cfg):
    """CLIP-style ViT encoder (frozen).  src: (B, 3, H, W) NCHW."""
    B, C, H, W = src.shape
    p, width = cfg["patch"], cfg["width"]
    gh, gw = H // p, W // p
    # conv1 (stride==kernel, no bias) as patch-extract (JAX glue) + Pallas matmul
    patches = src.reshape(B, C, gh, p, gw, p).transpose(0, 2, 4, 1, 3, 5)
    patches = patches.reshape(B * gh * gw, C * p * p).astype(BF16)
    x = linear(patches, ep["conv1_w"], jnp.zeros((width,), jnp.float32))
    x = x.reshape(B, gh * gw, width)
    cls = jnp.broadcast_to(ep["class_embedding"][None, None, :], (B, 1, width))
    x = jnp.concatenate([cls, x], axis=1)                      # (B, 1+P, width)
    # pos-add + ln_pre + all residual blocks fused into one call
    x = encoder_stack(x, ep, cfg["vit_heads"])
    # CLS drop + ln_post + proj fused
    return lnpost_proj(x, ep["ln_post_g"], ep["ln_post_b"], ep["proj"])


def decoder_forward(trg, e_out, src_mask, trg_mask, trg_attn_mask, dp, cfg):
    B, L = trg.shape
    x = dp["embed"][trg]                                 # gather = JAX glue; scale + PE fused in-kernel
    self_bias = make_bias(B, L, L, key_padding_mask=trg_mask, attn_mask=trg_attn_mask)
    cross_bias = make_bias(B, L, e_out.shape[1], key_padding_mask=src_mask)
    return decoder_stack(x, dp["pe"][:L], e_out, self_bias, cross_bias, dp, cfg["heads"])


def transformer_forward(params, src, trg, src_mask, trg_mask, trg_attn_mask, cfg):
    e_out = encoder_vit(src, params["encoder"], cfg)
    d_out = decoder_forward(trg, e_out, src_mask, trg_mask, trg_attn_mask,
                            params["decoder"], cfg)
    B, L, D = d_out.shape
    logp = head(d_out.reshape(B * L, D),
                params["decoder"]["lnf_g"], params["decoder"]["lnf_b"],
                params["out_w"], params["out_b"])
    return logp.reshape(B, L, -1)


# ----------------------------- parameter init -------------------------------

def _xavier(key, shape):
    fan_in, fan_out = shape[0], shape[1]
    limit = math.sqrt(6.0 / (fan_in + fan_out))
    return jax.random.uniform(key, shape, jnp.float32, -limit, limit)


def init_params(key, cfg):
    width, d_model, d_ff = cfg["width"], cfg["d_model"], cfg["d_ff"]
    patch, vocab = cfg["patch"], cfg["vocab"]
    num_tokens = (cfg["image"] // patch) ** 2 + 1
    NLe, NLd = cfg["vit_layers"], cfg["N_dec"]
    k_enc, k_dec, k_out = jax.random.split(key, 3)

    # ---------- frozen ViT encoder (weights pre-fused, pre-stacked, bf16) ----------
    eks = jax.random.split(k_enc, 4)
    bkeys = jax.random.split(jax.random.fold_in(k_enc, 1), NLe * 4)

    def estack(shape, slot):
        return jnp.stack([_xavier(bkeys[4 * i + slot], shape)
                          for i in range(NLe)]).astype(BF16)

    conv_w = 0.02 * jax.random.normal(eks[0], (width, 3 * patch * patch), jnp.float32)
    encoder = {
        "conv1_w": conv_w.T.astype(BF16),                               # (C*p*p, width)
        "class_embedding": 0.02 * jax.random.normal(eks[1], (width,), jnp.float32),
        "positional_embedding": 0.02 * jax.random.normal(eks[2], (num_tokens, width), jnp.float32),
        "ln_pre_g": jnp.ones((width,), jnp.float32), "ln_pre_b": jnp.zeros((width,), jnp.float32),
        "ln_post_g": jnp.ones((width,), jnp.float32), "ln_post_b": jnp.zeros((width,), jnp.float32),
        "proj": _xavier(eks[3], (width, d_model)).astype(BF16),
        # stacked per-layer params (leading axis = layer, selected by the grid index_map)
        "ln1_g": jnp.ones((NLe, 1, width), jnp.float32), "ln1_b": jnp.zeros((NLe, 1, width), jnp.float32),
        "ln2_g": jnp.ones((NLe, 1, width), jnp.float32), "ln2_b": jnp.zeros((NLe, 1, width), jnp.float32),
        "w_qkv": estack((width, 3 * width), 0), "b_qkv": jnp.zeros((NLe, 1, 3 * width), jnp.float32),
        "wo": estack((width, width), 1), "bo": jnp.zeros((NLe, 1, width), jnp.float32),
        "fc_w": estack((width, 4 * width), 2), "fc_b": jnp.zeros((NLe, 1, 4 * width), jnp.float32),
        "pj_w": estack((4 * width, width), 3), "pj_b": jnp.zeros((NLe, 1, width), jnp.float32),
    }

    # ---------- decoder ----------
    max_len = 64
    position = jnp.arange(max_len, dtype=jnp.float32)[:, None]
    div_term = jnp.exp(jnp.arange(0, d_model, 2, dtype=jnp.float32)
                       * (-math.log(10000.0) / d_model))
    pe = jnp.zeros((max_len, d_model), jnp.float32)
    pe = pe.at[:, 0::2].set(jnp.sin(position * div_term))
    pe = pe.at[:, 1::2].set(jnp.cos(position * div_term))

    dks = jax.random.split(k_dec, 2)
    lkeys = jax.random.split(dks[1], NLd * 7)

    def dstack(shape, slot):
        return jnp.stack([_xavier(lkeys[7 * i + slot], shape)
                          for i in range(NLd)]).astype(BF16)

    dec = {
        "embed": _xavier(dks[0], (vocab, d_model)),
        "pe": pe,
        "lnf_g": jnp.ones((d_model,), jnp.float32), "lnf_b": jnp.zeros((d_model,), jnp.float32),
        "ln1_g": jnp.ones((NLd, 1, d_model), jnp.float32), "ln1_b": jnp.zeros((NLd, 1, d_model), jnp.float32),
        "ln2_g": jnp.ones((NLd, 1, d_model), jnp.float32), "ln2_b": jnp.zeros((NLd, 1, d_model), jnp.float32),
        "ln3_g": jnp.ones((NLd, 1, d_model), jnp.float32), "ln3_b": jnp.zeros((NLd, 1, d_model), jnp.float32),
        "w_qkv": dstack((d_model, 3 * d_model), 0), "b_qkv": jnp.zeros((NLd, 1, 3 * d_model), jnp.float32),
        "wo1": dstack((d_model, d_model), 1), "bo1": jnp.zeros((NLd, 1, d_model), jnp.float32),
        "wq": dstack((d_model, d_model), 2), "bq": jnp.zeros((NLd, 1, d_model), jnp.float32),
        "w_kv": dstack((d_model, 2 * d_model), 3), "b_kv": jnp.zeros((NLd, 1, 2 * d_model), jnp.float32),
        "wo2": dstack((d_model, d_model), 4), "bo2": jnp.zeros((NLd, 1, d_model), jnp.float32),
        "ff1_w": dstack((d_model, d_ff), 5), "ff1_b": jnp.zeros((NLd, 1, d_ff), jnp.float32),
        "ff2_w": dstack((d_ff, d_model), 6), "ff2_b": jnp.zeros((NLd, 1, d_model), jnp.float32),
    }

    return {
        "encoder": encoder,
        "decoder": dec,
        "out_w": _xavier(k_out, (d_model, vocab)).astype(BF16),
        "out_b": jnp.zeros((vocab,), jnp.float32),
    }


# ----------------------------- main ------------------------------------------

if __name__ == "__main__":
    cfg = {
        "image": 16, "patch": 8, "width": 32, "vit_layers": 2, "vit_heads": 4,
        "d_model": 32, "d_ff": 64, "N_dec": 2, "heads": 4, "vocab": 64,
    }
    B, L_trg = 2, 8
    num_patches = (cfg["image"] // cfg["patch"]) ** 2  # 4

    key = jax.random.PRNGKey(0)
    k_params, k_src, k_trg = jax.random.split(key, 3)
    params = init_params(k_params, cfg)

    src = jax.random.normal(k_src, (B, 3, cfg["image"], cfg["image"]), jnp.float32)
    trg = jax.random.randint(k_trg, (B, L_trg), 0, cfg["vocab"], dtype=jnp.int32)

    # masks: True == masked (PyTorch bool-mask convention)
    src_mask = jnp.zeros((B, num_patches), dtype=bool).at[1, -1].set(True)
    trg_mask = jnp.zeros((B, L_trg), dtype=bool).at[0, -2:].set(True)
    trg_attn_mask = jnp.triu(jnp.ones((L_trg, L_trg), dtype=bool), k=1)  # causal

    fwd = jax.jit(partial(transformer_forward, cfg=cfg))
    out = fwd(params, src, trg, src_mask, trg_mask, trg_attn_mask)
    out = jax.block_until_ready(out)

    assert out.shape == (B, L_trg, cfg["vocab"]), out.shape
    assert bool(jnp.all(jnp.isfinite(out)))
    # log-softmax rows must sum to ~1 in prob space
    assert bool(jnp.allclose(jnp.sum(jnp.exp(out), axis=-1), 1.0, atol=1e-4))
    print("KERNEL_OK")
</pallas_src>

<mosaic_0001>
module attributes {stable_mosaic.version = 11 : i64} {
  func.func @_linear_kernel(%arg0: i32, %arg1: memref<8x192xbf16, #tpu.memory_space<vmem>>, %arg2: memref<192x32xbf16, #tpu.memory_space<vmem>>, %arg3: memref<1x32xf32, #tpu.memory_space<vmem>>, %arg4: memref<8x32xf32, #tpu.memory_space<vmem>>) attributes {dimension_semantics = [#tpu.dimension_semantics<parallel>], iteration_bounds = array<i64: 1>, scalar_prefetch = 0 : i64, scratch_operands = 0 : i64, tpu.core_type = #tpu.core_type<tc>, window_params = [{transform_indices = @transform_0, window_bounds = array<i64: 8, 192>}, {pipeline_mode = #tpu.pipeline_mode<synchronous>, transform_indices = @transform_1, window_bounds = array<i64: 192, 32>}, {pipeline_mode = #tpu.pipeline_mode<synchronous>, transform_indices = @transform_2, window_bounds = array<i64: 1, 32>}, {transform_indices = @transform_3, window_bounds = array<i64: 8, 32>}]} {
    %c0 = arith.constant 0 : index
    %c0_0 = arith.constant 0 : index
    %0 = vector.load %arg1[%c0, %c0_0] : memref<8x192xbf16, #tpu.memory_space<vmem>>, vector<8x192xbf16>
    %c0_1 = arith.constant 0 : index
    %c0_2 = arith.constant 0 : index
    %1 = vector.load %arg2[%c0_1, %c0_2] : memref<192x32xbf16, #tpu.memory_space<vmem>>, vector<192x32xbf16>
    %cst = arith.constant dense<0.000000e+00> : vector<8x32xf32>
    %2 = tpu.matmul %0, %1, %cst {dimension_numbers = #tpu.dot_dimension_numbers<[1], [0], [0], [1], [0, 0, 1, 1], [], []>} : vector<8x192xbf16>, vector<192x32xbf16>, vector<8x32xf32> -> vector<8x32xf32>
    %c0_3 = arith.constant 0 : index
    %c0_4 = arith.constant 0 : index
    %3 = vector.load %arg3[%c0_3, %c0_4] : memref<1x32xf32, #tpu.memory_space<vmem>>, vector<1x32xf32>
    %4 = vector.broadcast %3 : vector<1x32xf32> to vector<8x32xf32>
    %5 = arith.addf %2, %4 : vector<8x32xf32>
    %c0_5 = arith.constant 0 : index
    %c0_6 = arith.constant 0 : index
    %6 = vector.load %arg4[%c0_5, %c0_6] : memref<8x32xf32, #tpu.memory_space<vmem>>, vector<8x32xf32>
    tpu.vector_store %arg4[%c0_5, %c0_6], %5 {strides = array<i32>} : memref<8x32xf32, #tpu.memory_space<vmem>>, vector<8x32xf32>,
    return
  }
  func.func @transform_0(%arg0: i32) -> (i32, i32) {
    %c0_i32 = arith.constant 0 : i32
    %c0_i32_0 = arith.constant 0 : i32
    return %arg0, %c0_i32 : i32, i32
  }
  func.func @transform_1(%arg0: i32) -> (i32, i32) {
    %c0_i32 = arith.constant 0 : i32
    %c0_i32_0 = arith.constant 0 : i32
    %c0_i32_1 = arith.constant 0 : i32
    return %c0_i32, %c0_i32_0 : i32, i32
  }
  func.func @transform_2(%arg0: i32) -> (i32, i32) {
    %c0_i32 = arith.constant 0 : i32
    %c0_i32_0 = arith.constant 0 : i32
    %c0_i32_1 = arith.constant 0 : i32
    return %c0_i32, %c0_i32_0 : i32, i32
  }
  func.func @transform_3(%arg0: i32) -> (i32, i32) {
    %c0_i32 = arith.constant 0 : i32
    %c0_i32_0 = arith.constant 0 : i32
    return %arg0, %c0_i32 : i32, i32
  }
}

module attributes {stable_mosaic.version = 11 : i64} {
  func.func @_enc_stack_kernel(%arg0: i32, %arg1: i32, %arg2: memref<1x5x32xf32, #tpu.memory_space<vmem>>, %arg3: memref<5x32xf32, #tpu.memory_space<vmem>>, %arg4: memref<1x32xf32, #tpu.memory_space<vmem>>, %arg5: memref<1x32xf32, #tpu.memory_space<vmem>>, %arg6: memref<1x1x32xf32, #tpu.memory_space<vmem>>, %arg7: memref<1x1x32xf32, #tpu.memory_space<vmem>>, %arg8: memref<1x32x96xbf16, #tpu.memory_space<vmem>>, %arg9: memref<1x1x96xf32, #tpu.memory_space<vmem>>, %arg10: memref<1x32x32xbf16, #tpu.memory_space<vmem>>, %arg11: memref<1x1x32xf32, #tpu.memory_space<vmem>>, %arg12: memref<1x1x32xf32, #tpu.memory_space<vmem>>, %arg13: memref<1x1x32xf32, #tpu.memory_space<vmem>>, %arg14: memref<1x32x128xbf16, #tpu.memory_space<vmem>>, %arg15: memref<1x1x128xf32, #tpu.memory_space<vmem>>, %arg16: memref<1x128x32xbf16, #tpu.memory_space<vmem>>, %arg17: memref<1x1x32xf32, #tpu.memory_space<vmem>>, %arg18: memref<1x5x32xf32, #tpu.memory_space<vmem>>, %arg19: memref<5x32xf32, #tpu.memory_space<vmem>>) attributes {dimension_semantics = [#tpu.dimension_semantics<parallel>, #tpu.dimension_semantics<arbitrary>], iteration_bounds = array<i64: 2, 2>, scalar_prefetch = 0 : i64, scratch_operands = 1 : i64, tpu.core_type = #tpu.core_type<tc>, window_params = [{transform_indices = @transform_0, window_bounds = array<i64: 1, 5, 32>}, {pipeline_mode = #tpu.pipeline_mode<synchronous>, transform_indices = @transform_1, window_bounds = array<i64: 5, 32>}, {pipeline_mode = #tpu.pipeline_mode<synchronous>, transform_indices = @transform_2, window_bounds = array<i64: 1, 32>}, {pipeline_mode = #tpu.pipeline_mode<synchronous>, transform_indices = @transform_3, window_bounds = array<i64: 1, 32>}, {transform_indices = @transform_4, window_bounds = array<i64: 1, 1, 32>}, {transform_indices = @transform_5, window_bounds = array<i64: 1, 1, 32>}, {transform_indices = @transform_6, window_bounds = array<i64: 1, 32, 96>}, {transform_indices = @transform_7, window_bounds = array<i64: 1, 1, 96>}, {transform_indices = @transform_8, window_bounds = array<i64: 1, 32, 32>}, {transform_indices = @transform_9, window_bounds = array<i64: 1, 1, 32>}, {transform_indices = @transform_10, window_bounds = array<i64: 1, 1, 32>}, {transform_indices = @transform_11, window_bounds = array<i64: 1, 1, 32>}, {transform_indices = @transform_12, window_bounds = array<i64: 1, 32, 128>}, {transform_indices = @transform_13, window_bounds = array<i64: 1, 1, 128>}, {transform_indices = @transform_14, window_bounds = array<i64: 1, 128, 32>}, {transform_indices = @transform_15, window_bounds = array<i64: 1, 1, 32>}, {transform_indices = @transform_16, window_bounds = array<i64: 1, 5, 32>}]} {
    %c0_i32 = arith.constant 0 : i32
    %0 = arith.cmpi eq, %arg1, %c0_i32 : i32
    %1 = arith.extui %0 : i1 to i32
    %c0_i32_0 = arith.constant 0 : i32
    %2 = arith.cmpi ne, %1, %c0_i32_0 : i32
    scf.if %2 {
      %c0_85 = arith.constant 0 : index
      %c0_86 = arith.constant 0 : index
      %c0_87 = arith.constant 0 : index
      %181 = vector.load %arg2[%c0_85, %c0_86, %c0_87] : memref<1x5x32xf32, #tpu.memory_space<vmem>>, vector<1x5x32xf32>
      %182 = vector.shape_cast %181 : vector<1x5x32xf32> to vector<5x32xf32>
      %c0_88 = arith.constant 0 : index
      %c0_89 = arith.constant 0 : index
      %183 = vector.load %arg3[%c0_88, %c0_89] : memref<5x32xf32, #tpu.memory_space<vmem>>, vector<5x32xf32>
      %184 = arith.addf %182, %183 : vector<5x32xf32>
      %c0_90 = arith.constant 0 : index
      %c0_91 = arith.constant 0 : index
      %185 = vector.load %arg4[%c0_90, %c0_91] : memref<1x32xf32, #tpu.memory_space<vmem>>, vector<1x32xf32>
      %c0_92 = arith.constant 0 : index
      %c0_93 = arith.constant 0 : index
      %186 = vector.load %arg5[%c0_92, %c0_93] : memref<1x32xf32, #tpu.memory_space<vmem>>, vector<1x32xf32>
      %cst_94 = arith.constant dense<0.000000e+00> : vector<5xf32>
      %187 = vector.multi_reduction <add>, %184, %cst_94 [1] : vector<5x32xf32> to vector<5xf32>
      %188 = vector.shape_cast %187 : vector<5xf32> to vector<5x1xf32>
      %cst_95 = arith.constant 3.200000e+01 : f32
      %189 = vector.broadcast %cst_95 : f32 to vector<5x1xf32>
      %190 = arith.divf %188, %189 : vector<5x1xf32>
      %191 = vector.broadcast %190 : vector<5x1xf32> to vector<5x32xf32>
      %192 = arith.subf %184, %191 : vector<5x32xf32>
      %193 = arith.mulf %192, %192 : vector<5x32xf32>
      %cst_96 = arith.constant dense<0.000000e+00> : vector<5xf32>
      %194 = vector.multi_reduction <add>, %193, %cst_96 [1] : vector<5x32xf32> to vector<5xf32>
      %195 = vector.shape_cast %194 : vector<5xf32> to vector<5x1xf32>
      %cst_97 = arith.constant 3.200000e+01 : f32
      %196 = vector.broadcast %cst_97 : f32 to vector<5x1xf32>
      %197 = arith.divf %195, %196 : vector<5x1xf32>
      %cst_98 = arith.constant 9.99999974E-6 : f32
      %198 = vector.broadcast %cst_98 : f32 to vector<5x1xf32>
      %199 = arith.addf %197, %198 : vector<5x1xf32>
      %200 = math.rsqrt %199 : vector<5x1xf32>
      %201 = vector.broadcast %200 : vector<5x1xf32> to vector<5x32xf32>
      %202 = arith.mulf %192, %201 : vector<5x32xf32>
      %203 = vector.broadcast %185 : vector<1x32xf32> to vector<5x32xf32>
      %204 = arith.mulf %202, %203 : vector<5x32xf32>
      %205 = vector.broadcast %186 : vector<1x32xf32> to vector<5x32xf32>
      %206 = arith.addf %204, %205 : vector<5x32xf32>
      %c0_99 = arith.constant 0 : index
      %c0_100 = arith.constant 0 : index
      %c0_101 = arith.constant 0 : index
      %207 = vector.load %arg18[%c0_99, %c0_100, %c0_101] : memref<1x5x32xf32, #tpu.memory_space<vmem>>, vector<1x5x32xf32>
      %208 = vector.shape_cast %207 : vector<1x5x32xf32> to vector<5x32xf32>
      %209 = vector.shape_cast %206 : vector<5x32xf32> to vector<1x5x32xf32>
      tpu.vector_store %arg18[%c0_99, %c0_100, %c0_101], %209 {strides = array<i32>} : memref<1x5x32xf32, #tpu.memory_space<vmem>>, vector<1x5x32xf32>,
    } else {
    }
    %c0 = arith.constant 0 : index
    %c0_1 = arith.constant 0 : index
    %c0_2 = arith.constant 0 : index
    %3 = vector.load %arg18[%c0, %c0_1, %c0_2] : memref<1x5x32xf32, #tpu.memory_space<vmem>>, vector<1x5x32xf32>
    %4 = vector.shape_cast %3 : vector<1x5x32xf32> to vector<5x32xf32>
    %c0_3 = arith.constant 0 : index
    %c0_4 = arith.constant 0 : index
    %c0_5 = arith.constant 0 : index
    %5 = vector.load %arg6[%c0_3, %c0_4, %c0_5] : memref<1x1x32xf32, #tpu.memory_space<vmem>>, vector<1x1x32xf32>
    %6 = vector.shape_cast %5 : vector<1x1x32xf32> to vector<1x32xf32>
    %c0_6 = arith.constant 0 : index
    %c0_7 = arith.constant 0 : index
    %c0_8 = arith.constant 0 : index
    %7 = vector.load %arg7[%c0_6, %c0_7, %c0_8] : memref<1x1x32xf32, #tpu.memory_space<vmem>>, vector<1x1x32xf32>
    %8 = vector.shape_cast %7 : vector<1x1x32xf32> to vector<1x32xf32>
    %cst = arith.constant dense<0.000000e+00> : vector<5xf32>
    %9 = vector.multi_reduction <add>, %4, %cst [1] : vector<5x32xf32> to vector<5xf32>
    %10 = vector.shape_cast %9 : vector<5xf32> to vector<5x1xf32>
    %cst_9 = arith.constant 3.200000e+01 : f32
    %11 = vector.broadcast %cst_9 : f32 to vector<5x1xf32>
    %12 = arith.divf %10, %11 : vector<5x1xf32>
    %13 = vector.broadcast %12 : vector<5x1xf32> to vector<5x32xf32>
    %14 = arith.subf %4, %13 : vector<5x32xf32>
    %15 = arith.mulf %14, %14 : vector<5x32xf32>
    %cst_10 = arith.constant dense<0.000000e+00> : vector<5xf32>
    %16 = vector.multi_reduction <add>, %15, %cst_10 [1] : vector<5x32xf32> to vector<5xf32>
    %17 = vector.shape_cast %16 : vector<5xf32> to vector<5x1xf32>
    %cst_11 = arith.constant 3.200000e+01 : f32
    %18 = vector.broadcast %cst_11 : f32 to vector<5x1xf32>
    %19 = arith.divf %17, %18 : vector<5x1xf32>
    %cst_12 = arith.constant 9.99999974E-6 : f32
    %20 = vector.broadcast %cst_12 : f32 to vector<5x1xf32>
    %21 = arith.addf %19, %20 : vector<5x1xf32>
    %22 = math.rsqrt %21 : vector<5x1xf32>
    %23 = vector.broadcast %22 : vector<5x1xf32> to vector<5x32xf32>
    %24 = arith.mulf %14, %23 : vector<5x32xf32>
    %25 = vector.broadcast %6 : vector<1x32xf32> to vector<5x32xf32>
    %26 = arith.mulf %24, %25 : vector<5x32xf32>
    %27 = vector.broadcast %8 : vector<1x32xf32> to vector<5x32xf32>
    %28 = arith.addf %26, %27 : vector<5x32xf32>
    %29 = arith.truncf %28 : vector<5x32xf32> to vector<5x32xbf16>
    %c0_13 = arith.constant 0 : index
    %c0_14 = arith.constant 0 : index
    %c0_15 = arith.constant 0 : index
    %30 = vector.load %arg8[%c0_13, %c0_14, %c0_15] : memref<1x32x96xbf16, #tpu.memory_space<vmem>>, vector<1x32x96xbf16>
    %31 = vector.shape_cast %30 : vector<1x32x96xbf16> to vector<32x96xbf16>
    %cst_16 = arith.constant dense<0.000000e+00> : vector<5x96xf32>
    %32 = tpu.matmul %29, %31, %cst_16 {dimension_numbers = #tpu.dot_dimension_numbers<[1], [0], [0], [1], [0, 0, 1, 1], [], []>} : vector<5x32xbf16>, vector<32x96xbf16>, vector<5x96xf32> -> vector<5x96xf32>
    %c0_17 = arith.constant 0 : index
    %c0_18 = arith.constant 0 : index
    %c0_19 = arith.constant 0 : index
    %33 = vector.load %arg9[%c0_17, %c0_18, %c0_19] : memref<1x1x96xf32, #tpu.memory_space<vmem>>, vector<1x1x96xf32>
    %34 = vector.shape_cast %33 : vector<1x1x96xf32> to vector<1x96xf32>
    %35 = vector.broadcast %34 : vector<1x96xf32> to vector<5x96xf32>
    %36 = arith.addf %32, %35 : vector<5x96xf32>
    %37 = vector.extract_strided_slice %36 {offsets = [0, 0], sizes = [5, 32], strides = [1, 1]} : vector<5x96xf32> to vector<5x32xf32>
    %38 = vector.extract_strided_slice %36 {offsets = [0, 32], sizes = [5, 32], strides = [1, 1]} : vector<5x96xf32> to vector<5x32xf32>
    %39 = vector.extract_strided_slice %36 {offsets = [0, 64], sizes = [5, 32], strides = [1, 1]} : vector<5x96xf32> to vector<5x32xf32>
    %40 = arith.truncf %37 : vector<5x32xf32> to vector<5x32xbf16>
    %41 = arith.truncf %38 : vector<5x32xf32> to vector<5x32xbf16>
    %42 = arith.truncf %39 : vector<5x32xf32> to vector<5x32xbf16>
    %43 = vector.extract_strided_slice %40 {offsets = [0, 0], sizes = [5, 8], strides = [1, 1]} : vector<5x32xbf16> to vector<5x8xbf16>
    %44 = vector.extract_strided_slice %41 {offsets = [0, 0], sizes = [5, 8], strides = [1, 1]} : vector<5x32xbf16> to vector<5x8xbf16>
    %cst_20 = arith.constant dense<0.000000e+00> : vector<5x5xf32>
    %45 = tpu.matmul %43, %44, %cst_20 {dimension_numbers = #tpu.dot_dimension_numbers<[1], [1], [0], [0], [0, 0, 1, 0], [], []>} : vector<5x8xbf16>, vector<5x8xbf16>, vector<5x5xf32> -> vector<5x5xf32>
    %cst_21 = arith.constant 0.353553385 : f32
    %46 = vector.broadcast %cst_21 : f32 to vector<5x5xf32>
    %47 = arith.mulf %45, %46 : vector<5x5xf32>
    %cst_22 = arith.constant dense<0xFF800000> : vector<5xf32>
    %48 = vector.multi_reduction <maximumf>, %47, %cst_22 [1] : vector<5x5xf32> to vector<5xf32>
    %49 = vector.shape_cast %48 : vector<5xf32> to vector<5x1xf32>
    %50 = vector.broadcast %49 : vector<5x1xf32> to vector<5x5xf32>
    %51 = arith.subf %47, %50 : vector<5x5xf32>
    %52 = math.exp %51 : vector<5x5xf32>
    %cst_23 = arith.constant dense<0.000000e+00> : vector<5xf32>
    %53 = vector.multi_reduction <add>, %52, %cst_23 [1] : vector<5x5xf32> to vector<5xf32>
    %54 = vector.shape_cast %53 : vector<5xf32> to vector<5x1xf32>
    %55 = tpu.reciprocal %54 {approx = true} : vector<5x1xf32> -> vector<5x1xf32>
    %56 = vector.broadcast %55 : vector<5x1xf32> to vector<5x5xf32>
    %57 = arith.mulf %52, %56 : vector<5x5xf32>
    %58 = arith.truncf %57 : vector<5x5xf32> to vector<5x5xbf16>
    %59 = vector.extract_strided_slice %42 {offsets = [0, 0], sizes = [5, 8], strides = [1, 1]} : vector<5x32xbf16> to vector<5x8xbf16>
    %cst_24 = arith.constant dense<0.000000e+00> : vector<5x8xf32>
    %60 = tpu.matmul %58, %59, %cst_24 {dimension_numbers = #tpu.dot_dimension_numbers<[1], [0], [0], [1], [0, 0, 1, 1], [], []>} : vector<5x5xbf16>, vector<5x8xbf16>, vector<5x8xf32> -> vector<5x8xf32>
    %c0_25 = arith.constant 0 : index
    %c0_26 = arith.constant 0 : index
    %61 = vector.load %arg19[%c0_25, %c0_26] : memref<5x32xf32, #tpu.memory_space<vmem>>, vector<5x8xf32>
    tpu.vector_store %arg19[%c0_25, %c0_26], %60 {strides = array<i32>} : memref<5x32xf32, #tpu.memory_space<vmem>>, vector<5x8xf32>,
    %62 = vector.extract_strided_slice %40 {offsets = [0, 8], sizes = [5, 8], strides = [1, 1]} : vector<5x32xbf16> to vector<5x8xbf16>
    %63 = vector.extract_strided_slice %41 {offsets = [0, 8], sizes = [5, 8], strides = [1, 1]} : vector<5x32xbf16> to vector<5x8xbf16>
    %cst_27 = arith.constant dense<0.000000e+00> : vector<5x5xf32>
    %64 = tpu.matmul %62, %63, %cst_27 {dimension_numbers = #tpu.dot_dimension_numbers<[1], [1], [0], [0], [0, 0, 1, 0], [], []>} : vector<5x8xbf16>, vector<5x8xbf16>, vector<5x5xf32> -> vector<5x5xf32>
    %cst_28 = arith.constant 0.353553385 : f32
    %65 = vector.broadcast %cst_28 : f32 to vector<5x5xf32>
    %66 = arith.mulf %64, %65 : vector<5x5xf32>
    %cst_29 = arith.constant dense<0xFF800000> : vector<5xf32>
    %67 = vector.multi_reduction <maximumf>, %66, %cst_29 [1] : vector<5x5xf32> to vector<5xf32>
    %68 = vector.shape_cast %67 : vector<5xf32> to vector<5x1xf32>
    %69 = vector.broadcast %68 : vector<5x1xf32> to vector<5x5xf32>
    %70 = arith.subf %66, %69 : vector<5x5xf32>
    %71 = math.exp %70 : vector<5x5xf32>
    %cst_30 = arith.constant dense<0.000000e+00> : vector<5xf32>
    %72 = vector.multi_reduction <add>, %71, %cst_30 [1] : vector<5x5xf32> to vector<5xf32>
    %73 = vector.shape_cast %72 : vector<5xf32> to vector<5x1xf32>
    %74 = tpu.reciprocal %73 {approx = true} : vector<5x1xf32> -> vector<5x1xf32>
    %75 = vector.broadcast %74 : vector<5x1xf32> to vector<5x5xf32>
    %76 = arith.mulf %71, %75 : vector<5x5xf32>
    %77 = arith.truncf %76 : vector<5x5xf32> to vector<5x5xbf16>
    %78 = vector.extract_strided_slice %42 {offsets = [0, 8], sizes = [5, 8], strides = [1, 1]} : vector<5x32xbf16> to vector<5x8xbf16>
    %cst_31 = arith.constant dense<0.000000e+00> : vector<5x8xf32>
    %79 = tpu.matmul %77, %78, %cst_31 {dimension_numbers = #tpu.dot_dimension_numbers<[1], [0], [0], [1], [0, 0, 1, 1], [], []>} : vector<5x5xbf16>, vector<5x8xbf16>, vector<5x8xf32> -> vector<5x8xf32>
    %c0_32 = arith.constant 0 : index
    %c8 = arith.constant 8 : index
    %80 = vector.load %arg19[%c0_32, %c8] : memref<5x32xf32, #tpu.memory_space<vmem>>, vector<5x8xf32>
    tpu.vector_store %arg19[%c0_32, %c8], %79 {strides = array<i32>} : memref<5x32xf32, #tpu.memory_space<vmem>>, vector<5x8xf32>,
    %81 = vector.extract_strided_slice %40 {offsets = [0, 16], sizes = [5, 8], strides = [1, 1]} : vector<5x32xbf16> to vector<5x8xbf16>
    %82 = vector.extract_strided_slice %41 {offsets = [0, 16], sizes = [5, 8], strides = [1, 1]} : vector<5x32xbf16> to vector<5x8xbf16>
    %cst_33 = arith.constant dense<0.000000e+00> : vector<5x5xf32>
    %83 = tpu.matmul %81, %82, %cst_33 {dimension_numbers = #tpu.dot_dimension_numbers<[1], [1], [0], [0], [0, 0, 1, 0], [], []>} : vector<5x8xbf16>, vector<5x8xbf16>, vector<5x5xf32> -> vector<5x5xf32>
    %cst_34 = arith.constant 0.353553385 : f32
    %84 = vector.broadcast %cst_34 : f32 to vector<5x5xf32>
    %85 = arith.mulf %83, %84 : vector<5x5xf32>
    %cst_35 = arith.constant dense<0xFF800000> : vector<5xf32>
    %86 = vector.multi_reduction <maximumf>, %85, %cst_35 [1] : vector<5x5xf32> to vector<5xf32>
    %87 = vector.shape_cast %86 : vector<5xf32> to vector<5x1xf32>
    %88 = vector.broadcast %87 : vector<5x1xf32> to vector<5x5xf32>
    %89 = arith.subf %85, %88 : vector<5x5xf32>
    %90 = math.exp %89 : vector<5x5xf32>
    %cst_36 = arith.constant dense<0.000000e+00> : vector<5xf32>
    %91 = vector.multi_reduction <add>, %90, %cst_36 [1] : vector<5x5xf32> to vector<5xf32>
    %92 = vector.shape_cast %91 : vector<5xf32> to vector<5x1xf32>
    %93 = tpu.reciprocal %92 {approx = true} : vector<5x1xf32> -> vector<5x1xf32>
    %94 = vector.broadcast %93 : vector<5x1xf32> to vector<5x5xf32>
    %95 = arith.mulf %90, %94 : vector<5x5xf32>
    %96 = arith.truncf %95 : vector<5x5xf32> to vector<5x5xbf16>
    %97 = vector.extract_strided_slice %42 {offsets = [0, 16], sizes = [5, 8], strides = [1, 1]} : vector<5x32xbf16> to vector<5x8xbf16>
    %cst_37 = arith.constant dense<0.000000e+00> : vector<5x8xf32>
    %98 = tpu.matmul %96, %97, %cst_37 {dimension_numbers = #tpu.dot_dimension_numbers<[1], [0], [0], [1], [0, 0, 1, 1], [], []>} : vector<5x5xbf16>, vector<5x8xbf16>, vector<5x8xf32> -> vector<5x8xf32>
    %c0_38 = arith.constant 0 : index
    %c16 = arith.constant 16 : index
    %99 = vector.load %arg19[%c0_38, %c16] : memref<5x32xf32, #tpu.memory_space<vmem>>, vector<5x8xf32>
    tpu.vector_store %arg19[%c0_38, %c16], %98 {strides = array<i32>} : memref<5x32xf32, #tpu.memory_space<vmem>>, vector<5x8xf32>,
    %100 = vector.extract_strided_slice %40 {offsets = [0, 24], sizes = [5, 8], strides = [1, 1]} : vector<5x32xbf16> to vector<5x8xbf16>
    %101 = vector.extract_strided_slice %41 {offsets = [0, 24], sizes = [5, 8], strides = [1, 1]} : vector<5x32xbf16> to vector<5x8xbf16>
    %cst_39 = arith.constant dense<0.000000e+00> : vector<5x5xf32>
    %102 = tpu.matmul %100, %101, %cst_39 {dimension_numbers = #tpu.dot_dimension_numbers<[1], [1], [0], [0], [0, 0, 1, 0], [], []>} : vector<5x8xbf16>, vector<5x8xbf16>, vector<5x5xf32> -> vector<5x5xf32>
    %cst_40 = arith.constant 0.353553385 : f32
    %103 = vector.broadcast %cst_40 : f32 to vector<5x5xf32>
    %104 = arith.mulf %102, %103 : vector<5x5xf32>
    %cst_41 = arith.constant dense<0xFF800000> : vector<5xf32>
    %105 = vector.multi_reduction <maximumf>, %104, %cst_41 [1] : vector<5x5xf32> to vector<5xf32>
    %106 = vector.shape_cast %105 : vector<5xf32> to vector<5x1xf32>
    %107 = vector.broadcast %106 : vector<5x1xf32> to vector<5x5xf32>
    %108 = arith.subf %104, %107 : vector<5x5xf32>
    %109 = math.exp %108 : vector<5x5xf32>
    %cst_42 = arith.constant dense<0.000000e+00> : vector<5xf32>
    %110 = vector.multi_reduction <add>, %109, %cst_42 [1] : vector<5x5xf32> to vector<5xf32>
    %111 = vector.shape_cast %110 : vector<5xf32> to vector<5x1xf32>
    %112 = tpu.reciprocal %111 {approx = true} : vector<5x1xf32> -> vector<5x1xf32>
    %113 = vector.broadcast %112 : vector<5x1xf32> to vector<5x5xf32>
    %114 = arith.mulf %109, %113 : vector<5x5xf32>
    %115 = arith.truncf %114 : vector<5x5xf32> to vector<5x5xbf16>
    %116 = vector.extract_strided_slice %42 {offsets = [0, 24], sizes = [5, 8], strides = [1, 1]} : vector<5x32xbf16> to vector<5x8xbf16>
    %cst_43 = arith.constant dense<0.000000e+00> : vector<5x8xf32>
    %117 = tpu.matmul %115, %116, %cst_43 {dimension_numbers = #tpu.dot_dimension_numbers<[1], [0], [0], [1], [0, 0, 1, 1], [], []>} : vector<5x5xbf16>, vector<5x8xbf16>, vector<5x8xf32> -> vector<5x8xf32>
    %c0_44 = arith.constant 0 : index
    %c24 = arith.constant 24 : index
    %118 = vector.load %arg19[%c0_44, %c24] : memref<5x32xf32, #tpu.memory_space<vmem>>, vector<5x8xf32>
    tpu.vector_store %arg19[%c0_44, %c24], %117 {strides = array<i32>} : memref<5x32xf32, #tpu.memory_space<vmem>>, vector<5x8xf32>,
    %c0_45 = arith.constant 0 : index
    %c0_46 = arith.constant 0 : index
    %119 = vector.load %arg19[%c0_45, %c0_46] : memref<5x32xf32, #tpu.memory_space<vmem>>, vector<5x32xf32>
    %120 = arith.truncf %119 : vector<5x32xf32> to vector<5x32xbf16>
    %c0_47 = arith.constant 0 : index
    %c0_48 = arith.constant 0 : index
    %c0_49 = arith.constant 0 : index
    %121 = vector.load %arg10[%c0_47, %c0_48, %c0_49] : memref<1x32x32xbf16, #tpu.memory_space<vmem>>, vector<1x32x32xbf16>
    %122 = vector.shape_cast %121 : vector<1x32x32xbf16> to vector<32x32xbf16>
    %cst_50 = arith.constant dense<0.000000e+00> : vector<5x32xf32>
    %123 = tpu.matmul %120, %122, %cst_50 {dimension_numbers = #tpu.dot_dimension_numbers<[1], [0], [0], [1], [0, 0, 1, 1], [], []>} : vector<5x32xbf16>, vector<32x32xbf16>, vector<5x32xf32> -> vector<5x32xf32>
    %124 = arith.addf %4, %123 : vector<5x32xf32>
    %c0_51 = arith.constant 0 : index
    %c0_52 = arith.constant 0 : index
    %c0_53 = arith.constant 0 : index
    %125 = vector.load %arg11[%c0_51, %c0_52, %c0_53] : memref<1x1x32xf32, #tpu.memory_space<vmem>>, vector<1x1x32xf32>
    %126 = vector.shape_cast %125 : vector<1x1x32xf32> to vector<1x32xf32>
    %127 = vector.broadcast %126 : vector<1x32xf32> to vector<5x32xf32>
    %128 = arith.addf %124, %127 : vector<5x32xf32>
    %c0_54 = arith.constant 0 : index
    %c0_55 = arith.constant 0 : index
    %c0_56 = arith.constant 0 : index
    %129 = vector.load %arg12[%c0_54, %c0_55, %c0_56] : memref<1x1x32xf32, #tpu.memory_space<vmem>>, vector<1x1x32xf32>
    %130 = vector.shape_cast %129 : vector<1x1x32xf32> to vector<1x32xf32>
    %c0_57 = arith.constant 0 : index
    %c0_58 = arith.constant 0 : index
    %c0_59 = arith.constant 0 : index
    %131 = vector.load %arg13[%c0_57, %c0_58, %c0_59] : memref<1x1x32xf32, #tpu.memory_space<vmem>>, vector<1x1x32xf32>
    %132 = vector.shape_cast %131 : vector<1x1x32xf32> to vector<1x32xf32>
    %cst_60 = arith.constant dense<0.000000e+00> : vector<5xf32>
    %133 = vector.multi_reduction <add>, %128, %cst_60 [1] : vector<5x32xf32> to vector<5xf32>
    %134 = vector.shape_cast %133 : vector<5xf32> to vector<5x1xf32>
    %cst_61 = arith.constant 3.200000e+01 : f32
    %135 = vector.broadcast %cst_61 : f32 to vector<5x1xf32>
    %136 = arith.divf %134, %135 : vector<5x1xf32>
    %137 = vector.broadcast %136 : vector<5x1xf32> to vector<5x32xf32>
    %138 = arith.subf %128, %137 : vector<5x32xf32>
    %139 = arith.mulf %138, %138 : vector<5x32xf32>
    %cst_62 = arith.constant dense<0.000000e+00> : vector<5xf32>
    %140 = vector.multi_reduction <add>, %139, %cst_62 [1] : vector<5x32xf32> to vector<5xf32>
    %141 = vector.shape_cast %140 : vector<5xf32> to vector<5x1xf32>
    %cst_63 = arith.constant 3.200000e+01 : f32
    %142 = vector.broadcast %cst_63 : f32 to vector<5x1xf32>
    %143 = arith.divf %141, %142 : vector<5x1xf32>
    %cst_64 = arith.constant 9.99999974E-6 : f32
    %144 = vector.broadcast %cst_64 : f32 to vector<5x1xf32>
    %145 = arith.addf %143, %144 : vector<5x1xf32>
    %146 = math.rsqrt %145 : vector<5x1xf32>
    %147 = vector.broadcast %146 : vector<5x1xf32> to vector<5x32xf32>
    %148 = arith.mulf %138, %147 : vector<5x32xf32>
    %149 = vector.broadcast %130 : vector<1x32xf32> to vector<5x32xf32>
    %150 = arith.mulf %148, %149 : vector<5x32xf32>
    %151 = vector.broadcast %132 : vector<1x32xf32> to vector<5x32xf32>
    %152 = arith.addf %150, %151 : vector<5x32xf32>
    %153 = arith.truncf %152 : vector<5x32xf32> to vector<5x32xbf16>
    %c0_65 = arith.constant 0 : index
    %c0_66 = arith.constant 0 : index
    %c0_67 = arith.constant 0 : index
    %154 = vector.load %arg14[%c0_65, %c0_66, %c0_67] : memref<1x32x128xbf16, #tpu.memory_space<vmem>>, vector<1x32x128xbf16>
    %155 = vector.shape_cast %154 : vector<1x32x128xbf16> to vector<32x128xbf16>
    %cst_68 = arith.constant dense<0.000000e+00> : vector<5x128xf32>
    %156 = tpu.matmul %153, %155, %cst_68 {dimension_numbers = #tpu.dot_dimension_numbers<[1], [0], [0], [1], [0, 0, 1, 1], [], []>} : vector<5x32xbf16>, vector<32x128xbf16>, vector<5x128xf32> -> vector<5x128xf32>
    %c0_69 = arith.constant 0 : index
    %c0_70 = arith.constant 0 : index
    %c0_71 = arith.constant 0 : index
    %157 = vector.load %arg15[%c0_69, %c0_70, %c0_71] : memref<1x1x128xf32, #tpu.memory_space<vmem>>, vector<1x1x128xf32>
    %158 = vector.shape_cast %157 : vector<1x1x128xf32> to vector<1x128xf32>
    %159 = vector.broadcast %158 : vector<1x128xf32> to vector<5x128xf32>
    %160 = arith.addf %156, %159 : vector<5x128xf32>
    %cst_72 = arith.constant 5.000000e-01 : f32
    %161 = vector.broadcast %cst_72 : f32 to vector<5x128xf32>
    %162 = arith.mulf %161, %160 : vector<5x128xf32>
    %cst_73 = arith.constant 0.707106769 : f32
    %163 = vector.broadcast %cst_73 : f32 to vector<5x128xf32>
    %164 = arith.mulf %160, %163 : vector<5x128xf32>
    %165 = math.erf %164 : vector<5x128xf32>
    %cst_74 = arith.constant 1.000000e+00 : f32
    %166 = vector.broadcast %cst_74 : f32 to vector<5x128xf32>
    %167 = arith.addf %166, %165 : vector<5x128xf32>
    %168 = arith.mulf %162, %167 : vector<5x128xf32>
    %169 = arith.truncf %168 : vector<5x128xf32> to vector<5x128xbf16>
    %c0_75 = arith.constant 0 : index
    %c0_76 = arith.constant 0 : index
    %c0_77 = arith.constant 0 : index
    %170 = vector.load %arg16[%c0_75, %c0_76, %c0_77] : memref<1x128x32xbf16, #tpu.memory_space<vmem>>, vector<1x128x32xbf16>
    %171 = vector.shape_cast %170 : vector<1x128x32xbf16> to vector<128x32xbf16>
    %cst_78 = arith.constant dense<0.000000e+00> : vector<5x32xf32>
    %172 = tpu.matmul %169, %171, %cst_78 {dimension_numbers = #tpu.dot_dimension_numbers<[1], [0], [0], [1], [0, 0, 1, 1], [], []>} : vector<5x128xbf16>, vector<128x32xbf16>, vector<5x32xf32> -> vector<5x32xf32>
    %173 = arith.addf %128, %172 : vector<5x32xf32>
    %c0_79 = arith.constant 0 : index
    %c0_80 = arith.constant 0 : index
    %c0_81 = arith.constant 0 : index
    %174 = vector.load %arg17[%c0_79, %c0_80, %c0_81] : memref<1x1x32xf32, #tpu.memory_space<vmem>>, vector<1x1x32xf32>
    %175 = vector.shape_cast %174 : vector<1x1x32xf32> to vector<1x32xf32>
    %176 = vector.broadcast %175 : vector<1x32xf32> to vector<5x32xf32>
    %177 = arith.addf %173, %176 : vector<5x32xf32>
    %c0_82 = arith.constant 0 : index
    %c0_83 = arith.constant 0 : index
    %c0_84 = arith.constant 0 : index
    %178 = vector.load %arg18[%c0_82, %c0_83, %c0_84] : memref<1x5x32xf32, #tpu.memory_space<vmem>>, vector<1x5x32xf32>
    %179 = vector.shape_cast %178 : vector<1x5x32xf32> to vector<5x32xf32>
    %180 = vector.shape_cast %177 : vector<5x32xf32> to vector<1x5x32xf32>
    tpu.vector_store %arg18[%c0_82, %c0_83, %c0_84], %180 {strides = array<i32>} : memref<1x5x32xf32, #tpu.memory_space<vmem>>, vector<1x5x32xf32>,
    return
  }
  func.func @transform_0(%arg0: i32, %arg1: i32) -> (i32, i32, i32) {
    %c0_i32 = arith.constant 0 : i32
    %c0_i32_0 = arith.constant 0 : i32
    %c0_i32_1 = arith.constant 0 : i32
    return %arg0, %c0_i32, %c0_i32_0 : i32, i32, i32
  }
  func.func @transform_1(%arg0: i32, %arg1: i32) -> (i32, i32) {
    %c0_i32 = arith.constant 0 : i32
    %c0_i32_0 = arith.constant 0 : i32
    %c0_i32_1 = arith.constant 0 : i32
    return %c0_i32, %c0_i32_0 : i32, i32
  }
  func.func @transform_2(%arg0: i32, %arg1: i32) -> (i32, i32) {
    %c0_i32 = arith.constant 0 : i32
    %c0_i32_0 = arith.constant 0 : i32
    %c0_i32_1 = arith.constant 0 : i32
    return %c0_i32, %c0_i32_0 : i32, i32
  }
  func.func @transform_3(%arg0: i32, %arg1: i32) -> (i32, i32) {
    %c0_i32 = arith.constant 0 : i32
    %c0_i32_0 = arith.constant 0 : i32
    %c0_i32_1 = arith.constant 0 : i32
    return %c0_i32, %c0_i32_0 : i32, i32
  }
  func.func @transform_4(%arg0: i32, %arg1: i32) -> (i32, i32, i32) {
    %c0_i32 = arith.constant 0 : i32
    %c0_i32_0 = arith.constant 0 : i32
    %c0_i32_1 = arith.constant 0 : i32
    return %arg1, %c0_i32, %c0_i32_0 : i32, i32, i32
  }
  func.func @transform_5(%arg0: i32, %arg1: i32) -> (i32, i32, i32) {
    %c0_i32 = arith.constant 0 : i32
    %c0_i32_0 = arith.constant 0 : i32
    %c0_i32_1 = arith.constant 0 : i32
    return %arg1, %c0_i32, %c0_i32_0 : i32, i32, i32
  }
  func.func @transform_6(%arg0: i32, %arg1: i32) -> (i32, i32, i32) {
    %c0_i32 = arith.constant 0 : i32
    %c0_i32_0 = arith.constant 0 : i32
    %c0_i32_1 = arith.constant 0 : i32
    return %arg1, %c0_i32, %c0_i32_0 : i32, i32, i32
  }
  func.func @transform_7(%arg0: i32, %arg1: i32) -> (i32, i32, i32) {
    %c0_i32 = arith.constant 0 : i32
    %c0_i32_0 = arith.constant 0 : i32
    %c0_i32_1 = arith.constant 0 : i32
    return %arg1, %c0_i32, %c0_i32_0 : i32, i32, i32
  }
  func.func @transform_8(%arg0: i32, %arg1: i32) -> (i32, i32, i32) {
    %c0_i32 = arith.constant 0 : i32
    %c0_i32_0 = arith.constant 0 : i32
    %c0_i32_1 = arith.constant 0 : i32
    return %arg1, %c0_i32, %c0_i32_0 : i32, i32, i32
  }
  func.func @transform_9(%arg0: i32, %arg1: i32) -> (i32, i32, i32) {
    %c0_i32 = arith.constant 0 : i32
    %c0_i32_0 = arith.constant 0 : i32
    %c0_i32_1 = arith.constant 0 : i32
    return %arg1, %c0_i32, %c0_i32_0 : i32, i32, i32
  }
  func.func @transform_10(%arg0: i32, %arg1: i32) -> (i32, i32, i32) {
    %c0_i32 = arith.constant 0 : i32
    %c0_i32_0 = arith.constant 0 : i32
    %c0_i32_1 = arith.constant 0 : i32
    return %arg1, %c0_i32, %c0_i32_0 : i32, i32, i32
  }
  func.func @transform_11(%arg0: i32, %arg1: i32) -> (i32, i32, i32) {
    %c0_i32 = arith.constant 0 : i32
    %c0_i32_0 = arith.constant 0 : i32
    %c0_i32_1 = arith.constant 0 : i32
    return %arg1, %c0_i32, %c0_i32_0 : i32, i32, i32
  }
  func.func @transform_12(%arg0: i32, %arg1: i32) -> (i32, i32, i32) {
    %c0_i32 = arith.constant 0 : i32
    %c0_i32_0 = arith.constant 0 : i32
    %c0_i32_1 = arith.constant 0 : i32
    return %arg1, %c0_i32, %c0_i32_0 : i32, i32, i32
  }
  func.func @transform_13(%arg0: i32, %arg1: i32) -> (i32, i32, i32) {
    %c0_i32 = arith.constant 0 : i32
    %c0_i32_0 = arith.constant 0 : i32
    %c0_i32_1 = arith.constant 0 : i32
    return %arg1, %c0_i32, %c0_i32_0 : i32, i32, i32
  }
  func.func @transform_14(%arg0: i32, %arg1: i32) -> (i32, i32, i32) {
    %c0_i32 = arith.constant 0 : i32
    %c0_i32_0 = arith.constant 0 : i32
    %c0_i32_1 = arith.constant 0 : i32
    return %arg1, %c0_i32, %c0_i32_0 : i32, i32, i32
  }
  func.func @transform_15(%arg0: i32, %arg1: i32) -> (i32, i32, i32) {
    %c0_i32 = arith.constant 0 : i32
    %c0_i32_0 = arith.constant 0 : i32
    %c0_i32_1 = arith.constant 0 : i32
    return %arg1, %c0_i32, %c0_i32_0 : i32, i32, i32
  }
  func.func @transform_16(%arg0: i32, %arg1: i32) -> (i32, i32, i32) {
    %c0_i32 = arith.constant 0 : i32
    %c0_i32_0 = arith.constant 0 : i32
    %c0_i32_1 = arith.constant 0 : i32
    return %arg0, %c0_i32, %c0_i32_0 : i32, i32, i32
  }
}

module attributes {stable_mosaic.version = 11 : i64} {
  func.func @_lnpost_proj_kernel(%arg0: i32, %arg1: memref<1x5x32xf32, #tpu.memory_space<vmem>>, %arg2: memref<1x32xf32, #tpu.memory_space<vmem>>, %arg3: memref<1x32xf32, #tpu.memory_space<vmem>>, %arg4: memref<32x32xbf16, #tpu.memory_space<vmem>>, %arg5: memref<1x4x32xf32, #tpu.memory_space<vmem>>) attributes {dimension_semantics = [#tpu.dimension_semantics<parallel>], iteration_bounds = array<i64: 2>, scalar_prefetch = 0 : i64, scratch_operands = 0 : i64, tpu.core_type = #tpu.core_type<tc>, window_params = [{transform_indices = @transform_0, window_bounds = array<i64: 1, 5, 32>}, {pipeline_mode = #tpu.pipeline_mode<synchronous>, transform_indices = @transform_1, window_bounds = array<i64: 1, 32>}, {pipeline_mode = #tpu.pipeline_mode<synchronous>, transform_indices = @transform_2, window_bounds = array<i64: 1, 32>}, {pipeline_mode = #tpu.pipeline_mode<synchronous>, transform_indices = @transform_3, window_bounds = array<i64: 32, 32>}, {transform_indices = @transform_4, window_bounds = array<i64: 1, 4, 32>}]} {
    %c0 = arith.constant 0 : index
    %c0_0 = arith.constant 0 : index
    %c0_1 = arith.constant 0 : index
    %0 = vector.load %arg1[%c0, %c0_0, %c0_1] : memref<1x5x32xf32, #tpu.memory_space<vmem>>, vector<1x5x32xf32>
    %1 = vector.shape_cast %0 : vector<1x5x32xf32> to vector<5x32xf32>
    %2 = vector.extract_strided_slice %1 {offsets = [1, 0], sizes = [4, 32], strides = [1, 1]} : vector<5x32xf32> to vector<4x32xf32>
    %c0_2 = arith.constant 0 : index
    %c0_3 = arith.constant 0 : index
    %3 = vector.load %arg2[%c0_2, %c0_3] : memref<1x32xf32, #tpu.memory_space<vmem>>, vector<1x32xf32>
    %c0_4 = arith.constant 0 : index
    %c0_5 = arith.constant 0 : index
    %4 = vector.load %arg3[%c0_4, %c0_5] : memref<1x32xf32, #tpu.memory_space<vmem>>, vector<1x32xf32>
    %cst = arith.constant dense<0.000000e+00> : vector<4xf32>
    %5 = vector.multi_reduction <add>, %2, %cst [1] : vector<4x32xf32> to vector<4xf32>
    %6 = vector.shape_cast %5 : vector<4xf32> to vector<4x1xf32>
    %cst_6 = arith.constant 3.200000e+01 : f32
    %7 = vector.broadcast %cst_6 : f32 to vector<4x1xf32>
    %8 = arith.divf %6, %7 : vector<4x1xf32>
    %9 = vector.broadcast %8 : vector<4x1xf32> to vector<4x32xf32>
    %10 = arith.subf %2, %9 : vector<4x32xf32>
    %11 = arith.mulf %10, %10 : vector<4x32xf32>
    %cst_7 = arith.constant dense<0.000000e+00> : vector<4xf32>
    %12 = vector.multi_reduction <add>, %11, %cst_7 [1] : vector<4x32xf32> to vector<4xf32>
    %13 = vector.shape_cast %12 : vector<4xf32> to vector<4x1xf32>
    %cst_8 = arith.constant 3.200000e+01 : f32
    %14 = vector.broadcast %cst_8 : f32 to vector<4x1xf32>
    %15 = arith.divf %13, %14 : vector<4x1xf32>
    %cst_9 = arith.constant 9.99999974E-6 : f32
    %16 = vector.broadcast %cst_9 : f32 to vector<4x1xf32>
    %17 = arith.addf %15, %16 : vector<4x1xf32>
    %18 = math.rsqrt %17 : vector<4x1xf32>
    %19 = vector.broadcast %18 : vector<4x1xf32> to vector<4x32xf32>
    %20 = arith.mulf %10, %19 : vector<4x32xf32>
    %21 = vector.broadcast %3 : vector<1x32xf32> to vector<4x32xf32>
    %22 = arith.mulf %20, %21 : vector<4x32xf32>
    %23 = vector.broadcast %4 : vector<1x32xf32> to vector<4x32xf32>
    %24 = arith.addf %22, %23 : vector<4x32xf32>
    %25 = arith.truncf %24 : vector<4x32xf32> to vector<4x32xbf16>
    %c0_10 = arith.constant 0 : index
    %c0_11 = arith.constant 0 : index
    %26 = vector.load %arg4[%c0_10, %c0_11] : memref<32x32xbf16, #tpu.memory_space<vmem>>, vector<32x32xbf16>
    %cst_12 = arith.constant dense<0.000000e+00> : vector<4x32xf32>
    %27 = tpu.matmul %25, %26, %cst_12 {dimension_numbers = #tpu.dot_dimension_numbers<[1], [0], [0], [1], [0, 0, 1, 1], [], []>} : vector<4x32xbf16>, vector<32x32xbf16>, vector<4x32xf32> -> vector<4x32xf32>
    %c0_13 = arith.constant 0 : index
    %c0_14 = arith.constant 0 : index
    %c0_15 = arith.constant 0 : index
    %28 = vector.load %arg5[%c0_13, %c0_14, %c0_15] : memref<1x4x32xf32, #tpu.memory_space<vmem>>, vector<1x4x32xf32>
    %29 = vector.shape_cast %28 : vector<1x4x32xf32> to vector<4x32xf32>
    %30 = vector.shape_cast %27 : vector<4x32xf32> to vector<1x4x32xf32>
    tpu.vector_store %arg5[%c0_13, %c0_14, %c0_15], %30 {strides = array<i32>} : memref<1x4x32xf32, #tpu.memory_space<vmem>>, vector<1x4x32xf32>,
    return
  }
  func.func @transform_0(%arg0: i32) -> (i32, i32, i32) {
    %c0_i32 = arith.constant 0 : i32
    %c0_i32_0 = arith.constant 0 : i32
    %c0_i32_1 = arith.constant 0 : i32
    return %arg0, %c0_i32, %c0_i32_0 : i32, i32, i32
  }
  func.func @transform_1(%arg0: i32) -> (i32, i32) {
    %c0_i32 = arith.constant 0 : i32
    %c0_i32_0 = arith.constant 0 : i32
    %c0_i32_1 = arith.constant 0 : i32
    return %c0_i32, %c0_i32_0 : i32, i32
  }
  func.func @transform_2(%arg0: i32) -> (i32, i32) {
    %c0_i32 = arith.constant 0 : i32
    %c0_i32_0 = arith.constant 0 : i32
    %c0_i32_1 = arith.constant 0 : i32
    return %c0_i32, %c0_i32_0 : i32, i32
  }
  func.func @transform_3(%arg0: i32) -> (i32, i32) {
    %c0_i32 = arith.constant 0 : i32
    %c0_i32_0 = arith.constant 0 : i32
    %c0_i32_1 = arith.constant 0 : i32
    return %c0_i32, %c0_i32_0 : i32, i32
  }
  func.func @transform_4(%arg0: i32) -> (i32, i32, i32) {
    %c0_i32 = arith.constant 0 : i32
    %c0_i32_0 = arith.constant 0 : i32
    %c0_i32_1 = arith.constant 0 : i32
    return %arg0, %c0_i32, %c0_i32_0 : i32, i32, i32
  }
}

module attributes {stable_mosaic.version = 11 : i64} {
  func.func @_head_kernel(%arg0: i32, %arg1: memref<16x32xf32, #tpu.memory_space<vmem>>, %arg2: memref<1x32xf32, #tpu.memory_space<vmem>>, %arg3: memref<1x32xf32, #tpu.memory_space<vmem>>, %arg4: memref<32x64xbf16, #tpu.memory_space<vmem>>, %arg5: memref<1x64xf32, #tpu.memory_space<vmem>>, %arg6: memref<16x64xf32, #tpu.memory_space<vmem>>) attributes {dimension_semantics = [#tpu.dimension_semantics<parallel>], iteration_bounds = array<i64: 1>, scalar_prefetch = 0 : i64, scratch_operands = 0 : i64, tpu.core_type = #tpu.core_type<tc>, window_params = [{transform_indices = @transform_0, window_bounds = array<i64: 16, 32>}, {pipeline_mode = #tpu.pipeline_mode<synchronous>, transform_indices = @transform_1, window_bounds = array<i64: 1, 32>}, {pipeline_mode = #tpu.pipeline_mode<synchronous>, transform_indices = @transform_2, window_bounds = array<i64: 1, 32>}, {pipeline_mode = #tpu.pipeline_mode<synchronous>, transform_indices = @transform_3, window_bounds = array<i64: 32, 64>}, {pipeline_mode = #tpu.pipeline_mode<synchronous>, transform_indices = @transform_4, window_bounds = array<i64: 1, 64>}, {transform_indices = @transform_5, window_bounds = array<i64: 16, 64>}]} {
    %c0 = arith.constant 0 : index
    %c0_0 = arith.constant 0 : index
    %0 = vector.load %arg1[%c0, %c0_0] : memref<16x32xf32, #tpu.memory_space<vmem>>, vector<16x32xf32>
    %c0_1 = arith.constant 0 : index
    %c0_2 = arith.constant 0 : index
    %1 = vector.load %arg2[%c0_1, %c0_2] : memref<1x32xf32, #tpu.memory_space<vmem>>, vector<1x32xf32>
    %c0_3 = arith.constant 0 : index
    %c0_4 = arith.constant 0 : index
    %2 = vector.load %arg3[%c0_3, %c0_4] : memref<1x32xf32, #tpu.memory_space<vmem>>, vector<1x32xf32>
    %cst = arith.constant dense<0.000000e+00> : vector<16xf32>
    %3 = vector.multi_reduction <add>, %0, %cst [1] : vector<16x32xf32> to vector<16xf32>
    %4 = vector.shape_cast %3 : vector<16xf32> to vector<16x1xf32>
    %cst_5 = arith.constant 3.200000e+01 : f32
    %5 = vector.broadcast %cst_5 : f32 to vector<16x1xf32>
    %6 = arith.divf %4, %5 : vector<16x1xf32>
    %7 = vector.broadcast %6 : vector<16x1xf32> to vector<16x32xf32>
    %8 = arith.subf %0, %7 : vector<16x32xf32>
    %9 = arith.mulf %8, %8 : vector<16x32xf32>
    %cst_6 = arith.constant dense<0.000000e+00> : vector<16xf32>
    %10 = vector.multi_reduction <add>, %9, %cst_6 [1] : vector<16x32xf32> to vector<16xf32>
    %11 = vector.shape_cast %10 : vector<16xf32> to vector<16x1xf32>
    %cst_7 = arith.constant 3.200000e+01 : f32
    %12 = vector.broadcast %cst_7 : f32 to vector<16x1xf32>
    %13 = arith.divf %11, %12 : vector<16x1xf32>
    %cst_8 = arith.constant 9.99999974E-6 : f32
    %14 = vector.broadcast %cst_8 : f32 to vector<16x1xf32>
    %15 = arith.addf %13, %14 : vector<16x1xf32>
    %16 = math.rsqrt %15 : vector<16x1xf32>
    %17 = vector.broadcast %16 : vector<16x1xf32> to vector<16x32xf32>
    %18 = arith.mulf %8, %17 : vector<16x32xf32>
    %19 = vector.broadcast %1 : vector<1x32xf32> to vector<16x32xf32>
    %20 = arith.mulf %18, %19 : vector<16x32xf32>
    %21 = vector.broadcast %2 : vector<1x32xf32> to vector<16x32xf32>
    %22 = arith.addf %20, %21 : vector<16x32xf32>
    %23 = arith.truncf %22 : vector<16x32xf32> to vector<16x32xbf16>
    %c0_9 = arith.constant 0 : index
    %c0_10 = arith.constant 0 : index
    %24 = vector.load %arg4[%c0_9, %c0_10] : memref<32x64xbf16, #tpu.memory_space<vmem>>, vector<32x64xbf16>
    %cst_11 = arith.constant dense<0.000000e+00> : vector<16x64xf32>
    %25 = tpu.matmul %23, %24, %cst_11 {dimension_numbers = #tpu.dot_dimension_numbers<[1], [0], [0], [1], [0, 0, 1, 1], [], []>} : vector<16x32xbf16>, vector<32x64xbf16>, vector<16x64xf32> -> vector<16x64xf32>
    %c0_12 = arith.constant 0 : index
    %c0_13 = arith.constant 0 : index
    %26 = vector.load %arg5[%c0_12, %c0_13] : memref<1x64xf32, #tpu.memory_space<vmem>>, vector<1x64xf32>
    %27 = vector.broadcast %26 : vector<1x64xf32> to vector<16x64xf32>
    %28 = arith.addf %25, %27 : vector<16x64xf32>
    %cst_14 = arith.constant dense<0xFF800000> : vector<16xf32>
    %29 = vector.multi_reduction <maximumf>, %28, %cst_14 [1] : vector<16x64xf32> to vector<16xf32>
    %30 = vector.shape_cast %29 : vector<16xf32> to vector<16x1xf32>
    %31 = vector.broadcast %30 : vector<16x1xf32> to vector<16x64xf32>
    %32 = arith.subf %28, %31 : vector<16x64xf32>
    %33 = math.exp %32 : vector<16x64xf32>
    %cst_15 = arith.constant dense<0.000000e+00> : vector<16xf32>
    %34 = vector.multi_reduction <add>, %33, %cst_15 [1] : vector<16x64xf32> to vector<16xf32>
    %35 = vector.shape_cast %34 : vector<16xf32> to vector<16x1xf32>
    %36 = math.log %35 : vector<16x1xf32>
    %37 = arith.addf %36, %30 : vector<16x1xf32>
    %38 = vector.broadcast %37 : vector<16x1xf32> to vector<16x64xf32>
    %39 = arith.subf %28, %38 : vector<16x64xf32>
    %c0_16 = arith.constant 0 : index
    %c0_17 = arith.constant 0 : index
    %40 = vector.load %arg6[%c0_16, %c0_17] : memref<16x64xf32, #tpu.memory_space<vmem>>, vector<16x64xf32>
    tpu.vector_store %arg6[%c0_16, %c0_17], %39 {strides = array<i32>} : memref<16x64xf32, #tpu.memory_space<vmem>>, vector<16x64xf32>,
    return
  }
  func.func @transform_0(%arg0: i32) -> (i32, i32) {
    %c0_i32 = arith.constant 0 : i32
    %c0_i32_0 = arith.constant 0 : i32
    return %arg0, %c0_i32 : i32, i32
  }
  func.func @transform_1(%arg0: i32) -> (i32, i32) {
    %c0_i32 = arith.constant 0 : i32
    %c0_i32_0 = arith.constant 0 : i32
    %c0_i32_1 = arith.constant 0 : i32
    return %c0_i32, %c0_i32_0 : i32, i32
  }
  func.func @transform_2(%arg0: i32) -> (i32, i32) {
    %c0_i32 = arith.constant 0 : i32
    %c0_i32_0 = arith.constant 0 : i32
    %c0_i32_1 = arith.constant 0 : i32
    return %c0_i32, %c0_i32_0 : i32, i32
  }
  func.func @transform_3(%arg0: i32) -> (i32, i32) {
    %c0_i32 = arith.constant 0 : i32
    %c0_i32_0 = arith.constant 0 : i32
    %c0_i32_1 = arith.constant 0 : i32
    return %c0_i32, %c0_i32_0 : i32, i32
  }
  func.func @transform_4(%arg0: i32) -> (i32, i32) {
    %c0_i32 = arith.constant 0 : i32
    %c0_i32_0 = arith.constant 0 : i32
    %c0_i32_1 = arith.constant 0 : i32
    return %c0_i32, %c0_i32_0 : i32, i32
  }
  func.func @transform_5(%arg0: i32) -> (i32, i32) {
    %c0_i32 = arith.constant 0 : i32
    %c0_i32_0 = arith.constant 0 : i32
    return %arg0, %c0_i32 : i32, i32
  }
}

module attributes {stable_mosaic.version = 11 : i64} {
  func.func @_dec_stack_kernel(%arg0: i32, %arg1: i32, %arg2: memref<1x8x32xf32, #tpu.memory_space<vmem>>, %arg3: memref<8x32xf32, #tpu.memory_space<vmem>>, %arg4: memref<1x4x32xf32, #tpu.memory_space<vmem>>, %arg5: memref<1x1x8x8xf32, #tpu.memory_space<vmem>>, %arg6: memref<1x1x8x4xf32, #tpu.memory_space<vmem>>, %arg7: memref<1x1x32xf32, #tpu.memory_space<vmem>>, %arg8: memref<1x1x32xf32, #tpu.memory_space<vmem>>, %arg9: memref<1x32x96xbf16, #tpu.memory_space<vmem>>, %arg10: memref<1x1x96xf32, #tpu.memory_space<vmem>>, %arg11: memref<1x32x32xbf16, #tpu.memory_space<vmem>>, %arg12: memref<1x1x32xf32, #tpu.memory_space<vmem>>, %arg13: memref<1x1x32xf32, #tpu.memory_space<vmem>>, %arg14: memref<1x1x32xf32, #tpu.memory_space<vmem>>, %arg15: memref<1x32x32xbf16, #tpu.memory_space<vmem>>, %arg16: memref<1x1x32xf32, #tpu.memory_space<vmem>>, %arg17: memref<1x32x64xbf16, #tpu.memory_space<vmem>>, %arg18: memref<1x1x64xf32, #tpu.memory_space<vmem>>, %arg19: memref<1x32x32xbf16, #tpu.memory_space<vmem>>, %arg20: memref<1x1x32xf32, #tpu.memory_space<vmem>>, %arg21: memref<1x1x32xf32, #tpu.memory_space<vmem>>, %arg22: memref<1x1x32xf32, #tpu.memory_space<vmem>>, %arg23: memref<1x32x64xbf16, #tpu.memory_space<vmem>>, %arg24: memref<1x1x64xf32, #tpu.memory_space<vmem>>, %arg25: memref<1x64x32xbf16, #tpu.memory_space<vmem>>, %arg26: memref<1x1x32xf32, #tpu.memory_space<vmem>>, %arg27: memref<1x8x32xf32, #tpu.memory_space<vmem>>, %arg28: memref<8x32xf32, #tpu.memory_space<vmem>>) attributes {dimension_semantics = [#tpu.dimension_semantics<parallel>, #tpu.dimension_semantics<arbitrary>], iteration_bounds = array<i64: 2, 2>, scalar_prefetch = 0 : i64, scratch_operands = 1 : i64, tpu.core_type = #tpu.core_type<tc>, window_params = [{transform_indices = @transform_0, window_bounds = array<i64: 1, 8, 32>}, {pipeline_mode = #tpu.pipeline_mode<synchronous>, transform_indices = @transform_1, window_bounds = array<i64: 8, 32>}, {transform_indices = @transform_2, window_bounds = array<i64: 1, 4, 32>}, {transform_indices = @transform_3, window_bounds = array<i64: 1, 1, 8, 8>}, {transform_indices = @transform_4, window_bounds = array<i64: 1, 1, 8, 4>}, {transform_indices = @transform_5, window_bounds = array<i64: 1, 1, 32>}, {transform_indices = @transform_6, window_bounds = array<i64: 1, 1, 32>}, {transform_indices = @transform_7, window_bounds = array<i64: 1, 32, 96>}, {transform_indices = @transform_8, window_bounds = array<i64: 1, 1, 96>}, {transform_indices = @transform_9, window_bounds = array<i64: 1, 32, 32>}, {transform_indices = @transform_10, window_bounds = array<i64: 1, 1, 32>}, {transform_indices = @transform_11, window_bounds = array<i64: 1, 1, 32>}, {transform_indices = @transform_12, window_bounds = array<i64: 1, 1, 32>}, {transform_indices = @transform_13, window_bounds = array<i64: 1, 32, 32>}, {transform_indices = @transform_14, window_bounds = array<i64: 1, 1, 32>}, {transform_indices = @transform_15, window_bounds = array<i64: 1, 32, 64>}, {transform_indices = @transform_16, window_bounds = array<i64: 1, 1, 64>}, {transform_indices = @transform_17, window_bounds = array<i64: 1, 32, 32>}, {transform_indices = @transform_18, window_bounds = array<i64: 1, 1, 32>}, {transform_indices = @transform_19, window_bounds = array<i64: 1, 1, 32>}, {transform_indices = @transform_20, window_bounds = array<i64: 1, 1, 32>}, {transform_indices = @transform_21, window_bounds = array<i64: 1, 32, 64>}, {transform_indices = @transform_22, window_bounds = array<i64: 1, 1, 64>}, {transform_indices = @transform_23, window_bounds = array<i64: 1, 64, 32>}, {transform_indices = @transform_24, window_bounds = array<i64: 1, 1, 32>}, {transform_indices = @transform_25, window_bounds = array<i64: 1, 8, 32>}]} {
    %c0_i32 = arith.constant 0 : i32
    %0 = arith.cmpi eq, %arg1, %c0_i32 : i32
    %1 = arith.extui %0 : i1 to i32
    %c0_i32_0 = arith.constant 0 : i32
    %2 = arith.cmpi ne, %1, %c0_i32_0 : i32
    scf.if %2 {
      %c0_158 = arith.constant 0 : index
      %c0_159 = arith.constant 0 : index
      %c0_160 = arith.constant 0 : index
      %326 = vector.load %arg2[%c0_158, %c0_159, %c0_160] : memref<1x8x32xf32, #tpu.memory_space<vmem>>, vector<1x8x32xf32>
      %327 = vector.shape_cast %326 : vector<1x8x32xf32> to vector<8x32xf32>
      %cst_161 = arith.constant 5.65685415 : f32
      %328 = vector.broadcast %cst_161 : f32 to vector<8x32xf32>
      %329 = arith.mulf %327, %328 : vector<8x32xf32>
      %c0_162 = arith.constant 0 : index
      %c0_163 = arith.constant 0 : index
      %330 = vector.load %arg3[%c0_162, %c0_163] : memref<8x32xf32, #tpu.memory_space<vmem>>, vector<8x32xf32>
      %331 = arith.addf %329, %330 : vector<8x32xf32>
      %c0_164 = arith.constant 0 : index
      %c0_165 = arith.constant 0 : index
      %c0_166 = arith.constant 0 : index
      %332 = vector.load %arg27[%c0_164, %c0_165, %c0_166] : memref<1x8x32xf32, #tpu.memory_space<vmem>>, vector<1x8x32xf32>
      %333 = vector.shape_cast %332 : vector<1x8x32xf32> to vector<8x32xf32>
      %334 = vector.shape_cast %331 : vector<8x32xf32> to vector<1x8x32xf32>
      tpu.vector_store %arg27[%c0_164, %c0_165, %c0_166], %334 {strides = array<i32>} : memref<1x8x32xf32, #tpu.memory_space<vmem>>, vector<1x8x32xf32>,
    } else {
    }
    %c0 = arith.constant 0 : index
    %c0_1 = arith.constant 0 : index
    %c0_2 = arith.constant 0 : index
    %3 = vector.load %arg27[%c0, %c0_1, %c0_2] : memref<1x8x32xf32, #tpu.memory_space<vmem>>, vector<1x8x32xf32>
    %4 = vector.shape_cast %3 : vector<1x8x32xf32> to vector<8x32xf32>
    %c0_3 = arith.constant 0 : index
    %c0_4 = arith.constant 0 : index
    %c0_5 = arith.constant 0 : index
    %5 = vector.load %arg7[%c0_3, %c0_4, %c0_5] : memref<1x1x32xf32, #tpu.memory_space<vmem>>, vector<1x1x32xf32>
    %6 = vector.shape_cast %5 : vector<1x1x32xf32> to vector<1x32xf32>
    %c0_6 = arith.constant 0 : index
    %c0_7 = arith.constant 0 : index
    %c0_8 = arith.constant 0 : index
    %7 = vector.load %arg8[%c0_6, %c0_7, %c0_8] : memref<1x1x32xf32, #tpu.memory_space<vmem>>, vector<1x1x32xf32>
    %8 = vector.shape_cast %7 : vector<1x1x32xf32> to vector<1x32xf32>
    %cst = arith.constant dense<0.000000e+00> : vector<8xf32>
    %9 = vector.multi_reduction <add>, %4, %cst [1] : vector<8x32xf32> to vector<8xf32>
    %10 = vector.shape_cast %9 : vector<8xf32> to vector<8x1xf32>
    %cst_9 = arith.constant 3.200000e+01 : f32
    %11 = vector.broadcast %cst_9 : f32 to vector<8x1xf32>
    %12 = arith.divf %10, %11 : vector<8x1xf32>
    %13 = vector.broadcast %12 : vector<8x1xf32> to vector<8x32xf32>
    %14 = arith.subf %4, %13 : vector<8x32xf32>
    %15 = arith.mulf %14, %14 : vector<8x32xf32>
    %cst_10 = arith.constant dense<0.000000e+00> : vector<8xf32>
    %16 = vector.multi_reduction <add>, %15, %cst_10 [1] : vector<8x32xf32> to vector<8xf32>
    %17 = vector.shape_cast %16 : vector<8xf32> to vector<8x1xf32>
    %cst_11 = arith.constant 3.200000e+01 : f32
    %18 = vector.broadcast %cst_11 : f32 to vector<8x1xf32>
    %19 = arith.divf %17, %18 : vector<8x1xf32>
    %cst_12 = arith.constant 9.99999974E-6 : f32
    %20 = vector.broadcast %cst_12 : f32 to vector<8x1xf32>
    %21 = arith.addf %19, %20 : vector<8x1xf32>
    %22 = math.rsqrt %21 : vector<8x1xf32>
    %23 = vector.broadcast %22 : vector<8x1xf32> to vector<8x32xf32>
    %24 = arith.mulf %14, %23 : vector<8x32xf32>
    %25 = vector.broadcast %6 : vector<1x32xf32> to vector<8x32xf32>
    %26 = arith.mulf %24, %25 : vector<8x32xf32>
    %27 = vector.broadcast %8 : vector<1x32xf32> to vector<8x32xf32>
    %28 = arith.addf %26, %27 : vector<8x32xf32>
    %29 = arith.truncf %28 : vector<8x32xf32> to vector<8x32xbf16>
    %c0_13 = arith.constant 0 : index
    %c0_14 = arith.constant 0 : index
    %c0_15 = arith.constant 0 : index
    %30 = vector.load %arg9[%c0_13, %c0_14, %c0_15] : memref<1x32x96xbf16, #tpu.memory_space<vmem>>, vector<1x32x96xbf16>
    %31 = vector.shape_cast %30 : vector<1x32x96xbf16> to vector<32x96xbf16>
    %cst_16 = arith.constant dense<0.000000e+00> : vector<8x96xf32>
    %32 = tpu.matmul %29, %31, %cst_16 {dimension_numbers = #tpu.dot_dimension_numbers<[1], [0], [0], [1], [0, 0, 1, 1], [], []>} : vector<8x32xbf16>, vector<32x96xbf16>, vector<8x96xf32> -> vector<8x96xf32>
    %c0_17 = arith.constant 0 : index
    %c0_18 = arith.constant 0 : index
    %c0_19 = arith.constant 0 : index
    %33 = vector.load %arg10[%c0_17, %c0_18, %c0_19] : memref<1x1x96xf32, #tpu.memory_space<vmem>>, vector<1x1x96xf32>
    %34 = vector.shape_cast %33 : vector<1x1x96xf32> to vector<1x96xf32>
    %35 = vector.broadcast %34 : vector<1x96xf32> to vector<8x96xf32>
    %36 = arith.addf %32, %35 : vector<8x96xf32>
    %37 = vector.extract_strided_slice %36 {offsets = [0, 0], sizes = [8, 32], strides = [1, 1]} : vector<8x96xf32> to vector<8x32xf32>
    %38 = vector.extract_strided_slice %36 {offsets = [0, 32], sizes = [8, 32], strides = [1, 1]} : vector<8x96xf32> to vector<8x32xf32>
    %39 = vector.extract_strided_slice %36 {offsets = [0, 64], sizes = [8, 32], strides = [1, 1]} : vector<8x96xf32> to vector<8x32xf32>
    %c0_20 = arith.constant 0 : index
    %c0_21 = arith.constant 0 : index
    %c0_22 = arith.constant 0 : index
    %c0_23 = arith.constant 0 : index
    %40 = vector.load %arg5[%c0_20, %c0_21, %c0_22, %c0_23] : memref<1x1x8x8xf32, #tpu.memory_space<vmem>>, vector<1x1x8x8xf32>
    %41 = vector.shape_cast %40 : vector<1x1x8x8xf32> to vector<8x8xf32>
    %42 = arith.truncf %37 : vector<8x32xf32> to vector<8x32xbf16>
    %43 = arith.truncf %38 : vector<8x32xf32> to vector<8x32xbf16>
    %44 = arith.truncf %39 : vector<8x32xf32> to vector<8x32xbf16>
    %45 = vector.extract_strided_slice %42 {offsets = [0, 0], sizes = [8, 8], strides = [1, 1]} : vector<8x32xbf16> to vector<8x8xbf16>
    %46 = vector.extract_strided_slice %43 {offsets = [0, 0], sizes = [8, 8], strides = [1, 1]} : vector<8x32xbf16> to vector<8x8xbf16>
    %cst_24 = arith.constant dense<0.000000e+00> : vector<8x8xf32>
    %47 = tpu.matmul %45, %46, %cst_24 {dimension_numbers = #tpu.dot_dimension_numbers<[1], [1], [0], [0], [0, 0, 1, 0], [], []>} : vector<8x8xbf16>, vector<8x8xbf16>, vector<8x8xf32> -> vector<8x8xf32>
    %cst_25 = arith.constant 0.353553385 : f32
    %48 = vector.broadcast %cst_25 : f32 to vector<8x8xf32>
    %49 = arith.mulf %47, %48 : vector<8x8xf32>
    %50 = arith.addf %49, %41 : vector<8x8xf32>
    %cst_26 = arith.constant dense<0xFF800000> : vector<8xf32>
    %51 = vector.multi_reduction <maximumf>, %50, %cst_26 [1] : vector<8x8xf32> to vector<8xf32>
    %52 = vector.shape_cast %51 : vector<8xf32> to vector<8x1xf32>
    %53 = vector.broadcast %52 : vector<8x1xf32> to vector<8x8xf32>
    %54 = arith.subf %50, %53 : vector<8x8xf32>
    %55 = math.exp %54 : vector<8x8xf32>
    %cst_27 = arith.constant dense<0.000000e+00> : vector<8xf32>
    %56 = vector.multi_reduction <add>, %55, %cst_27 [1] : vector<8x8xf32> to vector<8xf32>
    %57 = vector.shape_cast %56 : vector<8xf32> to vector<8x1xf32>
    %58 = tpu.reciprocal %57 {approx = true} : vector<8x1xf32> -> vector<8x1xf32>
    %59 = vector.broadcast %58 : vector<8x1xf32> to vector<8x8xf32>
    %60 = arith.mulf %55, %59 : vector<8x8xf32>
    %61 = arith.truncf %60 : vector<8x8xf32> to vector<8x8xbf16>
    %62 = vector.extract_strided_slice %44 {offsets = [0, 0], sizes = [8, 8], strides = [1, 1]} : vector<8x32xbf16> to vector<8x8xbf16>
    %cst_28 = arith.constant dense<0.000000e+00> : vector<8x8xf32>
    %63 = tpu.matmul %61, %62, %cst_28 {dimension_numbers = #tpu.dot_dimension_numbers<[1], [0], [0], [1], [0, 0, 1, 1], [], []>} : vector<8x8xbf16>, vector<8x8xbf16>, vector<8x8xf32> -> vector<8x8xf32>
    %c0_29 = arith.constant 0 : index
    %c0_30 = arith.constant 0 : index
    %64 = vector.load %arg28[%c0_29, %c0_30] : memref<8x32xf32, #tpu.memory_space<vmem>>, vector<8x8xf32>
    tpu.vector_store %arg28[%c0_29, %c0_30], %63 {strides = array<i32>} : memref<8x32xf32, #tpu.memory_space<vmem>>, vector<8x8xf32>,
    %65 = vector.extract_strided_slice %42 {offsets = [0, 8], sizes = [8, 8], strides = [1, 1]} : vector<8x32xbf16> to vector<8x8xbf16>
    %66 = vector.extract_strided_slice %43 {offsets = [0, 8], sizes = [8, 8], strides = [1, 1]} : vector<8x32xbf16> to vector<8x8xbf16>
    %cst_31 = arith.constant dense<0.000000e+00> : vector<8x8xf32>
    %67 = tpu.matmul %65, %66, %cst_31 {dimension_numbers = #tpu.dot_dimension_numbers<[1], [1], [0], [0], [0, 0, 1, 0], [], []>} : vector<8x8xbf16>, vector<8x8xbf16>, vector<8x8xf32> -> vector<8x8xf32>
    %cst_32 = arith.constant 0.353553385 : f32
    %68 = vector.broadcast %cst_32 : f32 to vector<8x8xf32>
    %69 = arith.mulf %67, %68 : vector<8x8xf32>
    %70 = arith.addf %69, %41 : vector<8x8xf32>
    %cst_33 = arith.constant dense<0xFF800000> : vector<8xf32>
    %71 = vector.multi_reduction <maximumf>, %70, %cst_33 [1] : vector<8x8xf32> to vector<8xf32>
    %72 = vector.shape_cast %71 : vector<8xf32> to vector<8x1xf32>
    %73 = vector.broadcast %72 : vector<8x1xf32> to vector<8x8xf32>
    %74 = arith.subf %70, %73 : vector<8x8xf32>
    %75 = math.exp %74 : vector<8x8xf32>
    %cst_34 = arith.constant dense<0.000000e+00> : vector<8xf32>
    %76 = vector.multi_reduction <add>, %75, %cst_34 [1] : vector<8x8xf32> to vector<8xf32>
    %77 = vector.shape_cast %76 : vector<8xf32> to vector<8x1xf32>
    %78 = tpu.reciprocal %77 {approx = true} : vector<8x1xf32> -> vector<8x1xf32>
    %79 = vector.broadcast %78 : vector<8x1xf32> to vector<8x8xf32>
    %80 = arith.mulf %75, %79 : vector<8x8xf32>
    %81 = arith.truncf %80 : vector<8x8xf32> to vector<8x8xbf16>
    %82 = vector.extract_strided_slice %44 {offsets = [0, 8], sizes = [8, 8], strides = [1, 1]} : vector<8x32xbf16> to vector<8x8xbf16>
    %cst_35 = arith.constant dense<0.000000e+00> : vector<8x8xf32>
    %83 = tpu.matmul %81, %82, %cst_35 {dimension_numbers = #tpu.dot_dimension_numbers<[1], [0], [0], [1], [0, 0, 1, 1], [], []>} : vector<8x8xbf16>, vector<8x8xbf16>, vector<8x8xf32> -> vector<8x8xf32>
    %c0_36 = arith.constant 0 : index
    %c8 = arith.constant 8 : index
    %84 = vector.load %arg28[%c0_36, %c8] : memref<8x32xf32, #tpu.memory_space<vmem>>, vector<8x8xf32>
    tpu.vector_store %arg28[%c0_36, %c8], %83 {strides = array<i32>} : memref<8x32xf32, #tpu.memory_space<vmem>>, vector<8x8xf32>,
    %85 = vector.extract_strided_slice %42 {offsets = [0, 16], sizes = [8, 8], strides = [1, 1]} : vector<8x32xbf16> to vector<8x8xbf16>
    %86 = vector.extract_strided_slice %43 {offsets = [0, 16], sizes = [8, 8], strides = [1, 1]} : vector<8x32xbf16> to vector<8x8xbf16>
    %cst_37 = arith.constant dense<0.000000e+00> : vector<8x8xf32>
    %87 = tpu.matmul %85, %86, %cst_37 {dimension_numbers = #tpu.dot_dimension_numbers<[1], [1], [0], [0], [0, 0, 1, 0], [], []>} : vector<8x8xbf16>, vector<8x8xbf16>, vector<8x8xf32> -> vector<8x8xf32>
    %cst_38 = arith.constant 0.353553385 : f32
    %88 = vector.broadcast %cst_38 : f32 to vector<8x8xf32>
    %89 = arith.mulf %87, %88 : vector<8x8xf32>
    %90 = arith.addf %89, %41 : vector<8x8xf32>
    %cst_39 = arith.constant dense<0xFF800000> : vector<8xf32>
    %91 = vector.multi_reduction <maximumf>, %90, %cst_39 [1] : vector<8x8xf32> to vector<8xf32>
    %92 = vector.shape_cast %91 : vector<8xf32> to vector<8x1xf32>
    %93 = vector.broadcast %92 : vector<8x1xf32> to vector<8x8xf32>
    %94 = arith.subf %90, %93 : vector<8x8xf32>
    %95 = math.exp %94 : vector<8x8xf32>
    %cst_40 = arith.constant dense<0.000000e+00> : vector<8xf32>
    %96 = vector.multi_reduction <add>, %95, %cst_40 [1] : vector<8x8xf32> to vector<8xf32>
    %97 = vector.shape_cast %96 : vector<8xf32> to vector<8x1xf32>
    %98 = tpu.reciprocal %97 {approx = true} : vector<8x1xf32> -> vector<8x1xf32>
    %99 = vector.broadcast %98 : vector<8x1xf32> to vector<8x8xf32>
    %100 = arith.mulf %95, %99 : vector<8x8xf32>
    %101 = arith.truncf %100 : vector<8x8xf32> to vector<8x8xbf16>
    %102 = vector.extract_strided_slice %44 {offsets = [0, 16], sizes = [8, 8], strides = [1, 1]} : vector<8x32xbf16> to vector<8x8xbf16>
    %cst_41 = arith.constant dense<0.000000e+00> : vector<8x8xf32>
    %103 = tpu.matmul %101, %102, %cst_41 {dimension_numbers = #tpu.dot_dimension_numbers<[1], [0], [0], [1], [0, 0, 1, 1], [], []>} : vector<8x8xbf16>, vector<8x8xbf16>, vector<8x8xf32> -> vector<8x8xf32>
    %c0_42 = arith.constant 0 : index
    %c16 = arith.constant 16 : index
    %104 = vector.load %arg28[%c0_42, %c16] : memref<8x32xf32, #tpu.memory_space<vmem>>, vector<8x8xf32>
    tpu.vector_store %arg28[%c0_42, %c16], %103 {strides = array<i32>} : memref<8x32xf32, #tpu.memory_space<vmem>>, vector<8x8xf32>,
    %105 = vector.extract_strided_slice %42 {offsets = [0, 24], sizes = [8, 8], strides = [1, 1]} : vector<8x32xbf16> to vector<8x8xbf16>
    %106 = vector.extract_strided_slice %43 {offsets = [0, 24], sizes = [8, 8], strides = [1, 1]} : vector<8x32xbf16> to vector<8x8xbf16>
    %cst_43 = arith.constant dense<0.000000e+00> : vector<8x8xf32>
    %107 = tpu.matmul %105, %106, %cst_43 {dimension_numbers = #tpu.dot_dimension_numbers<[1], [1], [0], [0], [0, 0, 1, 0], [], []>} : vector<8x8xbf16>, vector<8x8xbf16>, vector<8x8xf32> -> vector<8x8xf32>
    %cst_44 = arith.constant 0.353553385 : f32
    %108 = vector.broadcast %cst_44 : f32 to vector<8x8xf32>
    %109 = arith.mulf %107, %108 : vector<8x8xf32>
    %110 = arith.addf %109, %41 : vector<8x8xf32>
    %cst_45 = arith.constant dense<0xFF800000> : vector<8xf32>
    %111 = vector.multi_reduction <maximumf>, %110, %cst_45 [1] : vector<8x8xf32> to vector<8xf32>
    %112 = vector.shape_cast %111 : vector<8xf32> to vector<8x1xf32>
    %113 = vector.broadcast %112 : vector<8x1xf32> to vector<8x8xf32>
    %114 = arith.subf %110, %113 : vector<8x8xf32>
    %115 = math.exp %114 : vector<8x8xf32>
    %cst_46 = arith.constant dense<0.000000e+00> : vector<8xf32>
    %116 = vector.multi_reduction <add>, %115, %cst_46 [1] : vector<8x8xf32> to vector<8xf32>
    %117 = vector.shape_cast %116 : vector<8xf32> to vector<8x1xf32>
    %118 = tpu.reciprocal %117 {approx = true} : vector<8x1xf32> -> vector<8x1xf32>
    %119 = vector.broadcast %118 : vector<8x1xf32> to vector<8x8xf32>
    %120 = arith.mulf %115, %119 : vector<8x8xf32>
    %121 = arith.truncf %120 : vector<8x8xf32> to vector<8x8xbf16>
    %122 = vector.extract_strided_slice %44 {offsets = [0, 24], sizes = [8, 8], strides = [1, 1]} : vector<8x32xbf16> to vector<8x8xbf16>
    %cst_47 = arith.constant dense<0.000000e+00> : vector<8x8xf32>
    %123 = tpu.matmul %121, %122, %cst_47 {dimension_numbers = #tpu.dot_dimension_numbers<[1], [0], [0], [1], [0, 0, 1, 1], [], []>} : vector<8x8xbf16>, vector<8x8xbf16>, vector<8x8xf32> -> vector<8x8xf32>
    %c0_48 = arith.constant 0 : index
    %c24 = arith.constant 24 : index
    %124 = vector.load %arg28[%c0_48, %c24] : memref<8x32xf32, #tpu.memory_space<vmem>>, vector<8x8xf32>
    tpu.vector_store %arg28[%c0_48, %c24], %123 {strides = array<i32>} : memref<8x32xf32, #tpu.memory_space<vmem>>, vector<8x8xf32>,
    %c0_49 = arith.constant 0 : index
    %c0_50 = arith.constant 0 : index
    %125 = vector.load %arg28[%c0_49, %c0_50] : memref<8x32xf32, #tpu.memory_space<vmem>>, vector<8x32xf32>
    %126 = arith.truncf %125 : vector<8x32xf32> to vector<8x32xbf16>
    %c0_51 = arith.constant 0 : index
    %c0_52 = arith.constant 0 : index
    %c0_53 = arith.constant 0 : index
    %127 = vector.load %arg11[%c0_51, %c0_52, %c0_53] : memref<1x32x32xbf16, #tpu.memory_space<vmem>>, vector<1x32x32xbf16>
    %128 = vector.shape_cast %127 : vector<1x32x32xbf16> to vector<32x32xbf16>
    %cst_54 = arith.constant dense<0.000000e+00> : vector<8x32xf32>
    %129 = tpu.matmul %126, %128, %cst_54 {dimension_numbers = #tpu.dot_dimension_numbers<[1], [0], [0], [1], [0, 0, 1, 1], [], []>} : vector<8x32xbf16>, vector<32x32xbf16>, vector<8x32xf32> -> vector<8x32xf32>
    %130 = arith.addf %4, %129 : vector<8x32xf32>
    %c0_55 = arith.constant 0 : index
    %c0_56 = arith.constant 0 : index
    %c0_57 = arith.constant 0 : index
    %131 = vector.load %arg12[%c0_55, %c0_56, %c0_57] : memref<1x1x32xf32, #tpu.memory_space<vmem>>, vector<1x1x32xf32>
    %132 = vector.shape_cast %131 : vector<1x1x32xf32> to vector<1x32xf32>
    %133 = vector.broadcast %132 : vector<1x32xf32> to vector<8x32xf32>
    %134 = arith.addf %130, %133 : vector<8x32xf32>
    %c0_58 = arith.constant 0 : index
    %c0_59 = arith.constant 0 : index
    %c0_60 = arith.constant 0 : index
    %135 = vector.load %arg13[%c0_58, %c0_59, %c0_60] : memref<1x1x32xf32, #tpu.memory_space<vmem>>, vector<1x1x32xf32>
    %136 = vector.shape_cast %135 : vector<1x1x32xf32> to vector<1x32xf32>
    %c0_61 = arith.constant 0 : index
    %c0_62 = arith.constant 0 : index
    %c0_63 = arith.constant 0 : index
    %137 = vector.load %arg14[%c0_61, %c0_62, %c0_63] : memref<1x1x32xf32, #tpu.memory_space<vmem>>, vector<1x1x32xf32>
    %138 = vector.shape_cast %137 : vector<1x1x32xf32> to vector<1x32xf32>
    %cst_64 = arith.constant dense<0.000000e+00> : vector<8xf32>
    %139 = vector.multi_reduction <add>, %134, %cst_64 [1] : vector<8x32xf32> to vector<8xf32>
    %140 = vector.shape_cast %139 : vector<8xf32> to vector<8x1xf32>
    %cst_65 = arith.constant 3.200000e+01 : f32
    %141 = vector.broadcast %cst_65 : f32 to vector<8x1xf32>
    %142 = arith.divf %140, %141 : vector<8x1xf32>
    %143 = vector.broadcast %142 : vector<8x1xf32> to vector<8x32xf32>
    %144 = arith.subf %134, %143 : vector<8x32xf32>
    %145 = arith.mulf %144, %144 : vector<8x32xf32>
    %cst_66 = arith.constant dense<0.000000e+00> : vector<8xf32>
    %146 = vector.multi_reduction <add>, %145, %cst_66 [1] : vector<8x32xf32> to vector<8xf32>
    %147 = vector.shape_cast %146 : vector<8xf32> to vector<8x1xf32>
    %cst_67 = arith.constant 3.200000e+01 : f32
    %148 = vector.broadcast %cst_67 : f32 to vector<8x1xf32>
    %149 = arith.divf %147, %148 : vector<8x1xf32>
    %cst_68 = arith.constant 9.99999974E-6 : f32
    %150 = vector.broadcast %cst_68 : f32 to vector<8x1xf32>
    %151 = arith.addf %149, %150 : vector<8x1xf32>
    %152 = math.rsqrt %151 : vector<8x1xf32>
    %153 = vector.broadcast %152 : vector<8x1xf32> to vector<8x32xf32>
    %154 = arith.mulf %144, %153 : vector<8x32xf32>
    %155 = vector.broadcast %136 : vector<1x32xf32> to vector<8x32xf32>
    %156 = arith.mulf %154, %155 : vector<8x32xf32>
    %157 = vector.broadcast %138 : vector<1x32xf32> to vector<8x32xf32>
    %158 = arith.addf %156, %157 : vector<8x32xf32>
    %159 = arith.truncf %158 : vector<8x32xf32> to vector<8x32xbf16>
    %c0_69 = arith.constant 0 : index
    %c0_70 = arith.constant 0 : index
    %c0_71 = arith.constant 0 : index
    %160 = vector.load %arg15[%c0_69, %c0_70, %c0_71] : memref<1x32x32xbf16, #tpu.memory_space<vmem>>, vector<1x32x32xbf16>
    %161 = vector.shape_cast %160 : vector<1x32x32xbf16> to vector<32x32xbf16>
    %cst_72 = arith.constant dense<0.000000e+00> : vector<8x32xf32>
    %162 = tpu.matmul %159, %161, %cst_72 {dimension_numbers = #tpu.dot_dimension_numbers<[1], [0], [0], [1], [0, 0, 1, 1], [], []>} : vector<8x32xbf16>, vector<32x32xbf16>, vector<8x32xf32> -> vector<8x32xf32>
    %c0_73 = arith.constant 0 : index
    %c0_74 = arith.constant 0 : index
    %c0_75 = arith.constant 0 : index
    %163 = vector.load %arg16[%c0_73, %c0_74, %c0_75] : memref<1x1x32xf32, #tpu.memory_space<vmem>>, vector<1x1x32xf32>
    %164 = vector.shape_cast %163 : vector<1x1x32xf32> to vector<1x32xf32>
    %165 = vector.broadcast %164 : vector<1x32xf32> to vector<8x32xf32>
    %166 = arith.addf %162, %165 : vector<8x32xf32>
    %c0_76 = arith.constant 0 : index
    %c0_77 = arith.constant 0 : index
    %c0_78 = arith.constant 0 : index
    %167 = vector.load %arg4[%c0_76, %c0_77, %c0_78] : memref<1x4x32xf32, #tpu.memory_space<vmem>>, vector<1x4x32xf32>
    %168 = vector.shape_cast %167 : vector<1x4x32xf32> to vector<4x32xf32>
    %169 = arith.truncf %168 : vector<4x32xf32> to vector<4x32xbf16>
    %c0_79 = arith.constant 0 : index
    %c0_80 = arith.constant 0 : index
    %c0_81 = arith.constant 0 : index
    %170 = vector.load %arg17[%c0_79, %c0_80, %c0_81] : memref<1x32x64xbf16, #tpu.memory_space<vmem>>, vector<1x32x64xbf16>
    %171 = vector.shape_cast %170 : vector<1x32x64xbf16> to vector<32x64xbf16>
    %cst_82 = arith.constant dense<0.000000e+00> : vector<4x64xf32>
    %172 = tpu.matmul %169, %171, %cst_82 {dimension_numbers = #tpu.dot_dimension_numbers<[1], [0], [0], [1], [0, 0, 1, 1], [], []>} : vector<4x32xbf16>, vector<32x64xbf16>, vector<4x64xf32> -> vector<4x64xf32>
    %c0_83 = arith.constant 0 : index
    %c0_84 = arith.constant 0 : index
    %c0_85 = arith.constant 0 : index
    %173 = vector.load %arg18[%c0_83, %c0_84, %c0_85] : memref<1x1x64xf32, #tpu.memory_space<vmem>>, vector<1x1x64xf32>
    %174 = vector.shape_cast %173 : vector<1x1x64xf32> to vector<1x64xf32>
    %175 = vector.broadcast %174 : vector<1x64xf32> to vector<4x64xf32>
    %176 = arith.addf %172, %175 : vector<4x64xf32>
    %177 = vector.extract_strided_slice %176 {offsets = [0, 0], sizes = [4, 32], strides = [1, 1]} : vector<4x64xf32> to vector<4x32xf32>
    %178 = vector.extract_strided_slice %176 {offsets = [0, 32], sizes = [4, 32], strides = [1, 1]} : vector<4x64xf32> to vector<4x32xf32>
    %c0_86 = arith.constant 0 : index
    %c0_87 = arith.constant 0 : index
    %c0_88 = arith.constant 0 : index
    %c0_89 = arith.constant 0 : index
    %179 = vector.load %arg6[%c0_86, %c0_87, %c0_88, %c0_89] : memref<1x1x8x4xf32, #tpu.memory_space<vmem>>, vector<1x1x8x4xf32>
    %180 = vector.shape_cast %179 : vector<1x1x8x4xf32> to vector<8x4xf32>
    %181 = arith.truncf %166 : vector<8x32xf32> to vector<8x32xbf16>
    %182 = arith.truncf %177 : vector<4x32xf32> to vector<4x32xbf16>
    %183 = arith.truncf %178 : vector<4x32xf32> to vector<4x32xbf16>
    %184 = vector.extract_strided_slice %181 {offsets = [0, 0], sizes = [8, 8], strides = [1, 1]} : vector<8x32xbf16> to vector<8x8xbf16>
    %185 = vector.extract_strided_slice %182 {offsets = [0, 0], sizes = [4, 8], strides = [1, 1]} : vector<4x32xbf16> to vector<4x8xbf16>
    %cst_90 = arith.constant dense<0.000000e+00> : vector<8x4xf32>
    %186 = tpu.matmul %184, %185, %cst_90 {dimension_numbers = #tpu.dot_dimension_numbers<[1], [1], [0], [0], [0, 0, 1, 0], [], []>} : vector<8x8xbf16>, vector<4x8xbf16>, vector<8x4xf32> -> vector<8x4xf32>
    %cst_91 = arith.constant 0.353553385 : f32
    %187 = vector.broadcast %cst_91 : f32 to vector<8x4xf32>
    %188 = arith.mulf %186, %187 : vector<8x4xf32>
    %189 = arith.addf %188, %180 : vector<8x4xf32>
    %cst_92 = arith.constant dense<0xFF800000> : vector<8xf32>
    %190 = vector.multi_reduction <maximumf>, %189, %cst_92 [1] : vector<8x4xf32> to vector<8xf32>
    %191 = vector.shape_cast %190 : vector<8xf32> to vector<8x1xf32>
    %192 = vector.broadcast %191 : vector<8x1xf32> to vector<8x4xf32>
    %193 = arith.subf %189, %192 : vector<8x4xf32>
    %194 = math.exp %193 : vector<8x4xf32>
    %cst_93 = arith.constant dense<0.000000e+00> : vector<8xf32>
    %195 = vector.multi_reduction <add>, %194, %cst_93 [1] : vector<8x4xf32> to vector<8xf32>
    %196 = vector.shape_cast %195 : vector<8xf32> to vector<8x1xf32>
    %197 = tpu.reciprocal %196 {approx = true} : vector<8x1xf32> -> vector<8x1xf32>
    %198 = vector.broadcast %197 : vector<8x1xf32> to vector<8x4xf32>
    %199 = arith.mulf %194, %198 : vector<8x4xf32>
    %200 = arith.truncf %199 : vector<8x4xf32> to vector<8x4xbf16>
    %201 = vector.extract_strided_slice %183 {offsets = [0, 0], sizes = [4, 8], strides = [1, 1]} : vector<4x32xbf16> to vector<4x8xbf16>
    %cst_94 = arith.constant dense<0.000000e+00> : vector<8x8xf32>
    %202 = tpu.matmul %200, %201, %cst_94 {dimension_numbers = #tpu.dot_dimension_numbers<[1], [0], [0], [1], [0, 0, 1, 1], [], []>} : vector<8x4xbf16>, vector<4x8xbf16>, vector<8x8xf32> -> vector<8x8xf32>
    %c0_95 = arith.constant 0 : index
    %c0_96 = arith.constant 0 : index
    %203 = vector.load %arg28[%c0_95, %c0_96] : memref<8x32xf32, #tpu.memory_space<vmem>>, vector<8x8xf32>
    tpu.vector_store %arg28[%c0_95, %c0_96], %202 {strides = array<i32>} : memref<8x32xf32, #tpu.memory_space<vmem>>, vector<8x8xf32>,
    %204 = vector.extract_strided_slice %181 {offsets = [0, 8], sizes = [8, 8], strides = [1, 1]} : vector<8x32xbf16> to vector<8x8xbf16>
    %205 = vector.extract_strided_slice %182 {offsets = [0, 8], sizes = [4, 8], strides = [1, 1]} : vector<4x32xbf16> to vector<4x8xbf16>
    %cst_97 = arith.constant dense<0.000000e+00> : vector<8x4xf32>
    %206 = tpu.matmul %204, %205, %cst_97 {dimension_numbers = #tpu.dot_dimension_numbers<[1], [1], [0], [0], [0, 0, 1, 0], [], []>} : vector<8x8xbf16>, vector<4x8xbf16>, vector<8x4xf32> -> vector<8x4xf32>
    %cst_98 = arith.constant 0.353553385 : f32
    %207 = vector.broadcast %cst_98 : f32 to vector<8x4xf32>
    %208 = arith.mulf %206, %207 : vector<8x4xf32>
    %209 = arith.addf %208, %180 : vector<8x4xf32>
    %cst_99 = arith.constant dense<0xFF800000> : vector<8xf32>
    %210 = vector.multi_reduction <maximumf>, %209, %cst_99 [1] : vector<8x4xf32> to vector<8xf32>
    %211 = vector.shape_cast %210 : vector<8xf32> to vector<8x1xf32>
    %212 = vector.broadcast %211 : vector<8x1xf32> to vector<8x4xf32>
    %213 = arith.subf %209, %212 : vector<8x4xf32>
    %214 = math.exp %213 : vector<8x4xf32>
    %cst_100 = arith.constant dense<0.000000e+00> : vector<8xf32>
    %215 = vector.multi_reduction <add>, %214, %cst_100 [1] : vector<8x4xf32> to vector<8xf32>
    %216 = vector.shape_cast %215 : vector<8xf32> to vector<8x1xf32>
    %217 = tpu.reciprocal %216 {approx = true} : vector<8x1xf32> -> vector<8x1xf32>
    %218 = vector.broadcast %217 : vector<8x1xf32> to vector<8x4xf32>
    %219 = arith.mulf %214, %218 : vector<8x4xf32>
    %220 = arith.truncf %219 : vector<8x4xf32> to vector<8x4xbf16>
    %221 = vector.extract_strided_slice %183 {offsets = [0, 8], sizes = [4, 8], strides = [1, 1]} : vector<4x32xbf16> to vector<4x8xbf16>
    %cst_101 = arith.constant dense<0.000000e+00> : vector<8x8xf32>
    %222 = tpu.matmul %220, %221, %cst_101 {dimension_numbers = #tpu.dot_dimension_numbers<[1], [0], [0], [1], [0, 0, 1, 1], [], []>} : vector<8x4xbf16>, vector<4x8xbf16>, vector<8x8xf32> -> vector<8x8xf32>
    %c0_102 = arith.constant 0 : index
    %c8_103 = arith.constant 8 : index
    %223 = vector.load %arg28[%c0_102, %c8_103] : memref<8x32xf32, #tpu.memory_space<vmem>>, vector<8x8xf32>
    tpu.vector_store %arg28[%c0_102, %c8_103], %222 {strides = array<i32>} : memref<8x32xf32, #tpu.memory_space<vmem>>, vector<8x8xf32>,
    %224 = vector.extract_strided_slice %181 {offsets = [0, 16], sizes = [8, 8], strides = [1, 1]} : vector<8x32xbf16> to vector<8x8xbf16>
    %225 = vector.extract_strided_slice %182 {offsets = [0, 16], sizes = [4, 8], strides = [1, 1]} : vector<4x32xbf16> to vector<4x8xbf16>
    %cst_104 = arith.constant dense<0.000000e+00> : vector<8x4xf32>
    %226 = tpu.matmul %224, %225, %cst_104 {dimension_numbers = #tpu.dot_dimension_numbers<[1], [1], [0], [0], [0, 0, 1, 0], [], []>} : vector<8x8xbf16>, vector<4x8xbf16>, vector<8x4xf32> -> vector<8x4xf32>
    %cst_105 = arith.constant 0.353553385 : f32
    %227 = vector.broadcast %cst_105 : f32 to vector<8x4xf32>
    %228 = arith.mulf %226, %227 : vector<8x4xf32>
    %229 = arith.addf %228, %180 : vector<8x4xf32>
    %cst_106 = arith.constant dense<0xFF800000> : vector<8xf32>
    %230 = vector.multi_reduction <maximumf>, %229, %cst_106 [1] : vector<8x4xf32> to vector<8xf32>
    %231 = vector.shape_cast %230 : vector<8xf32> to vector<8x1xf32>
    %232 = vector.broadcast %231 : vector<8x1xf32> to vector<8x4xf32>
    %233 = arith.subf %229, %232 : vector<8x4xf32>
    %234 = math.exp %233 : vector<8x4xf32>
    %cst_107 = arith.constant dense<0.000000e+00> : vector<8xf32>
    %235 = vector.multi_reduction <add>, %234, %cst_107 [1] : vector<8x4xf32> to vector<8xf32>
    %236 = vector.shape_cast %235 : vector<8xf32> to vector<8x1xf32>
    %237 = tpu.reciprocal %236 {approx = true} : vector<8x1xf32> -> vector<8x1xf32>
    %238 = vector.broadcast %237 : vector<8x1xf32> to vector<8x4xf32>
    %239 = arith.mulf %234, %238 : vector<8x4xf32>
    %240 = arith.truncf %239 : vector<8x4xf32> to vector<8x4xbf16>
    %241 = vector.extract_strided_slice %183 {offsets = [0, 16], sizes = [4, 8], strides = [1, 1]} : vector<4x32xbf16> to vector<4x8xbf16>
    %cst_108 = arith.constant dense<0.000000e+00> : vector<8x8xf32>
    %242 = tpu.matmul %240, %241, %cst_108 {dimension_numbers = #tpu.dot_dimension_numbers<[1], [0], [0], [1], [0, 0, 1, 1], [], []>} : vector<8x4xbf16>, vector<4x8xbf16>, vector<8x8xf32> -> vector<8x8xf32>
    %c0_109 = arith.constant 0 : index
    %c16_110 = arith.constant 16 : index
    %243 = vector.load %arg28[%c0_109, %c16_110] : memref<8x32xf32, #tpu.memory_space<vmem>>, vector<8x8xf32>
    tpu.vector_store %arg28[%c0_109, %c16_110], %242 {strides = array<i32>} : memref<8x32xf32, #tpu.memory_space<vmem>>, vector<8x8xf32>,
    %244 = vector.extract_strided_slice %181 {offsets = [0, 24], sizes = [8, 8], strides = [1, 1]} : vector<8x32xbf16> to vector<8x8xbf16>
    %245 = vector.extract_strided_slice %182 {offsets = [0, 24], sizes = [4, 8], strides = [1, 1]} : vector<4x32xbf16> to vector<4x8xbf16>
    %cst_111 = arith.constant dense<0.000000e+00> : vector<8x4xf32>
    %246 = tpu.matmul %244, %245, %cst_111 {dimension_numbers = #tpu.dot_dimension_numbers<[1], [1], [0], [0], [0, 0, 1, 0], [], []>} : vector<8x8xbf16>, vector<4x8xbf16>, vector<8x4xf32> -> vector<8x4xf32>
    %cst_112 = arith.constant 0.353553385 : f32
    %247 = vector.broadcast %cst_112 : f32 to vector<8x4xf32>
    %248 = arith.mulf %246, %247 : vector<8x4xf32>
    %249 = arith.addf %248, %180 : vector<8x4xf32>
    %cst_113 = arith.constant dense<0xFF800000> : vector<8xf32>
    %250 = vector.multi_reduction <maximumf>, %249, %cst_113 [1] : vector<8x4xf32> to vector<8xf32>
    %251 = vector.shape_cast %250 : vector<8xf32> to vector<8x1xf32>
    %252 = vector.broadcast %251 : vector<8x1xf32> to vector<8x4xf32>
    %253 = arith.subf %249, %252 : vector<8x4xf32>
    %254 = math.exp %253 : vector<8x4xf32>
    %cst_114 = arith.constant dense<0.000000e+00> : vector<8xf32>
    %255 = vector.multi_reduction <add>, %254, %cst_114 [1] : vector<8x4xf32> to vector<8xf32>
    %256 = vector.shape_cast %255 : vector<8xf32> to vector<8x1xf32>
    %257 = tpu.reciprocal %256 {approx = true} : vector<8x1xf32> -> vector<8x1xf32>
    %258 = vector.broadcast %257 : vector<8x1xf32> to vector<8x4xf32>
    %259 = arith.mulf %254, %258 : vector<8x4xf32>
    %260 = arith.truncf %259 : vector<8x4xf32> to vector<8x4xbf16>
    %261 = vector.extract_strided_slice %183 {offsets = [0, 24], sizes = [4, 8], strides = [1, 1]} : vector<4x32xbf16> to vector<4x8xbf16>
    %cst_115 = arith.constant dense<0.000000e+00> : vector<8x8xf32>
    %262 = tpu.matmul %260, %261, %cst_115 {dimension_numbers = #tpu.dot_dimension_numbers<[1], [0], [0], [1], [0, 0, 1, 1], [], []>} : vector<8x4xbf16>, vector<4x8xbf16>, vector<8x8xf32> -> vector<8x8xf32>
    %c0_116 = arith.constant 0 : index
    %c24_117 = arith.constant 24 : index
    %263 = vector.load %arg28[%c0_116, %c24_117] : memref<8x32xf32, #tpu.memory_space<vmem>>, vector<8x8xf32>
    tpu.vector_store %arg28[%c0_116, %c24_117], %262 {strides = array<i32>} : memref<8x32xf32, #tpu.memory_space<vmem>>, vector<8x8xf32>,
    %c0_118 = arith.constant 0 : index
    %c0_119 = arith.constant 0 : index
    %264 = vector.load %arg28[%c0_118, %c0_119] : memref<8x32xf32, #tpu.memory_space<vmem>>, vector<8x32xf32>
    %265 = arith.truncf %264 : vector<8x32xf32> to vector<8x32xbf16>
    %c0_120 = arith.constant 0 : index
    %c0_121 = arith.constant 0 : index
    %c0_122 = arith.constant 0 : index
    %266 = vector.load %arg19[%c0_120, %c0_121, %c0_122] : memref<1x32x32xbf16, #tpu.memory_space<vmem>>, vector<1x32x32xbf16>
    %267 = vector.shape_cast %266 : vector<1x32x32xbf16> to vector<32x32xbf16>
    %cst_123 = arith.constant dense<0.000000e+00> : vector<8x32xf32>
    %268 = tpu.matmul %265, %267, %cst_123 {dimension_numbers = #tpu.dot_dimension_numbers<[1], [0], [0], [1], [0, 0, 1, 1], [], []>} : vector<8x32xbf16>, vector<32x32xbf16>, vector<8x32xf32> -> vector<8x32xf32>
    %269 = arith.addf %134, %268 : vector<8x32xf32>
    %c0_124 = arith.constant 0 : index
    %c0_125 = arith.constant 0 : index
    %c0_126 = arith.constant 0 : index
    %270 = vector.load %arg20[%c0_124, %c0_125, %c0_126] : memref<1x1x32xf32, #tpu.memory_space<vmem>>, vector<1x1x32xf32>
    %271 = vector.shape_cast %270 : vector<1x1x32xf32> to vector<1x32xf32>
    %272 = vector.broadcast %271 : vector<1x32xf32> to vector<8x32xf32>
    %273 = arith.addf %269, %272 : vector<8x32xf32>
    %c0_127 = arith.constant 0 : index
    %c0_128 = arith.constant 0 : index
    %c0_129 = arith.constant 0 : index
    %274 = vector.load %arg21[%c0_127, %c0_128, %c0_129] : memref<1x1x32xf32, #tpu.memory_space<vmem>>, vector<1x1x32xf32>
    %275 = vector.shape_cast %274 : vector<1x1x32xf32> to vector<1x32xf32>
    %c0_130 = arith.constant 0 : index
    %c0_131 = arith.constant 0 : index
    %c0_132 = arith.constant 0 : index
    %276 = vector.load %arg22[%c0_130, %c0_131, %c0_132] : memref<1x1x32xf32, #tpu.memory_space<vmem>>, vector<1x1x32xf32>
    %277 = vector.shape_cast %276 : vector<1x1x32xf32> to vector<1x32xf32>
    %cst_133 = arith.constant dense<0.000000e+00> : vector<8xf32>
    %278 = vector.multi_reduction <add>, %273, %cst_133 [1] : vector<8x32xf32> to vector<8xf32>
    %279 = vector.shape_cast %278 : vector<8xf32> to vector<8x1xf32>
    %cst_134 = arith.constant 3.200000e+01 : f32
    %280 = vector.broadcast %cst_134 : f32 to vector<8x1xf32>
    %281 = arith.divf %279, %280 : vector<8x1xf32>
    %282 = vector.broadcast %281 : vector<8x1xf32> to vector<8x32xf32>
    %283 = arith.subf %273, %282 : vector<8x32xf32>
    %284 = arith.mulf %283, %283 : vector<8x32xf32>
    %cst_135 = arith.constant dense<0.000000e+00> : vector<8xf32>
    %285 = vector.multi_reduction <add>, %284, %cst_135 [1] : vector<8x32xf32> to vector<8xf32>
    %286 = vector.shape_cast %285 : vector<8xf32> to vector<8x1xf32>
    %cst_136 = arith.constant 3.200000e+01 : f32
    %287 = vector.broadcast %cst_136 : f32 to vector<8x1xf32>
    %288 = arith.divf %286, %287 : vector<8x1xf32>
    %cst_137 = arith.constant 9.99999974E-6 : f32
    %289 = vector.broadcast %cst_137 : f32 to vector<8x1xf32>
    %290 = arith.addf %288, %289 : vector<8x1xf32>
    %291 = math.rsqrt %290 : vector<8x1xf32>
    %292 = vector.broadcast %291 : vector<8x1xf32> to vector<8x32xf32>
    %293 = arith.mulf %283, %292 : vector<8x32xf32>
    %294 = vector.broadcast %275 : vector<1x32xf32> to vector<8x32xf32>
    %295 = arith.mulf %293, %294 : vector<8x32xf32>
    %296 = vector.broadcast %277 : vector<1x32xf32> to vector<8x32xf32>
    %297 = arith.addf %295, %296 : vector<8x32xf32>
    %298 = arith.truncf %297 : vector<8x32xf32> to vector<8x32xbf16>
    %c0_138 = arith.constant 0 : index
    %c0_139 = arith.constant 0 : index
    %c0_140 = arith.constant 0 : index
    %299 = vector.load %arg23[%c0_138, %c0_139, %c0_140] : memref<1x32x64xbf16, #tpu.memory_space<vmem>>, vector<1x32x64xbf16>
    %300 = vector.shape_cast %299 : vector<1x32x64xbf16> to vector<32x64xbf16>
    %cst_141 = arith.constant dense<0.000000e+00> : vector<8x64xf32>
    %301 = tpu.matmul %298, %300, %cst_141 {dimension_numbers = #tpu.dot_dimension_numbers<[1], [0], [0], [1], [0, 0, 1, 1], [], []>} : vector<8x32xbf16>, vector<32x64xbf16>, vector<8x64xf32> -> vector<8x64xf32>
    %c0_142 = arith.constant 0 : index
    %c0_143 = arith.constant 0 : index
    %c0_144 = arith.constant 0 : index
    %302 = vector.load %arg24[%c0_142, %c0_143, %c0_144] : memref<1x1x64xf32, #tpu.memory_space<vmem>>, vector<1x1x64xf32>
    %303 = vector.shape_cast %302 : vector<1x1x64xf32> to vector<1x64xf32>
    %304 = vector.broadcast %303 : vector<1x64xf32> to vector<8x64xf32>
    %305 = arith.addf %301, %304 : vector<8x64xf32>
    %cst_145 = arith.constant 5.000000e-01 : f32
    %306 = vector.broadcast %cst_145 : f32 to vector<8x64xf32>
    %307 = arith.mulf %306, %305 : vector<8x64xf32>
    %cst_146 = arith.constant 0.707106769 : f32
    %308 = vector.broadcast %cst_146 : f32 to vector<8x64xf32>
    %309 = arith.mulf %305, %308 : vector<8x64xf32>
    %310 = math.erf %309 : vector<8x64xf32>
    %cst_147 = arith.constant 1.000000e+00 : f32
    %311 = vector.broadcast %cst_147 : f32 to vector<8x64xf32>
    %312 = arith.addf %311, %310 : vector<8x64xf32>
    %313 = arith.mulf %307, %312 : vector<8x64xf32>
    %314 = arith.truncf %313 : vector<8x64xf32> to vector<8x64xbf16>
    %c0_148 = arith.constant 0 : index
    %c0_149 = arith.constant 0 : index
    %c0_150 = arith.constant 0 : index
    %315 = vector.load %arg25[%c0_148, %c0_149, %c0_150] : memref<1x64x32xbf16, #tpu.memory_space<vmem>>, vector<1x64x32xbf16>
    %316 = vector.shape_cast %315 : vector<1x64x32xbf16> to vector<64x32xbf16>
    %cst_151 = arith.constant dense<0.000000e+00> : vector<8x32xf32>
    %317 = tpu.matmul %314, %316, %cst_151 {dimension_numbers = #tpu.dot_dimension_numbers<[1], [0], [0], [1], [0, 0, 1, 1], [], []>} : vector<8x64xbf16>, vector<64x32xbf16>, vector<8x32xf32> -> vector<8x32xf32>
    %318 = arith.addf %273, %317 : vector<8x32xf32>
    %c0_152 = arith.constant 0 : index
    %c0_153 = arith.constant 0 : index
    %c0_154 = arith.constant 0 : index
    %319 = vector.load %arg26[%c0_152, %c0_153, %c0_154] : memref<1x1x32xf32, #tpu.memory_space<vmem>>, vector<1x1x32xf32>
    %320 = vector.shape_cast %319 : vector<1x1x32xf32> to vector<1x32xf32>
    %321 = vector.broadcast %320 : vector<1x32xf32> to vector<8x32xf32>
    %322 = arith.addf %318, %321 : vector<8x32xf32>
    %c0_155 = arith.constant 0 : index
    %c0_156 = arith.constant 0 : index
    %c0_157 = arith.constant 0 : index
    %323 = vector.load %arg27[%c0_155, %c0_156, %c0_157] : memref<1x8x32xf32, #tpu.memory_space<vmem>>, vector<1x8x32xf32>
    %324 = vector.shape_cast %323 : vector<1x8x32xf32> to vector<8x32xf32>
    %325 = vector.shape_cast %322 : vector<8x32xf32> to vector<1x8x32xf32>
    tpu.vector_store %arg27[%c0_155, %c0_156, %c0_157], %325 {strides = array<i32>} : memref<1x8x32xf32, #tpu.memory_space<vmem>>, vector<1x8x32xf32>,
    return
  }
  func.func @transform_0(%arg0: i32, %arg1: i32) -> (i32, i32, i32) {
    %c0_i32 = arith.constant 0 : i32
    %c0_i32_0 = arith.constant 0 : i32
    %c0_i32_1 = arith.constant 0 : i32
    return %arg0, %c0_i32, %c0_i32_0 : i32, i32, i32
  }
  func.func @transform_1(%arg0: i32, %arg1: i32) -> (i32, i32) {
    %c0_i32 = arith.constant 0 : i32
    %c0_i32_0 = arith.constant 0 : i32
    %c0_i32_1 = arith.constant 0 : i32
    return %c0_i32, %c0_i32_0 : i32, i32
  }
  func.func @transform_2(%arg0: i32, %arg1: i32) -> (i32, i32, i32) {
    %c0_i32 = arith.constant 0 : i32
    %c0_i32_0 = arith.constant 0 : i32
    %c0_i32_1 = arith.constant 0 : i32
    return %arg0, %c0_i32, %c0_i32_0 : i32, i32, i32
  }
  func.func @transform_3(%arg0: i32, %arg1: i32) -> (i32, i32, i32, i32) {
    %c0_i32 = arith.constant 0 : i32
    %c0_i32_0 = arith.constant 0 : i32
    %c0_i32_1 = arith.constant 0 : i32
    %c0_i32_2 = arith.constant 0 : i32
    return %arg0, %c0_i32, %c0_i32_0, %c0_i32_1 : i32, i32, i32, i32
  }
  func.func @transform_4(%arg0: i32, %arg1: i32) -> (i32, i32, i32, i32) {
    %c0_i32 = arith.constant 0 : i32
    %c0_i32_0 = arith.constant 0 : i32
    %c0_i32_1 = arith.constant 0 : i32
    %c0_i32_2 = arith.constant 0 : i32
    return %arg0, %c0_i32, %c0_i32_0, %c0_i32_1 : i32, i32, i32, i32
  }
  func.func @transform_5(%arg0: i32, %arg1: i32) -> (i32, i32, i32) {
    %c0_i32 = arith.constant 0 : i32
    %c0_i32_0 = arith.constant 0 : i32
    %c0_i32_1 = arith.constant 0 : i32
    return %arg1, %c0_i32, %c0_i32_0 : i32, i32, i32
  }
  func.func @transform_6(%arg0: i32, %arg1: i32) -> (i32, i32, i32) {
    %c0_i32 = arith.constant 0 : i32
    %c0_i32_0 = arith.constant 0 : i32
    %c0_i32_1 = arith.constant 0 : i32
    return %arg1, %c0_i32, %c0_i32_0 : i32, i32, i32
  }
  func.func @transform_7(%arg0: i32, %arg1: i32) -> (i32, i32, i32) {
    %c0_i32 = arith.constant 0 : i32
    %c0_i32_0 = arith.constant 0 : i32
    %c0_i32_1 = arith.constant 0 : i32
    return %arg1, %c0_i32, %c0_i32_0 : i32, i32, i32
  }
  func.func @transform_8(%arg0: i32, %arg1: i32) -> (i32, i32, i32) {
    %c0_i32 = arith.constant 0 : i32
    %c0_i32_0 = arith.constant 0 : i32
    %c0_i32_1 = arith.constant 0 : i32
    return %arg1, %c0_i32, %c0_i32_0 : i32, i32, i32
  }
  func.func @transform_9(%arg0: i32, %arg1: i32) -> (i32, i32, i32) {
    %c0_i32 = arith.constant 0 : i32
    %c0_i32_0 = arith.constant 0 : i32
    %c0_i32_1 = arith.constant 0 : i32
    return %arg1, %c0_i32, %c0_i32_0 : i32, i32, i32
  }
  func.func @transform_10(%arg0: i32, %arg1: i32) -> (i32, i32, i32) {
    %c0_i32 = arith.constant 0 : i32
    %c0_i32_0 = arith.constant 0 : i32
    %c0_i32_1 = arith.constant 0 : i32
    return %arg1, %c0_i32, %c0_i32_0 : i32, i32, i32
  }
  func.func @transform_11(%arg0: i32, %arg1: i32) -> (i32, i32, i32) {
    %c0_i32 = arith.constant 0 : i32
    %c0_i32_0 = arith.constant 0 : i32
    %c0_i32_1 = arith.constant 0 : i32
    return %arg1, %c0_i32, %c0_i32_0 : i32, i32, i32
  }
  func.func @transform_12(%arg0: i32, %arg1: i32) -> (i32, i32, i32) {
    %c0_i32 = arith.constant 0 : i32
    %c0_i32_0 = arith.constant 0 : i32
    %c0_i32_1 = arith.constant 0 : i32
    return %arg1, %c0_i32, %c0_i32_0 : i32, i32, i32
  }
  func.func @transform_13(%arg0: i32, %arg1: i32) -> (i32, i32, i32) {
    %c0_i32 = arith.constant 0 : i32
    %c0_i32_0 = arith.constant 0 : i32
    %c0_i32_1 = arith.constant 0 : i32
    return %arg1, %c0_i32, %c0_i32_0 : i32, i32, i32
  }
  func.func @transform_14(%arg0: i32, %arg1: i32) -> (i32, i32, i32) {
    %c0_i32 = arith.constant 0 : i32
    %c0_i32_0 = arith.constant 0 : i32
    %c0_i32_1 = arith.constant 0 : i32
    return %arg1, %c0_i32, %c0_i32_0 : i32, i32, i32
  }
  func.func @transform_15(%arg0: i32, %arg1: i32) -> (i32, i32, i32) {
    %c0_i32 = arith.constant 0 : i32
    %c0_i32_0 = arith.constant 0 : i32
    %c0_i32_1 = arith.constant 0 : i32
    return %arg1, %c0_i32, %c0_i32_0 : i32, i32, i32
  }
  func.func @transform_16(%arg0: i32, %arg1: i32) -> (i32, i32, i32) {
    %c0_i32 = arith.constant 0 : i32
    %c0_i32_0 = arith.constant 0 : i32
    %c0_i32_1 = arith.constant 0 : i32
    return %arg1, %c0_i32, %c0_i32_0 : i32, i32, i32
  }
  func.func @transform_17(%arg0: i32, %arg1: i32) -> (i32, i32, i32) {
    %c0_i32 = arith.constant 0 : i32
    %c0_i32_0 = arith.constant 0 : i32
    %c0_i32_1 = arith.constant 0 : i32
    return %arg1, %c0_i32, %c0_i32_0 : i32, i32, i32
  }
  func.func @transform_18(%arg0: i32, %arg1: i32) -> (i32, i32, i32) {
    %c0_i32 = arith.constant 0 : i32
    %c0_i32_0 = arith.constant 0 : i32
    %c0_i32_1 = arith.constant 0 : i32
    return %arg1, %c0_i32, %c0_i32_0 : i32, i32, i32
  }
  func.func @transform_19(%arg0: i32, %arg1: i32) -> (i32, i32, i32) {
    %c0_i32 = arith.constant 0 : i32
    %c0_i32_0 = arith.constant 0 : i32
    %c0_i32_1 = arith.constant 0 : i32
    return %arg1, %c0_i32, %c0_i32_0 : i32, i32, i32
  }
  func.func @transform_20(%arg0: i32, %arg1: i32) -> (i32, i32, i32) {
    %c0_i32 = arith.constant 0 : i32
    %c0_i32_0 = arith.constant 0 : i32
    %c0_i32_1 = arith.constant 0 : i32
    return %arg1, %c0_i32, %c0_i32_0 : i32, i32, i32
  }
  func.func @transform_21(%arg0: i32, %arg1: i32) -> (i32, i32, i32) {
    %c0_i32 = arith.constant 0 : i32
    %c0_i32_0 = arith.constant 0 : i32
    %c0_i32_1 = arith.constant 0 : i32
    return %arg1, %c0_i32, %c0_i32_0 : i32, i32, i32
  }
  func.func @transform_22(%arg0: i32, %arg1: i32) -> (i32, i32, i32) {
    %c0_i32 = arith.constant 0 : i32
    %c0_i32_0 = arith.constant 0 : i32
    %c0_i32_1 = arith.constant 0 : i32
    return %arg1, %c0_i32, %c0_i32_0 : i32, i32, i32
  }
  func.func @transform_23(%arg0: i32, %arg1: i32) -> (i32, i32, i32) {
    %c0_i32 = arith.constant 0 : i32
    %c0_i32_0 = arith.constant 0 : i32
    %c0_i32_1 = arith.constant 0 : i32
    return %arg1, %c0_i32, %c0_i32_0 : i32, i32, i32
  }
  func.func @transform_24(%arg0: i32, %arg1: i32) -> (i32, i32, i32) {
    %c0_i32 = arith.constant 0 : i32
    %c0_i32_0 = arith.constant 0 : i32
    %c0_i32_1 = arith.constant 0 : i32
    return %arg1, %c0_i32, %c0_i32_0 : i32, i32, i32
  }
  func.func @transform_25(%arg0: i32, %arg1: i32) -> (i32, i32, i32) {
    %c0_i32 = arith.constant 0 : i32
    %c0_i32_0 = arith.constant 0 : i32
    %c0_i32_1 = arith.constant 0 : i32
    return %arg0, %c0_i32, %c0_i32_0 : i32, i32, i32
  }
}

</mosaic_0001>

<bundles_post_ra>
// kernel: transformer_forward.5
= control target key start
LH: loop header
LB: loop body
LE: loop exit
PB: predicated region body
PF: predicated region fallthrough
CT: control target
= control target key end

     0   :  { %8 = vsyncpa [#allocation3], 0  ;;  %s431_s0 = inlined_call_operand.hbm [shape: bf16[8,192], index: 0, kind: input, shape index: {}]   ;;  %s432_s1 = inlined_call_operand.hbm [shape: bf16[192,32], index: 1, kind: input, shape index: {}]   ;;  %s433_s2 = inlined_call_operand.hbm [shape: f32[1,32], index: 2, kind: input, shape index: {}]   ;;  %s434_s3 = inlined_call_operand.hbm [shape: f32[8,32], index: 3, kind: output, shape index: {}]  }
   0x1   :  { %9 = vsyncpa [#allocation6], 0 }
   0x2   :  { %10 = vsyncpa [#allocation4], 0  ;;  %s356_s12 = smov [#allocation5]   ;;  %s262_s16 = scalar_lea.hbm %s432_s1, 1536 }
   0x3   :  { %s26_s13 = sshll.u32 %s356_s12, 4  ;;  %p263_p0 = scmp.ne.s32.totalorder %s432_s1, %s262_s16  ;;  %s27_s13 = int_to_ptr.vmem [resolvable:$true] %s26_s13 }
   0x4   :  { %p266_p1 = scmp.lt.u32.totalorder %s262_s16, %s432_s1 }
   0x6   :  { %p268_p2 = pnand %p266_p1, %p263_p0 }
   0x8   :  { %271 = shalt.err (!%p268_p2)
}
   0x9   :  { %s272_s21 = scalar_lea.vmem %s27_s13, 1536  ;;  %p277_p4 = scmp.lt.s32.totalorder %s27_s13, %s27_s13 }
   0xa   :  { %p273_p3 = scmp.ne.s32.totalorder %s27_s13, %s272_s21  ;;  %p278_p5 = scmp.lt.s32.totalorder %s272_s21, %s272_s21 }
   0xc   :  { %p279_p6 = por %p278_p5, %p277_p4 }
   0xe   :  { %p280_p7 = pnand %p279_p6, %p273_p3 }
  0x10   :  { %283 = shalt.err (!%p280_p7)
}
  0x11   :  { %s357_s22 = smov 64   ;;  %s358_s23 = smov 4  }
  0x12   :  { %32 = dma.hbm_to_vmem [thread:$0]  %s432_s1, 1536, %s27_s13, [#allocation6], %s357_s22, %s357_s22, %s358_s23  }
  0x13   :  { %s359_s26 = smov [#allocation2]   ;;  %s360_s28 = smov [#allocation7]  }
  0x14   :  { %s17_s27 = sshll.u32 %s359_s26, 4  ;;  %s39_s29 = sshll.u32 %s360_s28, 4  ;;  %s18_s27 = int_to_ptr.vmem [resolvable:$true] %s17_s27  ;;  %s40_s29 = int_to_ptr.vmem [resolvable:$true] %s39_s29 }
  0x15   :  { %s284_s5 = scalar_lea.hbm %s431_s0, 128 }
  0x16   :  { %p285_p8 = scmp.ne.s32.totalorder %s431_s0, %s284_s5  ;;  %p288_p9 = scmp.lt.u32.totalorder %s284_s5, %s431_s0 }
  0x18   :  { %p290_p10 = pnand %p288_p9, %p285_p8 }
  0x1a   :  { %293 = shalt.err (!%p290_p10)
}
  0x1b   :  { %s294_s1 = scalar_lea.vmem %s18_s27, 128  ;;  %p299_p12 = scmp.lt.s32.totalorder %s18_s27, %s18_s27 }
  0x1c   :  { %p295_p11 = scmp.ne.s32.totalorder %s18_s27, %s294_s1  ;;  %p300_p13 = scmp.lt.s32.totalorder %s294_s1, %s294_s1 }
  0x1e   :  { %p301_p0 = por %p300_p13, %p299_p12 }
  0x20   :  { %p302_p1 = pnand %p301_p0, %p295_p11 }
  0x22   :  { %305 = shalt.err (!%p302_p1)
}
  0x23   :  { %20 = dma.hbm_to_vmem [thread:$0]  %s431_s0, 128, %s18_s27, [#allocation3]  }
  0x24   :  { %s306_s14 = scalar_lea.hbm %s433_s2, 16 }
  0x25   :  { %p307_p2 = scmp.ne.s32.totalorder %s433_s2, %s306_s14  ;;  %p310_p3 = scmp.lt.u32.totalorder %s306_s14, %s433_s2 }
  0x27   :  { %p312_p4 = pnand %p310_p3, %p307_p2 }
  0x29   :  { %315 = shalt.err (!%p312_p4)
}
  0x2a   :  { %s316_s19 = scalar_lea.vmem %s40_s29, 16  ;;  %s320_s20 = scalar_lea.vmem %s40_s29, 32 }
  0x2b   :  { %p317_p5 = scmp.ne.s32.totalorder %s40_s29, %s316_s19  ;;  %p321_p6 = scmp.lt.s32.totalorder %s40_s29, %s40_s29 }
  0x2c   :  { %p322_p7 = scmp.lt.s32.totalorder %s320_s20, %s316_s19 }
  0x2e   :  { %p323_p8 = por %p322_p7, %p321_p6 }
  0x30   :  { %p324_p9 = pnand %p323_p8, %p317_p5 }
  0x32   :  { %327 = shalt.err (!%p324_p9)
}
  0x33   :  { %42 = dma.hbm_to_vmem [thread:$0]  %s433_s2, 16, %s40_s29, [#allocation6]  }
  0x34   :  { %350 = dma.done.wait [#allocation3], 128  }
  0x35   :  { %351 = vsyncadd [#allocation3], 4294967168 }
  0x36   :  { %352 = dma.done.wait [#allocation6], 1552  }
  0x37   :  { %353 = vsyncadd [#allocation6], 4294965744  ;;  %v361_v0 = vmov 0   ;;  %v248_v1 = vld [vmem:[#allocation5] sm:$0xff]   ;;  %v249_v2 = vld [vmem:[#allocation5 + $0x8] sm:$0xff]   ;;  %vm163_vm0 = vcmask 523264  }
  0x38   :  { %167 = vmatprep.subr.bf16.mxu0 %v361_v0  ;;  %v250_v3 = vld [vmem:[#allocation5 + $0x10] sm:$0xff]   ;;  %v251_v4 = vld [vmem:[#allocation5 + $0x18] sm:$0xff]   ;;  %v252_v7 = vld [vmem:[#allocation5 + $0x20] sm:$0xff]   ;;  %s362_s2 = smov [#allocation8]   ;;  %vm207_vm1 = vcmask 261120  }
  0x39   :  { %168 = vmatpush1.bf16.msra.mxu0 %v248_v1  ;;  %v53_v5 = vld [vmem:[#allocation2] sm:$0xff]  ;;  %v253_v8 = vld [vmem:[#allocation5 + $0x28] sm:$0xff]   ;;  %v254_v9 = vld [vmem:[#allocation5 + $0x30] sm:$0xff]   ;;  %s215_s22 = sshll.u32 %s362_s2, 4  ;;  %s216_s22 = int_to_ptr.vmem [resolvable:$true] %s215_s22 }
  0x3a   :  { %169 = vmatprep.subr.bf16.mxu0 %v361_v0  ;;  %v227_v6 = vcombine.high %v53_v5, %v53_v5  ;;  %v255_v10 = vld [vmem:[#allocation5 + $0x38] sm:$0xff]   ;;  %v256_v11 = vld [vmem:[#allocation5 + $0x40] sm:$0xff]   ;;  %v257_v12 = vld [vmem:[#allocation5 + $0x48] sm:$0xff]   ;;  %v226_v15 = vcombine.low %v53_v5, %v53_v5  ;;  %s328_s23 = scalar_lea.vmem %s216_s22, 128  ;;  %p333_p11 = scmp.lt.s32.totalorder %s216_s22, %s216_s22 }
  0x3b   :  { %v258_v13 = vld [vmem:[#allocation5 + $0x50] sm:$0xff]   ;;  %v259_v14 = vld [vmem:[#allocation5 + $0x58] sm:$0xff]   ;;  %v225_v16 = vld [vmem:[#allocation7] ss:$0 sm:$0xff]  ;;  %p329_p10 = scmp.ne.s32.totalorder %s216_s22, %s328_s23  ;;  %p334_p12 = scmp.lt.s32.totalorder %s328_s23, %s328_s23 }
  0x3c   :  { %240 = vmatprep.mubr.msk.bf16.mxu0 %vm163_vm0, %v227_v6 }
  0x3d   :  { %170 = vmatpush1.bf16.msra.mxu0 %v249_v2  ;;  %p335_p13 = por %p334_p12, %p333_p11 }
  0x3e   :  { %171 = vmatprep.subr.bf16.mxu0 %v361_v0 }
  0x3f   :  { %p336_p0 = pnand %p335_p13, %p329_p10 }
  0x41   :  { %172 = vmatpush1.bf16.msra.mxu0 %v250_v3 }
  0x42   :  { %173 = vmatprep.subr.bf16.mxu0 %v361_v0 }
  0x45   :  { %174 = vmatpush1.bf16.msra.mxu0 %v251_v4 }
  0x46   :  { %175 = vmatprep.subr.bf16.mxu0 %v361_v0 }
  0x49   :  { %176 = vmatpush1.bf16.msra.mxu0 %v252_v7 }
  0x4a   :  { %177 = vmatprep.subr.bf16.mxu0 %v361_v0 }
  0x4d   :  { %178 = vmatpush1.bf16.msra.mxu0 %v253_v8 }
  0x4e   :  { %179 = vmatprep.subr.bf16.mxu0 %v361_v0 }
  0x51   :  { %180 = vmatpush1.bf16.msra.mxu0 %v254_v9 }
  0x52   :  { %181 = vmatprep.subr.bf16.mxu0 %v361_v0 }
  0x55   :  { %182 = vmatpush1.bf16.msra.mxu0 %v255_v10 }
  0x56   :  { %183 = vmatprep.subr.bf16.mxu0 %v361_v0 }
  0x59   :  { %184 = vmatpush1.bf16.msra.mxu0 %v256_v11 }
  0x5a   :  { %185 = vmatprep.subr.bf16.mxu0 %v361_v0 }
  0x5d   :  { %186 = vmatpush1.bf16.msra.mxu0 %v257_v12 }
  0x5e   :  { %187 = vmatprep.subr.bf16.mxu0 %v361_v0 }
  0x61   :  { %188 = vmatpush1.bf16.msra.mxu0 %v258_v13 }
  0x62   :  { %189 = vmatprep.subr.bf16.mxu0 %v361_v0 }
  0x65   :  { %190 = vmatpush1.bf16.msra.mxu0 %v259_v14 }
  0x68   :  { %200 = vmatmul.mubr.bf16.vlgmr.msra.gmra.mrb[0].mxu0 %v226_v15 }
 0x13b   :  { %v201_v17 = vpop.f32.mrb[0].mxu0 }
 0x13c   :  { %v202_v18 = vadd.f32 %v225_v16, %v201_v17  ;;  %v203_v19 = vpop.f32.mrb[1].mxu0 }
 0x13d   :  { %v204_v20 = vpop.f32.mrb[2].mxu0 }
 0x13e   :  { %v205_v21 = vpop.f32.mrb[3].mxu0  ;;  %208 = vst.msk [vmem:[#allocation8] sm:$0xff] %vm207_vm1, %v202_v18 }
 0x13f   :  { %339 = shalt.err (!%p336_p0)
}
 0x140   :  { %s340_s26 = scalar_lea.hbm %s434_s3, 128 }
 0x141   :  { %p341_p1 = scmp.ne.s32.totalorder %s434_s3, %s340_s26  ;;  %p344_p2 = scmp.lt.u32.totalorder %s340_s26, %s434_s3 }
 0x143   :  { %p346_p3 = pnand %p344_p2, %p341_p1 }
 0x145   :  { %349 = shalt.err (!%p346_p3)
}
 0x146   :  { %218 = dma.vmem_to_hbm [thread:$0]  %s216_s22, 128, %s434_s3, [#allocation4]  }
 0x147   :  { %354 = dma.done.wait [#allocation4], 128  }
 0x148   :  { %355 = vsyncadd [#allocation4], 4294967168 }
 0x149   :  { %222 = vsyncpa [#allocation3], 1 }
 0x14a   :  { %223 = vsyncpa [#allocation6], 1 }
 0x14b   :  { %224 = vsyncpa [#allocation4], 1 }

// kernel: transformer_forward.7
= control target key start
LH: loop header
LB: loop body
LE: loop exit
PB: predicated region body
PF: predicated region fallthrough
CT: control target
= control target key end

     0   :  { %9 = vsyncpa [#allocation3], 0  ;;  %s1065_s0 = inlined_call_operand.hbm [shape: f32[2,5,32], index: 0, kind: input, shape index: {}]   ;;  %s1066_s1 = inlined_call_operand.hbm [shape: f32[1,32], index: 1, kind: input, shape index: {}]   ;;  %s1067_s2 = inlined_call_operand.hbm [shape: f32[1,32], index: 2, kind: input, shape index: {}]   ;;  %s1068_s3 = inlined_call_operand.hbm [shape: bf16[32,32], index: 3, kind: input, shape index: {}]   ;;  %s1069_s4 = inlined_call_operand.hbm [shape: f32[2,4,32], index: 4, kind: output, shape index: {}]  }
   0x1   :  { %11 = vsyncpa [#allocation3 + $0x1], 0 }
   0x2   :  { %12 = vsyncpa [#allocation6], 0 }
   0x3   :  { %13 = vsyncpa [#allocation9], 0 }
   0x4   :  { %14 = vsyncpa [#allocation4], 0 }
   0x5   :  { %16 = vsyncpa [#allocation4 + $0x1], 0  ;;  %s812_s15 = smov 0   ;;  %s814_s16 = smov 0  }
   0x6   :  { %s816_s17 = smov 0   ;;  %s818_s18 = smov 0  }
   0x7 LB: > { %s833_s19 = sadd.s32 4294967295, %s776_s18   ;;  %s469_s20 = sadd.s32 4294967294, %s776_s18   ;;  %s776_s18 = sphi %s818_s18, %s1092_s18   ;;  %s772_s17 = sphi %s816_s17, %s1091_s17   ;;  %s768_s16 = sphi %s814_s16, %s1090_s16   ;;  %s764_s15 = sphi %s812_s15, %s1089_s15  }
   0x8   : > { %p42_p0 = scmp.ne.s32.totalorder %s768_s16, %s764_s15  ;;  %p1070_p1 = scmp.eq.s32.totalorder %s833_s19, 0 }
   0x9   : > { %p135_p3 = scmp.eq.s32.totalorder %s469_s20, 1  ;;  %p470_p5 = scmp.ge.s32.totalorder %s776_s18, 1 }
   0xa   : > { %p842_p4 = por %p1070_p1, %p42_p0  ;;  %p142_p7 = scmp.lt.s32.totalorder %s776_s18, 3 }
   0xb   : > { %p847_p6 = por %p135_p3, %p42_p0  ;;  %s778_s24 = smov [#allocation5]  }
   0xc   : > { %s1073_s21 = scalar_select %p842_p4, 1, 0 }
   0xd   : > { %s1074_s22 = scalar_select %p847_p6, 1, 0 }
   0xe   : > { %p852_p8 = pnand %p470_p5, %p142_p7  ;;  %s155_s25 = sshll.u32 %s778_s24, 4  ;;  %s156_s25 = int_to_ptr.vmem [resolvable:$true] %s155_s25 }
   0xf   : > { %s779_s26 = smov [#allocation7]   ;;  %s780_s29 = smov [#allocation8]  }
  0x10   : > { %s1075_s23 = scalar_select %p852_p8, 1, 0 }
  0x11   : > { %p519_p10 = pneg %p852_p8  ;;  %s166_s27 = sshll.u32 %s779_s26, 4  ;;  %s865_s27 = int_to_ptr.vmem [resolvable:$true] %s166_s27 }
  0x12   : > { %s176_s30 = sshll.u32 %s780_s29, 4  ;;  %s588_s7 = scalar_lea.hbm %s1066_s1, 16  ;;  %s867_s30 = int_to_ptr.vmem [resolvable:$true] %s176_s30 }
  0x13   : > { %p861_p11 = pnand %p519_p10, %p1070_p1  ;;  %p589_p12 = scmp.ne.s32.totalorder %s1066_s1, %s588_s7 }
  0x14   : > { %p595_p5 = scmp.lt.u32.totalorder %s588_s7, %s1066_s1 }
  0x15   : > { %p877_p13 = pneg %p861_p11 }
  0x17   : > { %p591_p0 = pnand %p877_p13, %p589_p12 }
  0x19   : > { %p592_p3 = pneg %p591_p0 }
  0x1b   : > { %p597_p7 = pnand %p595_p5, %p592_p3 }
  0x1d   : > { %600 = shalt.err (!%p597_p7)
}
  0x1e   : > { %s601_s13 = scalar_lea.vmem %s156_s25, 16  ;;  %s608_s14 = scalar_lea.vmem %s156_s25, 32 }
  0x1f   : > { %p602_p10 = scmp.ne.s32.totalorder %s156_s25, %s601_s13  ;;  %p609_p2 = scmp.lt.s32.totalorder %s156_s25, %s156_s25 }
  0x20   : > { %p610_p6 = scmp.lt.s32.totalorder %s608_s14, %s601_s13 }
  0x21   : > { %p604_p9 = pnand %p602_p10, %p877_p13 }
  0x22   : > { %p611_p4 = por %p610_p6, %p609_p2 }
  0x23   : > { %p605_p1 = pneg %p604_p9 }
  0x25   : > { %p612_p8 = pnand %p611_p4, %p605_p1 }
  0x27   : > { %615 = shalt.err (!%p612_p8)
}
  0x28   : > { %522 = dma.hbm_to_vmem [thread:$0]  (!%p861_p11), %s1066_s1, 16, %s156_s25, [#allocation6]  }
  0x29   : > { %s616_s5 = scalar_lea.hbm %s1067_s2, 16 }
  0x2a   : > { %p617_p9 = scmp.ne.s32.totalorder %s1067_s2, %s616_s5  ;;  %p623_p1 = scmp.lt.u32.totalorder %s616_s5, %s1067_s2 }
  0x2c   : > { %p619_p12 = pnand %p617_p9, %p877_p13 }
  0x2e   : > { %p620_p2 = pneg %p619_p12 }
  0x30   : > { %p625_p4 = pnand %p623_p1, %p620_p2 }
  0x32   : > { %628 = shalt.err (!%p625_p4)
}
  0x33   : > { %s629_s25 = scalar_lea.vmem %s865_s27, 16  ;;  %s636_s11 = scalar_lea.vmem %s865_s27, 32 }
  0x34   : > { %p630_p6 = scmp.ne.s32.totalorder %s865_s27, %s629_s25  ;;  %p637_p3 = scmp.lt.s32.totalorder %s865_s27, %s865_s27 }
  0x35   : > { %p638_p5 = scmp.lt.s32.totalorder %s636_s11, %s629_s25 }
  0x36   : > { %p632_p8 = pnand %p630_p6, %p877_p13 }
  0x37   : > { %p639_p7 = por %p638_p5, %p637_p3 }
  0x38   : > { %p633_p0 = pneg %p632_p8 }
  0x3a   : > { %p640_p10 = pnand %p639_p7, %p633_p0 }
  0x3c   : > { %643 = shalt.err (!%p640_p10)
}
  0x3d   : > { %525 = dma.hbm_to_vmem [thread:$0]  (!%p861_p11), %s1067_s2, 16, %s865_s27, [#allocation6]  }
  0x3e   : > { %s644_s24 = scalar_lea.hbm %s1068_s3, 256 }
  0x3f   : > { %p645_p9 = scmp.ne.s32.totalorder %s1068_s3, %s644_s24  ;;  %p651_p1 = scmp.lt.u32.totalorder %s644_s24, %s1068_s3 }
  0x41   : > { %p647_p12 = pnand %p645_p9, %p877_p13 }
  0x43   : > { %p648_p2 = pneg %p647_p12 }
  0x45   : > { %p653_p4 = pnand %p651_p1, %p648_p2 }
  0x47   : > { %656 = shalt.err (!%p653_p4)
}
  0x48   : > { %s657_s27 = scalar_lea.vmem %s867_s30, 256  ;;  %p665_p3 = scmp.lt.s32.totalorder %s867_s30, %s867_s30 }
  0x49   : > { %p658_p6 = scmp.ne.s32.totalorder %s867_s30, %s657_s27  ;;  %p666_p5 = scmp.lt.s32.totalorder %s657_s27, %s657_s27 }
  0x4b   : > { %p660_p8 = pnand %p658_p6, %p877_p13  ;;  %p667_p7 = por %p666_p5, %p665_p3 }
  0x4d   : > { %p661_p0 = pneg %p660_p8 }
  0x4f   : > { %p668_p10 = pnand %p667_p7, %p661_p0 }
  0x51   : > { %671 = shalt.err (!%p668_p10)
}
  0x52   : > { %s781_s7 = smov 64   ;;  %s782_s10 = smov 4  }
  0x53   : > { %528 = dma.hbm_to_vmem [thread:$0]  (!%p861_p11), %s1068_s3, 256, %s867_s30, [#allocation9], %s781_s7, %s781_s7, %s782_s10  }
  0x54   : > { %s941_s25 = sadd.s32 1, %s776_s18   ;;  %s29_s12 = sadd.s32 1, %s772_s17 }
  0x55   : > { %s26_s11 = ssub.s32 %s776_s18, %s941_s25  ;;  %p36_p9 = scmp.ne.s32.totalorder %s772_s17, %s768_s16 }
  0x56   : > { %p27_p13 = scmp.eq.s32.totalorder %s26_s11, 0  ;;  %p37_p12 = scmp.eq.s32.totalorder %s776_s18, 0 }
  0x57   : > { %p540_p2 = scmp.lt.s32.totalorder %s776_s18, 2  ;;  %p1078_p4 = scmp.eq.s32.totalorder %s833_s19, 1 }
  0x58   : > { %s951_s13 = scalar_select %p27_p13, %s772_s17, %s29_s12  }
  0x59   : > { %p38_p1 = por %p37_p12, %p36_p9  ;;  %p955_p6 = por %p1078_p4, %p36_p9 }
  0x5a   : > { %s190_s28 = sand.u32 1, %s772_s17   ;;  %s476_s20 = sshll.u32 %s776_s18, 7 }
  0x5b   : > { %s475_s30 = sshll.u32 %s190_s28, 3  ;;  %s964_s29 = scalar_lea.hbm %s1065_s0, %s476_s20 }
  0x5c   : > { %s194_s5 = scalar_lea.vmem [#allocation2], %s475_s30  ;;  %p966_p11 = pnand %p540_p2, %p38_p1 }
  0x5d   : > { %s201_s6 = sshll.u32 %s194_s5, 4  ;;  %s191_s7 = scalar_lea.sflag [#allocation3], %s190_s28  ;;  %s970_s6 = int_to_ptr.vmem [resolvable:$true] %s201_s6 }
  0x5e   : > { %s672_s10 = scalar_lea.hbm %s964_s29, 128  ;;  %p674_p0 = pneg %p966_p11 }
  0x5f   : > { %p673_p8 = scmp.ne.s32.totalorder %s964_s29, %s672_s10  ;;  %s677_s11 = scalar_lea.hbm %s1065_s0, 256 }
  0x60   : > { %p678_p7 = scmp.lt.u32.totalorder %s964_s29, %s1065_s0  ;;  %p679_p10 = scmp.lt.u32.totalorder %s677_s11, %s672_s10 }
  0x61   : > { %p675_p3 = pnand %p674_p0, %p673_p8  ;;  %p681_p9 = scmp.lt.u32.totalorder %s672_s10, %s964_s29 }
  0x62   : > { %p680_p13 = por %p679_p10, %p678_p7 }
  0x63   : > { %p676_p5 = pneg %p675_p3 }
  0x64   : > { %p682_p12 = por %p681_p9, %p680_p13 }
  0x66   : > { %p683_p2 = pnand %p682_p12, %p676_p5 }
  0x68   : > { %686 = shalt.err (!%p683_p2)
}
  0x69   : > { %s687_s28 = scalar_lea.vmem %s970_s6, 128  ;;  %s783_s30 = smov [#allocation2]  }
  0x6a   : > { %p688_p1 = scmp.ne.s32.totalorder %s970_s6, %s687_s28  ;;  %s692_s24 = sshll.u32 %s783_s30, 4  ;;  %s693_s24 = int_to_ptr.vmem [resolvable:$false] %s692_s24 }
  0x6b   : > { %s694_s26 = scalar_lea.vmem %s693_s24, 256  ;;  %p695_p3 = scmp.lt.s32.totalorder %s970_s6, %s693_s24 }
  0x6c   : > { %p690_p4 = pnand %p688_p1, %p674_p0  ;;  %p696_p7 = scmp.lt.s32.totalorder %s694_s26, %s687_s28 }
  0x6e   : > { %p691_p8 = pneg %p690_p4  ;;  %p697_p10 = por %p696_p7, %p695_p3 }
  0x70   : > { %p698_p13 = pnand %p697_p10, %p691_p8 }
  0x72   : > { %701 = shalt.err (!%p698_p13)
}
  0x73   : > { %532 = dma.hbm_to_vmem [thread:$0]  (!%p966_p11), %s964_s29, 128, %s970_s6, %s191_s7  }
  0x74   : > { %p1081_p5 = scmp.ne.s32.totalorder %s1075_s23, 0 }
  0x75   : > { %s1000_s5 = sand.u32 (!%p1081_p5), 1, %s768_s16   ;;  %p1082_p0 = scmp.ne.s32.totalorder (!%p1081_p5), %s1073_s21, 0 }
  0x76   : > { %210 = sbr.rel (%p1081_p5) target bundleno = 681 (0x2a9), region = 36  ;;  %s478_s10 = sshll.u32 (!%p1081_p5), %s1000_s5, 3 }
  0x77   : > { %s213_s8 = scalar_lea.sflag (!%p1081_p5), [#allocation3], %s1000_s5  ;;  %s216_s9 = scalar_lea.vmem (!%p1081_p5), [#allocation2], %s478_s10 }
  0x7d   : > { %747 = dma.done.wait (%p1082_p0), %s213_s8, 128  }
  0x7e   : > { %749 = vsyncadd (%p1082_p0), %s213_s8, 4294967168  ;;  %p1083_p9 = scmp.eq.s32.totalorder %s833_s19, 0 }
  0x80   : > { %751 = dma.done.wait (%p1083_p9), [#allocation6], 32   ;;  %p1084_p11 = pmov %p1083_p9 }
  0x81   : > { %p1085_p12 = pmov %p1083_p9 }
  0x82   : > { %753 = vsyncadd (%p1084_p11), [#allocation6], 4294967264 }
  0x83   : > { %755 = dma.done.wait (%p1085_p12), [#allocation9], 256   ;;  %p1086_p2 = pmov %p1083_p9 }
  0x84   : > { %vm257_vm0 = vcmask 258049   ;;  %v254_v0 = vld [vmem:[%s216_s9] sm:$0x1f]  ;;  %v584_v7 = vld [vmem:[#allocation8] sm:$0xff]   ;;  %v784_v8 = vmov 0.0   ;;  %vm785_vm1 = vmmov 0  }
  0x85   : > { %757 = vsyncadd (%p1086_p2), [#allocation9], 4294967040  ;;  %v258_v1 = vsel %vm257_vm0, %v254_v0, 0.0  ;;  %495 = vmatprep.subr.bf16.mxu0 %v784_v8  ;;  %499 = vmatprep.mubr.msk.bf16.mxu0 %vm785_vm1, %v784_v8  ;;  %v585_v9 = vld [vmem:[#allocation8 + $0x8] sm:$0xff]   ;;  %v483_v14 = vld [vmem:[#allocation5] ss:$0 sm:$0xff] }
  0x86   : > { %259 = vadd.xlane.f32.xlu0 %v258_v1  ;;  %496 = vmatpush3.bf16.msra.mxu0 %v584_v7  ;;  %v484_v16 = vld [vmem:[#allocation7] ss:$0 sm:$0xff]  ;;  %vm310_vm2 = vcmask 261120   ;;  %s482_s21 = sshll.u32 %s1000_s5, 2  ;;  %s489_s23 = sshll.u32 %s833_s19, 6  ;;  %vm354_vm3 = vcmask 257024  }
  0x87   : > { %497 = vmatprep.subr.bf16.mxu0 %v784_v8  ;;  %s252_s29 = scalar_lea.vmem [#allocation10], %s482_s21  ;;  %s1021_s11 = scalar_lea.hbm %s1069_s4, %s489_s23 }
  0x88   : > { %s370_s6 = sshll.u32 %s252_s29, 4  ;;  %s357_s12 = scalar_lea.sflag [#allocation4], %s1000_s5  ;;  %s1023_s6 = int_to_ptr.vmem [resolvable:$true] %s370_s6 }
  0x89   : > { %s702_s20 = scalar_lea.vmem %s1023_s6, 64  ;;  %s786_s19 = smov [#allocation10]  }
  0x8a   : > { %498 = vmatpush3.bf16.msra.mxu0 %v585_v9  ;;  %p703_p1 = scmp.ne.s32.totalorder %s1023_s6, %s702_s20  ;;  %s706_s28 = sshll.u32 %s786_s19, 4  ;;  %s707_s28 = int_to_ptr.vmem [resolvable:$false] %s706_s28 }
  0x8b   : > { %s708_s30 = scalar_lea.vmem %s707_s28, 128  ;;  %p709_p3 = scmp.lt.s32.totalorder %s1023_s6, %s707_s28 }
  0x8c   : > { %p704_p4 = pnand %p703_p1, %p955_p6  ;;  %p710_p7 = scmp.lt.s32.totalorder %s708_s30, %s702_s20 }
  0x8e   : > { %p705_p8 = pneg %p704_p4  ;;  %p711_p10 = por %p710_p7, %p709_p3 }
  0x90   : > { %p712_p13 = pnand %p711_p10, %p705_p8 }
 0x113   : > { %v260_v2 = vpop.xlane.xlu0 %259 }
 0x114   : > { %v262_v3 = vmul.f32 0.03125, %v260_v2 }
 0x116   : > { %v263_v4 = vsub.f32 %v254_v0, %v262_v3 }
 0x118   : > { %v264_v5 = vmul.f32 %v263_v4, %v263_v4 }
 0x11a   : > { %v265_v6 = vsel %vm257_vm0, %v264_v5, 0.0 }
 0x11b   : > { %266 = vadd.xlane.f32.xlu0 %v265_v6 }
 0x1a8   : > { %v267_v10 = vpop.xlane.xlu0 %266 }
 0x1a9   : > { %v268_v11 = vmul.f32 0.03125, %v267_v10 }
 0x1ab   : > { %v269_v12 = vadd.f32 1e-05, %v268_v11 }
 0x1ad   : > { %586 = vrsqrt.f32 %v269_v12 }
 0x1b7   : > { %v587_v13 = vpop.eup %586 }
 0x1b8   : > { %v271_v15 = vmul.f32 %v587_v13, %v263_v4 }
 0x1ba   : > { %v278_v17 = vmul.f32 %v483_v14, %v271_v15 }
 0x1bc   : > { %v285_v18 = vadd.f32 %v484_v16, %v278_v17 }
 0x1be   : > { %v286_v19 = vpack.c.bf16 %v285_v18, %v285_v18 }
 0x1c0   : > { %v294_v20 = vshll.u32 %v286_v19, 16  ;;  %v292_v21 = vshrl.u32 %v286_v19, 16 }
 0x1c2   : > { %v296_v22 = vrot.slane %v294_v20, 1 }
 0x1c4   : > { %v297_v23 = vor.u32 %v296_v22, %v292_v21 }
 0x1c6   : > { %500 = vmatmul.mubr.msk.bf16.vlgmr.msra.gmra.mrb[0].mxu0 %vm310_vm2, %v297_v23 }
 0x299   : > { %v348_v24 = vpop.f32.mrb[0].mxu0 }
 0x29a   : > { %355 = vst.msk [vmem:[%s252_s29] sm:$0xf] %vm354_vm3, %v348_v24  ;;  %v501_v25 = vpop.f32.mrb[1].mxu0 }
 0x29b   : > { %v351_v26 = vpop.f32.mrb[2].mxu0 }
 0x29c   : > { %715 = shalt.err (!%p712_p13)
}
 0x29d   : > { %s716_s24 = scalar_lea.hbm %s1021_s11, 64  ;;  %s720_s10 = scalar_lea.hbm %s1069_s4, 128 }
 0x29e   : > { %p717_p5 = scmp.ne.s32.totalorder %s1021_s11, %s716_s24  ;;  %p721_p11 = scmp.lt.u32.totalorder %s1021_s11, %s1069_s4 }
 0x29f   : > { %p722_p12 = scmp.lt.u32.totalorder %s720_s10, %s716_s24  ;;  %p724_p1 = scmp.lt.u32.totalorder %s716_s24, %s1021_s11 }
 0x2a0   : > { %p718_p0 = pnand %p717_p5, %p955_p6 }
 0x2a1   : > { %p723_p2 = por %p722_p12, %p721_p11 }
 0x2a2   : > { %p719_p9 = pneg %p718_p0 }
 0x2a3   : > { %p725_p4 = por %p724_p1, %p723_p2 }
 0x2a5   : > { %p726_p8 = pnand %p725_p4, %p719_p9 }
 0x2a7   : > { %729 = shalt.err (!%p726_p8)
}
 0x2a8   : > { %517 = dma.vmem_to_hbm [thread:$0]  (%p955_p6), %s1023_s6, 64, %s1021_s11, %s357_s12   ;;  %v502_v27 = vpop.f32.mrb[3].mxu0 }
 0x2a9 PF: > { %s382_s21 = sand.u32 1, %s764_s15   ;;  %p1087_p3 = scmp.ne.s32.totalorder %s1074_s22, 0 }
 0x2aa   : > { %p1088_p7 = scmp.ge.s32.totalorder %s776_s18, 2  ;;  %s383_s23 = scalar_lea.sflag [#allocation4], %s382_s21 }
 0x2ac   : > { %p534_p10 = pnand %p1088_p7, %p1087_p3 }
 0x2ae   : > { %759 = dma.done.wait (!%p534_p10), %s383_s23, 64  }
 0x2af   : > { %761 = vsyncadd (!%p534_p10), %s383_s23, 4294967232  ;;  %p19_p13 = scmp.ge.s32.totalorder %s941_s25, 4   ;;  %s1089_s15 = smov %s768_s16 }
 0x2b0   : > { %s1090_s16 = smov %s772_s17  ;;  %s1091_s17 = smov %s951_s13 }
 0x2b1   : > { %s1092_s18 = smov %s941_s25  ;;  %21 = sbr.rel (!%p19_p13) target bundleno = 7 (0x7), region = 93 }
 0x2b8   :  { %388 = vsyncpa [#allocation3], 1 }
 0x2b9   :  { %390 = vsyncpa [#allocation3 + $0x1], 1 }
 0x2ba   :  { %391 = vsyncpa [#allocation6], 1 }
 0x2bb   :  { %392 = vsyncpa [#allocation9], 1 }
 0x2bc   :  { %393 = vsyncpa [#allocation4], 1 }
 0x2bd   :  { %395 = vsyncpa [#allocation4 + $0x1], 1 }

// kernel: transformer_forward.6
= control target key start
LH: loop header
LB: loop body
LE: loop exit
PB: predicated region body
PF: predicated region fallthrough
CT: control target
= control target key end

     0   :  { %s4283_s0 = inlined_call_operand.hbm [shape: f32[2,5,32], index: 0, kind: input, shape index: {}]   ;;  %s4284_s1 = inlined_call_operand.hbm [shape: f32[5,32], index: 1, kind: input, shape index: {}]   ;;  %s4285_s2 = inlined_call_operand.hbm [shape: f32[1,32], index: 2, kind: input, shape index: {}]   ;;  %s4286_s3 = inlined_call_operand.hbm [shape: f32[1,32], index: 3, kind: input, shape index: {}]   ;;  %s4287_s4 = inlined_call_operand.hbm [shape: f32[2,1,32], index: 4, kind: input, shape index: {}]   ;;  %s4288_s5 = inlined_call_operand.hbm [shape: f32[2,1,32], index: 5, kind: input, shape index: {}]   ;;  %s4289_s6 = inlined_call_operand.hbm [shape: bf16[2,32,96], index: 6, kind: input, shape index: {}]   ;;  %s4290_s7 = inlined_call_operand.hbm [shape: f32[2,1,96], index: 7, kind: input, shape index: {}]   ;;  %s4291_s8 = inlined_call_operand.hbm [shape: bf16[2,32,32], index: 8, kind: input, shape index: {}]   ;;  %s4292_s9 = inlined_call_operand.hbm [shape: f32[2,1,32], index: 9, kind: input, shape index: {}]   ;;  %s4293_s10 = inlined_call_operand.hbm [shape: f32[2,1,32], index: 10, kind: input, shape index: {}]   ;;  %s4294_s11 = inlined_call_operand.hbm [shape: f32[2,1,32], index: 11, kind: input, shape index: {}]   ;;  %s4295_s12 = inlined_call_operand.hbm [shape: bf16[2,32,128], index: 12, kind: input, shape index: {}]   ;;  %s4296_s13 = inlined_call_operand.hbm [shape: f32[2,1,128], index: 13, kind: input, shape index: {}]   ;;  %s4297_s14 = inlined_call_operand.hbm [shape: bf16[2,128,32], index: 14, kind: input, shape index: {}]   ;;  %s4298_s15 = inlined_call_operand.hbm [shape: f32[2,1,32], index: 15, kind: input, shape index: {}]   ;;  %s4299_s16 = inlined_call_operand.hbm [shape: f32[2,5,32], index: 16, kind: output, shape index: {}]  }
   0x1   :  { %4340 = sst [smem:[#allocation43_spill]] %s4283_s0 }
   0x2   :  { %4341 = sst [smem:[#allocation44_spill]] %s4284_s1 }
   0x3   :  { %4342 = sst [smem:[#allocation45_spill]] %s4285_s2 }
   0x4   :  { %4343 = sst [smem:[#allocation46_spill]] %s4286_s3 }
   0x5   :  { %4344 = sst [smem:[#allocation47_spill]] %s4287_s4 }
   0x6   :  { %4345 = sst [smem:[#allocation48_spill]] %s4288_s5 }
   0x7   :  { %4346 = sst [smem:[#allocation49_spill]] %s4289_s6 }
   0x8   :  { %4347 = sst [smem:[#allocation50_spill]] %s4290_s7 }
   0x9   :  { %4348 = sst [smem:[#allocation51_spill]] %s4291_s8 }
   0xa   :  { %4349 = sst [smem:[#allocation52_spill]] %s4292_s9 }
   0xb   :  { %4350 = sst [smem:[#allocation53_spill]] %s4293_s10 }
   0xc   :  { %4351 = sst [smem:[#allocation54_spill]] %s4294_s11 }
   0xd   :  { %4352 = sst [smem:[#allocation55_spill]] %s4295_s12 }
   0xe   :  { %4353 = sst [smem:[#allocation56_spill]] %s4296_s13 }
   0xf   :  { %4354 = sst [smem:[#allocation57_spill]] %s4297_s14 }
  0x10   :  { %4355 = sst [smem:[#allocation58_spill]] %s4298_s15 }
  0x11   :  { %4356 = sst [smem:[#allocation59_spill]] %s4299_s16 }
  0x12   :  { %21 = vsyncpa [#allocation4], 0 }
  0x13   :  { %23 = vsyncpa [#allocation4 + $0x1], 0 }
  0x14   :  { %24 = vsyncpa [#allocation7], 0 }
  0x15   :  { %25 = vsyncpa [#allocation10], 0 }
  0x16   :  { %26 = vsyncpa [#allocation5], 0 }
  0x17   :  { %28 = vsyncpa [#allocation5 + $0x1], 0  ;;  %s3410_s21 = smov 0   ;;  %s3412_s22 = smov 0  }
  0x18   :  { %s3414_s23 = smov 0   ;;  %s3416_s24 = smov 0  }
  0x19   :  { %s3418_s25 = smov 0   ;;  %s3420_s26 = smov 0  }
  0x1a   :  { %s3422_s27 = smov 0   ;;  %s3424_s28 = smov 0  }
  0x1b   :  { %s3426_s29 = smov 0   ;;  %s3428_s30 = smov 0  }
  0x1c   :  { %s3430_s0 = smov 0  }
  0x1d LB: > { %4357 = sst [smem:[#allocation29_spill]] %s3247_s21  ;;  %s3466_s17 = sadd.s32 4294967295, %s3287_s0   ;;  %s3287_s0 = sphi %s3430_s0, %s34_s0   ;;  %s3283_s30 = sphi %s3428_s30, %s4442_s30   ;;  %s3279_s29 = sphi %s3426_s29, %s4441_s29   ;;  %s3275_s28 = sphi %s3424_s28, %s4440_s28   ;;  %s3271_s27 = sphi %s3422_s27, %s4445_s27   ;;  %s3267_s26 = sphi %s3420_s26, %s4438_s26   ;;  %s3263_s25 = sphi %s3418_s25, %s4444_s25   ;;  %s3259_s24 = sphi %s3416_s24, %s4443_s24   ;;  %s3255_s23 = sphi %s3414_s23, %s4436_s23   ;;  %s3251_s22 = sphi %s3412_s22, %s4435_s22   ;;  %s3247_s21 = sphi %s3410_s21, %s4434_s21  }
  0x1e   : > { %4358 = sst [smem:[#allocation30_spill]] %s3251_s22  ;;  %s2221_s18 = sadd.s32 4294967294, %s3287_s0  }
  0x1f   : > { %4359 = sst [smem:[#allocation31_spill]] %s3255_s23  ;;  %s43_s19 = sadd.s32 1, %s3279_s29 }
  0x20   : > { %4360 = sst [smem:[#allocation32_spill]] %s3267_s26  ;;  %s46_s20 = sadd.s32 1, %s3283_s30 }
  0x21   : > { %4361 = sst [smem:[#allocation33_spill]] %s3271_s27  ;;  %p44_p0 = scmp.ge.s32.totalorder %s43_s19, 2 }
  0x22   : > { %4362 = sst [smem:[#allocation34_spill]] %s3275_s28  ;;  %s53_s16 = sadd.s32 1, %s3267_s26 }
  0x23   : > { %4363 = sst [smem:[#allocation35_spill]] %s3279_s29  ;;  %p60_p1 = scmp.ne.s32.totalorder %s3267_s26, %s3263_s25 }
  0x24   : > { %4364 = sst [smem:[#allocation36_spill]] %s3283_s30  ;;  %p61_p2 = scmp.eq.s32.totalorder %s3287_s0, 0 }
  0x25   : > { %s4447_s19 = smov (%p44_p0, %s43_s19), 0  ;;  %s4449_s20 = smov (!%p44_p0, %s46_s20), %s3283_s30 }
  0x26   : > { %4365 = sst [smem:[#allocation37_spill]] %s4447_s19  ;;  %p3483_p3 = por %p61_p2, %p60_p1 }
  0x27   : > { %p4315_p4 = scmp.ne.s32.totalorder %s3263_s25, %s3259_s24  ;;  %p48_p5 = scmp.ge.s32.totalorder %s4449_s20, 2 }
  0x28   : > { %s139_s27 = ssub.s32 %s3279_s29, %s4447_s19  ;;  %s142_s15 = sadd.s32 1, %s3255_s23 }
  0x29   : > { %p140_p6 = scmp.eq.s32.totalorder %s139_s27, 0  ;;  %s4451_s20 = smov (%p48_p5, %s4449_s20), 0 }
  0x2a   : > { %4367 = sst [smem:[#allocation38_spill]] %s4451_s20  ;;  %s50_s2 = ssub.s32 %s3283_s30, %s4451_s20 }
  0x2b   : > { %s3495_s3 = scalar_select %p140_p6, %s3255_s23, %s142_s15  }
  0x2c   : > { %p149_p7 = scmp.ne.s32.totalorder %s3255_s23, %s3251_s22  ;;  %p51_p8 = scmp.eq.s32.totalorder %s50_s2, 0 }
  0x2d   : > { %4368 = sst [smem:[#allocation39_spill]] %s3495_s3  ;;  %p465_p11 = scmp.eq.s32.totalorder %s3466_s17, 3 }
  0x2e   : > { %p3505_p10 = por %p149_p7, %p61_p2  ;;  %p471_p13 = scmp.eq.s32.totalorder %s2221_s18, 3 }
  0x2f   : > { %s3511_s27 = scalar_select %p51_p8, %s3267_s26, %s53_s16  }
  0x30   : > { %p3516_p12 = por %p465_p11, %p60_p1  ;;  %p3523_p0 = por %p471_p13, %p4315_p4 }
  0x31   : > { %4370 = sst [smem:[#allocation40_spill]] %s3511_s27  ;;  %p2526_p2 = scmp.lt.s32.totalorder %s3287_s0, 4 }
  0x32   : > { %s4371_s19 = scalar_select %p3516_p12, 1, 0 }
  0x33   : > { %s4373_s2 = scalar_select %p3523_p0, 1, 0 }
  0x34   : > { %4372 = sst [smem:[#allocation41_spill]] %s4371_s19  ;;  %s524_s15 = sand.u32 1, %s3287_s0  }
  0x35   : > { %4374 = sst [smem:[#allocation42_spill]] %s4373_s2  ;;  %s526_s20 = sand.u32 1, %s3267_s26  }
  0x36   : > { %s2227_s3 = sshll.u32 %s526_s20, 3  ;;  %s2228_s14 = sshll.u32 %s3283_s30, 7 }
  0x37   : > { %s4375_s16 = sld [smem:[#allocation43_spill]]  ;;  %s528_s19 = scalar_lea.vmem [#allocation3], %s2227_s3 }
  0x38   : > { %s535_s18 = sshll.u32 %s528_s19, 4  ;;  %p3540_p1 = pnand %p2526_p2, %p3483_p3  ;;  %s3536_s18 = int_to_ptr.vmem [resolvable:$true] %s535_s18 }
  0x39   : > { %s3545_s20 = sand.u32 1, %s3255_s23   ;;  %p3549_p5 = pnand %p2526_p2, %p3505_p10 }
  0x3a   : > { %s3553_s21 = scalar_lea.sflag [#allocation4], %s524_s15  ;;  %p2681_p7 = pneg %p3540_p1 }
  0x3d   : > { %s3534_s27 = scalar_lea.hbm %s4375_s16, %s2228_s14  ;;  %s2684_s19 = scalar_lea.hbm %s4375_s16, 256 }
  0x3e   : > { %s4377_s14 = scalar_select %p3549_p5, 1, 0 }
  0x3f   : > { %s2679_s3 = scalar_lea.hbm %s3534_s27, 128  ;;  %p2685_p10 = scmp.lt.u32.totalorder %s3534_s27, %s4375_s16 }
  0x40   : > { %p2680_p6 = scmp.ne.s32.totalorder %s3534_s27, %s2679_s3  ;;  %p2686_p11 = scmp.lt.u32.totalorder %s2684_s19, %s2679_s3 }
  0x41   : > { %p2688_p2 = scmp.lt.u32.totalorder %s2679_s3, %s3534_s27 }
  0x42   : > { %p2682_p3 = pnand %p2681_p7, %p2680_p6  ;;  %p2687_p13 = por %p2686_p11, %p2685_p10 }
  0x44   : > { %p2683_p8 = pneg %p2682_p3  ;;  %p2689_p9 = por %p2688_p2, %p2687_p13 }
  0x46   : > { %p2690_p4 = pnand %p2689_p9, %p2683_p8 }
  0x48   : > { %2693 = shalt.err (!%p2690_p4)
}
  0x49   : > { %s2694_s15 = scalar_lea.vmem %s3536_s18, 128  ;;  %s3289_s22 = smov [#allocation3]  }
  0x4a   : > { %p2695_p6 = scmp.ne.s32.totalorder %s3536_s18, %s2694_s15  ;;  %s2699_s28 = sshll.u32 %s3289_s22, 4  ;;  %s2700_s28 = int_to_ptr.vmem [resolvable:$false] %s2699_s28 }
  0x4b   : > { %s2701_s30 = scalar_lea.vmem %s2700_s28, 256  ;;  %p2702_p12 = scmp.lt.s32.totalorder %s3536_s18, %s2700_s28 }
  0x4c   : > { %p2697_p3 = pnand %p2695_p6, %p2681_p7  ;;  %p2703_p10 = scmp.lt.s32.totalorder %s2701_s30, %s2694_s15 }
  0x4e   : > { %p2698_p0 = pneg %p2697_p3  ;;  %p2704_p11 = por %p2703_p10, %p2702_p12 }
  0x50   : > { %p2705_p13 = pnand %p2704_p11, %p2698_p0 }
  0x52   : > { %2708 = shalt.err (!%p2705_p13)
}
  0x53   : > { %2482 = dma.hbm_to_vmem [thread:$0]  (!%p3540_p1), %s3534_s27, 128, %s3536_s18, %s3553_s21  }
  0x54   : > { %s3582_s3 = sshll.u32 %s3279_s29, 4  ;;  %s4378_s4 = sld [smem:[#allocation47_spill]] }
  0x55   : > { %s545_s2 = scalar_lea.vmem [#allocation11], %s3545_s20  ;;  %p3595_p9 = pneg %p3549_p5 }
  0x56   : > { %s552_s15 = sshll.u32 %s545_s2, 4  ;;  %s553_s15 = int_to_ptr.vmem [resolvable:$true] %s552_s15 }
  0x57   : > { %s4379_s27 = scalar_select %p3595_p9, 1, 0 }
  0x5a   : > { %s3588_s22 = scalar_lea.hbm %s4378_s4, %s3582_s3  ;;  %s2714_s19 = scalar_lea.hbm %s4378_s4, 32 }
  0x5b   : > { %s2709_s28 = scalar_lea.hbm %s3588_s22, 16  ;;  %p2715_p1 = scmp.lt.u32.totalorder %s3588_s22, %s4378_s4 }
  0x5c   : > { %p2710_p4 = scmp.ne.s32.totalorder %s3588_s22, %s2709_s28  ;;  %p2716_p7 = scmp.lt.u32.totalorder %s2714_s19, %s2709_s28 }
  0x5d   : > { %p2718_p2 = scmp.lt.u32.totalorder %s2709_s28, %s3588_s22 }
  0x5e   : > { %p2712_p12 = pnand %p3595_p9, %p2710_p4  ;;  %p2717_p8 = por %p2716_p7, %p2715_p1 }
  0x60   : > { %p2713_p0 = pneg %p2712_p12  ;;  %p2719_p6 = por %p2718_p2, %p2717_p8 }
  0x62   : > { %p2720_p3 = pnand %p2719_p6, %p2713_p0 }
  0x64   : > { %2723 = shalt.err (!%p2720_p3)
}
  0x65   : > { %s2724_s2 = scalar_lea.vmem %s553_s15, 16  ;;  %s3290_s26 = smov [#allocation11]  }
  0x66   : > { %p2725_p10 = scmp.ne.s32.totalorder %s553_s15, %s2724_s2  ;;  %s2729_s23 = sshll.u32 %s3290_s26, 4  ;;  %s2730_s23 = int_to_ptr.vmem [resolvable:$false] %s2729_s23 }
  0x67   : > { %s2731_s18 = scalar_lea.vmem %s2730_s23, 32  ;;  %p2732_p4 = scmp.lt.s32.totalorder %s553_s15, %s2730_s23 }
  0x68   : > { %p2727_p11 = pnand %p2725_p10, %p3595_p9  ;;  %p2733_p12 = scmp.lt.s32.totalorder %s2731_s18, %s2724_s2 }
  0x6a   : > { %p2728_p13 = pneg %p2727_p11  ;;  %p2734_p5 = por %p2733_p12, %p2732_p4 }
  0x6c   : > { %p2735_p1 = pnand %p2734_p5, %p2728_p13 }
  0x6e   : > { %2738 = shalt.err (!%p2735_p1)
}
  0x6f   : > { %p4380_p7 = scmp.ne.s32.totalorder %s4377_s14, 0  ;;  %s4381_s5 = sld [smem:[#allocation48_spill]] }
  0x70   : > { %s562_s23 = scalar_lea.vmem [#allocation12], %s3545_s20  ;;  %s3623_s19 = sshll.u32 %s3545_s20, 4 }
  0x71   : > { %2485 = dma.hbm_to_vmem [thread:$0]  (!%p4380_p7), %s3588_s22, 16, %s553_s15, %s3553_s21  }
  0x72   : > { %s569_s30 = sshll.u32 %s562_s23, 4  ;;  %s570_s30 = int_to_ptr.vmem [resolvable:$true] %s569_s30 }
  0x75   : > { %s3619_s26 = scalar_lea.hbm %s4381_s5, %s3582_s3  ;;  %s2744_s2 = scalar_lea.hbm %s4381_s5, 32 }
  0x76   : > { %s2739_s1 = scalar_lea.hbm %s3619_s26, 16  ;;  %p2745_p2 = scmp.lt.u32.totalorder %s3619_s26, %s4381_s5 }
  0x77   : > { %p2740_p5 = scmp.ne.s32.totalorder %s3619_s26, %s2739_s1  ;;  %p2746_p6 = scmp.lt.u32.totalorder %s2744_s2, %s2739_s1 }
  0x78   : > { %p2748_p10 = scmp.lt.u32.totalorder %s2739_s1, %s3619_s26 }
  0x79   : > { %p2742_p0 = pnand %p2740_p5, %p3595_p9  ;;  %p2747_p3 = por %p2746_p6, %p2745_p2 }
  0x7b   : > { %p2743_p8 = pneg %p2742_p0  ;;  %p2749_p11 = por %p2748_p10, %p2747_p3 }
  0x7d   : > { %p2750_p13 = pnand %p2749_p11, %p2743_p8 }
  0x7f   : > { %2753 = shalt.err (!%p2750_p13)
}
  0x80   : > { %s2754_s28 = scalar_lea.vmem %s570_s30, 16  ;;  %s3291_s23 = smov [#allocation12]  }
  0x81   : > { %p2755_p4 = scmp.ne.s32.totalorder %s570_s30, %s2754_s28  ;;  %s2759_s4 = sshll.u32 %s3291_s23, 4  ;;  %s2760_s4 = int_to_ptr.vmem [resolvable:$false] %s2759_s4 }
  0x82   : > { %s2761_s22 = scalar_lea.vmem %s2760_s4, 32  ;;  %p2762_p5 = scmp.lt.s32.totalorder %s570_s30, %s2760_s4 }
  0x83   : > { %p2757_p12 = pnand %p2755_p4, %p3595_p9  ;;  %p2763_p0 = scmp.lt.s32.totalorder %s2761_s22, %s2754_s28 }
  0x85   : > { %p2758_p1 = pneg %p2757_p12  ;;  %p2764_p7 = por %p2763_p0, %p2762_p5 }
  0x87   : > { %p2765_p2 = pnand %p2764_p7, %p2758_p1 }
  0x89   : > { %2768 = shalt.err (!%p2765_p2)
}
  0x8a   : > { %p4382_p6 = scmp.ne.s32.totalorder %s4377_s14, 0  ;;  %s3644_s1 = sshll.u32 %s3279_s29, 8 }
  0x8b   : > { %s4383_s6 = sld [smem:[#allocation49_spill]]  ;;  %s580_s4 = scalar_lea.vmem [#allocation13], %s3623_s19 }
  0x8c   : > { %2488 = dma.hbm_to_vmem [thread:$0]  (!%p4382_p6), %s3619_s26, 16, %s570_s30, %s3553_s21  }
  0x8d   : > { %s587_s16 = sshll.u32 %s580_s4, 4  ;;  %s3653_s16 = int_to_ptr.vmem [resolvable:$true] %s587_s16 }
  0x91   : > { %s3650_s18 = scalar_lea.hbm %s4383_s6, %s3644_s1  ;;  %s2774_s23 = scalar_lea.hbm %s4383_s6, 512 }
  0x92   : > { %s2769_s28 = scalar_lea.hbm %s3650_s18, 256  ;;  %p2775_p10 = scmp.lt.u32.totalorder %s3650_s18, %s4383_s6 }
  0x93   : > { %p2770_p7 = scmp.ne.s32.totalorder %s3650_s18, %s2769_s28  ;;  %p2776_p11 = scmp.lt.u32.totalorder %s2774_s23, %s2769_s28 }
  0x94   : > { %p2778_p4 = scmp.lt.u32.totalorder %s2769_s28, %s3650_s18 }
  0x95   : > { %p2772_p8 = pnand %p2770_p7, %p3595_p9  ;;  %p2777_p13 = por %p2776_p11, %p2775_p10 }
  0x97   : > { %p2773_p3 = pneg %p2772_p8  ;;  %p2779_p12 = por %p2778_p4, %p2777_p13 }
  0x99   : > { %p2780_p1 = pnand %p2779_p12, %p2773_p3 }
  0x9b   : > { %2783 = shalt.err (!%p2780_p1)
}
  0x9c   : > { %s2784_s2 = scalar_lea.vmem %s3653_s16, 256  ;;  %s3292_s4 = smov [#allocation13]  }
  0x9d   : > { %p2785_p5 = scmp.ne.s32.totalorder %s3653_s16, %s2784_s2  ;;  %s2789_s26 = sshll.u32 %s3292_s4, 4  ;;  %s2790_s26 = int_to_ptr.vmem [resolvable:$false] %s2789_s26 }
  0x9e   : > { %s2791_s30 = scalar_lea.vmem %s2790_s26, 512  ;;  %p2792_p7 = scmp.lt.s32.totalorder %s3653_s16, %s2790_s26 }
  0x9f   : > { %p2787_p0 = pnand %p2785_p5, %p3595_p9  ;;  %p2793_p8 = scmp.lt.s32.totalorder %s2791_s30, %s2784_s2 }
  0xa1   : > { %p2788_p2 = pneg %p2787_p0  ;;  %p2794_p10 = por %p2793_p8, %p2792_p7 }
  0xa3   : > { %p2795_p11 = pnand %p2794_p10, %p2788_p2 }
  0xa5   : > { %2798 = shalt.err (!%p2795_p11)
}
  0xa6   : > { %s4322_s28 = smov 64   ;;  %s4325_s23 = smov 4  }
  0xa7   : > { %2491 = dma.hbm_to_vmem [thread:$0]  (!%p4382_p6), %s3650_s18, 256, %s3653_s16, %s3553_s21, %s4322_s28, %s4322_s28, %s4325_s23  }
  0xa8   : > { %s4384_s7 = sld [smem:[#allocation50_spill]]  ;;  %s600_s4 = scalar_lea.vmem [#allocation14], %s3545_s20 }
  0xa9   : > { %s607_s26 = sshll.u32 %s600_s4, 4  ;;  %s608_s26 = int_to_ptr.vmem [resolvable:$true] %s607_s26 }
  0xae   : > { %s3684_s2 = scalar_lea.hbm %s4384_s7, %s3582_s3  ;;  %s2804_s18 = scalar_lea.hbm %s4384_s7, 32 }
  0xaf   : > { %s2799_s30 = scalar_lea.hbm %s3684_s2, 16  ;;  %p2805_p12 = scmp.lt.u32.totalorder %s3684_s2, %s4384_s7 }
  0xb0   : > { %p2800_p3 = scmp.ne.s32.totalorder %s3684_s2, %s2799_s30  ;;  %p2806_p1 = scmp.lt.u32.totalorder %s2804_s18, %s2799_s30 }
  0xb1   : > { %p2808_p0 = scmp.lt.u32.totalorder %s2799_s30, %s3684_s2 }
  0xb2   : > { %p2802_p13 = pnand %p2800_p3, %p3595_p9  ;;  %p2807_p5 = por %p2806_p1, %p2805_p12 }
  0xb4   : > { %p2803_p4 = pneg %p2802_p13  ;;  %p2809_p2 = por %p2808_p0, %p2807_p5 }
  0xb6   : > { %p2810_p7 = pnand %p2809_p2, %p2803_p4 }
  0xb8   : > { %2813 = shalt.err (!%p2810_p7)
}
  0xb9   : > { %s2814_s15 = scalar_lea.vmem %s608_s26, 16  ;;  %s3295_s4 = smov [#allocation14]  }
  0xba   : > { %p2815_p8 = scmp.ne.s32.totalorder %s608_s26, %s2814_s15  ;;  %s2819_s28 = sshll.u32 %s3295_s4, 4  ;;  %s2820_s28 = int_to_ptr.vmem [resolvable:$false] %s2819_s28 }
  0xbb   : > { %s2821_s5 = scalar_lea.vmem %s2820_s28, 32  ;;  %p2822_p3 = scmp.lt.s32.totalorder %s608_s26, %s2820_s28 }
  0xbc   : > { %p2817_p10 = pnand %p2815_p8, %p3595_p9  ;;  %p2823_p13 = scmp.lt.s32.totalorder %s2821_s5, %s2814_s15 }
  0xbe   : > { %p2818_p11 = pneg %p2817_p10  ;;  %p2824_p6 = por %p2823_p13, %p2822_p3 }
  0xc0   : > { %p2825_p1 = pnand %p2824_p6, %p2818_p11 }
  0xc2   : > { %2828 = shalt.err (!%p2825_p1)
}
  0xc3   : > { %p4385_p12 = scmp.ne.s32.totalorder %s4377_s14, 0  ;;  %s4386_s8 = sld [smem:[#allocation51_spill]] }
  0xc4   : > { %s618_s28 = scalar_lea.vmem [#allocation15], %s3623_s19 }
  0xc5   : > { %2494 = dma.hbm_to_vmem [thread:$0]  (!%p4385_p12), %s3684_s2, 16, %s608_s26, %s3553_s21  }
  0xc6   : > { %s625_s16 = sshll.u32 %s618_s28, 4  ;;  %s3712_s16 = int_to_ptr.vmem [resolvable:$true] %s625_s16 }
  0xc9   : > { %s3709_s18 = scalar_lea.hbm %s4386_s8, %s3644_s1  ;;  %s2834_s26 = scalar_lea.hbm %s4386_s8, 512 }
  0xca   : > { %s2829_s22 = scalar_lea.hbm %s3709_s18, 256  ;;  %p2835_p0 = scmp.lt.u32.totalorder %s3709_s18, %s4386_s8 }
  0xcb   : > { %p2830_p6 = scmp.ne.s32.totalorder %s3709_s18, %s2829_s22  ;;  %p2836_p2 = scmp.lt.u32.totalorder %s2834_s26, %s2829_s22 }
  0xcc   : > { %p2838_p8 = scmp.lt.u32.totalorder %s2829_s22, %s3709_s18 }
  0xcd   : > { %p2832_p4 = pnand %p2830_p6, %p3595_p9  ;;  %p2837_p7 = por %p2836_p2, %p2835_p0 }
  0xcf   : > { %p2833_p5 = pneg %p2832_p4  ;;  %p2839_p10 = por %p2838_p8, %p2837_p7 }
  0xd1   : > { %p2840_p11 = pnand %p2839_p10, %p2833_p5 }
  0xd3   : > { %2843 = shalt.err (!%p2840_p11)
}
  0xd4   : > { %s2844_s6 = scalar_lea.vmem %s3712_s16, 256  ;;  %s3296_s30 = smov [#allocation15]  }
  0xd5   : > { %p2845_p3 = scmp.ne.s32.totalorder %s3712_s16, %s2844_s6  ;;  %s2849_s28 = sshll.u32 %s3296_s30, 4  ;;  %s2850_s28 = int_to_ptr.vmem [resolvable:$false] %s2849_s28 }
  0xd6   : > { %s2851_s15 = scalar_lea.vmem %s2850_s28, 512  ;;  %p2852_p6 = scmp.lt.s32.totalorder %s3712_s16, %s2850_s28 }
  0xd7   : > { %p2847_p13 = pnand %p2845_p3, %p3595_p9  ;;  %p2853_p4 = scmp.lt.s32.totalorder %s2851_s15, %s2844_s6 }
  0xd9   : > { %p2848_p1 = pneg %p2847_p13  ;;  %p2854_p0 = por %p2853_p4, %p2852_p6 }
  0xdb   : > { %p2855_p2 = pnand %p2854_p0, %p2848_p1 }
  0xdd   : > { %2858 = shalt.err (!%p2855_p2)
}
  0xde   : > { %s4387_s22 = smov 64   ;;  %s4388_s9 = sld [smem:[#allocation52_spill]] }
  0xdf   : > { %2497 = dma.hbm_to_vmem [thread:$0]  (!%p4385_p12), %s3709_s18, 256, %s3712_s16, %s3553_s21, %s4387_s22, %s4387_s22, %s4325_s23  }
  0xe0   : > { %s638_s5 = scalar_lea.vmem [#allocation16], %s3545_s20 }
  0xe1   : > { %s645_s6 = sshll.u32 %s638_s5, 4  ;;  %s646_s6 = int_to_ptr.vmem [resolvable:$true] %s645_s6 }
  0xe4   : > { %s3743_s4 = scalar_lea.hbm %s4388_s9, %s3582_s3  ;;  %s2864_s18 = scalar_lea.hbm %s4388_s9, 32 }
  0xe5   : > { %s2859_s30 = scalar_lea.hbm %s3743_s4, 16  ;;  %p2865_p10 = scmp.lt.u32.totalorder %s3743_s4, %s4388_s9 }
  0xe6   : > { %p2860_p5 = scmp.ne.s32.totalorder %s3743_s4, %s2859_s30  ;;  %p2866_p11 = scmp.lt.u32.totalorder %s2864_s18, %s2859_s30 }
  0xe7   : > { %p2868_p13 = scmp.lt.u32.totalorder %s2859_s30, %s3743_s4 }
  0xe8   : > { %p2862_p7 = pnand %p2860_p5, %p3595_p9  ;;  %p2867_p3 = por %p2866_p11, %p2865_p10 }
  0xea   : > { %p2863_p8 = pneg %p2862_p7  ;;  %p2869_p1 = por %p2868_p13, %p2867_p3 }
  0xec   : > { %p2870_p6 = pnand %p2869_p1, %p2863_p8 }
  0xee   : > { %2873 = shalt.err (!%p2870_p6)
}
  0xef   : > { %s2874_s26 = scalar_lea.vmem %s646_s6, 16  ;;  %s3297_s5 = smov [#allocation16]  }
  0xf0   : > { %p2875_p4 = scmp.ne.s32.totalorder %s646_s6, %s2874_s26  ;;  %s2879_s23 = sshll.u32 %s3297_s5, 4  ;;  %s2880_s23 = int_to_ptr.vmem [resolvable:$false] %s2879_s23 }
  0xf1   : > { %s2881_s28 = scalar_lea.vmem %s2880_s23, 32  ;;  %p2882_p5 = scmp.lt.s32.totalorder %s646_s6, %s2880_s23 }
  0xf2   : > { %p2877_p0 = pnand %p2875_p4, %p3595_p9  ;;  %p2883_p7 = scmp.lt.s32.totalorder %s2881_s28, %s2874_s26 }
  0xf4   : > { %p2878_p2 = pneg %p2877_p0  ;;  %p2884_p12 = por %p2883_p7, %p2882_p5 }
  0xf6   : > { %p2885_p10 = pnand %p2884_p12, %p2878_p2 }
  0xf8   : > { %2888 = shalt.err (!%p2885_p10)
}
  0xf9   : > { %p4389_p11 = scmp.ne.s32.totalorder %s4377_s14, 0  ;;  %s4390_s10 = sld [smem:[#allocation53_spill]] }
  0xfa   : > { %s655_s23 = scalar_lea.vmem [#allocation17], %s3545_s20 }
  0xfb   : > { %2500 = dma.hbm_to_vmem [thread:$0]  (!%p4389_p11), %s3743_s4, 16, %s646_s6, %s3553_s21  }
  0xfc   : > { %s662_s16 = sshll.u32 %s655_s23, 4  ;;  %s663_s16 = int_to_ptr.vmem [resolvable:$true] %s662_s16 }
  0xff   : > { %s3768_s18 = scalar_lea.hbm %s4390_s10, %s3582_s3  ;;  %s2894_s4 = scalar_lea.hbm %s4390_s10, 32 }
 0x100   : > { %s2889_s2 = scalar_lea.hbm %s3768_s18, 16  ;;  %p2895_p13 = scmp.lt.u32.totalorder %s3768_s18, %s4390_s10 }
 0x101   : > { %p2890_p12 = scmp.ne.s32.totalorder %s3768_s18, %s2889_s2  ;;  %p2896_p1 = scmp.lt.u32.totalorder %s2894_s4, %s2889_s2 }
 0x102   : > { %p2898_p4 = scmp.lt.u32.totalorder %s2889_s2, %s3768_s18 }
 0x103   : > { %p2892_p8 = pnand %p2890_p12, %p3595_p9  ;;  %p2897_p6 = por %p2896_p1, %p2895_p13 }
 0x105   : > { %p2893_p3 = pneg %p2892_p8  ;;  %p2899_p0 = por %p2898_p4, %p2897_p6 }
 0x107   : > { %p2900_p2 = pnand %p2899_p0, %p2893_p3 }
 0x109   : > { %2903 = shalt.err (!%p2900_p2)
}
 0x10a   : > { %s2904_s30 = scalar_lea.vmem %s663_s16, 16  ;;  %s3298_s15 = smov [#allocation17]  }
 0x10b   : > { %p2905_p5 = scmp.ne.s32.totalorder %s663_s16, %s2904_s30  ;;  %s2909_s23 = sshll.u32 %s3298_s15, 4  ;;  %s2910_s23 = int_to_ptr.vmem [resolvable:$false] %s2909_s23 }
 0x10c   : > { %s2911_s26 = scalar_lea.vmem %s2910_s23, 32  ;;  %p2912_p12 = scmp.lt.s32.totalorder %s663_s16, %s2910_s23 }
 0x10d   : > { %p2907_p7 = pnand %p2905_p5, %p3595_p9  ;;  %p2913_p8 = scmp.lt.s32.totalorder %s2911_s26, %s2904_s30 }
 0x10f   : > { %p2908_p10 = pneg %p2907_p7  ;;  %p2914_p11 = por %p2913_p8, %p2912_p12 }
 0x111   : > { %p2915_p1 = pnand %p2914_p11, %p2908_p10 }
 0x113   : > { %2918 = shalt.err (!%p2915_p1)
}
 0x114   : > { %p4391_p13 = scmp.ne.s32.totalorder %s4377_s14, 0  ;;  %s4392_s11 = sld [smem:[#allocation54_spill]] }
 0x115   : > { %s672_s6 = scalar_lea.vmem [#allocation18], %s3545_s20 }
 0x116   : > { %2503 = dma.hbm_to_vmem [thread:$0]  (!%p4391_p13), %s3768_s18, 16, %s663_s16, %s3553_s21  }
 0x117   : > { %s679_s28 = sshll.u32 %s672_s6, 4  ;;  %s680_s28 = int_to_ptr.vmem [resolvable:$true] %s679_s28 }
 0x11a   : > { %s3793_s4 = scalar_lea.hbm %s4392_s11, %s3582_s3  ;;  %s2924_s18 = scalar_lea.hbm %s4392_s11, 32 }
 0x11b   : > { %s2919_s30 = scalar_lea.hbm %s3793_s4, 16  ;;  %p2925_p4 = scmp.lt.u32.totalorder %s3793_s4, %s4392_s11 }
 0x11c   : > { %p2920_p11 = scmp.ne.s32.totalorder %s3793_s4, %s2919_s30  ;;  %p2926_p0 = scmp.lt.u32.totalorder %s2924_s18, %s2919_s30 }
 0x11d   : > { %p2928_p5 = scmp.lt.u32.totalorder %s2919_s30, %s3793_s4 }
 0x11e   : > { %p2922_p3 = pnand %p2920_p11, %p3595_p9  ;;  %p2927_p2 = por %p2926_p0, %p2925_p4 }
 0x120   : > { %p2923_p6 = pneg %p2922_p3  ;;  %p2929_p7 = por %p2928_p5, %p2927_p2 }
 0x122   : > { %p2930_p10 = pnand %p2929_p7, %p2923_p6 }
 0x124   : > { %2933 = shalt.err (!%p2930_p10)
}
 0x125   : > { %s2934_s2 = scalar_lea.vmem %s680_s28, 16  ;;  %s3299_s5 = smov [#allocation18]  }
 0x126   : > { %p2935_p12 = scmp.ne.s32.totalorder %s680_s28, %s2934_s2  ;;  %s2939_s6 = sshll.u32 %s3299_s5, 4  ;;  %s2940_s6 = int_to_ptr.vmem [resolvable:$false] %s2939_s6 }
 0x127   : > { %s2941_s15 = scalar_lea.vmem %s2940_s6, 32  ;;  %p2942_p11 = scmp.lt.s32.totalorder %s680_s28, %s2940_s6 }
 0x128   : > { %p2937_p8 = pnand %p2935_p12, %p3595_p9  ;;  %p2943_p3 = scmp.lt.s32.totalorder %s2941_s15, %s2934_s2 }
 0x12a   : > { %p2938_p1 = pneg %p2937_p8  ;;  %p2944_p13 = por %p2943_p3, %p2942_p11 }
 0x12c   : > { %p2945_p0 = pnand %p2944_p13, %p2938_p1 }
 0x12e   : > { %2948 = shalt.err (!%p2945_p0)
}
 0x12f   : > { %p4393_p4 = scmp.ne.s32.totalorder %s4377_s14, 0  ;;  %s4394_s12 = sld [smem:[#allocation55_spill]] }
 0x130   : > { %s690_s16 = scalar_lea.vmem [#allocation19], %s3623_s19 }
 0x131   : > { %2506 = dma.hbm_to_vmem [thread:$0]  (!%p4393_p4), %s3793_s4, 16, %s680_s28, %s3553_s21  }
 0x132   : > { %s697_s26 = sshll.u32 %s690_s16, 4  ;;  %s3821_s26 = int_to_ptr.vmem [resolvable:$true] %s697_s26 }
 0x135   : > { %s3818_s18 = scalar_lea.hbm %s4394_s12, %s3644_s1  ;;  %s2954_s28 = scalar_lea.hbm %s4394_s12, 512 }
 0x136   : > { %s2949_s2 = scalar_lea.hbm %s3818_s18, 256  ;;  %p2955_p5 = scmp.lt.u32.totalorder %s3818_s18, %s4394_s12 }
 0x137   : > { %p2950_p13 = scmp.ne.s32.totalorder %s3818_s18, %s2949_s2  ;;  %p2956_p7 = scmp.lt.u32.totalorder %s2954_s28, %s2949_s2 }
 0x138   : > { %p2958_p12 = scmp.lt.u32.totalorder %s2949_s2, %s3818_s18 }
 0x139   : > { %p2952_p6 = pnand %p2950_p13, %p3595_p9  ;;  %p2957_p10 = por %p2956_p7, %p2955_p5 }
 0x13b   : > { %p2953_p2 = pneg %p2952_p6  ;;  %p2959_p8 = por %p2958_p12, %p2957_p10 }
 0x13d   : > { %p2960_p1 = pnand %p2959_p8, %p2953_p2 }
 0x13f   : > { %2963 = shalt.err (!%p2960_p1)
}
 0x140   : > { %s2964_s19 = scalar_lea.vmem %s3821_s26, 256  ;;  %s3300_s15 = smov [#allocation19]  }
 0x141   : > { %p2965_p11 = scmp.ne.s32.totalorder %s3821_s26, %s2964_s19  ;;  %s2969_s30 = sshll.u32 %s3300_s15, 4  ;;  %s2970_s30 = int_to_ptr.vmem [resolvable:$false] %s2969_s30 }
 0x142   : > { %s2971_s23 = scalar_lea.vmem %s2970_s30, 512  ;;  %p2972_p13 = scmp.lt.s32.totalorder %s3821_s26, %s2970_s30 }
 0x143   : > { %p2967_p3 = pnand %p2965_p11, %p3595_p9  ;;  %p2973_p6 = scmp.lt.s32.totalorder %s2971_s23, %s2964_s19 }
 0x145   : > { %p2968_p0 = pneg %p2967_p3  ;;  %p2974_p5 = por %p2973_p6, %p2972_p13 }
 0x147   : > { %p2975_p7 = pnand %p2974_p5, %p2968_p0 }
 0x149   : > { %2978 = shalt.err (!%p2975_p7)
}
 0x14a   : > { %s4395_s16 = smov 4   ;;  %s4396_s13 = sld [smem:[#allocation56_spill]] }
 0x14b   : > { %2509 = dma.hbm_to_vmem [thread:$0]  (!%p4393_p4), %s3818_s18, 256, %s3821_s26, %s3553_s21, %s4387_s22, %s4387_s22, %s4395_s16  }
 0x14c   : > { %s710_s28 = scalar_lea.vmem [#allocation20], %s3545_s20 }
 0x14d   : > { %s717_s6 = sshll.u32 %s710_s28, 4  ;;  %s718_s6 = int_to_ptr.vmem [resolvable:$true] %s717_s6 }
 0x150   : > { %s3852_s4 = scalar_lea.hbm %s4396_s13, %s3582_s3  ;;  %s2984_s18 = scalar_lea.hbm %s4396_s13, 32 }
 0x151   : > { %s2979_s1 = scalar_lea.hbm %s3852_s4, 16  ;;  %p2985_p8 = scmp.lt.u32.totalorder %s3852_s4, %s4396_s13 }
 0x152   : > { %p2980_p2 = scmp.ne.s32.totalorder %s3852_s4, %s2979_s1  ;;  %p2986_p1 = scmp.lt.u32.totalorder %s2984_s18, %s2979_s1 }
 0x153   : > { %p2988_p3 = scmp.lt.u32.totalorder %s2979_s1, %s3852_s4 }
 0x154   : > { %p2982_p10 = pnand %p2980_p2, %p3595_p9  ;;  %p2987_p11 = por %p2986_p1, %p2985_p8 }
 0x156   : > { %p2983_p12 = pneg %p2982_p10  ;;  %p2989_p0 = por %p2988_p3, %p2987_p11 }
 0x158   : > { %p2990_p13 = pnand %p2989_p0, %p2983_p12 }
 0x15a   : > { %2993 = shalt.err (!%p2990_p13)
}
 0x15b   : > { %s2994_s23 = scalar_lea.vmem %s718_s6, 16  ;;  %s3301_s2 = smov [#allocation20]  }
 0x15c   : > { %p2995_p6 = scmp.ne.s32.totalorder %s718_s6, %s2994_s23  ;;  %s2999_s5 = sshll.u32 %s3301_s2, 4  ;;  %s3000_s5 = int_to_ptr.vmem [resolvable:$false] %s2999_s5 }
 0x15d   : > { %s3001_s28 = scalar_lea.vmem %s3000_s5, 32  ;;  %p3002_p2 = scmp.lt.s32.totalorder %s718_s6, %s3000_s5 }
 0x15e   : > { %p2997_p5 = pnand %p2995_p6, %p3595_p9  ;;  %p3003_p10 = scmp.lt.s32.totalorder %s3001_s28, %s2994_s23 }
 0x160   : > { %p2998_p7 = pneg %p2997_p5  ;;  %p3004_p4 = por %p3003_p10, %p3002_p2 }
 0x162   : > { %p3005_p1 = pnand %p3004_p4, %p2998_p7 }
 0x164   : > { %3008 = shalt.err (!%p3005_p1)
}
 0x165   : > { %p4397_p8 = scmp.ne.s32.totalorder %s4377_s14, 0  ;;  %s4398_s1 = sld [smem:[#allocation30_spill]] }
 0x166   : > { %s4399_s19 = sld [smem:[#allocation29_spill]]  ;;  %p4330_p12 = scmp.eq.s32.totalorder %s3466_s17, 0 }
 0x167   : > { %2512 = dma.hbm_to_vmem [thread:$0]  (!%p4397_p8), %s3852_s4, 16, %s718_s6, %s3553_s21  }
 0x168   : > { %p2222_p4 = scmp.ge.s32.totalorder %s3287_s0, 1  ;;  %p478_p11 = scmp.lt.s32.totalorder %s3287_s0, 5 }
 0x169   : > { %p4400_p3 = scmp.ne.s32.totalorder %s3263_s25, %s3259_s24  ;;  %s3302_s4 = smov [#allocation6]  }
 0x16a   : > { %p3894_p5 = pnand %p2222_p4, %p478_p11  ;;  %s491_s6 = sshll.u32 %s3302_s4, 4  ;;  %s492_s6 = int_to_ptr.vmem [resolvable:$true] %s491_s6 }
 0x16b   : > { %p3881_p0 = por %p4330_p12, %p4400_p3  ;;  %s2245_s30 = sshll.u32 %s3545_s20, 6 }
 0x16c   : > { %p4402_p13 = scmp.ne.s32.totalorder %s4398_s1, %s4399_s19  ;;  %p2469_p7 = pneg %p3894_p5 }
 0x16d   : > { %s4401_s15 = scalar_select %p3881_p0, 1, 0 }
 0x16e   : > { %p3890_p6 = por %p4402_p13, %p4330_p12  ;;  %s2302_s23 = sshll.u32 %s3279_s29, 10 }
 0x16f   : > { %s4404_s26 = scalar_select %p3894_p5, 1, 0 }
 0x170   : > { %s4403_s18 = scalar_select %p3890_p6, 1, 0 }
 0x171   : > { %p3904_p2 = pnand %p2469_p7, %p4330_p12  ;;  %s4406_s1 = sld [smem:[#allocation57_spill]] }
 0x172   : > { %s728_s7 = scalar_lea.vmem [#allocation21], %s2245_s30  ;;  %s4407_s10 = sld [smem:[#allocation44_spill]] }
 0x173   : > { %s4405_s2 = scalar_select %p3904_p2, 1, 0 }
 0x174   : > { %s735_s8 = sshll.u32 %s728_s7, 4  ;;  %p3923_p1 = pneg %p3904_p2  ;;  %s3913_s8 = int_to_ptr.vmem [resolvable:$true] %s735_s8 }
 0x177   : > { %s3911_s19 = scalar_lea.hbm %s4406_s1, %s2302_s23 }
 0x178   : > { %s3009_s11 = scalar_lea.hbm %s4407_s10, 128 }
 0x179   : > { %p3010_p10 = scmp.ne.s32.totalorder %s4407_s10, %s3009_s11  ;;  %p3016_p3 = scmp.lt.u32.totalorder %s3009_s11, %s4407_s10 }
 0x17b   : > { %p3012_p4 = pnand %p3923_p1, %p3010_p10 }
 0x17d   : > { %p3013_p11 = pneg %p3012_p4 }
 0x17f   : > { %p3018_p13 = pnand %p3016_p3, %p3013_p11 }
 0x181   : > { %3021 = shalt.err (!%p3018_p13)
}
 0x182   : > { %s3022_s9 = scalar_lea.vmem %s492_s6, 128  ;;  %p3030_p0 = scmp.lt.s32.totalorder %s492_s6, %s492_s6 }
 0x183   : > { %p3023_p7 = scmp.ne.s32.totalorder %s492_s6, %s3022_s9  ;;  %p3031_p5 = scmp.lt.s32.totalorder %s3022_s9, %s3022_s9 }
 0x185   : > { %p3025_p12 = pnand %p3023_p7, %p3923_p1  ;;  %p3032_p8 = por %p3031_p5, %p3030_p0 }
 0x187   : > { %p3026_p6 = pneg %p3025_p12 }
 0x189   : > { %p3033_p9 = pnand %p3032_p8, %p3026_p6 }
 0x18b   : > { %3036 = shalt.err (!%p3033_p9)
}
 0x18c   : > { %2472 = dma.hbm_to_vmem [thread:$0]  (!%p3904_p2), %s4407_s10, 128, %s492_s6, [#allocation7]  }
 0x18d   : > { %s3037_s11 = scalar_lea.hbm %s3911_s19, 1024  ;;  %p4409_p4 = scmp.ne.s32.totalorder %s4379_s27, 0 }
 0x18e   : > { %p3038_p10 = scmp.ne.s32.totalorder %s3911_s19, %s3037_s11  ;;  %s3042_s28 = scalar_lea.hbm %s4406_s1, 2048 }
 0x18f   : > { %p3043_p9 = scmp.lt.u32.totalorder %s3911_s19, %s4406_s1  ;;  %p3044_p8 = scmp.lt.u32.totalorder %s3042_s28, %s3037_s11 }
 0x190   : > { %p3040_p12 = pnand %p3038_p10, %p4409_p4  ;;  %p3046_p6 = scmp.lt.u32.totalorder %s3037_s11, %s3911_s19 }
 0x191   : > { %p3045_p0 = por %p3044_p8, %p3043_p9 }
 0x192   : > { %p3041_p11 = pneg %p3040_p12 }
 0x193   : > { %p3047_p5 = por %p3046_p6, %p3045_p0 }
 0x195   : > { %p3048_p3 = pnand %p3047_p5, %p3041_p11 }
 0x197   : > { %3051 = shalt.err (!%p3048_p3)
}
 0x198   : > { %s3052_s6 = scalar_lea.vmem %s3913_s8, 1024  ;;  %s3303_s30 = smov [#allocation21]  }
 0x199   : > { %p3053_p13 = scmp.ne.s32.totalorder %s3913_s8, %s3052_s6  ;;  %s3057_s9 = sshll.u32 %s3303_s30, 4  ;;  %s3058_s9 = int_to_ptr.vmem [resolvable:$false] %s3057_s9 }
 0x19a   : > { %s3059_s12 = scalar_lea.vmem %s3058_s9, 2048  ;;  %p3060_p12 = scmp.lt.s32.totalorder %s3913_s8, %s3058_s9 }
 0x19b   : > { %p3055_p7 = pnand %p3053_p13, %p4409_p4  ;;  %p3061_p2 = scmp.lt.s32.totalorder %s3059_s12, %s3052_s6 }
 0x19d   : > { %p3056_p10 = pneg %p3055_p7  ;;  %p3062_p9 = por %p3061_p2, %p3060_p12 }
 0x19f   : > { %p3063_p8 = pnand %p3062_p9, %p3056_p10 }
 0x1a1   : > { %3066 = shalt.err (!%p3063_p8)
}
 0x1a2   : > { %p4410_p11 = scmp.ne.s32.totalorder %s4377_s14, 0  ;;  %s3304_s13 = smov [#allocation8]  }
 0x1a3   : > { %s502_s11 = sshll.u32 %s3304_s13, 4  ;;  %s3305_s23 = smov [#allocation9]   ;;  %s503_s11 = int_to_ptr.vmem [resolvable:$true] %s502_s11 }
 0x1a4   : > { %2515 = dma.hbm_to_vmem [thread:$0]  (!%p4410_p11), %s3911_s19, 1024, %s3913_s8, %s3553_s21, %s4387_s22, %s4387_s22, %s4395_s16  }
 0x1a5   : > { %s513_s5 = sshll.u32 %s3305_s23, 4  ;;  %s4411_s7 = sld [smem:[#allocation45_spill]]  ;;  %s514_s5 = int_to_ptr.vmem [resolvable:$true] %s513_s5 }
 0x1ab   : > { %s3067_s6 = scalar_lea.hbm %s4411_s7, 16 }
 0x1ac   : > { %p3068_p2 = scmp.ne.s32.totalorder %s4411_s7, %s3067_s6  ;;  %p3074_p5 = scmp.lt.u32.totalorder %s3067_s6, %s4411_s7 }
 0x1ae   : > { %p3070_p0 = pnand %p3068_p2, %p3923_p1 }
 0x1b0   : > { %p3071_p6 = pneg %p3070_p0 }
 0x1b2   : > { %p3076_p3 = pnand %p3074_p5, %p3071_p6 }
 0x1b4   : > { %3079 = shalt.err (!%p3076_p3)
}
 0x1b5   : > { %s3080_s8 = scalar_lea.vmem %s503_s11, 16  ;;  %s3087_s22 = scalar_lea.vmem %s503_s11, 32 }
 0x1b6   : > { %p3081_p13 = scmp.ne.s32.totalorder %s503_s11, %s3080_s8  ;;  %p3088_p12 = scmp.lt.s32.totalorder %s503_s11, %s503_s11 }
 0x1b7   : > { %p3089_p9 = scmp.lt.s32.totalorder %s3087_s22, %s3080_s8 }
 0x1b8   : > { %p3083_p7 = pnand %p3081_p13, %p3923_p1 }
 0x1b9   : > { %p3090_p8 = por %p3089_p9, %p3088_p12 }
 0x1ba   : > { %p3084_p10 = pneg %p3083_p7 }
 0x1bc   : > { %p3091_p11 = pnand %p3090_p8, %p3084_p10 }
 0x1be   : > { %3094 = shalt.err (!%p3091_p11)
}
 0x1bf   : > { %p4412_p2 = scmp.ne.s32.totalorder %s4405_s2, 0  ;;  %s4413_s23 = sld [smem:[#allocation46_spill]] }
 0x1c1   : > { %2475 = dma.hbm_to_vmem [thread:$0]  (!%p4412_p2), %s4411_s7, 16, %s503_s11, [#allocation7]  }
 0x1c5   : > { %s4414_s4 = smov %s4413_s23  ;;  %s3095_s28 = scalar_lea.hbm %s4413_s23, 16 }
 0x1c6   : > { %p3096_p0 = scmp.ne.s32.totalorder %s4414_s4, %s3095_s28  ;;  %p3102_p11 = scmp.lt.u32.totalorder %s3095_s28, %s4414_s4 }
 0x1c8   : > { %p3098_p6 = pnand %p3096_p0, %p3923_p1 }
 0x1ca   : > { %p3099_p5 = pneg %p3098_p6 }
 0x1cc   : > { %p3104_p3 = pnand %p3102_p11, %p3099_p5 }
 0x1ce   : > { %3107 = shalt.err (!%p3104_p3)
}
 0x1cf   : > { %s3108_s8 = scalar_lea.vmem %s514_s5, 16  ;;  %s3115_s11 = scalar_lea.vmem %s514_s5, 32 }
 0x1d0   : > { %p3109_p13 = scmp.ne.s32.totalorder %s514_s5, %s3108_s8  ;;  %p3116_p12 = scmp.lt.s32.totalorder %s514_s5, %s514_s5 }
 0x1d1   : > { %p3117_p9 = scmp.lt.s32.totalorder %s3115_s11, %s3108_s8 }
 0x1d2   : > { %p3111_p7 = pnand %p3109_p13, %p3923_p1 }
 0x1d3   : > { %p3118_p8 = por %p3117_p9, %p3116_p12 }
 0x1d4   : > { %p3112_p10 = pneg %p3111_p7 }
 0x1d6   : > { %p3119_p4 = pnand %p3118_p8, %p3112_p10 }
 0x1d8   : > { %3122 = shalt.err (!%p3119_p4)
}
 0x1d9   : > { %2478 = dma.hbm_to_vmem [thread:$0]  (!%p4412_p2), %s4414_s4, 16, %s514_s5, [#allocation10]  }
 0x1da   : > { %s4415_s29 = sld [smem:[#allocation58_spill]]  ;;  %s748_s28 = scalar_lea.vmem [#allocation22], %s3545_s20 }
 0x1db   : > { %s755_s6 = sshll.u32 %s748_s28, 4  ;;  %p4417_p4 = scmp.ne.s32.totalorder %s4379_s27, 0  ;;  %s756_s6 = int_to_ptr.vmem [resolvable:$true] %s755_s6 }
 0x1e0   : > { %s4416_s13 = smov %s4415_s29  ;;  %s4004_s23 = scalar_lea.hbm %s4415_s29, %s3582_s3 }
 0x1e1   : > { %s3123_s2 = scalar_lea.hbm %s4004_s23, 16  ;;  %s3128_s5 = scalar_lea.hbm %s4416_s13, 32 }
 0x1e2   : > { %p3124_p1 = scmp.ne.s32.totalorder %s4004_s23, %s3123_s2  ;;  %p3129_p2 = scmp.lt.u32.totalorder %s4004_s23, %s4416_s13 }
 0x1e3   : > { %p3130_p5 = scmp.lt.u32.totalorder %s3128_s5, %s3123_s2  ;;  %p3132_p3 = scmp.lt.u32.totalorder %s3123_s2, %s4004_s23 }
 0x1e4   : > { %p3126_p0 = pnand %p3124_p1, %p4417_p4 }
 0x1e5   : > { %p3131_p11 = por %p3130_p5, %p3129_p2 }
 0x1e6   : > { %p3127_p6 = pneg %p3126_p0 }
 0x1e7   : > { %p3133_p13 = por %p3132_p3, %p3131_p11 }
 0x1e9   : > { %p3134_p7 = pnand %p3133_p13, %p3127_p6 }
 0x1eb   : > { %3137 = shalt.err (!%p3134_p7)
}
 0x1ec   : > { %s3138_s20 = scalar_lea.vmem %s756_s6, 16  ;;  %s3306_s3 = smov [#allocation22]  }
 0x1ed   : > { %p3139_p10 = scmp.ne.s32.totalorder %s756_s6, %s3138_s20  ;;  %s3143_s11 = sshll.u32 %s3306_s3, 4  ;;  %s3144_s11 = int_to_ptr.vmem [resolvable:$false] %s3143_s11 }
 0x1ee   : > { %s3145_s22 = scalar_lea.vmem %s3144_s11, 32  ;;  %p3146_p8 = scmp.lt.s32.totalorder %s756_s6, %s3144_s11 }
 0x1ef   : > { %p3141_p12 = pnand %p3139_p10, %p4417_p4  ;;  %p3147_p1 = scmp.lt.s32.totalorder %s3145_s22, %s3138_s20 }
 0x1f1   : > { %p3142_p9 = pneg %p3141_p12  ;;  %p3148_p0 = por %p3147_p1, %p3146_p8 }
 0x1f3   : > { %p3149_p2 = pnand %p3148_p0, %p3142_p9 }
 0x1f5   : > { %3152 = shalt.err (!%p3149_p2)
}
 0x1f6   : > { %p4418_p5 = scmp.ne.s32.totalorder %s4377_s14, 0  ;;  %p4419_p6 = scmp.ne.s32.totalorder %s4404_s26, 0 }
 0x1f7   : > { %s766_s27 = sand.u32 (!%p4419_p6), 1, %s3466_s17   ;;  %s768_s16 = sand.u32 (!%p4419_p6), 1, %s3263_s25  }
 0x1f8   : > { %2518 = dma.hbm_to_vmem [thread:$0]  (!%p4418_p5), %s4004_s23, 16, %s756_s6, %s3553_s21  }
 0x1f9   : > { %764 = sbr.rel (%p4419_p6) target bundleno = 3443 (0xd73), region = 84  ;;  %s4031_s19 = sshll.u32 (!%p4419_p6), %s768_s16, 3 }
 0x1fa   : > { %s767_s1 = scalar_lea.sflag (!%p4419_p6), [#allocation4], %s766_s27  ;;  %s770_s29 = scalar_lea.vmem (!%p4419_p6), [#allocation3], %s4031_s19 }
 0x1fb   : > { %p4420_p4 = scmp.ne.s32.totalorder (!%p4419_p6), %s4401_s15, 0 }
 0x200   : > { %3226 = dma.done.wait (%p4420_p4), %s767_s1, 128  }
 0x201   : > { %3228 = vsyncadd (%p4420_p4), %s767_s1, 4294967168  ;;  %p4421_p11 = scmp.eq.s32.totalorder %s3466_s17, 0 }
 0x203   : > { %3230 = dma.done.wait (%p4421_p11), [#allocation7], 144   ;;  %p4422_p3 = pmov %p4421_p11 }
 0x205   : > { %3232 = vsyncadd (%p4422_p3), [#allocation7], 4294967152  ;;  %p4423_p13 = pmov %p4422_p3 }
 0x206   : > { %p4424_p7 = pmov %p4422_p3 }
 0x207   : > { %3234 = dma.done.wait (%p4423_p13), [#allocation10], 16  }
 0x208   : > { %3236 = vsyncadd (%p4424_p7), [#allocation10], 4294967280  ;;  %s4425_s14 = sld [smem:[#allocation30_spill]]  ;;  %p4426_p10 = scmp.ne.s32.totalorder %s4403_s18, 0 }
 0x20e   : > { %s4047_s21 = sand.u32 1, %s4425_s14  }
 0x20f   : > { %s790_s26 = scalar_lea.vmem [#allocation11], %s4047_s21 }
 0x210   : > { %3238 = dma.done.wait (%p4426_p10), %s767_s1, 1920  }
 0x211   : > { %3240 = vsyncadd (%p4426_p10), %s767_s1, 4294965376  ;;  %s4055_s17 = sshll.u32 %s4047_s21, 4  ;;  %s2257_s15 = sshll.u32 %s4047_s21, 6 }
 0x212   : > { %s798_s23 = scalar_lea.vmem [#allocation12], %s4047_s21  ;;  %s807_s28 = scalar_lea.vmem [#allocation13], %s4055_s17 }
 0x213   : > { %s815_s18 = scalar_lea.vmem [#allocation14], %s4047_s21  ;;  %s824_s6 = scalar_lea.vmem [#allocation15], %s4055_s17 }
 0x214   : > { %s832_s2 = scalar_lea.vmem [#allocation16], %s4047_s21  ;;  %s840_s30 = scalar_lea.vmem [#allocation17], %s4047_s21 }
 0x215   : > { %s848_s9 = scalar_lea.vmem [#allocation18], %s4047_s21  ;;  %s857_s5 = scalar_lea.vmem [#allocation19], %s4055_s17 }
 0x216   : > { %s865_s12 = scalar_lea.vmem [#allocation20], %s4047_s21  ;;  %s4067_s8 = scalar_lea.vmem [#allocation21], %s2257_s15 }
 0x217   : > { %s882_s20 = scalar_lea.vmem [#allocation22], %s4047_s21  ;;  %s4071_s3 = scalar_lea.vmem [#allocation23], %s4031_s19 }
 0x218   : > { %s4427_s11 = sld [smem:[#allocation33_spill]] }
 0x21e   : > { %p2259_p12 = scmp.ne.s32.totalorder %s4427_s11, 0 }
 0x21f   : > { %v988_v0 = vld [vmem:[%s770_s29] sm:$0x1f] (!%p2259_p12)  ;;  %v989_v1 = vld [vmem:[#allocation6] sm:$0x1f] (!%p2259_p12)  ;;  %vm993_vm0 = vcmask (!%p2259_p12), 258048  }
 0x220   : > { %987 = sbr.rel (%p2259_p12) target bundleno = 860 (0x35c), region = 152  ;;  %v990_v2 = vadd.f32 (!%p2259_p12), %v989_v1, %v988_v0  ;;  %v2260_v13 = vld [vmem:[#allocation8] ss:$0 sm:$0xff] (!%p2259_p12)  ;;  %v2261_v15 = vld [vmem:[#allocation9] ss:$0 sm:$0xff] (!%p2259_p12) }
 0x222   : > { %v994_v3 = vsel (!%p2259_p12), %vm993_vm0, %v990_v2, 0.0 }
 0x223   : > { %995 = vadd.xlane.f32.xlu0 (!%p2259_p12), %v994_v3 }
 0x2b0   : > { %v996_v4 = vpop.xlane.xlu0 %995 }
 0x2b1   : > { %v998_v5 = vmul.f32 0.03125, %v996_v4 }
 0x2b3   : > { %v999_v6 = vsub.f32 %v990_v2, %v998_v5 }
 0x2b5   : > { %v1000_v7 = vmul.f32 %v999_v6, %v999_v6 }
 0x2b7   : > { %v1001_v8 = vsel %vm993_vm0, %v1000_v7, 0.0 }
 0x2b8   : > { %1002 = vadd.xlane.f32.xlu0 %v1001_v8 }
 0x345   : > { %v1003_v9 = vpop.xlane.xlu0 %1002 }
 0x346   : > { %v1004_v10 = vmul.f32 0.03125, %v1003_v9 }
 0x348   : > { %v1005_v11 = vadd.f32 1e-05, %v1004_v10 }
 0x34a   : > { %2641 = vrsqrt.f32 %v1005_v11 }
 0x354   : > { %v2642_v12 = vpop.eup %2641 }
 0x355   : > { %v1007_v14 = vmul.f32 %v2642_v12, %v999_v6 }
 0x357   : > { %v1014_v16 = vmul.f32 %v2260_v13, %v1007_v14 }
 0x359   : > { %v1021_v17 = vadd.f32 %v2261_v15, %v1014_v16 }
 0x35b   : > { %1022 = vst.msk [vmem:[%s4071_s3] sm:$0x1f] %vm993_vm0, %v1021_v17 }
 0x35c PF: > { %vm1026_vm1 = vcmask 258048   ;;  %v2643_v25 = vld [vmem:[%s807_s28] sm:$0xff]   ;;  %v3307_v26 = vmov 0.0   ;;  %vm3308_vm2 = vmmov 0   ;;  %v2644_v27 = vld [vmem:[%s807_s28 + $0x8] sm:$0xff]   ;;  %vm1079_vm3 = vcmask 261120  }
 0x35d   : > { %2337 = vmatprep.subr.bf16.mxu0 %v3307_v26  ;;  %2341 = vmatprep.mubr.msk.bf16.mxu0 %vm3308_vm2, %v3307_v26  ;;  %v2262_v32 = vld [vmem:[%s790_s26] ss:$0 sm:$0xff]  ;;  %s3309_s22 = smov 120   ;;  %s3310_s27 = smov 96   ;;  %vm1127_vm4 = vcmask 64512   ;;  %vm1175_vm5 = vcmask 36864  }
 0x35e   : > { %2338 = vmatpush3.bf16.msra.mxu0 %v2643_v25  ;;  %2357 = vmatprep.subr.bf16.mxu1 %v3307_v26  ;;  %v2263_v34 = vld [vmem:[%s798_s23] ss:$0 sm:$0xff]  ;;  %s3311_s19 = smov 88   ;;  %s3312_s1 = smov 80   ;;  %vm1194_vm6 = vcmask 1041408   ;;  %vm1195_vm7 = vcmask 1042432  }
 0x35f   : > { %2339 = vmatprep.subr.bf16.mxu0 %v3307_v26  ;;  %2359 = vmatprep.mubr.msk.bf16.mxu1 %vm3308_vm2, %v3307_v26  ;;  %v2264_v38 = vld [vmem:[%s815_s18] ss:$0 sm:$0xff]  ;;  %s3313_s29 = smov 112   ;;  %s3314_s14 = smov 72   ;;  %vm1190_vm8 = vcmask 39936   ;;  %vm1241_vm9 = vcmask 61440  }
 0x360   : > { %s3315_s26 = smov 104   ;;  %s3316_s15 = smov 56   ;;  %vm1358_vm10 = vcmask 127040   ;;  %vm1475_vm11 = vcmask 192640   ;;  %vm1592_vm12 = vcmask 258240  }
 0x361   : > { %s3317_s23 = smov 64   ;;  %s3318_s28 = smov 48  }
 0x362   : > { %v4079_v18 = vld [vmem:[%s4071_s3] sm:$0x1f]  ;;  %2340 = vmatpush3.bf16.msra.mxu0 %v2644_v27  ;;  %s3319_s18 = smov 40   ;;  %s3321_s11 = smov 8  }
 0x363   : > { %v1027_v19 = vsel %vm1026_vm1, %v4079_v18, 0.0  ;;  %2345 = vmatprep.subr.bf16.mxu0 %v3307_v26  ;;  %s4428_s17 = sld [smem:[#allocation34_spill]]  ;;  %s1881_s21 = scalar_lea.sflag [#allocation5], %s768_s16 }
 0x364   : > { %1028 = vadd.xlane.f32.xlu0 %v1027_v19 }
 0x3f1   : > { %v1029_v20 = vpop.xlane.xlu0 %1028 }
 0x3f2   : > { %v1031_v21 = vmul.f32 0.03125, %v1029_v20 }
 0x3f4   : > { %v1032_v22 = vsub.f32 %v4079_v18, %v1031_v21 }
 0x3f6   : > { %v1033_v23 = vmul.f32 %v1032_v22, %v1032_v22 }
 0x3f8   : > { %v1034_v24 = vsel %vm1026_vm1, %v1033_v23, 0.0 }
 0x3f9   : > { %1035 = vadd.xlane.f32.xlu0 %v1034_v24 }
 0x486   : > { %v1036_v28 = vpop.xlane.xlu0 %1035 }
 0x487   : > { %v1037_v29 = vmul.f32 0.03125, %v1036_v28 }
 0x489   : > { %v1038_v30 = vadd.f32 1e-05, %v1037_v29 }
 0x48b   : > { %2657 = vrsqrt.f32 %v1038_v30 }
 0x495   : > { %v2658_v31 = vpop.eup %2657 }
 0x496   : > { %v1040_v33 = vmul.f32 %v2658_v31, %v1032_v22 }
 0x498   : > { %v1047_v35 = vmul.f32 %v2262_v32, %v1040_v33 }
 0x49a   : > { %v1054_v36 = vadd.f32 %v2263_v34, %v1047_v35 }
 0x49c   : > { %v1055_v37 = vpack.c.bf16 %v1054_v36, %v1054_v36 }
 0x49e   : > { %2342 = vmatmul.mubr.msk.bf16.vlgmr.msra.gmra.mrb[0].mxu0 %vm1079_vm3, %v1055_v37 }
 0x49f   : > { %2347 = vmatprep.mubr.msk.bf16.mxu0 %vm3308_vm2, %v3307_v26 }
 0x571   : > { %v1117_v39 = vpop.f32.mrb[0].mxu0 }
 0x572   : > { %v1118_v40 = vadd.f32 %v2264_v38, %v1117_v39  ;;  %v2343_v41 = vpop.f32.mrb[1].mxu0 }
 0x573   : > { %v1120_v42 = vpop.f32.mrb[2].mxu0 }
 0x574   : > { %v4106_v43 = vpack.c.bf16 %v1118_v40, %v1118_v40  ;;  %v2344_v44 = vpop.f32.mrb[3].mxu0  ;;  %v3320_v40 = vmov 65535  }
 0x575   : > { %v1196_v41 = vsel %vm1194_vm6, 4294967295, %v3320_v40  ;;  %v2649_v40 = vld [vmem:[%s4067_s8] sm:$0xff]  }
 0x576   : > { %1243 = vrot.lane.b32.xlu0 %v4106_v43, %s3309_s22  ;;  %1125 = vrot.lane.b32.xlu1 %v4106_v43, %s3310_s27  ;;  %v1197_v42 = vsel %vm1195_vm7, %v1196_v41, 0  ;;  %s3322_s22 = smov 16   ;;  %s3323_s27 = smov 24   ;;  %v2650_v41 = vld [vmem:[%s4067_s8 + $0x8] sm:$0xff]  }
 0x57a   : > { %1245 = vrot.lane.b32.xlu1 %v4106_v43, %s3311_s19  ;;  %s3324_s19 = smov [#allocation23]  }
 0x57e   : > { %1362 = vrot.lane.b32.xlu1 %v4106_v43, %s3312_s1  ;;  %s3157_s1 = sshll.u32 %s3324_s19, 4  ;;  %s3158_s1 = int_to_ptr.vmem [resolvable:$false] %s3157_s1 }
 0x582   : > { %1360 = vrot.lane.b32.xlu1 %v4106_v43, %s3313_s29  ;;  %s3159_s29 = scalar_lea.vmem %s3158_s1, 256 }
 0x586   : > { %1479 = vrot.lane.b32.xlu1 %v4106_v43, %s3314_s14 }
 0x58a   : > { %1477 = vrot.lane.b32.xlu1 %v4106_v43, %s3315_s26 }
 0x5e8   : > { %v1126_v45 = vpop.permute.xlu1 %1125  ;;  %v1244_v50 = vpop.permute.xlu0 %1243 }
 0x5e9   : > { %v1132_v46 = vsel %vm1127_vm4, %v1126_v45, 0 }
 0x5ea   : > { %2346 = vmatpush3.bf16.xpose.msra.mxu0 %v1132_v46 }
 0x5eb   : > { %2351 = vmatprep.subr.bf16.mxu0 %v3307_v26 }
 0x5ec   : > { %v1246_v47 = vpop.permute.xlu1 %1245 }
 0x5ed   : > { %v1251_v48 = vsel %vm1127_vm4, %v1246_v47, 0 }
 0x5ee   : > { %2358 = vmatpush3.bf16.xpose.msra.mxu1 %v1251_v48 }
 0x5ef   : > { %2369 = vmatprep.subr.bf16.mxu1 %v3307_v26 }
 0x5f0   : > { %v1363_v49 = vpop.permute.xlu1 %1362 }
 0x5f1   : > { %2348 = vmatmul.mubr.msk.bf16.vlgmr.msra.gmra.mrb[4].mxu0 %vm1127_vm4, %v4106_v43  ;;  %v1368_v52 = vsel %vm1127_vm4, %v1363_v49, 0 }
 0x5f2   : > { %2353 = vmatprep.mubr.msk.bf16.mxu0 %vm3308_vm2, %v3307_v26 }
 0x5f4   : > { %v1361_v51 = vpop.permute.xlu1 %1360 }
 0x5f5   : > { %2360 = vmatmul.mubr.msk.bf16.vlgmr.msra.gmra.mrb[0].mxu1 %vm1127_vm4, %v1244_v50 }
 0x5f6   : > { %2370 = vmatpush3.bf16.xpose.msra.mxu1 %v1368_v52  ;;  %2371 = vmatprep.mubr.msk.bf16.mxu1 %vm3308_vm2, %v3307_v26 }
 0x5f7   : > { %2381 = vmatprep.subr.bf16.mxu1 %v3307_v26 }
 0x5f8   : > { %v1480_v53 = vpop.permute.xlu1 %1479 }
 0x5f9   : > { %v1485_v54 = vsel %vm1127_vm4, %v1480_v53, 0 }
 0x5fc   : > { %v1478_v55 = vpop.permute.xlu1 %1477 }
 0x5fd   : > { %2372 = vmatmul.mubr.msk.bf16.vlgmr.msra.gmra.mrb[4].mxu1 %vm1127_vm4, %v1361_v51 }
 0x5fe   : > { %2382 = vmatpush3.bf16.xpose.msra.mxu1 %v1485_v54  ;;  %2383 = vmatprep.mubr.msk.bf16.mxu1 %vm3308_vm2, %v3307_v26 }
 0x5ff   : > { %2393 = vmatprep.subr.bf16.mxu1 %v3307_v26 }
 0x605   : > { %2384 = vmatmul.mubr.msk.bf16.vlgmr.msra.gmra.mrb[8].mxu1 %vm1127_vm4, %v1478_v55 }
 0x606   : > { %2397 = vmatprep.mubr.msk.bf16.mxu1 %vm3308_vm2, %v3307_v26 }
 0x6c4   : > { %v1168_v56 = vpop.f32.mrb[4].mxu0 }
 0x6c5   : > { %v1174_v57 = vmul.f32 0.35355338, %v1168_v56  ;;  %v2349_v58 = vpop.f32.mrb[5].mxu0 }
 0x6c6   : > { %v1171_v59 = vpop.f32.mrb[6].mxu0 }
 0x6c7   : > { %v2350_v60 = vpop.f32.mrb[7].mxu0  ;;  %v1176_v61 = vsel %vm1175_vm5, %v1174_v57, -inf }
 0x6c8   : > { %v1287_v62 = vpop.f32.mrb[0].mxu1  ;;  %1177 = vmax.xlane.f32.xlu1 %v1176_v61 }
 0x6c9   : > { %v1293_v63 = vmul.f32 0.35355338, %v1287_v62  ;;  %v2361_v0 = vpop.f32.mrb[1].mxu1 }
 0x6ca   : > { %v1290_v1 = vpop.f32.mrb[2].mxu1 }
 0x6cb   : > { %v2362_v2 = vpop.f32.mrb[3].mxu1  ;;  %v1294_v3 = vsel %vm1175_vm5, %v1293_v63, -inf }
 0x6cc   : > { %1295 = vmax.xlane.f32.xlu0 %v1294_v3 }
 0x6d0   : > { %v1404_v4 = vpop.f32.mrb[4].mxu1 }
 0x6d1   : > { %v1410_v5 = vmul.f32 0.35355338, %v1404_v4  ;;  %v2373_v6 = vpop.f32.mrb[5].mxu1 }
 0x6d2   : > { %v1407_v7 = vpop.f32.mrb[6].mxu1 }
 0x6d3   : > { %v2374_v8 = vpop.f32.mrb[7].mxu1  ;;  %v1411_v9 = vsel %vm1175_vm5, %v1410_v5, -inf }
 0x6d4   : > { %1412 = vmax.xlane.f32.xlu1 %v1411_v9  ;;  %v2645_v9 = vld [vmem:[%s824_s6] sm:$0xff]  }
 0x6d5   : > { %2394 = vmatpush3.bf16.msra.mxu1 %v2645_v9 }
 0x6d6   : > { %2395 = vmatprep.subr.bf16.mxu1 %v3307_v26 }
 0x6d8   : > { %v1521_v10 = vpop.f32.mrb[8].mxu1 }
 0x6d9   : > { %v1527_v11 = vmul.f32 0.35355338, %v1521_v10  ;;  %v2385_v12 = vpop.f32.mrb[9].mxu1  ;;  %v2646_v10 = vld [vmem:[%s824_s6 + $0x8] sm:$0xff]   ;;  %s4429_s6 = sld [smem:[#allocation41_spill]] }
 0x6da   : > { %v1524_v13 = vpop.f32.mrb[10].mxu1  ;;  %2396 = vmatpush3.bf16.msra.mxu1 %v2646_v10 }
 0x6db   : > { %v2386_v14 = vpop.f32.mrb[11].mxu1  ;;  %v1528_v15 = vsel %vm1175_vm5, %v1527_v11, -inf  ;;  %2409 = vmatprep.subr.bf16.mxu1 %v3307_v26 }
 0x6dc   : > { %1529 = vmax.xlane.f32.xlu0 %v1528_v15 }
 0x6df   : > { %p4431_p8 = scmp.ne.s32.totalorder %s4429_s6, 0 }
 0x755   : > { %v1178_v16 = vpop.xlane.xlu1 %1177 }
 0x756   : > { %v1179_v17 = vsub.f32 %v1174_v57, %v1178_v16 }
 0x758   : > { %v1180_v19 = vmul.f32 1.442695, %v1179_v17 }
 0x759   : > { %v1296_v20 = vpop.xlane.xlu0 %1295 }
 0x75a   : > { %2659 = vpow2.f32 %v1180_v19  ;;  %v1297_v21 = vsub.f32 %v1293_v63, %v1296_v20 }
 0x75c   : > { %v1298_v22 = vmul.f32 1.442695, %v1297_v21 }
 0x75e   : > { %2661 = vpow2.f32 %v1298_v22 }
 0x761   : > { %v1413_v28 = vpop.xlane.xlu1 %1412 }
 0x762   : > { %v1414_v29 = vsub.f32 %v1410_v5, %v1413_v28 }
 0x764   : > { %v2660_v23 = vpop.eup %2659  ;;  %v1415_v31 = vmul.f32 1.442695, %v1414_v29 }
 0x765   : > { %v1182_v24 = vsel %vm1175_vm5, %v2660_v23, 0.0 }
 0x766   : > { %1183 = vadd.xlane.f32.xlu1 %v1182_v24  ;;  %2663 = vpow2.f32 %v1415_v31 }
 0x768   : > { %v2662_v25 = vpop.eup %2661 }
 0x769   : > { %v1300_v27 = vsel %vm1175_vm5, %v2662_v25, 0.0  ;;  %v1530_v30 = vpop.xlane.xlu0 %1529 }
 0x76a   : > { %1301 = vadd.xlane.f32.xlu0 %v1300_v27  ;;  %v1531_v32 = vsub.f32 %v1527_v11, %v1530_v30  ;;  %v2279_v27 = vld [vmem:[%s832_s2] ss:$0 sm:$0xff]  ;;  %s2296_s2 = sshll.u32 %s4428_s17, 7 }
 0x76c   : > { %v1532_v33 = vmul.f32 1.442695, %v1531_v32 }
 0x76e   : > { %2665 = vpow2.f32 %v1532_v33 }
 0x770   : > { %v2664_v34 = vpop.eup %2663 }
 0x771   : > { %v1417_v35 = vsel %vm1175_vm5, %v2664_v34, 0.0 }
 0x777   : > { %1306 = vrot.lane.b32.xlu1 %v4106_v43, %s3316_s15 }
 0x778   : > { %v2666_v36 = vpop.eup %2665 }
 0x779   : > { %v1534_v37 = vsel %vm1175_vm5, %v2666_v36, 0.0 }
 0x780   : > { %1188 = vrot.lane.b32.xlu0 %v4106_v43, %s3317_s23 }
 0x784   : > { %1423 = vrot.lane.b32.xlu0 %v4106_v43, %s3318_s28 }
 0x79b   : > { %1418 = vadd.xlane.f32.xlu1 %v1417_v35 }
 0x79f   : > { %1535 = vadd.xlane.f32.xlu1 %v1534_v37 }
 0x7b0   : > { %1540 = vrot.lane.b32.xlu1 %v4106_v43, %s3319_s18 }
 0x7f3   : > { %v1184_v38 = vpop.xlane.xlu1 %1183 }
 0x7f4   : > { %2667 = vrcp.f32 %v1184_v38 }
 0x7f7   : > { %v1302_v39 = vpop.xlane.xlu0 %1301  ;;  %v1307_v48 = vpop.permute.xlu1 %1306 }
 0x7f8   : > { %2669 = vrcp.f32 %v1302_v39  ;;  %v1312_v50 = vand.u32 %v1307_v48, %v1197_v42  ;;  %v2648_v39 = vld [vmem:[%s857_s5 + $0x8] sm:$0xff]   ;;  %v2280_v48 = vld [vmem:[%s840_s30] ss:$0 sm:$0xff]  ;;  %s1894_s30 = sshll.u32 %s4071_s3, 4  ;;  %s4219_s30 = int_to_ptr.vmem [resolvable:$true] %s1894_s30 }
 0x7f9   : > { %p3160_p2 = scmp.lt.s32.totalorder %s4219_s30, %s3158_s1 }
 0x7fb   : > { %v1189_v44 = vpop.permute.xlu0 %1188 }
 0x7fc   : > { %v1199_v45 = vand.u32 %v1197_v42, %v1189_v44 }
 0x7fe   : > { %v2668_v46 = vpop.eup %2667  ;;  %2352 = vmatpush3.bf16.msra.mxu0 %v1199_v45 }
 0x7ff   : > { %v1186_v47 = vmul.f32 %v2668_v46, %v2660_v23  ;;  %2363 = vmatprep.subr.bf16.mxu0 %v3307_v26  ;;  %v1424_v52 = vpop.permute.xlu0 %1423 }
 0x800   : > { %v1429_v54 = vand.u32 %v1424_v52, %v1197_v42 }
 0x801   : > { %v1187_v49 = vpack.c.bf16 %v1186_v47, %v1186_v47 }
 0x802   : > { %v2670_v43 = vpop.eup %2669 }
 0x803   : > { %2354 = vmatmul.mubr.msk.bf16.vlgmr.msra.gmra.mrb[8].mxu0 %vm1190_vm8, %v1187_v49  ;;  %v1304_v51 = vmul.f32 %v2670_v43, %v2662_v25  ;;  %v2281_v43 = vld [vmem:[%s848_s9] ss:$0 sm:$0xff] }
 0x804   : > { %2364 = vmatpush3.bf16.msra.mxu0 %v1312_v50  ;;  %2365 = vmatprep.mubr.msk.bf16.mxu0 %vm3308_vm2, %v3307_v26 }
 0x805   : > { %2375 = vmatprep.subr.bf16.mxu0 %v3307_v26  ;;  %v1305_v53 = vpack.c.bf16 %v1304_v51, %v1304_v51 }
 0x80b   : > { %2366 = vmatmul.mubr.msk.bf16.vlgmr.msra.gmra.mrb[12].mxu0 %vm1190_vm8, %v1305_v53  ;;  %v2652_v53 = vld [vmem:[%s4067_s8 + $0x18] sm:$0xff]  }
 0x80c   : > { %2376 = vmatpush3.bf16.msra.mxu0 %v1429_v54  ;;  %2377 = vmatprep.mubr.msk.bf16.mxu0 %vm3308_vm2, %v3307_v26  ;;  %v2653_v54 = vld [vmem:[%s4067_s8 + $0x20] sm:$0xff]  }
 0x80d   : > { %2387 = vmatprep.subr.bf16.mxu0 %v3307_v26 }
 0x828   : > { %v1419_v55 = vpop.xlane.xlu1 %1418 }
 0x829   : > { %2671 = vrcp.f32 %v1419_v55  ;;  %v2654_v55 = vld [vmem:[%s4067_s8 + $0x28] sm:$0xff]  }
 0x82c   : > { %v1536_v56 = vpop.xlane.xlu1 %1535 }
 0x82d   : > { %2673 = vrcp.f32 %v1536_v56  ;;  %v2655_v56 = vld [vmem:[%s4067_s8 + $0x30] sm:$0xff]  }
 0x830   : > { %v1541_v59 = vpop.permute.xlu1 %1540 }
 0x831   : > { %v1546_v62 = vand.u32 %v1541_v59, %v1197_v42  ;;  %v2651_v42 = vld [vmem:[%s4067_s8 + $0x10] sm:$0xff]  }
 0x833   : > { %v2672_v57 = vpop.eup %2671 }
 0x834   : > { %v1421_v58 = vmul.f32 %v2672_v57, %v2664_v34  ;;  %v2656_v57 = vld [vmem:[%s4067_s8 + $0x38] sm:$0xff]  }
 0x836   : > { %v1422_v60 = vpack.c.bf16 %v1421_v58, %v1421_v58  ;;  %v2282_v58 = vld [vmem:[%s865_s12] ss:$0 sm:$0xff]  ;;  %s4430_s12 = sld [smem:[#allocation59_spill]] }
 0x837   : > { %v2674_v61 = vpop.eup %2673 }
 0x838   : > { %2378 = vmatmul.mubr.msk.bf16.vlgmr.msra.gmra.mrb[16].mxu0 %vm1190_vm8, %v1422_v60  ;;  %v1538_v63 = vmul.f32 %v2674_v61, %v2666_v36 }
 0x839   : > { %2388 = vmatpush3.bf16.msra.mxu0 %v1546_v62  ;;  %2389 = vmatprep.mubr.msk.bf16.mxu0 %vm3308_vm2, %v3307_v26 }
 0x83a   : > { %2401 = vmatprep.subr.bf16.mxu0 %v3307_v26  ;;  %v1539_v0 = vpack.c.bf16 %v1538_v63, %v1538_v63 }
 0x83c   : > { %s4217_s8 = scalar_lea.hbm %s4430_s12, %s2296_s2 }
 0x840   : > { %2390 = vmatmul.mubr.msk.bf16.vlgmr.msra.gmra.mrb[20].mxu0 %vm1190_vm8, %v1539_v0 }
 0x841   : > { %2405 = vmatprep.mubr.msk.bf16.mxu0 %vm3308_vm2, %v3307_v26 }
 0x8d6   : > { %v1235_v1 = vpop.f32.mrb[8].mxu0 }
 0x8d7   : > { %1242 = vst.msk [vmem:[#allocation2] sm:$0x1f] %vm1241_vm9, %v1235_v1  ;;  %v2355_v2 = vpop.f32.mrb[9].mxu0 }
 0x8d8   : > { %v1238_v3 = vpop.f32.mrb[10].mxu0 }
 0x8d9   : > { %v2356_v4 = vpop.f32.mrb[11].mxu0 }
 0x8de   : > { %v1348_v5 = vpop.f32.mrb[12].mxu0 }
 0x8df   : > { %1355 = vrot.lane.b32.xlu0 %v1348_v5, %s3321_s11  ;;  %v2367_v6 = vpop.f32.mrb[13].mxu0 }
 0x8e0   : > { %v1351_v7 = vpop.f32.mrb[14].mxu0  ;;  %v2294_v6 = vld [vmem:[%s882_s20] ss:$0 sm:$0xff]  ;;  %s3153_s20 = scalar_lea.vmem %s4219_s30, 128 }
 0x8e1   : > { %v2368_v8 = vpop.f32.mrb[15].mxu0  ;;  %p3154_p9 = scmp.ne.s32.totalorder %s4219_s30, %s3153_s20  ;;  %p3161_p5 = scmp.lt.s32.totalorder %s3159_s29, %s3153_s20 }
 0x8e3   : > { %p3155_p1 = pnand %p3154_p9, %p4431_p8  ;;  %p3162_p6 = por %p3161_p5, %p3160_p2 }
 0x8e5   : > { %p3156_p0 = pneg %p3155_p1 }
 0x8e7   : > { %p3163_p4 = pnand %p3162_p6, %p3156_p0 }
 0x90b   : > { %v1465_v11 = vpop.f32.mrb[16].mxu0 }
 0x90c   : > { %1472 = vrot.lane.b32.xlu1 %v1465_v11, %s3322_s22  ;;  %v2379_v12 = vpop.f32.mrb[17].mxu0 }
 0x90d   : > { %v1468_v13 = vpop.f32.mrb[18].mxu0 }
 0x90e   : > { %v2380_v14 = vpop.f32.mrb[19].mxu0 }
 0x913   : > { %v1582_v15 = vpop.f32.mrb[20].mxu0 }
 0x914   : > { %1589 = vrot.lane.b32.xlu0 %v1582_v15, %s3323_s27  ;;  %v2391_v16 = vpop.f32.mrb[21].mxu0 }
 0x915   : > { %v1585_v17 = vpop.f32.mrb[22].mxu0 }
 0x916   : > { %v2392_v19 = vpop.f32.mrb[23].mxu0 }
 0x951   : > { %v1356_v20 = vpop.permute.xlu0 %1355 }
 0x952   : > { %1359 = vst.msk [vmem:[#allocation2] sm:$0x1f] %vm1358_vm10, %v1356_v20 }
 0x97e   : > { %v1473_v21 = vpop.permute.xlu1 %1472 }
 0x97f   : > { %1476 = vst.msk [vmem:[#allocation2] sm:$0x1f] %vm1475_vm11, %v1473_v21 }
 0x986   : > { %v1590_v22 = vpop.permute.xlu0 %1589 }
 0x987   : > { %1593 = vst.msk [vmem:[#allocation2] sm:$0x1f] %vm1592_vm12, %v1590_v22 }
 0x98e   : > { %v1594_v23 = vld [vmem:[#allocation2] sm:$0x1f] }
 0x98f   : > { %v1595_v24 = vpack.c.bf16 %v1594_v23, %v1594_v23 }
 0x991   : > { %2398 = vmatmul.mubr.msk.bf16.vlgmr.msra.gmra.mrb[12].mxu1 %vm1079_vm3, %v1595_v24 }
 0x992   : > { %2425 = vmatprep.mubr.msk.bf16.mxu1 %vm3308_vm2, %v3307_v26  ;;  %2410 = vmatpush3.bf16.msra.mxu1 %v2649_v40 }
 0x993   : > { %2411 = vmatprep.subr.bf16.mxu1 %v3307_v26 }
 0x996   : > { %2412 = vmatpush3.bf16.msra.mxu1 %v2650_v41 }
 0x997   : > { %2413 = vmatprep.subr.bf16.mxu1 %v3307_v26 }
 0x99a   : > { %2414 = vmatpush3.bf16.msra.mxu1 %v2651_v42 }
 0x99b   : > { %2415 = vmatprep.subr.bf16.mxu1 %v3307_v26 }
 0x99e   : > { %2416 = vmatpush3.bf16.msra.mxu1 %v2652_v53 }
 0x99f   : > { %2417 = vmatprep.subr.bf16.mxu1 %v3307_v26 }
 0x9a2   : > { %2418 = vmatpush3.bf16.msra.mxu1 %v2653_v54 }
 0x9a3   : > { %2419 = vmatprep.subr.bf16.mxu1 %v3307_v26 }
 0x9a6   : > { %2420 = vmatpush3.bf16.msra.mxu1 %v2654_v55 }
 0x9a7   : > { %2421 = vmatprep.subr.bf16.mxu1 %v3307_v26 }
 0x9aa   : > { %2422 = vmatpush3.bf16.msra.mxu1 %v2655_v56 }
 0x9ab   : > { %2423 = vmatprep.subr.bf16.mxu1 %v3307_v26 }
 0x9ae   : > { %2424 = vmatpush3.bf16.msra.mxu1 %v2656_v57 }
 0xa64   : > { %v1649_v25 = vpop.f32.mrb[12].mxu1 }
 0xa65   : > { %v1655_v28 = vadd.f32 %v1649_v25, %v4079_v18  ;;  %v2399_v29 = vpop.f32.mrb[13].mxu1  ;;  %v2647_v18 = vld [vmem:[%s857_s5] sm:$0xff]  }
 0xa66   : > { %v1652_v30 = vpop.f32.mrb[14].mxu1  ;;  %2402 = vmatpush3.bf16.msra.mxu0 %v2647_v18 }
 0xa67   : > { %v4176_v31 = vadd.f32 %v2279_v27, %v1655_v28  ;;  %v2400_v32 = vpop.f32.mrb[15].mxu1  ;;  %2403 = vmatprep.subr.bf16.mxu0 %v3307_v26 }
 0xa69   : > { %v1666_v33 = vsel %vm1026_vm1, %v4176_v31, 0.0 }
 0xa6a   : > { %1667 = vadd.xlane.f32.xlu1 %v1666_v33  ;;  %2404 = vmatpush3.bf16.msra.mxu0 %v2648_v39 }
 0xaf7   : > { %v1668_v34 = vpop.xlane.xlu1 %1667 }
 0xaf8   : > { %v1669_v35 = vmul.f32 0.03125, %v1668_v34 }
 0xafa   : > { %v1670_v36 = vsub.f32 %v4176_v31, %v1669_v35 }
 0xafc   : > { %v1671_v37 = vmul.f32 %v1670_v36, %v1670_v36 }
 0xafe   : > { %v1672_v38 = vsel %vm1026_vm1, %v1671_v37, 0.0 }
 0xaff   : > { %1673 = vadd.xlane.f32.xlu0 %v1672_v38 }
 0xb8c   : > { %v1674_v44 = vpop.xlane.xlu0 %1673 }
 0xb8d   : > { %v1675_v45 = vmul.f32 0.03125, %v1674_v44 }
 0xb8f   : > { %v1676_v46 = vadd.f32 1e-05, %v1675_v45 }
 0xb91   : > { %2675 = vrsqrt.f32 %v1676_v46 }
 0xb9b   : > { %v2676_v47 = vpop.eup %2675 }
 0xb9c   : > { %v1678_v49 = vmul.f32 %v2676_v47, %v1670_v36 }
 0xb9e   : > { %v1685_v50 = vmul.f32 %v2280_v48, %v1678_v49 }
 0xba0   : > { %v1692_v51 = vadd.f32 %v2281_v43, %v1685_v50 }
 0xba2   : > { %v1693_v52 = vpack.c.bf16 %v1692_v51, %v1692_v51 }
 0xba4   : > { %2406 = vmatmul.mubr.msk.bf16.vlgmr.msra.gmra.mrb[24].mxu0 %vm1079_vm3, %v1693_v52 }
 0xc77   : > { %v1754_v59 = vpop.f32.mrb[24].mxu0 }
 0xc78   : > { %v1755_v60 = vadd.f32 %v2282_v58, %v1754_v59  ;;  %v2407_v61 = vpop.f32.mrb[25].mxu0 }
 0xc79   : > { %v1757_v62 = vpop.f32.mrb[26].mxu0 }
 0xc7a   : > { %v1761_v63 = vmul.f32 0.70710677, %v1755_v60  ;;  %v2408_v0 = vpop.f32.mrb[27].mxu0  ;;  %v1760_v2 = vmul.f32 0.5, %v1755_v60 }
 0xc7c   : > { %2677 = verf.f32 %v1761_v63 }
 0xc86   : > { %v2678_v1 = vpop.eup %2677 }
 0xc87   : > { %v1763_v3 = vadd.f32 1.0, %v2678_v1 }
 0xc89   : > { %v1764_v26 = vmul.f32 %v1763_v3, %v1760_v2 }
 0xc8b   : > { %v1765_v4 = vpack.c.bf16 %v1764_v26, %v1764_v26 }
 0xc8d   : > { %2426 = vmatmul.mubr.bf16.vlgmr.msra.gmra.mrb[16].mxu1 %v1765_v4 }
 0xd60   : > { %v1864_v5 = vpop.f32.mrb[16].mxu1 }
 0xd61   : > { %v1870_v7 = vadd.f32 %v1864_v5, %v4176_v31  ;;  %v2427_v8 = vpop.f32.mrb[17].mxu1 }
 0xd62   : > { %v1867_v9 = vpop.f32.mrb[18].mxu1 }
 0xd63   : > { %v1878_v10 = vadd.f32 %v2294_v6, %v1870_v7  ;;  %v2428_v11 = vpop.f32.mrb[19].mxu1 }
 0xd65   : > { %1879 = vst.msk [vmem:[%s4071_s3] sm:$0x1f] %vm1026_vm1, %v1878_v10 }
 0xd66   : > { %3166 = shalt.err (!%p3163_p4)
}
 0xd67   : > { %s3167_s16 = scalar_lea.hbm %s4217_s8, 128  ;;  %s3171_s26 = scalar_lea.hbm %s4430_s12, 256 }
 0xd68   : > { %p3168_p11 = scmp.ne.s32.totalorder %s4217_s8, %s3167_s16  ;;  %p3172_p7 = scmp.lt.u32.totalorder %s4217_s8, %s4430_s12 }
 0xd69   : > { %p3173_p10 = scmp.lt.u32.totalorder %s3171_s26, %s3167_s16  ;;  %p3175_p9 = scmp.lt.u32.totalorder %s3167_s16, %s4217_s8 }
 0xd6a   : > { %p3169_p3 = pnand %p3168_p11, %p4431_p8 }
 0xd6b   : > { %p3174_p12 = por %p3173_p10, %p3172_p7 }
 0xd6c   : > { %p3170_p13 = pneg %p3169_p3 }
 0xd6d   : > { %p3176_p1 = por %p3175_p9, %p3174_p12 }
 0xd6f   : > { %p3177_p0 = pnand %p3176_p1, %p3170_p13 }
 0xd71   : > { %3180 = shalt.err (!%p3177_p0)
}
 0xd72   : > { %2467 = dma.vmem_to_hbm [thread:$0]  (%p4431_p8), %s4219_s30, 128, %s4217_s8, %s1881_s21  }
 0xd73 PF: > { %s4432_s28 = sld [smem:[#allocation42_spill]]  ;;  %p2530_p2 = scmp.ge.s32.totalorder %s3287_s0, 2 }
 0xd74   : > { %s1906_s18 = sand.u32 1, %s3259_s24  }
 0xd75   : > { %s1907_s11 = scalar_lea.sflag [#allocation5], %s1906_s18 }
 0xd79   : > { %p4433_p5 = scmp.ne.s32.totalorder %s4432_s28, 0 }
 0xd7b   : > { %p2520_p6 = pnand %p2530_p2, %p4433_p5 }
 0xd7d   : > { %3242 = dma.done.wait (!%p2520_p6), %s1907_s11, 128  }
 0xd7e   : > { %3244 = vsyncadd (!%p2520_p6), %s1907_s11, 4294967168  ;;  %s34_s0 = sadd.s32 1, %s3287_s0   ;;  %s4434_s21 = sld [smem:[#allocation30_spill]] }
 0xd7f   : > { %p31_p4 = scmp.ge.s32.totalorder %s34_s0, 6   ;;  %s4435_s22 = sld [smem:[#allocation31_spill]] }
 0xd80   : > { %s4436_s23 = sld [smem:[#allocation39_spill]]  ;;  %s4437_s27 = sld [smem:[#allocation32_spill]] }
 0xd81   : > { %s4438_s26 = sld [smem:[#allocation40_spill]]  ;;  %s4439_s17 = sld [smem:[#allocation35_spill]] }
 0xd82   : > { %s4440_s28 = sld [smem:[#allocation36_spill]]  ;;  %s4441_s29 = sld [smem:[#allocation37_spill]] }
 0xd83   : > { %s4442_s30 = sld [smem:[#allocation38_spill]]  ;;  %s4443_s24 = smov %s3263_s25 }
 0xd84   :  { %33 = sbr.rel (!%p31_p4) target bundleno = 29 (0x1d), region = 277 }
 0xd86   : > { %s4444_s25 = smov %s4437_s27 }
 0xd87   : > { %s4445_s27 = smov %s4439_s17 }
 0xd8b   :  { %1912 = vsyncpa [#allocation4], 1 }
 0xd8c   :  { %1914 = vsyncpa [#allocation4 + $0x1], 1 }
 0xd8d   :  { %1915 = vsyncpa [#allocation7], 1 }
 0xd8e   :  { %1916 = vsyncpa [#allocation10], 1 }
 0xd8f   :  { %1917 = vsyncpa [#allocation5], 1 }
 0xd90   :  { %1919 = vsyncpa [#allocation5 + $0x1], 1 }

// kernel: transformer_forward.9
= control target key start
LH: loop header
LB: loop body
LE: loop exit
PB: predicated region body
PF: predicated region fallthrough
CT: control target
= control target key end

     0   :  { %10 = vsyncpa [#allocation3], 0  ;;  %s569_s0 = inlined_call_operand.hbm [shape: f32[16,32], index: 0, kind: input, shape index: {}]   ;;  %s570_s1 = inlined_call_operand.hbm [shape: f32[1,32], index: 1, kind: input, shape index: {}]   ;;  %s571_s2 = inlined_call_operand.hbm [shape: f32[1,32], index: 2, kind: input, shape index: {}]   ;;  %s572_s3 = inlined_call_operand.hbm [shape: bf16[32,64], index: 3, kind: input, shape index: {}]   ;;  %s573_s4 = inlined_call_operand.hbm [shape: f32[1,64], index: 4, kind: input, shape index: {}]   ;;  %s574_s5 = inlined_call_operand.hbm [shape: f32[16,64], index: 5, kind: output, shape index: {}]  }
   0x1   :  { %11 = vsyncpa [#allocation6], 0 }
   0x2   :  { %12 = vsyncpa [#allocation9], 0 }
   0x3   :  { %13 = vsyncpa [#allocation4], 0  ;;  %s431_s18 = smov [#allocation5]   ;;  %s432_s20 = smov [#allocation8]  }
   0x4   :  { %s32_s19 = sshll.u32 %s431_s18, 4  ;;  %s51_s21 = sshll.u32 %s432_s20, 4  ;;  %s33_s19 = int_to_ptr.vmem [resolvable:$true] %s32_s19  ;;  %s473_s21 = int_to_ptr.vmem [resolvable:$true] %s51_s21 }
   0x5   :  { %s291_s24 = scalar_lea.hbm %s570_s1, 16 }
   0x6   :  { %p292_p0 = scmp.ne.s32.totalorder %s570_s1, %s291_s24  ;;  %p295_p1 = scmp.lt.u32.totalorder %s291_s24, %s570_s1 }
   0x8   :  { %p297_p2 = pnand %p295_p1, %p292_p0 }
   0xa   :  { %300 = shalt.err (!%p297_p2)
}
   0xb   :  { %s301_s29 = scalar_lea.vmem %s33_s19, 16  ;;  %s305_s30 = scalar_lea.vmem %s33_s19, 32 }
   0xc   :  { %p302_p3 = scmp.ne.s32.totalorder %s33_s19, %s301_s29  ;;  %p306_p4 = scmp.lt.s32.totalorder %s33_s19, %s33_s19 }
   0xd   :  { %p307_p5 = scmp.lt.s32.totalorder %s305_s30, %s301_s29 }
   0xf   :  { %p308_p6 = por %p307_p5, %p306_p4 }
  0x11   :  { %p309_p7 = pnand %p308_p6, %p302_p3 }
  0x13   :  { %312 = shalt.err (!%p309_p7)
}
  0x14   :  { %35 = dma.hbm_to_vmem [thread:$0]  %s570_s1, 16, %s33_s19, [#allocation6]  }
  0x15   :  { %s313_s10 = scalar_lea.hbm %s572_s3, 256 }
  0x16   :  { %p314_p8 = scmp.ne.s32.totalorder %s572_s3, %s313_s10  ;;  %p317_p9 = scmp.lt.u32.totalorder %s313_s10, %s572_s3 }
  0x18   :  { %p319_p10 = pnand %p317_p9, %p314_p8 }
  0x1a   :  { %322 = shalt.err (!%p319_p10)
}
  0x1b   :  { %s323_s15 = scalar_lea.vmem %s473_s21, 256  ;;  %p328_p12 = scmp.lt.s32.totalorder %s473_s21, %s473_s21 }
  0x1c   :  { %p324_p11 = scmp.ne.s32.totalorder %s473_s21, %s323_s15  ;;  %p329_p13 = scmp.lt.s32.totalorder %s323_s15, %s323_s15 }
  0x1e   :  { %p330_p0 = por %p329_p13, %p328_p12 }
  0x20   :  { %p331_p1 = pnand %p330_p0, %p324_p11 }
  0x22   :  { %334 = shalt.err (!%p331_p1)
}
  0x23   :  { %s433_s1 = smov 64   ;;  %s434_s16 = smov 4  }
  0x24   :  { %57 = dma.hbm_to_vmem [thread:$0]  %s572_s3, 256, %s473_s21, [#allocation9], %s433_s1, %s433_s1, %s434_s16  }
  0x25   :  { %s435_s19 = smov [#allocation2]   ;;  %s335_s24 = scalar_lea.hbm %s569_s0, 256 }
  0x26   :  { %s19_s20 = sshll.u32 %s435_s19, 4  ;;  %p336_p2 = scmp.ne.s32.totalorder %s569_s0, %s335_s24  ;;  %s20_s20 = int_to_ptr.vmem [resolvable:$true] %s19_s20 }
  0x27   :  { %p339_p3 = scmp.lt.u32.totalorder %s335_s24, %s569_s0 }
  0x29   :  { %p341_p4 = pnand %p339_p3, %p336_p2 }
  0x2b   :  { %344 = shalt.err (!%p341_p4)
}
  0x2c   :  { %s345_s29 = scalar_lea.vmem %s20_s20, 256  ;;  %p350_p6 = scmp.lt.s32.totalorder %s20_s20, %s20_s20 }
  0x2d   :  { %p346_p5 = scmp.ne.s32.totalorder %s20_s20, %s345_s29  ;;  %p351_p7 = scmp.lt.s32.totalorder %s345_s29, %s345_s29 }
  0x2f   :  { %p352_p8 = por %p351_p7, %p350_p6 }
  0x31   :  { %p353_p9 = pnand %p352_p8, %p346_p5 }
  0x33   :  { %356 = shalt.err (!%p353_p9)
}
  0x34   :  { %s436_s3 = smov 128   ;;  %s437_s21 = smov 8  }
  0x35   :  { %25 = dma.hbm_to_vmem [thread:$0]  %s569_s0, 256, %s20_s20, [#allocation3], %s436_s3, %s436_s3, %s437_s21  }
  0x36   :  { %s438_s7 = smov [#allocation7]   ;;  %s439_s9 = smov [#allocation10]  }
  0x37   :  { %s42_s8 = sshll.u32 %s438_s7, 4  ;;  %s64_s10 = sshll.u32 %s439_s9, 4  ;;  %s43_s8 = int_to_ptr.vmem [resolvable:$true] %s42_s8  ;;  %s65_s10 = int_to_ptr.vmem [resolvable:$true] %s64_s10 }
  0x38   :  { %s357_s13 = scalar_lea.hbm %s571_s2, 16 }
  0x39   :  { %p358_p10 = scmp.ne.s32.totalorder %s571_s2, %s357_s13  ;;  %p361_p11 = scmp.lt.u32.totalorder %s357_s13, %s571_s2 }
  0x3b   :  { %p363_p12 = pnand %p361_p11, %p358_p10 }
  0x3d   :  { %366 = shalt.err (!%p363_p12)
}
  0x3e   :  { %s367_s0 = scalar_lea.vmem %s43_s8, 16  ;;  %s371_s17 = scalar_lea.vmem %s43_s8, 32 }
  0x3f   :  { %p368_p13 = scmp.ne.s32.totalorder %s43_s8, %s367_s0  ;;  %p372_p0 = scmp.lt.s32.totalorder %s43_s8, %s43_s8 }
  0x40   :  { %p373_p1 = scmp.lt.s32.totalorder %s371_s17, %s367_s0 }
  0x42   :  { %p374_p2 = por %p373_p1, %p372_p0 }
  0x44   :  { %p375_p3 = pnand %p374_p2, %p368_p13 }
  0x46   :  { %378 = shalt.err (!%p375_p3)
}
  0x47   :  { %45 = dma.hbm_to_vmem [thread:$0]  %s571_s2, 16, %s43_s8, [#allocation6]  }
  0x48   :  { %s379_s23 = scalar_lea.hbm %s573_s4, 16 }
  0x49   :  { %p380_p4 = scmp.ne.s32.totalorder %s573_s4, %s379_s23  ;;  %p383_p5 = scmp.lt.u32.totalorder %s379_s23, %s573_s4 }
  0x4b   :  { %p385_p6 = pnand %p383_p5, %p380_p4 }
  0x4d   :  { %388 = shalt.err (!%p385_p6)
}
  0x4e   :  { %s389_s28 = scalar_lea.vmem %s65_s10, 16  ;;  %s393_s29 = scalar_lea.vmem %s65_s10, 32 }
  0x4f   :  { %p390_p7 = scmp.ne.s32.totalorder %s65_s10, %s389_s28  ;;  %p394_p8 = scmp.lt.s32.totalorder %s65_s10, %s65_s10 }
  0x50   :  { %p395_p9 = scmp.lt.s32.totalorder %s393_s29, %s389_s28 }
  0x52   :  { %p396_p10 = por %p395_p9, %p394_p8 }
  0x54   :  { %p397_p11 = pnand %p396_p10, %p390_p7 }
  0x56   :  { %400 = shalt.err (!%p397_p11)
}
  0x57   :  { %67 = dma.hbm_to_vmem [thread:$0]  %s573_s4, 16, %s65_s10, [#allocation9]  }
  0x58   :  { %423 = dma.done.wait [#allocation3], 256  }
  0x59   :  { %424 = vsyncadd [#allocation3], 4294967040 }
  0x5a   :  { %425 = dma.done.wait [#allocation6], 32  }
  0x5b   :  { %426 = vsyncadd [#allocation6], 4294967264 }
  0x5c   :  { %427 = dma.done.wait [#allocation9], 272  }
  0x5d   :  { %428 = vsyncadd [#allocation9], 4294967024  ;;  %vm88_vm0 = vcmask 261120   ;;  %v84_v0 = vld [vmem:[#allocation2] sm:$0xff]  ;;  %v85_v1 = vld [vmem:[#allocation2 + $0x8] sm:$0xff]  ;;  %v440_v15 = vmov 0.0  }
  0x5e   :  { %v89_v2 = vsel %vm88_vm0, %v84_v0, 0.0  ;;  %v92_v3 = vsel %vm88_vm0, %v85_v1, 0.0  ;;  %v277_v14 = vld [vmem:[#allocation8] sm:$0xff]   ;;  %257 = vmatprep.subr.bf16.mxu0 %v440_v15  ;;  %v278_v16 = vld [vmem:[#allocation8 + $0x8] sm:$0xff]   ;;  %vm441_vm1 = vmmov 0   ;;  %vm200_vm2 = vcmask 523264  }
  0x5f   :  { %90 = vadd.xlane.f32.xlu0 %v89_v2  ;;  %258 = vmatpush3.bf16.msra.mxu0 %v277_v14  ;;  %v248_v25 = vld [vmem:[#allocation5] ss:$0 sm:$0xff]  ;;  %v249_v29 = vld [vmem:[#allocation7] ss:$0 sm:$0xff]  ;;  %v250_v34 = vld [vmem:[#allocation10] ss:$0 sm:$0xff] }
  0x60   :  { %261 = vmatprep.mubr.msk.bf16.mxu0 %vm441_vm1, %v440_v15  ;;  %259 = vmatprep.subr.bf16.mxu0 %v440_v15  ;;  %s442_s4 = smov [#allocation11]  }
  0x61   :  { %s234_s6 = sshll.u32 %s442_s4, 4  ;;  %s235_s6 = int_to_ptr.vmem [resolvable:$true] %s234_s6 }
  0x62   :  { %s401_s7 = scalar_lea.vmem %s235_s6, 256  ;;  %p406_p13 = scmp.lt.s32.totalorder %s235_s6, %s235_s6 }
  0x63   :  { %93 = vadd.xlane.f32.xlu0 %v92_v3  ;;  %260 = vmatpush3.bf16.msra.mxu0 %v278_v16  ;;  %p402_p12 = scmp.ne.s32.totalorder %s235_s6, %s401_s7  ;;  %p407_p0 = scmp.lt.s32.totalorder %s401_s7, %s401_s7 }
  0x65   :  { %p408_p1 = por %p407_p0, %p406_p13 }
  0x67   :  { %p409_p2 = pnand %p408_p1, %p402_p12 }
  0xec   :  { %v91_v4 = vpop.xlane.xlu0 %90 }
  0xed   :  { %v96_v5 = vmul.f32 0.03125, %v91_v4 }
  0xef   :  { %v98_v6 = vsub.f32 %v84_v0, %v96_v5 }
  0xf0   :  { %v94_v7 = vpop.xlane.xlu0 %93 }
  0xf1   :  { %v97_v8 = vmul.f32 0.03125, %v94_v7  ;;  %v100_v9 = vmul.f32 %v98_v6, %v98_v6 }
  0xf3   :  { %v99_v10 = vsub.f32 %v85_v1, %v97_v8  ;;  %v102_v11 = vsel %vm88_vm0, %v100_v9, 0.0 }
  0xf4   :  { %103 = vadd.xlane.f32.xlu1 %v102_v11 }
  0xf5   :  { %v101_v12 = vmul.f32 %v99_v10, %v99_v10 }
  0xf7   :  { %v105_v13 = vsel %vm88_vm0, %v101_v12, 0.0 }
  0xf8   :  { %106 = vadd.xlane.f32.xlu1 %v105_v13 }
 0x181   :  { %v104_v17 = vpop.xlane.xlu1 %103 }
 0x182   :  { %v108_v18 = vmul.f32 0.03125, %v104_v17 }
 0x184   :  { %v110_v19 = vadd.f32 1e-05, %v108_v18 }
 0x185   :  { %v107_v20 = vpop.xlane.xlu1 %106 }
 0x186   :  { %279 = vrsqrt.f32 %v110_v19  ;;  %v109_v21 = vmul.f32 0.03125, %v107_v20 }
 0x188   :  { %v111_v22 = vadd.f32 1e-05, %v109_v21 }
 0x18a   :  { %281 = vrsqrt.f32 %v111_v22 }
 0x190   :  { %v280_v23 = vpop.eup %279 }
 0x191   :  { %v114_v24 = vmul.f32 %v280_v23, %v98_v6 }
 0x193   :  { %v122_v28 = vmul.f32 %v248_v25, %v114_v24 }
 0x194   :  { %v282_v26 = vpop.eup %281 }
 0x195   :  { %v115_v27 = vmul.f32 %v282_v26, %v99_v10  ;;  %v130_v31 = vadd.f32 %v249_v29, %v122_v28 }
 0x197   :  { %v123_v30 = vmul.f32 %v248_v25, %v115_v27 }
 0x199   :  { %v131_v32 = vadd.f32 %v249_v29, %v123_v30 }
 0x19b   :  { %v132_v33 = vpack.c.bf16 %v131_v32, %v130_v31 }
 0x19d   :  { %262 = vmatmul.mubr.msk.bf16.vlgmr.msra.gmra.mrb[0].mxu0 %vm88_vm0, %v132_v33 }
 0x270   :  { %v193_v35 = vpop.f32.mrb[0].mxu0 }
 0x271   :  { %v194_v36 = vadd.f32 %v250_v34, %v193_v35  ;;  %v263_v37 = vpop.f32.mrb[1].mxu0 }
 0x272   :  { %v196_v38 = vpop.f32.mrb[2].mxu0 }
 0x273   :  { %v197_v39 = vadd.f32 %v250_v34, %v196_v38  ;;  %v264_v40 = vpop.f32.mrb[3].mxu0  ;;  %v201_v41 = vsel %vm200_vm2, %v194_v36, -inf }
 0x274   :  { %202 = vmax.xlane.f32.xlu0 %v201_v41 }
 0x275   :  { %v204_v42 = vsel %vm200_vm2, %v197_v39, -inf }
 0x276   :  { %205 = vmax.xlane.f32.xlu1 %v204_v42 }
 0x301   :  { %v203_v43 = vpop.xlane.xlu0 %202 }
 0x302   :  { %v207_v44 = vsub.f32 %v194_v36, %v203_v43 }
 0x303   :  { %v206_v45 = vpop.xlane.xlu1 %205 }
 0x304   :  { %v209_v46 = vmul.f32 1.442695, %v207_v44  ;;  %v208_v47 = vsub.f32 %v197_v39, %v206_v45 }
 0x306   :  { %283 = vpow2.f32 %v209_v46  ;;  %v211_v48 = vmul.f32 1.442695, %v208_v47 }
 0x308   :  { %285 = vpow2.f32 %v211_v48 }
 0x310   :  { %v284_v49 = vpop.eup %283 }
 0x311   :  { %v213_v50 = vsel %vm200_vm2, %v284_v49, 0.0 }
 0x312   :  { %v286_v51 = vpop.eup %285  ;;  %214 = vadd.xlane.f32.xlu0 %v213_v50 }
 0x313   :  { %v216_v52 = vsel %vm200_vm2, %v286_v51, 0.0 }
 0x314   :  { %217 = vadd.xlane.f32.xlu1 %v216_v52 }
 0x39f   :  { %v215_v53 = vpop.xlane.xlu0 %214 }
 0x3a0   :  { %287 = vlog2.f32 %v215_v53 }
 0x3a1   :  { %v218_v54 = vpop.xlane.xlu1 %217 }
 0x3a2   :  { %289 = vlog2.f32 %v218_v54 }
 0x3aa   :  { %v288_v55 = vpop.eup %287 }
 0x3ab   :  { %v220_v56 = vmul.f32 0.6931472, %v288_v55 }
 0x3ac   :  { %v290_v57 = vpop.eup %289 }
 0x3ad   :  { %v223_v58 = vadd.f32 %v220_v56, %v203_v43  ;;  %v222_v59 = vmul.f32 0.6931472, %v290_v57 }
 0x3af   :  { %v225_v60 = vsub.f32 %v194_v36, %v223_v58  ;;  %v224_v61 = vadd.f32 %v222_v59, %v206_v45 }
 0x3b1   :  { %227 = vst.msk [vmem:[#allocation11] sm:$0xff] %vm200_vm2, %v225_v60  ;;  %v226_v62 = vsub.f32 %v197_v39, %v224_v61 }
 0x3b3   :  { %228 = vst.msk [vmem:[#allocation11 + $0x8] sm:$0xff] %vm200_vm2, %v226_v62 }
 0x3b4   :  { %412 = shalt.err (!%p409_p2)
}
 0x3b5   :  { %s413_s10 = scalar_lea.hbm %s574_s5, 256 }
 0x3b6   :  { %p414_p3 = scmp.ne.s32.totalorder %s574_s5, %s413_s10  ;;  %p417_p4 = scmp.lt.u32.totalorder %s413_s10, %s574_s5 }
 0x3b8   :  { %p419_p5 = pnand %p417_p4, %p414_p3 }
 0x3ba   :  { %422 = shalt.err (!%p419_p5)
}
 0x3bb   :  { %240 = dma.vmem_to_hbm [thread:$0]  %s235_s6, 256, %s574_s5, [#allocation4], %s436_s3, %s436_s3, %s437_s21  }
 0x3bc   :  { %429 = dma.done.wait [#allocation4], 256  }
 0x3bd   :  { %430 = vsyncadd [#allocation4], 4294967040 }
 0x3be   :  { %244 = vsyncpa [#allocation3], 1 }
 0x3bf   :  { %245 = vsyncpa [#allocation6], 1 }
 0x3c0   :  { %246 = vsyncpa [#allocation9], 1 }
 0x3c1   :  { %247 = vsyncpa [#allocation4], 1 }

// kernel: transformer_forward.8
= control target key start
LH: loop header
LB: loop body
LE: loop exit
PB: predicated region body
PF: predicated region fallthrough
CT: control target
= control target key end

     0   :  { %s6465_s0 = inlined_call_operand.hbm [shape: f32[2,8,32], index: 0, kind: input, shape index: {}]   ;;  %s6466_s1 = inlined_call_operand.hbm [shape: f32[8,32], index: 1, kind: input, shape index: {}]   ;;  %s6467_s2 = inlined_call_operand.hbm [shape: f32[2,4,32], index: 2, kind: input, shape index: {}]   ;;  %s6468_s3 = inlined_call_operand.hbm [shape: f32[2,1,8,8], index: 3, kind: input, shape index: {}]   ;;  %s6469_s4 = inlined_call_operand.hbm [shape: f32[2,1,8,4], index: 4, kind: input, shape index: {}]   ;;  %s6470_s5 = inlined_call_operand.hbm [shape: f32[2,1,32], index: 5, kind: input, shape index: {}]   ;;  %s6471_s6 = inlined_call_operand.hbm [shape: f32[2,1,32], index: 6, kind: input, shape index: {}]   ;;  %s6472_s7 = inlined_call_operand.hbm [shape: bf16[2,32,96], index: 7, kind: input, shape index: {}]   ;;  %s6473_s8 = inlined_call_operand.hbm [shape: f32[2,1,96], index: 8, kind: input, shape index: {}]   ;;  %s6474_s9 = inlined_call_operand.hbm [shape: bf16[2,32,32], index: 9, kind: input, shape index: {}]   ;;  %s6475_s10 = inlined_call_operand.hbm [shape: f32[2,1,32], index: 10, kind: input, shape index: {}]   ;;  %s6476_s11 = inlined_call_operand.hbm [shape: f32[2,1,32], index: 11, kind: input, shape index: {}]   ;;  %s6477_s12 = inlined_call_operand.hbm [shape: f32[2,1,32], index: 12, kind: input, shape index: {}]   ;;  %s6478_s13 = inlined_call_operand.hbm [shape: bf16[2,32,32], index: 13, kind: input, shape index: {}]   ;;  %s6479_s14 = inlined_call_operand.hbm [shape: f32[2,1,32], index: 14, kind: input, shape index: {}]   ;;  %s6480_s15 = inlined_call_operand.hbm [shape: bf16[2,32,64], index: 15, kind: input, shape index: {}]   ;;  %s6481_s16 = inlined_call_operand.hbm [shape: f32[2,1,64], index: 16, kind: input, shape index: {}]   ;;  %s6482_s17 = inlined_call_operand.hbm [shape: bf16[2,32,32], index: 17, kind: input, shape index: {}]   ;;  %s6483_s18 = inlined_call_operand.hbm [shape: f32[2,1,32], index: 18, kind: input, shape index: {}]   ;;  %s6484_s19 = inlined_call_operand.hbm [shape: f32[2,1,32], index: 19, kind: input, shape index: {}]   ;;  %s6485_s20 = inlined_call_operand.hbm [shape: f32[2,1,32], index: 20, kind: input, shape index: {}]   ;;  %s6486_s21 = inlined_call_operand.hbm [shape: bf16[2,32,64], index: 21, kind: input, shape index: {}]   ;;  %s6487_s22 = inlined_call_operand.hbm [shape: f32[2,1,64], index: 22, kind: input, shape index: {}]   ;;  %s6488_s23 = inlined_call_operand.hbm [shape: bf16[2,64,32], index: 23, kind: input, shape index: {}]   ;;  %s6489_s24 = inlined_call_operand.hbm [shape: f32[2,1,32], index: 24, kind: input, shape index: {}]   ;;  %s6490_s25 = inlined_call_operand.hbm [shape: f32[2,8,32], index: 25, kind: output, shape index: {}]  }
   0x1   :  { %6555 = sst [smem:[#allocation54_spill]] %s6465_s0 }
   0x2   :  { %6556 = sst [smem:[#allocation55_spill]] %s6466_s1 }
   0x3   :  { %6557 = sst [smem:[#allocation56_spill]] %s6467_s2 }
   0x4   :  { %6558 = sst [smem:[#allocation57_spill]] %s6468_s3 }
   0x5   :  { %6559 = sst [smem:[#allocation58_spill]] %s6469_s4 }
   0x6   :  { %6560 = sst [smem:[#allocation59_spill]] %s6470_s5 }
   0x7   :  { %6561 = sst [smem:[#allocation60_spill]] %s6471_s6 }
   0x8   :  { %6562 = sst [smem:[#allocation61_spill]] %s6472_s7 }
   0x9   :  { %6563 = sst [smem:[#allocation62_spill]] %s6473_s8 }
   0xa   :  { %6564 = sst [smem:[#allocation63_spill]] %s6474_s9 }
   0xb   :  { %6565 = sst [smem:[#allocation64_spill]] %s6475_s10 }
   0xc   :  { %6566 = sst [smem:[#allocation65_spill]] %s6476_s11 }
   0xd   :  { %6567 = sst [smem:[#allocation66_spill]] %s6477_s12 }
   0xe   :  { %6568 = sst [smem:[#allocation67_spill]] %s6478_s13 }
   0xf   :  { %6569 = sst [smem:[#allocation68_spill]] %s6479_s14 }
  0x10   :  { %6570 = sst [smem:[#allocation69_spill]] %s6484_s19 }
  0x11   :  { %6571 = sst [smem:[#allocation70_spill]] %s6485_s20 }
  0x12   :  { %6572 = sst [smem:[#allocation71_spill]] %s6486_s21 }
  0x13   :  { %6573 = sst [smem:[#allocation72_spill]] %s6487_s22 }
  0x14   :  { %6574 = sst [smem:[#allocation73_spill]] %s6488_s23 }
  0x15   :  { %6575 = sst [smem:[#allocation74_spill]] %s6489_s24 }
  0x16   :  { %6576 = sst [smem:[#allocation75_spill]] %s6490_s25 }
  0x17   :  { %30 = vsyncpa [#allocation4], 0 }
  0x18   :  { %32 = vsyncpa [#allocation4 + $0x1], 0 }
  0x19   :  { %33 = vsyncpa [#allocation7], 0 }
  0x1a   :  { %34 = vsyncpa [#allocation5], 0 }
  0x1b   :  { %36 = vsyncpa [#allocation5 + $0x1], 0  ;;  %s5208_s29 = smov 0   ;;  %s5210_s2 = smov 0  }
  0x1c   :  { %s5212_s6 = smov 0   ;;  %s5214_s30 = smov 0  }
  0x1d   :  { %s5216_s7 = smov 0   ;;  %s5218_s3 = smov 0  }
  0x1e   :  { %s5220_s26 = smov 0   ;;  %s5222_s1 = smov 0  }
  0x1f   :  { %s5224_s8 = smov 0   ;;  %s5226_s27 = smov 0  }
  0x20   :  { %s5228_s4 = smov 0  }
  0x21 LB: > { %6577 = sst [smem:[#allocation37_spill]] %s4996_s2  ;;  %s5264_s28 = sadd.s32 4294967295, %s5032_s4   ;;  %s5032_s4 = sphi %s5228_s4, %s42_s4   ;;  %s5028_s27 = sphi %s5226_s27, %s6690_s27   ;;  %s5024_s8 = sphi %s5224_s8, %s6694_s8   ;;  %s5020_s1 = sphi %s5222_s1, %s6688_s1   ;;  %s5016_s26 = sphi %s5220_s26, %s6693_s26   ;;  %s5012_s3 = sphi %s5218_s3, %s6687_s3   ;;  %s5008_s7 = sphi %s5216_s7, %s6686_s7   ;;  %s5004_s30 = sphi %s5214_s30, %s6685_s30   ;;  %s5000_s6 = sphi %s5212_s6, %s6692_s6   ;;  %s4996_s2 = sphi %s5210_s2, %s6691_s2   ;;  %s4992_s29 = sphi %s5208_s29, %s6683_s29  }
  0x22   : > { %6578 = sst [smem:[#allocation38_spill]] %s5004_s30  ;;  %s3635_s9 = sadd.s32 4294967294, %s5032_s4  }
  0x23   : > { %6579 = sst [smem:[#allocation39_spill]] %s5008_s7  ;;  %s51_s5 = sadd.s32 1, %s5024_s8 }
  0x24   : > { %6580 = sst [smem:[#allocation40_spill]] %s5012_s3  ;;  %s54_s0 = sadd.s32 1, %s5028_s27 }
  0x25   : > { %6581 = sst [smem:[#allocation41_spill]] %s5016_s26  ;;  %p52_p0 = scmp.ge.s32.totalorder %s51_s5, 2 }
  0x26   : > { %6582 = sst [smem:[#allocation42_spill]] %s5020_s1  ;;  %s61_s25 = sadd.s32 1, %s5012_s3 }
  0x27   : > { %6583 = sst [smem:[#allocation43_spill]] %s5028_s27  ;;  %p6510_p1 = scmp.ne.s32.totalorder %s5012_s3, %s5008_s7 }
  0x28   : > { %6584 = sst [smem:[#allocation44_spill]] %s5032_s4  ;;  %p69_p2 = scmp.eq.s32.totalorder %s5032_s4, 0 }
  0x29   : > { %6585 = sst [smem:[#allocation45_spill]] %s5264_s28  ;;  %s6696_s5 = smov (%p52_p0, %s51_s5), 0 }
  0x2a   : > { %6586 = sst [smem:[#allocation46_spill]] %s6696_s5  ;;  %s6698_s0 = smov (!%p52_p0, %s54_s0), %s5028_s27 }
  0x2b   : > { %p5281_p3 = por %p69_p2, %p6510_p1  ;;  %p6509_p4 = scmp.ne.s32.totalorder %s5008_s7, %s5004_s30 }
  0x2c   : > { %p56_p5 = scmp.ge.s32.totalorder %s6698_s0, 2  ;;  %p6521_p6 = scmp.eq.s32.totalorder %s5264_s28, 0 }
  0x2d   : > { %s6587_s1 = scalar_select %p5281_p3, 1, 0 }
  0x2e   : > { %s183_s26 = ssub.s32 %s5024_s8, %s6696_s5  ;;  %s186_s24 = sadd.s32 1, %s5000_s6 }
  0x2f   : > { %s6700_s0 = smov (%p56_p5, %s6698_s0), 0  ;;  %p5298_p7 = por %p6521_p6, %p6509_p4 }
  0x30   : > { %6588 = sst [smem:[#allocation47_spill]] %s6700_s0  ;;  %p184_p8 = scmp.eq.s32.totalorder %s183_s26, 0 }
  0x31   : > { %s6589_s23 = scalar_select %p5298_p7, 1, 0 }
  0x32   : > { %s58_s22 = ssub.s32 %s5028_s27, %s6700_s0  ;;  %p193_p9 = scmp.ne.s32.totalorder %s5000_s6, %s4996_s2 }
  0x33   : > { %6590 = sst [smem:[#allocation48_spill]] %s6589_s23  ;;  %p59_p10 = scmp.eq.s32.totalorder %s58_s22, 0 }
  0x34   : > { %p199_p11 = scmp.ne.s32.totalorder %s4996_s2, %s4992_s29  ;;  %p5316_p12 = por %p193_p9, %p69_p2 }
  0x35   : > { %s5309_s5 = scalar_select %p184_p8, %s5000_s6, %s186_s24  }
  0x36   : > { %s5312_s21 = scalar_select %p59_p10, %s5012_s3, %s61_s25  }
  0x37   : > { %6591 = sst [smem:[#allocation49_spill]] %s5309_s5  ;;  %p5322_p13 = por %p199_p11, %p6521_p6 }
  0x38   : > { %6592 = sst [smem:[#allocation50_spill]] %s5312_s21  ;;  %p717_p0 = scmp.eq.s32.totalorder %s5264_s28, 3 }
  0x39   : > { %s6593_s20 = scalar_select %p5316_p12, 1, 0 }
  0x3a   : > { %s6594_s19 = scalar_select %p5322_p13, 1, 0 }
  0x3b   : > { %p723_p5 = scmp.eq.s32.totalorder %s3635_s9, 3  ;;  %p3636_p4 = scmp.ge.s32.totalorder %s5032_s4, 1 }
  0x3c   : > { %6595 = sst [smem:[#allocation51_spill]] %s6594_s19  ;;  %p730_p1 = scmp.lt.s32.totalorder %s5032_s4, 5 }
  0x3d   : > { %p6596_p7 = scmp.ne.s32.totalorder %s5012_s3, %s5008_s7  ;;  %p6599_p8 = scmp.ne.s32.totalorder %s5008_s7, %s5004_s30 }
  0x3e   : > { %p5343_p2 = pnand %p3636_p4, %p730_p1  ;;  %s5034_s29 = smov [#allocation6]  }
  0x3f   : > { %p5332_p3 = por %p717_p0, %p6596_p7  ;;  %p5339_p10 = por %p723_p5, %p6599_p8 }
  0x40   : > { %s6602_s25 = scalar_select %p5343_p2, 1, 0 }
  0x41   : > { %s6597_s22 = scalar_select %p5332_p3, 1, 0 }
  0x42   : > { %s6600_s24 = scalar_select %p5339_p10, 1, 0 }
  0x43   : > { %6598 = sst [smem:[#allocation52_spill]] %s6597_s22  ;;  %p4024_p9 = pneg %p5343_p2 }
  0x44   : > { %6601 = sst [smem:[#allocation53_spill]] %s6600_s24  ;;  %s743_s26 = sshll.u32 %s5034_s29, 4  ;;  %s744_s26 = int_to_ptr.vmem [resolvable:$true] %s743_s26 }
  0x45   : > { %p5351_p7 = pnand %p4024_p9, %p6521_p6  ;;  %s6604_s5 = sld [smem:[#allocation55_spill]] }
  0x47   : > { %p4200_p4 = pneg %p5351_p7 }
  0x4b   : > { %s4198_s24 = scalar_lea.hbm %s6604_s5, 128 }
  0x4c   : > { %p4199_p1 = scmp.ne.s32.totalorder %s6604_s5, %s4198_s24  ;;  %p4205_p5 = scmp.lt.u32.totalorder %s4198_s24, %s6604_s5 }
  0x4e   : > { %p4201_p11 = pnand %p4200_p4, %p4199_p1 }
  0x50   : > { %p4202_p0 = pneg %p4201_p11 }
  0x52   : > { %p4207_p8 = pnand %p4205_p5, %p4202_p0 }
  0x54   : > { %4210 = shalt.err (!%p4207_p8)
}
  0x55   : > { %s4211_s2 = scalar_lea.vmem %s744_s26, 128  ;;  %p4219_p3 = scmp.lt.s32.totalorder %s744_s26, %s744_s26 }
  0x56   : > { %p4212_p9 = scmp.ne.s32.totalorder %s744_s26, %s4211_s2  ;;  %p4220_p13 = scmp.lt.s32.totalorder %s4211_s2, %s4211_s2 }
  0x58   : > { %p4214_p6 = pnand %p4212_p9, %p4200_p4  ;;  %p4221_p2 = por %p4220_p13, %p4219_p3 }
  0x5a   : > { %p4215_p10 = pneg %p4214_p6 }
  0x5c   : > { %p4222_p12 = pnand %p4221_p2, %p4215_p10 }
  0x5e   : > { %4225 = shalt.err (!%p4222_p12)
}
  0x5f   : > { %4027 = dma.hbm_to_vmem [thread:$0]  (!%p5351_p7), %s6604_s5, 128, %s744_s26, [#allocation7]  }
  0x60   : > { %p3638_p1 = scmp.ge.s32.totalorder %s5032_s4, 4 }
  0x61   : > { %s754_s19 = sand.u32 (!%p3638_p1), 1, %s5032_s4   ;;  %s756_s0 = sand.u32 (!%p3638_p1), 1, %s5012_s3  }
  0x62   : > { %750 = sbr.rel (%p3638_p1) target bundleno = 762 (0x2fa), region = 20  ;;  %s5374_s22 = sshll.u32 (!%p3638_p1), %s756_s0, 3 }
  0x63   : > { %s5377_s2 = sshll.u32 (!%p3638_p1), %s5028_s27, 7  ;;  %s6605_s29 = sld [smem:[#allocation54_spill]] (!%p3638_p1) }
  0x64   : > { %s758_s26 = scalar_lea.vmem (!%p3638_p1), [#allocation3], %s5374_s22  ;;  %s5388_s5 = sshll.u32 (!%p3638_p1), %s756_s0, 2 }
  0x65   : > { %s765_s30 = sshll.u32 (!%p3638_p1), %s758_s26, 4  ;;  %s5390_s3 = scalar_lea.sflag (!%p3638_p1), [#allocation4], %s754_s19  ;;  %s5386_s30 = int_to_ptr.vmem [resolvable:$true] %s765_s30 }
  0x66   : > { %p6607_p6 = scmp.ne.s32.totalorder (!%p3638_p1), %s6587_s1, 0 }
  0x69   : > { %s6606_s23 = smov %s6605_s29  ;;  %s5383_s21 = scalar_lea.hbm %s6605_s29, %s5377_s2 }
  0x6a   : > { %s4226_s4 = scalar_lea.hbm %s5383_s21, 128  ;;  %s4230_s29 = scalar_lea.hbm %s6606_s23, 256 }
  0x6b   : > { %p4227_p3 = scmp.ne.s32.totalorder %s5383_s21, %s4226_s4  ;;  %p4231_p10 = scmp.lt.u32.totalorder %s5383_s21, %s6606_s23 }
  0x6c   : > { %p4232_p2 = scmp.lt.u32.totalorder %s4230_s29, %s4226_s4  ;;  %p4234_p4 = scmp.lt.u32.totalorder %s4226_s4, %s5383_s21 }
  0x6d   : > { %p4228_p12 = pnand %p4227_p3, %p6607_p6 }
  0x6e   : > { %p4233_p7 = por %p4232_p2, %p4231_p10 }
  0x6f   : > { %p4229_p13 = pneg %p4228_p12 }
  0x70   : > { %p4235_p11 = por %p4234_p4, %p4233_p7 }
  0x72   : > { %p4236_p0 = pnand %p4235_p11, %p4229_p13 }
  0x74   : > { %4239 = shalt.err (!%p4236_p0)
}
  0x75   : > { %s4240_s19 = scalar_lea.vmem %s5386_s30, 128  ;;  %s5035_s0 = smov [#allocation3]  }
  0x76   : > { %p4241_p5 = scmp.ne.s32.totalorder %s5386_s30, %s4240_s19  ;;  %s4244_s26 = sshll.u32 %s5035_s0, 4  ;;  %s4245_s26 = int_to_ptr.vmem [resolvable:$false] %s4244_s26 }
  0x77   : > { %s4246_s7 = scalar_lea.vmem %s4245_s26, 256  ;;  %p4247_p1 = scmp.lt.s32.totalorder %s5386_s30, %s4245_s26 }
  0x78   : > { %p4242_p8 = pnand %p4241_p5, %p6607_p6  ;;  %p4248_p3 = scmp.lt.s32.totalorder %s4246_s7, %s4240_s19 }
  0x7a   : > { %p4243_p9 = pneg %p4242_p8  ;;  %p4249_p12 = por %p4248_p3, %p4247_p1 }
  0x7c   : > { %p4250_p10 = pnand %p4249_p12, %p4243_p9 }
  0x7e   : > { %4253 = shalt.err (!%p4250_p10)
}
  0x7f   : > { %3972 = dma.hbm_to_vmem [thread:$0]  (%p6607_p6), %s5383_s21, 128, %s5386_s30, %s5390_s3  }
  0x80   : > { %s3642_s4 = sshll.u32 %s5028_s27, 6  ;;  %s6608_s9 = sld [smem:[#allocation56_spill]] }
  0x81   : > { %s776_s19 = scalar_lea.vmem [#allocation8], %s5388_s5 }
  0x82   : > { %s783_s0 = sshll.u32 %s776_s19, 4  ;;  %s784_s0 = int_to_ptr.vmem [resolvable:$true] %s783_s0 }
  0x86   : > { %s5418_s29 = scalar_lea.hbm %s6608_s9, %s3642_s4  ;;  %s4258_s30 = scalar_lea.hbm %s6608_s9, 128 }
  0x87   : > { %s4254_s26 = scalar_lea.hbm %s5418_s29, 64  ;;  %p4259_p4 = scmp.lt.u32.totalorder %s5418_s29, %s6608_s9 }
  0x88   : > { %p4255_p13 = scmp.ne.s32.totalorder %s5418_s29, %s4254_s26  ;;  %p4260_p11 = scmp.lt.u32.totalorder %s4258_s30, %s4254_s26 }
  0x89   : > { %p4262_p5 = scmp.lt.u32.totalorder %s4254_s26, %s5418_s29 }
  0x8a   : > { %p4256_p2 = pnand %p4255_p13, %p6607_p6  ;;  %p4261_p0 = por %p4260_p11, %p4259_p4 }
  0x8c   : > { %p4257_p7 = pneg %p4256_p2  ;;  %p4263_p8 = por %p4262_p5, %p4261_p0 }
  0x8e   : > { %p4264_p9 = pnand %p4263_p8, %p4257_p7 }
  0x90   : > { %4267 = shalt.err (!%p4264_p9)
}
  0x91   : > { %s4268_s5 = scalar_lea.vmem %s784_s0, 64  ;;  %s5036_s4 = smov [#allocation8]  }
  0x92   : > { %p4269_p1 = scmp.ne.s32.totalorder %s784_s0, %s4268_s5  ;;  %s4272_s24 = sshll.u32 %s5036_s4, 4  ;;  %s4273_s24 = int_to_ptr.vmem [resolvable:$false] %s4272_s24 }
  0x93   : > { %s4274_s19 = scalar_lea.vmem %s4273_s24, 128  ;;  %p4275_p10 = scmp.lt.s32.totalorder %s784_s0, %s4273_s24 }
  0x94   : > { %p4270_p3 = pnand %p4269_p1, %p6607_p6  ;;  %p4276_p13 = scmp.lt.s32.totalorder %s4274_s19, %s4268_s5 }
  0x96   : > { %p4271_p12 = pneg %p4270_p3  ;;  %p4277_p2 = por %p4276_p13, %p4275_p10 }
  0x98   : > { %p4278_p4 = pnand %p4277_p2, %p4271_p12 }
  0x9a   : > { %4281 = shalt.err (!%p4278_p4)
}
  0x9b   : > { %3973 = dma.hbm_to_vmem [thread:$0]  (%p6607_p6), %s5418_s29, 64, %s784_s0, %s5390_s3  }
  0x9c   : > { %s6609_s7 = sld [smem:[#allocation57_spill]]  ;;  %s794_s28 = scalar_lea.vmem [#allocation9], %s5374_s22 }
  0x9d   : > { %s801_s5 = sshll.u32 %s794_s28, 4  ;;  %s802_s5 = int_to_ptr.vmem [resolvable:$true] %s801_s5 }
  0xa2   : > { %s6610_s21 = smov %s6609_s7  ;;  %s5443_s30 = scalar_lea.hbm %s6609_s7, %s5377_s2 }
  0xa3   : > { %s4282_s4 = scalar_lea.hbm %s5443_s30, 128  ;;  %s4286_s29 = scalar_lea.hbm %s6610_s21, 256 }
  0xa4   : > { %p4283_p7 = scmp.ne.s32.totalorder %s5443_s30, %s4282_s4  ;;  %p4287_p5 = scmp.lt.u32.totalorder %s5443_s30, %s6610_s21 }
  0xa5   : > { %p4288_p8 = scmp.lt.u32.totalorder %s4286_s29, %s4282_s4  ;;  %p4290_p1 = scmp.lt.u32.totalorder %s4282_s4, %s5443_s30 }
  0xa6   : > { %p4284_p11 = pnand %p4283_p7, %p6607_p6 }
  0xa7   : > { %p4289_p9 = por %p4288_p8, %p4287_p5 }
  0xa8   : > { %p4285_p0 = pneg %p4284_p11 }
  0xa9   : > { %p4291_p3 = por %p4290_p1, %p4289_p9 }
  0xab   : > { %p4292_p12 = pnand %p4291_p3, %p4285_p0 }
  0xad   : > { %4295 = shalt.err (!%p4292_p12)
}
  0xae   : > { %s4296_s26 = scalar_lea.vmem %s802_s5, 128  ;;  %s5037_s7 = smov [#allocation9]  }
  0xaf   : > { %p4297_p10 = scmp.ne.s32.totalorder %s802_s5, %s4296_s26  ;;  %s4300_s28 = sshll.u32 %s5037_s7, 4  ;;  %s4301_s28 = int_to_ptr.vmem [resolvable:$false] %s4300_s28 }
  0xb0   : > { %s4302_s24 = scalar_lea.vmem %s4301_s28, 256  ;;  %p4303_p4 = scmp.lt.s32.totalorder %s802_s5, %s4301_s28 }
  0xb1   : > { %p4298_p13 = pnand %p4297_p10, %p6607_p6  ;;  %p4304_p7 = scmp.lt.s32.totalorder %s4302_s24, %s4296_s26 }
  0xb3   : > { %p4299_p2 = pneg %p4298_p13  ;;  %p4305_p11 = por %p4304_p7, %p4303_p4 }
  0xb5   : > { %p4306_p5 = pnand %p4305_p11, %p4299_p2 }
  0xb7   : > { %4309 = shalt.err (!%p4306_p5)
}
  0xb8   : > { %3974 = dma.hbm_to_vmem [thread:$0]  (%p6607_p6), %s5443_s30, 128, %s802_s5, %s5390_s3  }
  0xb9   : > { %s6611_s29 = sld [smem:[#allocation58_spill]]  ;;  %s812_s26 = scalar_lea.vmem [#allocation10], %s5374_s22 }
  0xba   : > { %s819_s7 = sshll.u32 %s812_s26, 4  ;;  %s5472_s28 = sand.u32 1, %s5000_s6   ;;  %s820_s7 = int_to_ptr.vmem [resolvable:$true] %s819_s7 }
  0xbf   : > { %s6612_s0 = smov %s6611_s29  ;;  %s5468_s23 = scalar_lea.hbm %s6611_s29, %s5377_s2 }
  0xc0   : > { %s4310_s24 = scalar_lea.hbm %s5468_s23, 128  ;;  %s4314_s4 = scalar_lea.hbm %s6612_s0, 256 }
  0xc1   : > { %p4311_p0 = scmp.ne.s32.totalorder %s5468_s23, %s4310_s24  ;;  %p4315_p1 = scmp.lt.u32.totalorder %s5468_s23, %s6612_s0 }
  0xc2   : > { %p4316_p3 = scmp.lt.u32.totalorder %s4314_s4, %s4310_s24  ;;  %p4318_p10 = scmp.lt.u32.totalorder %s4310_s24, %s5468_s23 }
  0xc3   : > { %p4312_p8 = pnand %p4311_p0, %p6607_p6 }
  0xc4   : > { %p4317_p12 = por %p4316_p3, %p4315_p1 }
  0xc5   : > { %p4313_p9 = pneg %p4312_p8 }
  0xc6   : > { %p4319_p13 = por %p4318_p10, %p4317_p12 }
  0xc8   : > { %p4320_p2 = pnand %p4319_p13, %p4313_p9 }
  0xca   : > { %4323 = shalt.err (!%p4320_p2)
}
  0xcb   : > { %s4324_s22 = scalar_lea.vmem %s820_s7, 128  ;;  %s5038_s29 = smov [#allocation10]  }
  0xcc   : > { %p4325_p4 = scmp.ne.s32.totalorder %s820_s7, %s4324_s22  ;;  %s4328_s26 = sshll.u32 %s5038_s29, 4  ;;  %s4329_s26 = int_to_ptr.vmem [resolvable:$false] %s4328_s26 }
  0xcd   : > { %s4330_s30 = scalar_lea.vmem %s4329_s26, 256  ;;  %p4331_p5 = scmp.lt.s32.totalorder %s820_s7, %s4329_s26 }
  0xce   : > { %p4326_p7 = pnand %p4325_p4, %p6607_p6  ;;  %p4332_p0 = scmp.lt.s32.totalorder %s4330_s30, %s4324_s22 }
  0xd0   : > { %p4327_p11 = pneg %p4326_p7  ;;  %p4333_p8 = por %p4332_p0, %p4331_p5 }
  0xd2   : > { %p4334_p1 = pnand %p4333_p8, %p4327_p11 }
  0xd4   : > { %4337 = shalt.err (!%p4334_p1)
}
  0xd5   : > { %3975 = dma.hbm_to_vmem [thread:$0]  (%p6607_p6), %s5468_s23, 128, %s820_s7, %s5390_s3  }
  0xd6   : > { %s5493_s24 = sshll.u32 %s5024_s8, 4  ;;  %s6613_s2 = sld [smem:[#allocation59_spill]] }
  0xd7   : > { %s829_s22 = scalar_lea.vmem [#allocation11], %s5472_s28  ;;  %p6615_p3 = scmp.ne.s32.totalorder %s6593_s20, 0 }
  0xd8   : > { %s836_s1 = sshll.u32 %s829_s22, 4  ;;  %s837_s1 = int_to_ptr.vmem [resolvable:$true] %s836_s1 }
  0xdc   : > { %s6614_s19 = smov %s6613_s2  ;;  %s5499_s29 = scalar_lea.hbm %s6613_s2, %s5493_s24 }
  0xdd   : > { %s4338_s26 = scalar_lea.hbm %s5499_s29, 16  ;;  %s4342_s30 = scalar_lea.hbm %s6614_s19, 32 }
  0xde   : > { %p4339_p9 = scmp.ne.s32.totalorder %s5499_s29, %s4338_s26  ;;  %p4343_p10 = scmp.lt.u32.totalorder %s5499_s29, %s6614_s19 }
  0xdf   : > { %p4344_p13 = scmp.lt.u32.totalorder %s4342_s30, %s4338_s26  ;;  %p4346_p4 = scmp.lt.u32.totalorder %s4338_s26, %s5499_s29 }
  0xe0   : > { %p4340_p12 = pnand %p4339_p9, %p6615_p3 }
  0xe1   : > { %p4345_p2 = por %p4344_p13, %p4343_p10 }
  0xe2   : > { %p4341_p6 = pneg %p4340_p12 }
  0xe3   : > { %p4347_p7 = por %p4346_p4, %p4345_p2 }
  0xe5   : > { %p4348_p11 = pnand %p4347_p7, %p4341_p6 }
  0xe7   : > { %4351 = shalt.err (!%p4348_p11)
}
  0xe8   : > { %s4352_s4 = scalar_lea.vmem %s837_s1, 16  ;;  %s5039_s2 = smov [#allocation11]  }
  0xe9   : > { %p4353_p5 = scmp.ne.s32.totalorder %s837_s1, %s4352_s4  ;;  %s4356_s22 = sshll.u32 %s5039_s2, 4  ;;  %s4357_s22 = int_to_ptr.vmem [resolvable:$false] %s4356_s22 }
  0xea   : > { %s4358_s23 = scalar_lea.vmem %s4357_s22, 32  ;;  %p4359_p1 = scmp.lt.s32.totalorder %s837_s1, %s4357_s22 }
  0xeb   : > { %p4354_p0 = pnand %p4353_p5, %p6615_p3  ;;  %p4360_p9 = scmp.lt.s32.totalorder %s4358_s23, %s4352_s4 }
  0xed   : > { %p4355_p8 = pneg %p4354_p0  ;;  %p4361_p12 = por %p4360_p9, %p4359_p1 }
  0xef   : > { %p4362_p10 = pnand %p4361_p12, %p4355_p8 }
  0xf1   : > { %4365 = shalt.err (!%p4362_p10)
}
  0xf2   : > { %3976 = dma.hbm_to_vmem [thread:$0]  (%p6615_p3), %s5499_s29, 16, %s837_s1, %s5390_s3  }
  0xf3   : > { %s6616_s7 = sld [smem:[#allocation60_spill]]  ;;  %s846_s4 = scalar_lea.vmem [#allocation12], %s5472_s28 }
  0xf4   : > { %s853_s2 = sshll.u32 %s846_s4, 4  ;;  %s5528_s22 = sshll.u32 %s5472_s28, 4  ;;  %s854_s2 = int_to_ptr.vmem [resolvable:$true] %s853_s2 }
  0xf9   : > { %s6617_s5 = smov %s6616_s7  ;;  %s5524_s30 = scalar_lea.hbm %s6616_s7, %s5493_s24 }
  0xfa   : > { %s4366_s23 = scalar_lea.hbm %s5524_s30, 16  ;;  %s4370_s0 = scalar_lea.hbm %s6617_s5, 32 }
  0xfb   : > { %p4367_p6 = scmp.ne.s32.totalorder %s5524_s30, %s4366_s23  ;;  %p4371_p4 = scmp.lt.u32.totalorder %s5524_s30, %s6617_s5 }
  0xfc   : > { %p4372_p7 = scmp.lt.u32.totalorder %s4370_s0, %s4366_s23  ;;  %p4374_p5 = scmp.lt.u32.totalorder %s4366_s23, %s5524_s30 }
  0xfd   : > { %p4368_p13 = pnand %p4367_p6, %p6615_p3 }
  0xfe   : > { %p4373_p11 = por %p4372_p7, %p4371_p4 }
  0xff   : > { %p4369_p2 = pneg %p4368_p13 }
 0x100   : > { %p4375_p0 = por %p4374_p5, %p4373_p11 }
 0x102   : > { %p4376_p8 = pnand %p4375_p0, %p4369_p2 }
 0x104   : > { %4379 = shalt.err (!%p4376_p8)
}
 0x105   : > { %s4380_s4 = scalar_lea.vmem %s854_s2, 16  ;;  %s5040_s9 = smov [#allocation12]  }
 0x106   : > { %p4381_p1 = scmp.ne.s32.totalorder %s854_s2, %s4380_s4  ;;  %s4384_s19 = sshll.u32 %s5040_s9, 4  ;;  %s4385_s19 = int_to_ptr.vmem [resolvable:$false] %s4384_s19 }
 0x107   : > { %s4386_s29 = scalar_lea.vmem %s4385_s19, 32  ;;  %p4387_p10 = scmp.lt.s32.totalorder %s854_s2, %s4385_s19 }
 0x108   : > { %p4382_p9 = pnand %p4381_p1, %p6615_p3  ;;  %p4388_p6 = scmp.lt.s32.totalorder %s4386_s29, %s4380_s4 }
 0x10a   : > { %p4383_p12 = pneg %p4382_p9  ;;  %p4389_p13 = por %p4388_p6, %p4387_p10 }
 0x10c   : > { %p4390_p4 = pnand %p4389_p13, %p4383_p12 }
 0x10e   : > { %4393 = shalt.err (!%p4390_p4)
}
 0x10f   : > { %3977 = dma.hbm_to_vmem [thread:$0]  (%p6615_p3), %s5524_s30, 16, %s854_s2, %s5390_s3  }
 0x110   : > { %s5549_s23 = sshll.u32 %s5024_s8, 8  ;;  %s6618_s0 = sld [smem:[#allocation61_spill]] }
 0x111   : > { %s864_s19 = scalar_lea.vmem [#allocation13], %s5528_s22 }
 0x112   : > { %s871_s7 = sshll.u32 %s864_s19, 4  ;;  %s5558_s7 = int_to_ptr.vmem [resolvable:$true] %s871_s7 }
 0x116   : > { %s5555_s26 = scalar_lea.hbm %s6618_s0, %s5549_s23  ;;  %s4398_s29 = scalar_lea.hbm %s6618_s0, 512 }
 0x117   : > { %s4394_s4 = scalar_lea.hbm %s5555_s26, 256  ;;  %p4399_p5 = scmp.lt.u32.totalorder %s5555_s26, %s6618_s0 }
 0x118   : > { %p4395_p2 = scmp.ne.s32.totalorder %s5555_s26, %s4394_s4  ;;  %p4400_p0 = scmp.lt.u32.totalorder %s4398_s29, %s4394_s4 }
 0x119   : > { %p4402_p1 = scmp.lt.u32.totalorder %s4394_s4, %s5555_s26 }
 0x11a   : > { %p4396_p7 = pnand %p4395_p2, %p6615_p3  ;;  %p4401_p8 = por %p4400_p0, %p4399_p5 }
 0x11c   : > { %p4397_p11 = pneg %p4396_p7  ;;  %p4403_p9 = por %p4402_p1, %p4401_p8 }
 0x11e   : > { %p4404_p12 = pnand %p4403_p9, %p4397_p11 }
 0x120   : > { %4407 = shalt.err (!%p4404_p12)
}
 0x121   : > { %s4408_s19 = scalar_lea.vmem %s5558_s7, 256  ;;  %s5041_s30 = smov [#allocation13]  }
 0x122   : > { %p4409_p10 = scmp.ne.s32.totalorder %s5558_s7, %s4408_s19  ;;  %s4412_s2 = sshll.u32 %s5041_s30, 4  ;;  %s4413_s2 = int_to_ptr.vmem [resolvable:$false] %s4412_s2 }
 0x123   : > { %s4414_s1 = scalar_lea.vmem %s4413_s2, 512  ;;  %p4415_p4 = scmp.lt.s32.totalorder %s5558_s7, %s4413_s2 }
 0x124   : > { %p4410_p6 = pnand %p4409_p10, %p6615_p3  ;;  %p4416_p2 = scmp.lt.s32.totalorder %s4414_s1, %s4408_s19 }
 0x126   : > { %p4411_p13 = pneg %p4410_p6  ;;  %p4417_p7 = por %p4416_p2, %p4415_p4 }
 0x128   : > { %p4418_p5 = pnand %p4417_p7, %p4411_p13 }
 0x12a   : > { %4421 = shalt.err (!%p4418_p5)
}
 0x12b   : > { %s6543_s4 = smov 64   ;;  %s6546_s29 = smov 4  }
 0x12c   : > { %3978 = dma.hbm_to_vmem [thread:$0]  (%p6615_p3), %s5555_s26, 256, %s5558_s7, %s5390_s3, %s6543_s4, %s6543_s4, %s6546_s29  }
 0x12d   : > { %s6619_s19 = sld [smem:[#allocation62_spill]]  ;;  %s884_s1 = scalar_lea.vmem [#allocation14], %s5472_s28 }
 0x12e   : > { %s891_s0 = sshll.u32 %s884_s1, 4  ;;  %s892_s0 = int_to_ptr.vmem [resolvable:$true] %s891_s0 }
 0x133   : > { %s5589_s2 = scalar_lea.hbm %s6619_s19, %s5493_s24  ;;  %s4426_s26 = scalar_lea.hbm %s6619_s19, 32 }
 0x134   : > { %s4422_s5 = scalar_lea.hbm %s5589_s2, 16  ;;  %p4427_p1 = scmp.lt.u32.totalorder %s5589_s2, %s6619_s19 }
 0x135   : > { %p4423_p11 = scmp.ne.s32.totalorder %s5589_s2, %s4422_s5  ;;  %p4428_p9 = scmp.lt.u32.totalorder %s4426_s26, %s4422_s5 }
 0x136   : > { %p4430_p10 = scmp.lt.u32.totalorder %s4422_s5, %s5589_s2 }
 0x137   : > { %p4424_p0 = pnand %p4423_p11, %p6615_p3  ;;  %p4429_p12 = por %p4428_p9, %p4427_p1 }
 0x139   : > { %p4425_p8 = pneg %p4424_p0  ;;  %p4431_p6 = por %p4430_p10, %p4429_p12 }
 0x13b   : > { %p4432_p13 = pnand %p4431_p6, %p4425_p8 }
 0x13d   : > { %4435 = shalt.err (!%p4432_p13)
}
 0x13e   : > { %s4436_s30 = scalar_lea.vmem %s892_s0, 16  ;;  %s5044_s1 = smov [#allocation14]  }
 0x13f   : > { %p4437_p4 = scmp.ne.s32.totalorder %s892_s0, %s4436_s30  ;;  %s4440_s4 = sshll.u32 %s5044_s1, 4  ;;  %s4441_s4 = int_to_ptr.vmem [resolvable:$false] %s4440_s4 }
 0x140   : > { %s4442_s27 = scalar_lea.vmem %s4441_s4, 32  ;;  %p4443_p5 = scmp.lt.s32.totalorder %s892_s0, %s4441_s4 }
 0x141   : > { %p4438_p2 = pnand %p4437_p4, %p6615_p3  ;;  %p4444_p11 = scmp.lt.s32.totalorder %s4442_s27, %s4436_s30 }
 0x143   : > { %p4439_p7 = pneg %p4438_p2  ;;  %p4445_p0 = por %p4444_p11, %p4443_p5 }
 0x145   : > { %p4446_p1 = pnand %p4445_p0, %p4439_p7 }
 0x147   : > { %4449 = shalt.err (!%p4446_p1)
}
 0x148   : > { %3979 = dma.hbm_to_vmem [thread:$0]  (%p6615_p3), %s5589_s2, 16, %s892_s0, %s5390_s3  }
 0x149   : > { %s6620_s26 = sld [smem:[#allocation63_spill]]  ;;  %s902_s4 = scalar_lea.vmem [#allocation15], %s5528_s22 }
 0x14a   : > { %s909_s30 = sshll.u32 %s902_s4, 4  ;;  %s5617_s30 = int_to_ptr.vmem [resolvable:$true] %s909_s30 }
 0x14f   : > { %s6621_s9 = smov %s6620_s26  ;;  %s5614_s7 = scalar_lea.hbm %s6620_s26, %s5549_s23 }
 0x150   : > { %s4450_s1 = scalar_lea.hbm %s5614_s7, 256  ;;  %s4454_s2 = scalar_lea.hbm %s6621_s9, 512 }
 0x151   : > { %p4451_p8 = scmp.ne.s32.totalorder %s5614_s7, %s4450_s1  ;;  %p4455_p10 = scmp.lt.u32.totalorder %s5614_s7, %s6621_s9 }
 0x152   : > { %p4456_p6 = scmp.lt.u32.totalorder %s4454_s2, %s4450_s1  ;;  %p4458_p4 = scmp.lt.u32.totalorder %s4450_s1, %s5614_s7 }
 0x153   : > { %p4452_p9 = pnand %p4451_p8, %p6615_p3 }
 0x154   : > { %p4457_p13 = por %p4456_p6, %p4455_p10 }
 0x155   : > { %p4453_p12 = pneg %p4452_p9 }
 0x156   : > { %p4459_p2 = por %p4458_p4, %p4457_p13 }
 0x158   : > { %p4460_p7 = pnand %p4459_p2, %p4453_p12 }
 0x15a   : > { %4463 = shalt.err (!%p4460_p7)
}
 0x15b   : > { %s4464_s26 = scalar_lea.vmem %s5617_s30, 256  ;;  %s5045_s4 = smov [#allocation15]  }
 0x15c   : > { %p4465_p5 = scmp.ne.s32.totalorder %s5617_s30, %s4464_s26  ;;  %s4468_s27 = sshll.u32 %s5045_s4, 4  ;;  %s4469_s27 = int_to_ptr.vmem [resolvable:$false] %s4468_s27 }
 0x15d   : > { %s4470_s0 = scalar_lea.vmem %s4469_s27, 512  ;;  %p4471_p1 = scmp.lt.s32.totalorder %s5617_s30, %s4469_s27 }
 0x15e   : > { %p4466_p11 = pnand %p4465_p5, %p6615_p3  ;;  %p4472_p8 = scmp.lt.s32.totalorder %s4470_s0, %s4464_s26 }
 0x160   : > { %p4467_p0 = pneg %p4466_p11  ;;  %p4473_p9 = por %p4472_p8, %p4471_p1 }
 0x162   : > { %p4474_p10 = pnand %p4473_p9, %p4467_p0 }
 0x164   : > { %4477 = shalt.err (!%p4474_p10)
}
 0x165   : > { %s6622_s1 = smov 64   ;;  %s6623_s10 = sld [smem:[#allocation64_spill]] }
 0x166   : > { %3980 = dma.hbm_to_vmem [thread:$0]  (%p6615_p3), %s5614_s7, 256, %s5617_s30, %s5390_s3, %s6622_s1, %s6622_s1, %s6546_s29  }
 0x167   : > { %s922_s26 = scalar_lea.vmem [#allocation16], %s5472_s28 }
 0x168   : > { %s929_s4 = sshll.u32 %s922_s26, 4  ;;  %s930_s4 = int_to_ptr.vmem [resolvable:$true] %s929_s4 }
 0x16b   : > { %s5648_s5 = scalar_lea.hbm %s6623_s10, %s5493_s24  ;;  %s4482_s7 = scalar_lea.hbm %s6623_s10, 32 }
 0x16c   : > { %s4478_s27 = scalar_lea.hbm %s5648_s5, 16  ;;  %p4483_p4 = scmp.lt.u32.totalorder %s5648_s5, %s6623_s10 }
 0x16d   : > { %p4479_p12 = scmp.ne.s32.totalorder %s5648_s5, %s4478_s27  ;;  %p4484_p2 = scmp.lt.u32.totalorder %s4482_s7, %s4478_s27 }
 0x16e   : > { %p4486_p5 = scmp.lt.u32.totalorder %s4478_s27, %s5648_s5 }
 0x16f   : > { %p4480_p6 = pnand %p4479_p12, %p6615_p3  ;;  %p4485_p7 = por %p4484_p2, %p4483_p4 }
 0x171   : > { %p4481_p13 = pneg %p4480_p6  ;;  %p4487_p11 = por %p4486_p5, %p4485_p7 }
 0x173   : > { %p4488_p0 = pnand %p4487_p11, %p4481_p13 }
 0x175   : > { %4491 = shalt.err (!%p4488_p0)
}
 0x176   : > { %s4492_s21 = scalar_lea.vmem %s930_s4, 16  ;;  %s5046_s26 = smov [#allocation16]  }
 0x177   : > { %p4493_p1 = scmp.ne.s32.totalorder %s930_s4, %s4492_s21  ;;  %s4496_s29 = sshll.u32 %s5046_s26, 4  ;;  %s4497_s29 = int_to_ptr.vmem [resolvable:$false] %s4496_s29 }
 0x178   : > { %s4498_s9 = scalar_lea.vmem %s4497_s29, 32  ;;  %p4499_p10 = scmp.lt.s32.totalorder %s930_s4, %s4497_s29 }
 0x179   : > { %p4494_p8 = pnand %p4493_p1, %p6615_p3  ;;  %p4500_p12 = scmp.lt.s32.totalorder %s4498_s9, %s4492_s21 }
 0x17b   : > { %p4495_p9 = pneg %p4494_p8  ;;  %p4501_p6 = por %p4500_p12, %p4499_p10 }
 0x17d   : > { %p4502_p2 = pnand %p4501_p6, %p4495_p9 }
 0x17f   : > { %4505 = shalt.err (!%p4502_p2)
}
 0x180   : > { %3981 = dma.hbm_to_vmem [thread:$0]  (%p6615_p3), %s5648_s5, 16, %s930_s4, %s5390_s3  }
 0x181   : > { %s6624_s11 = sld [smem:[#allocation65_spill]]  ;;  %s939_s29 = scalar_lea.vmem [#allocation17], %s5472_s28 }
 0x182   : > { %s946_s30 = sshll.u32 %s939_s29, 4  ;;  %s947_s30 = int_to_ptr.vmem [resolvable:$true] %s946_s30 }
 0x187   : > { %s5673_s7 = scalar_lea.hbm %s6624_s11, %s5493_s24  ;;  %s4510_s5 = scalar_lea.hbm %s6624_s11, 32 }
 0x188   : > { %s4506_s2 = scalar_lea.hbm %s5673_s7, 16  ;;  %p4511_p5 = scmp.lt.u32.totalorder %s5673_s7, %s6624_s11 }
 0x189   : > { %p4507_p13 = scmp.ne.s32.totalorder %s5673_s7, %s4506_s2  ;;  %p4512_p11 = scmp.lt.u32.totalorder %s4510_s5, %s4506_s2 }
 0x18a   : > { %p4514_p1 = scmp.lt.u32.totalorder %s4506_s2, %s5673_s7 }
 0x18b   : > { %p4508_p4 = pnand %p4507_p13, %p6615_p3  ;;  %p4513_p0 = por %p4512_p11, %p4511_p5 }
 0x18d   : > { %p4509_p7 = pneg %p4508_p4  ;;  %p4515_p8 = por %p4514_p1, %p4513_p0 }
 0x18f   : > { %p4516_p9 = pnand %p4515_p8, %p4509_p7 }
 0x191   : > { %4519 = shalt.err (!%p4516_p9)
}
 0x192   : > { %s4520_s27 = scalar_lea.vmem %s947_s30, 16  ;;  %s5047_s0 = smov [#allocation17]  }
 0x193   : > { %p4521_p10 = scmp.ne.s32.totalorder %s947_s30, %s4520_s27  ;;  %s4524_s29 = sshll.u32 %s5047_s0, 4  ;;  %s4525_s29 = int_to_ptr.vmem [resolvable:$false] %s4524_s29 }
 0x194   : > { %s4526_s21 = scalar_lea.vmem %s4525_s29, 32  ;;  %p4527_p2 = scmp.lt.s32.totalorder %s947_s30, %s4525_s29 }
 0x195   : > { %p4522_p12 = pnand %p4521_p10, %p6615_p3  ;;  %p4528_p13 = scmp.lt.s32.totalorder %s4526_s21, %s4520_s27 }
 0x197   : > { %p4523_p6 = pneg %p4522_p12  ;;  %p4529_p4 = por %p4528_p13, %p4527_p2 }
 0x199   : > { %p4530_p5 = pnand %p4529_p4, %p4523_p6 }
 0x19b   : > { %4533 = shalt.err (!%p4530_p5)
}
 0x19c   : > { %3982 = dma.hbm_to_vmem [thread:$0]  (%p6615_p3), %s5673_s7, 16, %s947_s30, %s5390_s3  }
 0x19d   : > { %s6625_s12 = sld [smem:[#allocation66_spill]]  ;;  %s956_s4 = scalar_lea.vmem [#allocation18], %s5472_s28 }
 0x19e   : > { %s963_s9 = sshll.u32 %s956_s4, 4  ;;  %s964_s9 = int_to_ptr.vmem [resolvable:$true] %s963_s9 }
 0x1a3   : > { %s5698_s5 = scalar_lea.hbm %s6625_s12, %s5493_s24  ;;  %s4538_s7 = scalar_lea.hbm %s6625_s12, 32 }
 0x1a4   : > { %s4534_s27 = scalar_lea.hbm %s5698_s5, 16  ;;  %p4539_p1 = scmp.lt.u32.totalorder %s5698_s5, %s6625_s12 }
 0x1a5   : > { %p4535_p7 = scmp.ne.s32.totalorder %s5698_s5, %s4534_s27  ;;  %p4540_p8 = scmp.lt.u32.totalorder %s4538_s7, %s4534_s27 }
 0x1a6   : > { %p4542_p10 = scmp.lt.u32.totalorder %s4534_s27, %s5698_s5 }
 0x1a7   : > { %p4536_p11 = pnand %p4535_p7, %p6615_p3  ;;  %p4541_p9 = por %p4540_p8, %p4539_p1 }
 0x1a9   : > { %p4537_p0 = pneg %p4536_p11  ;;  %p4543_p12 = por %p4542_p10, %p4541_p9 }
 0x1ab   : > { %p4544_p6 = pnand %p4543_p12, %p4537_p0 }
 0x1ad   : > { %4547 = shalt.err (!%p4544_p6)
}
 0x1ae   : > { %s4548_s2 = scalar_lea.vmem %s964_s9, 16  ;;  %s5048_s26 = smov [#allocation18]  }
 0x1af   : > { %p4549_p2 = scmp.ne.s32.totalorder %s964_s9, %s4548_s2  ;;  %s4552_s4 = sshll.u32 %s5048_s26, 4  ;;  %s4553_s4 = int_to_ptr.vmem [resolvable:$false] %s4552_s4 }
 0x1b0   : > { %s4554_s0 = scalar_lea.vmem %s4553_s4, 32  ;;  %p4555_p5 = scmp.lt.s32.totalorder %s964_s9, %s4553_s4 }
 0x1b1   : > { %p4550_p13 = pnand %p4549_p2, %p6615_p3  ;;  %p4556_p7 = scmp.lt.s32.totalorder %s4554_s0, %s4548_s2 }
 0x1b3   : > { %p4551_p4 = pneg %p4550_p13  ;;  %p4557_p11 = por %p4556_p7, %p4555_p5 }
 0x1b5   : > { %p4558_p1 = pnand %p4557_p11, %p4551_p4 }
 0x1b7   : > { %4561 = shalt.err (!%p4558_p1)
}
 0x1b8   : > { %3983 = dma.hbm_to_vmem [thread:$0]  (%p6615_p3), %s5698_s5, 16, %s964_s9, %s5390_s3  }
 0x1b9   : > { %s6626_s13 = sld [smem:[#allocation67_spill]]  ;;  %s974_s30 = scalar_lea.vmem [#allocation19], %s5528_s22 }
 0x1ba   : > { %s981_s21 = sshll.u32 %s974_s30, 4  ;;  %s5726_s21 = int_to_ptr.vmem [resolvable:$true] %s981_s21 }
 0x1bf   : > { %s5723_s7 = scalar_lea.hbm %s6626_s13, %s5549_s23  ;;  %s4566_s9 = scalar_lea.hbm %s6626_s13, 512 }
 0x1c0   : > { %s4562_s2 = scalar_lea.hbm %s5723_s7, 256  ;;  %p4567_p10 = scmp.lt.u32.totalorder %s5723_s7, %s6626_s13 }
 0x1c1   : > { %p4563_p0 = scmp.ne.s32.totalorder %s5723_s7, %s4562_s2  ;;  %p4568_p12 = scmp.lt.u32.totalorder %s4566_s9, %s4562_s2 }
 0x1c2   : > { %p4570_p2 = scmp.lt.u32.totalorder %s4562_s2, %s5723_s7 }
 0x1c3   : > { %p4564_p8 = pnand %p4563_p0, %p6615_p3  ;;  %p4569_p6 = por %p4568_p12, %p4567_p10 }
 0x1c5   : > { %p4565_p9 = pneg %p4564_p8  ;;  %p4571_p13 = por %p4570_p2, %p4569_p6 }
 0x1c7   : > { %p4572_p4 = pnand %p4571_p13, %p4565_p9 }
 0x1c9   : > { %4575 = shalt.err (!%p4572_p4)
}
 0x1ca   : > { %s4576_s27 = scalar_lea.vmem %s5726_s21, 256  ;;  %s5049_s29 = smov [#allocation19]  }
 0x1cb   : > { %p4577_p5 = scmp.ne.s32.totalorder %s5726_s21, %s4576_s27  ;;  %s4580_s30 = sshll.u32 %s5049_s29, 4  ;;  %s4581_s30 = int_to_ptr.vmem [resolvable:$false] %s4580_s30 }
 0x1cc   : > { %s4582_s26 = scalar_lea.vmem %s4581_s30, 512  ;;  %p4583_p1 = scmp.lt.s32.totalorder %s5726_s21, %s4581_s30 }
 0x1cd   : > { %p4578_p7 = pnand %p4577_p5, %p6615_p3  ;;  %p4584_p0 = scmp.lt.s32.totalorder %s4582_s26, %s4576_s27 }
 0x1cf   : > { %p4579_p11 = pneg %p4578_p7  ;;  %p4585_p8 = por %p4584_p0, %p4583_p1 }
 0x1d1   : > { %p4586_p10 = pnand %p4585_p8, %p4579_p11 }
 0x1d3   : > { %4589 = shalt.err (!%p4586_p10)
}
 0x1d4   : > { %s6627_s2 = smov 4   ;;  %s6628_s14 = sld [smem:[#allocation68_spill]] }
 0x1d5   : > { %3984 = dma.hbm_to_vmem [thread:$0]  (%p6615_p3), %s5723_s7, 256, %s5726_s21, %s5390_s3, %s6622_s1, %s6622_s1, %s6627_s2  }
 0x1d6   : > { %s994_s0 = scalar_lea.vmem [#allocation20], %s5472_s28 }
 0x1d7   : > { %s1001_s27 = sshll.u32 %s994_s0, 4  ;;  %s1002_s27 = int_to_ptr.vmem [resolvable:$true] %s1001_s27 }
 0x1da   : > { %s5757_s4 = scalar_lea.hbm %s6628_s14, %s5493_s24  ;;  %s4594_s7 = scalar_lea.hbm %s6628_s14, 32 }
 0x1db   : > { %s4590_s29 = scalar_lea.hbm %s5757_s4, 16  ;;  %p4595_p2 = scmp.lt.u32.totalorder %s5757_s4, %s6628_s14 }
 0x1dc   : > { %p4591_p9 = scmp.ne.s32.totalorder %s5757_s4, %s4590_s29  ;;  %p4596_p13 = scmp.lt.u32.totalorder %s4594_s7, %s4590_s29 }
 0x1dd   : > { %p4598_p5 = scmp.lt.u32.totalorder %s4590_s29, %s5757_s4 }
 0x1de   : > { %p4592_p12 = pnand %p4591_p9, %p6615_p3  ;;  %p4597_p4 = por %p4596_p13, %p4595_p2 }
 0x1e0   : > { %p4593_p6 = pneg %p4592_p12  ;;  %p4599_p7 = por %p4598_p5, %p4597_p4 }
 0x1e2   : > { %p4600_p11 = pnand %p4599_p7, %p4593_p6 }
 0x1e4   : > { %4603 = shalt.err (!%p4600_p11)
}
 0x1e5   : > { %s4604_s9 = scalar_lea.vmem %s1002_s27, 16  ;;  %s5050_s0 = smov [#allocation20]  }
 0x1e6   : > { %p4605_p1 = scmp.ne.s32.totalorder %s1002_s27, %s4604_s9  ;;  %s4608_s10 = sshll.u32 %s5050_s0, 4  ;;  %s4609_s10 = int_to_ptr.vmem [resolvable:$false] %s4608_s10 }
 0x1e7   : > { %s4610_s30 = scalar_lea.vmem %s4609_s10, 32  ;;  %p4611_p10 = scmp.lt.s32.totalorder %s1002_s27, %s4609_s10 }
 0x1e8   : > { %p4606_p0 = pnand %p4605_p1, %p6615_p3  ;;  %p4612_p9 = scmp.lt.s32.totalorder %s4610_s30, %s4604_s9 }
 0x1ea   : > { %p4607_p8 = pneg %p4606_p0  ;;  %p4613_p12 = por %p4612_p9, %p4611_p10 }
 0x1ec   : > { %p4614_p2 = pnand %p4613_p12, %p4607_p8 }
 0x1ee   : > { %4617 = shalt.err (!%p4614_p2)
}
 0x1ef   : > { %3985 = dma.hbm_to_vmem [thread:$0]  (%p6615_p3), %s5757_s4, 16, %s1002_s27, %s5390_s3  }
 0x1f0   : > { %s5782_s7 = scalar_lea.hbm %s6480_s15, %s5549_s23  ;;  %s1012_s10 = scalar_lea.vmem [#allocation21], %s5528_s22 }
 0x1f1   : > { %s1019_s21 = sshll.u32 %s1012_s10, 4  ;;  %s4618_s5 = scalar_lea.hbm %s5782_s7, 256  ;;  %s5785_s21 = int_to_ptr.vmem [resolvable:$true] %s1019_s21 }
 0x1f2   : > { %p4619_p6 = scmp.ne.s32.totalorder %s5782_s7, %s4618_s5  ;;  %s4622_s27 = scalar_lea.hbm %s6480_s15, 512 }
 0x1f3   : > { %p4623_p5 = scmp.lt.u32.totalorder %s5782_s7, %s6480_s15  ;;  %p4624_p7 = scmp.lt.u32.totalorder %s4622_s27, %s4618_s5 }
 0x1f4   : > { %p4620_p13 = pnand %p4619_p6, %p6615_p3  ;;  %p4626_p1 = scmp.lt.u32.totalorder %s4618_s5, %s5782_s7 }
 0x1f5   : > { %p4625_p11 = por %p4624_p7, %p4623_p5 }
 0x1f6   : > { %p4621_p4 = pneg %p4620_p13 }
 0x1f7   : > { %p4627_p0 = por %p4626_p1, %p4625_p11 }
 0x1f9   : > { %p4628_p8 = pnand %p4627_p0, %p4621_p4 }
 0x1fb   : > { %4631 = shalt.err (!%p4628_p8)
}
 0x1fc   : > { %s4632_s29 = scalar_lea.vmem %s5785_s21, 256  ;;  %s5051_s26 = smov [#allocation21]  }
 0x1fd   : > { %p4633_p10 = scmp.ne.s32.totalorder %s5785_s21, %s4632_s29  ;;  %s4636_s10 = sshll.u32 %s5051_s26, 4  ;;  %s4637_s10 = int_to_ptr.vmem [resolvable:$false] %s4636_s10 }
 0x1fe   : > { %s4638_s9 = scalar_lea.vmem %s4637_s10, 512  ;;  %p4639_p2 = scmp.lt.s32.totalorder %s5785_s21, %s4637_s10 }
 0x1ff   : > { %p4634_p9 = pnand %p4633_p10, %p6615_p3  ;;  %p4640_p6 = scmp.lt.s32.totalorder %s4638_s9, %s4632_s29 }
 0x201   : > { %p4635_p12 = pneg %p4634_p9  ;;  %p4641_p13 = por %p4640_p6, %p4639_p2 }
 0x203   : > { %p4642_p5 = pnand %p4641_p13, %p4635_p12 }
 0x205   : > { %4645 = shalt.err (!%p4642_p5)
}
 0x206   : > { %3986 = dma.hbm_to_vmem [thread:$0]  (%p6615_p3), %s5782_s7, 256, %s5785_s21, %s5390_s3, %s6622_s1, %s6622_s1, %s6627_s2  }
 0x207   : > { %s5816_s27 = scalar_lea.hbm %s6481_s16, %s5493_s24  ;;  %s1032_s0 = scalar_lea.vmem [#allocation22], %s5472_s28 }
 0x208   : > { %s1039_s30 = sshll.u32 %s1032_s0, 4  ;;  %s4646_s29 = scalar_lea.hbm %s5816_s27, 16  ;;  %s1040_s30 = int_to_ptr.vmem [resolvable:$true] %s1039_s30 }
 0x209   : > { %p4647_p4 = scmp.ne.s32.totalorder %s5816_s27, %s4646_s29  ;;  %s4650_s7 = scalar_lea.hbm %s6481_s16, 32 }
 0x20a   : > { %p4651_p1 = scmp.lt.u32.totalorder %s5816_s27, %s6481_s16  ;;  %p4652_p0 = scmp.lt.u32.totalorder %s4650_s7, %s4646_s29 }
 0x20b   : > { %p4648_p7 = pnand %p4647_p4, %p6615_p3  ;;  %p4654_p10 = scmp.lt.u32.totalorder %s4646_s29, %s5816_s27 }
 0x20c   : > { %p4653_p8 = por %p4652_p0, %p4651_p1 }
 0x20d   : > { %p4649_p11 = pneg %p4648_p7 }
 0x20e   : > { %p4655_p9 = por %p4654_p10, %p4653_p8 }
 0x210   : > { %p4656_p12 = pnand %p4655_p9, %p4649_p11 }
 0x212   : > { %4659 = shalt.err (!%p4656_p12)
}
 0x213   : > { %s4660_s5 = scalar_lea.vmem %s1040_s30, 16  ;;  %s5052_s4 = smov [#allocation22]  }
 0x214   : > { %p4661_p2 = scmp.ne.s32.totalorder %s1040_s30, %s4660_s5  ;;  %s4664_s0 = sshll.u32 %s5052_s4, 4  ;;  %s4665_s0 = int_to_ptr.vmem [resolvable:$false] %s4664_s0 }
 0x215   : > { %s4666_s26 = scalar_lea.vmem %s4665_s0, 32  ;;  %p4667_p5 = scmp.lt.s32.totalorder %s1040_s30, %s4665_s0 }
 0x216   : > { %p4662_p6 = pnand %p4661_p2, %p6615_p3  ;;  %p4668_p4 = scmp.lt.s32.totalorder %s4666_s26, %s4660_s5 }
 0x218   : > { %p4663_p13 = pneg %p4662_p6  ;;  %p4669_p7 = por %p4668_p4, %p4667_p5 }
 0x21a   : > { %p4670_p0 = pnand %p4669_p7, %p4663_p13 }
 0x21c   : > { %4673 = shalt.err (!%p4670_p0)
}
 0x21d   : > { %3987 = dma.hbm_to_vmem [thread:$0]  (%p6615_p3), %s5816_s27, 16, %s1040_s30, %s5390_s3  }
 0x21e   : > { %s5841_s7 = scalar_lea.hbm %s6482_s17, %s5549_s23  ;;  %s1050_s21 = scalar_lea.vmem [#allocation23], %s5528_s22 }
 0x21f   : > { %s1057_s9 = sshll.u32 %s1050_s21, 4  ;;  %s4674_s5 = scalar_lea.hbm %s5841_s7, 256  ;;  %s5844_s9 = int_to_ptr.vmem [resolvable:$true] %s1057_s9 }
 0x220   : > { %p4675_p11 = scmp.ne.s32.totalorder %s5841_s7, %s4674_s5  ;;  %s4678_s30 = scalar_lea.hbm %s6482_s17, 512 }
 0x221   : > { %p4679_p10 = scmp.lt.u32.totalorder %s5841_s7, %s6482_s17  ;;  %p4680_p9 = scmp.lt.u32.totalorder %s4678_s30, %s4674_s5 }
 0x222   : > { %p4676_p1 = pnand %p4675_p11, %p6615_p3  ;;  %p4682_p2 = scmp.lt.u32.totalorder %s4674_s5, %s5841_s7 }
 0x223   : > { %p4681_p12 = por %p4680_p9, %p4679_p10 }
 0x224   : > { %p4677_p8 = pneg %p4676_p1 }
 0x225   : > { %p4683_p6 = por %p4682_p2, %p4681_p12 }
 0x227   : > { %p4684_p13 = pnand %p4683_p6, %p4677_p8 }
 0x229   : > { %4687 = shalt.err (!%p4684_p13)
}
 0x22a   : > { %s4688_s29 = scalar_lea.vmem %s5844_s9, 256  ;;  %s5053_s10 = smov [#allocation23]  }
 0x22b   : > { %p4689_p5 = scmp.ne.s32.totalorder %s5844_s9, %s4688_s29  ;;  %s4692_s21 = sshll.u32 %s5053_s10, 4  ;;  %s4693_s21 = int_to_ptr.vmem [resolvable:$false] %s4692_s21 }
 0x22c   : > { %s4694_s4 = scalar_lea.vmem %s4693_s21, 512  ;;  %p4695_p0 = scmp.lt.s32.totalorder %s5844_s9, %s4693_s21 }
 0x22d   : > { %p4690_p4 = pnand %p4689_p5, %p6615_p3  ;;  %p4696_p11 = scmp.lt.s32.totalorder %s4694_s4, %s4688_s29 }
 0x22f   : > { %p4691_p7 = pneg %p4690_p4  ;;  %p4697_p1 = por %p4696_p11, %p4695_p0 }
 0x231   : > { %p4698_p10 = pnand %p4697_p1, %p4691_p7 }
 0x233   : > { %4701 = shalt.err (!%p4698_p10)
}
 0x234   : > { %3988 = dma.hbm_to_vmem [thread:$0]  (%p6615_p3), %s5841_s7, 256, %s5844_s9, %s5390_s3, %s6622_s1, %s6622_s1, %s6627_s2  }
 0x235   : > { %s5875_s30 = scalar_lea.hbm %s6483_s18, %s5493_s24  ;;  %s1070_s0 = scalar_lea.vmem [#allocation24], %s5472_s28 }
 0x236   : > { %s1077_s26 = sshll.u32 %s1070_s0, 4  ;;  %s4702_s29 = scalar_lea.hbm %s5875_s30, 16  ;;  %s1078_s26 = int_to_ptr.vmem [resolvable:$true] %s1077_s26 }
 0x237   : > { %p4703_p8 = scmp.ne.s32.totalorder %s5875_s30, %s4702_s29  ;;  %s4706_s7 = scalar_lea.hbm %s6483_s18, 32 }
 0x238   : > { %p4707_p2 = scmp.lt.u32.totalorder %s5875_s30, %s6483_s18  ;;  %p4708_p6 = scmp.lt.u32.totalorder %s4706_s7, %s4702_s29 }
 0x239   : > { %p4704_p9 = pnand %p4703_p8, %p6615_p3  ;;  %p4710_p5 = scmp.lt.u32.totalorder %s4702_s29, %s5875_s30 }
 0x23a   : > { %p4709_p13 = por %p4708_p6, %p4707_p2 }
 0x23b   : > { %p4705_p12 = pneg %p4704_p9 }
 0x23c   : > { %p4711_p4 = por %p4710_p5, %p4709_p13 }
 0x23e   : > { %p4712_p7 = pnand %p4711_p4, %p4705_p12 }
 0x240   : > { %4715 = shalt.err (!%p4712_p7)
}
 0x241   : > { %s4716_s5 = scalar_lea.vmem %s1078_s26, 16  ;;  %s5054_s27 = smov [#allocation24]  }
 0x242   : > { %p4717_p0 = scmp.ne.s32.totalorder %s1078_s26, %s4716_s5  ;;  %s4720_s0 = sshll.u32 %s5054_s27, 4  ;;  %s4721_s0 = int_to_ptr.vmem [resolvable:$false] %s4720_s0 }
 0x243   : > { %s4722_s10 = scalar_lea.vmem %s4721_s0, 32  ;;  %p4723_p10 = scmp.lt.s32.totalorder %s1078_s26, %s4721_s0 }
 0x244   : > { %p4718_p11 = pnand %p4717_p0, %p6615_p3  ;;  %p4724_p8 = scmp.lt.s32.totalorder %s4722_s10, %s4716_s5 }
 0x246   : > { %p4719_p1 = pneg %p4718_p11  ;;  %p4725_p9 = por %p4724_p8, %p4723_p10 }
 0x248   : > { %p4726_p2 = pnand %p4725_p9, %p4719_p1 }
 0x24a   : > { %4729 = shalt.err (!%p4726_p2)
}
 0x24b   : > { %3989 = dma.hbm_to_vmem [thread:$0]  (%p6615_p3), %s5875_s30, 16, %s1078_s26, %s5390_s3  }
 0x24c   : > { %s6629_s7 = sld [smem:[#allocation69_spill]]  ;;  %s1087_s5 = scalar_lea.vmem [#allocation25], %s5472_s28 }
 0x24d   : > { %s1094_s27 = sshll.u32 %s1087_s5, 4  ;;  %s1095_s27 = int_to_ptr.vmem [resolvable:$true] %s1094_s27 }
 0x252   : > { %s6630_s9 = smov %s6629_s7  ;;  %s5900_s4 = scalar_lea.hbm %s6629_s7, %s5493_s24 }
 0x253   : > { %s4730_s0 = scalar_lea.hbm %s5900_s4, 16  ;;  %s4734_s30 = scalar_lea.hbm %s6630_s9, 32 }
 0x254   : > { %p4731_p12 = scmp.ne.s32.totalorder %s5900_s4, %s4730_s0  ;;  %p4735_p5 = scmp.lt.u32.totalorder %s5900_s4, %s6630_s9 }
 0x255   : > { %p4736_p4 = scmp.lt.u32.totalorder %s4734_s30, %s4730_s0  ;;  %p4738_p0 = scmp.lt.u32.totalorder %s4730_s0, %s5900_s4 }
 0x256   : > { %p4732_p6 = pnand %p4731_p12, %p6615_p3 }
 0x257   : > { %p4737_p7 = por %p4736_p4, %p4735_p5 }
 0x258   : > { %p4733_p13 = pneg %p4732_p6 }
 0x259   : > { %p4739_p11 = por %p4738_p0, %p4737_p7 }
 0x25b   : > { %p4740_p1 = pnand %p4739_p11, %p4733_p13 }
 0x25d   : > { %4743 = shalt.err (!%p4740_p1)
}
 0x25e   : > { %s4744_s21 = scalar_lea.vmem %s1095_s27, 16  ;;  %s5055_s7 = smov [#allocation25]  }
 0x25f   : > { %p4745_p10 = scmp.ne.s32.totalorder %s1095_s27, %s4744_s21  ;;  %s4748_s5 = sshll.u32 %s5055_s7, 4  ;;  %s4749_s5 = int_to_ptr.vmem [resolvable:$false] %s4748_s5 }
 0x260   : > { %s4750_s11 = scalar_lea.vmem %s4749_s5, 32  ;;  %p4751_p2 = scmp.lt.s32.totalorder %s1095_s27, %s4749_s5 }
 0x261   : > { %p4746_p8 = pnand %p4745_p10, %p6615_p3  ;;  %p4752_p12 = scmp.lt.s32.totalorder %s4750_s11, %s4744_s21 }
 0x263   : > { %p4747_p9 = pneg %p4746_p8  ;;  %p4753_p6 = por %p4752_p12, %p4751_p2 }
 0x265   : > { %p4754_p4 = pnand %p4753_p6, %p4747_p9 }
 0x267   : > { %4757 = shalt.err (!%p4754_p4)
}
 0x268   : > { %3990 = dma.hbm_to_vmem [thread:$0]  (%p6615_p3), %s5900_s4, 16, %s1095_s27, %s5390_s3  }
 0x269   : > { %s6631_s30 = sld [smem:[#allocation70_spill]]  ;;  %s1104_s29 = scalar_lea.vmem [#allocation26], %s5472_s28 }
 0x26a   : > { %s1111_s21 = sshll.u32 %s1104_s29, 4  ;;  %s1112_s21 = int_to_ptr.vmem [resolvable:$true] %s1111_s21 }
 0x26f   : > { %s6632_s9 = smov %s6631_s30  ;;  %s5925_s26 = scalar_lea.hbm %s6631_s30, %s5493_s24 }
 0x270   : > { %s4758_s7 = scalar_lea.hbm %s5925_s26, 16  ;;  %s4762_s4 = scalar_lea.hbm %s6632_s9, 32 }
 0x271   : > { %p4759_p13 = scmp.ne.s32.totalorder %s5925_s26, %s4758_s7  ;;  %p4763_p0 = scmp.lt.u32.totalorder %s5925_s26, %s6632_s9 }
 0x272   : > { %p4764_p11 = scmp.lt.u32.totalorder %s4762_s4, %s4758_s7  ;;  %p4766_p10 = scmp.lt.u32.totalorder %s4758_s7, %s5925_s26 }
 0x273   : > { %p4760_p5 = pnand %p4759_p13, %p6615_p3 }
 0x274   : > { %p4765_p1 = por %p4764_p11, %p4763_p0 }
 0x275   : > { %p4761_p7 = pneg %p4760_p5 }
 0x276   : > { %p4767_p8 = por %p4766_p10, %p4765_p1 }
 0x278   : > { %p4768_p9 = pnand %p4767_p8, %p4761_p7 }
 0x27a   : > { %4771 = shalt.err (!%p4768_p9)
}
 0x27b   : > { %s4772_s10 = scalar_lea.vmem %s1112_s21, 16  ;;  %s5056_s30 = smov [#allocation26]  }
 0x27c   : > { %p4773_p2 = scmp.ne.s32.totalorder %s1112_s21, %s4772_s10  ;;  %s4776_s29 = sshll.u32 %s5056_s30, 4  ;;  %s4777_s29 = int_to_ptr.vmem [resolvable:$false] %s4776_s29 }
 0x27d   : > { %s4778_s5 = scalar_lea.vmem %s4777_s29, 32  ;;  %p4779_p4 = scmp.lt.s32.totalorder %s1112_s21, %s4777_s29 }
 0x27e   : > { %p4774_p12 = pnand %p4773_p2, %p6615_p3  ;;  %p4780_p13 = scmp.lt.s32.totalorder %s4778_s5, %s4772_s10 }
 0x280   : > { %p4775_p6 = pneg %p4774_p12  ;;  %p4781_p5 = por %p4780_p13, %p4779_p4 }
 0x282   : > { %p4782_p0 = pnand %p4781_p5, %p4775_p6 }
 0x284   : > { %4785 = shalt.err (!%p4782_p0)
}
 0x285   : > { %3991 = dma.hbm_to_vmem [thread:$0]  (%p6615_p3), %s5925_s26, 16, %s1112_s21, %s5390_s3  }
 0x286   : > { %s6633_s4 = sld [smem:[#allocation71_spill]]  ;;  %s1122_s10 = scalar_lea.vmem [#allocation27], %s5528_s22 }
 0x287   : > { %s1129_s30 = sshll.u32 %s1122_s10, 4  ;;  %s5953_s30 = int_to_ptr.vmem [resolvable:$true] %s1129_s30 }
 0x28c   : > { %s6634_s0 = smov %s6633_s4  ;;  %s5950_s27 = scalar_lea.hbm %s6633_s4, %s5549_s23 }
 0x28d   : > { %s4786_s29 = scalar_lea.hbm %s5950_s27, 256  ;;  %s4790_s21 = scalar_lea.hbm %s6634_s0, 512 }
 0x28e   : > { %p4787_p7 = scmp.ne.s32.totalorder %s5950_s27, %s4786_s29  ;;  %p4791_p10 = scmp.lt.u32.totalorder %s5950_s27, %s6634_s0 }
 0x28f   : > { %p4792_p8 = scmp.lt.u32.totalorder %s4790_s21, %s4786_s29  ;;  %p4794_p2 = scmp.lt.u32.totalorder %s4786_s29, %s5950_s27 }
 0x290   : > { %p4788_p11 = pnand %p4787_p7, %p6615_p3 }
 0x291   : > { %p4793_p9 = por %p4792_p8, %p4791_p10 }
 0x292   : > { %p4789_p1 = pneg %p4788_p11 }
 0x293   : > { %p4795_p12 = por %p4794_p2, %p4793_p9 }
 0x295   : > { %p4796_p6 = pnand %p4795_p12, %p4789_p1 }
 0x297   : > { %4799 = shalt.err (!%p4796_p6)
}
 0x298   : > { %s4800_s22 = scalar_lea.vmem %s5953_s30, 256  ;;  %s5057_s11 = smov [#allocation27]  }
 0x299   : > { %p4801_p4 = scmp.ne.s32.totalorder %s5953_s30, %s4800_s22  ;;  %s4804_s4 = sshll.u32 %s5057_s11, 4  ;;  %s4805_s4 = int_to_ptr.vmem [resolvable:$false] %s4804_s4 }
 0x29a   : > { %s4806_s10 = scalar_lea.vmem %s4805_s4, 512  ;;  %p4807_p0 = scmp.lt.s32.totalorder %s5953_s30, %s4805_s4 }
 0x29b   : > { %p4802_p13 = pnand %p4801_p4, %p6615_p3  ;;  %p4808_p7 = scmp.lt.s32.totalorder %s4806_s10, %s4800_s22 }
 0x29d   : > { %p4803_p5 = pneg %p4802_p13  ;;  %p4809_p11 = por %p4808_p7, %p4807_p0 }
 0x29f   : > { %p4810_p10 = pnand %p4809_p11, %p4803_p5 }
 0x2a1   : > { %4813 = shalt.err (!%p4810_p10)
}
 0x2a2   : > { %3992 = dma.hbm_to_vmem [thread:$0]  (%p6615_p3), %s5950_s27, 256, %s5953_s30, %s5390_s3, %s6622_s1, %s6622_s1, %s6627_s2  }
 0x2a3   : > { %s6635_s26 = sld [smem:[#allocation72_spill]]  ;;  %s1142_s23 = scalar_lea.vmem [#allocation28], %s5472_s28 }
 0x2a4   : > { %s1149_s22 = sshll.u32 %s1142_s23, 4  ;;  %s1150_s22 = int_to_ptr.vmem [resolvable:$true] %s1149_s22 }
 0x2a9   : > { %s6636_s21 = smov %s6635_s26  ;;  %s5984_s7 = scalar_lea.hbm %s6635_s26, %s5493_s24 }
 0x2aa   : > { %s4814_s4 = scalar_lea.hbm %s5984_s7, 16  ;;  %s4818_s30 = scalar_lea.hbm %s6636_s21, 32 }
 0x2ab   : > { %p4815_p1 = scmp.ne.s32.totalorder %s5984_s7, %s4814_s4  ;;  %p4819_p2 = scmp.lt.u32.totalorder %s5984_s7, %s6636_s21 }
 0x2ac   : > { %p4820_p12 = scmp.lt.u32.totalorder %s4818_s30, %s4814_s4  ;;  %p4822_p4 = scmp.lt.u32.totalorder %s4814_s4, %s5984_s7 }
 0x2ad   : > { %p4816_p8 = pnand %p4815_p1, %p6615_p3 }
 0x2ae   : > { %p4821_p6 = por %p4820_p12, %p4819_p2 }
 0x2af   : > { %p4817_p9 = pneg %p4816_p8 }
 0x2b0   : > { %p4823_p13 = por %p4822_p4, %p4821_p6 }
 0x2b2   : > { %p4824_p5 = pnand %p4823_p13, %p4817_p9 }
 0x2b4   : > { %4827 = shalt.err (!%p4824_p5)
}
 0x2b5   : > { %s4828_s26 = scalar_lea.vmem %s1150_s22, 16  ;;  %s5058_s23 = smov [#allocation28]  }
 0x2b6   : > { %p4829_p0 = scmp.ne.s32.totalorder %s1150_s22, %s4828_s26  ;;  %s4832_s11 = sshll.u32 %s5058_s23, 4  ;;  %s4833_s11 = int_to_ptr.vmem [resolvable:$false] %s4832_s11 }
 0x2b7   : > { %s4834_s10 = scalar_lea.vmem %s4833_s11, 32  ;;  %p4835_p10 = scmp.lt.s32.totalorder %s1150_s22, %s4833_s11 }
 0x2b8   : > { %p4830_p7 = pnand %p4829_p0, %p6615_p3  ;;  %p4836_p1 = scmp.lt.s32.totalorder %s4834_s10, %s4828_s26 }
 0x2ba   : > { %p4831_p11 = pneg %p4830_p7  ;;  %p4837_p8 = por %p4836_p1, %p4835_p10 }
 0x2bc   : > { %p4838_p2 = pnand %p4837_p8, %p4831_p11 }
 0x2be   : > { %4841 = shalt.err (!%p4838_p2)
}
 0x2bf   : > { %3993 = dma.hbm_to_vmem [thread:$0]  (%p6615_p3), %s5984_s7, 16, %s1150_s22, %s5390_s3  }
 0x2c0   : > { %s3758_s4 = sshll.u32 %s5024_s8, 9  ;;  %s6637_s29 = sld [smem:[#allocation73_spill]] }
 0x2c1   : > { %s6639_s0 = sshll.u32 %s5472_s28, 5 }
 0x2c2   : > { %s1160_s11 = scalar_lea.vmem [#allocation29], %s6639_s0 }
 0x2c3   : > { %s1167_s26 = sshll.u32 %s1160_s11, 4  ;;  %s6014_s26 = int_to_ptr.vmem [resolvable:$true] %s1167_s26 }
 0x2c6   : > { %s6638_s5 = smov %s6637_s29  ;;  %s6010_s23 = scalar_lea.hbm %s6637_s29, %s3758_s4 }
 0x2c7   : > { %s4842_s10 = scalar_lea.hbm %s6010_s23, 512  ;;  %s4846_s27 = scalar_lea.hbm %s6638_s5, 1024 }
 0x2c8   : > { %p4843_p9 = scmp.ne.s32.totalorder %s6010_s23, %s4842_s10  ;;  %p4847_p4 = scmp.lt.u32.totalorder %s6010_s23, %s6638_s5 }
 0x2c9   : > { %p4848_p13 = scmp.lt.u32.totalorder %s4846_s27, %s4842_s10  ;;  %p4850_p0 = scmp.lt.u32.totalorder %s4842_s10, %s6010_s23 }
 0x2ca   : > { %p4844_p12 = pnand %p4843_p9, %p6615_p3 }
 0x2cb   : > { %p4849_p5 = por %p4848_p13, %p4847_p4 }
 0x2cc   : > { %p4845_p6 = pneg %p4844_p12 }
 0x2cd   : > { %p4851_p7 = por %p4850_p0, %p4849_p5 }
 0x2cf   : > { %p4852_p11 = pnand %p4851_p7, %p4845_p6 }
 0x2d1   : > { %4855 = shalt.err (!%p4852_p11)
}
 0x2d2   : > { %s4856_s0 = scalar_lea.vmem %s6014_s26, 512  ;;  %s5059_s29 = smov [#allocation29]  }
 0x2d3   : > { %p4857_p10 = scmp.ne.s32.totalorder %s6014_s26, %s4856_s0  ;;  %s4860_s11 = sshll.u32 %s5059_s29, 4  ;;  %s4861_s11 = int_to_ptr.vmem [resolvable:$false] %s4860_s11 }
 0x2d4   : > { %s4862_s7 = scalar_lea.vmem %s4861_s11, 1024  ;;  %p4863_p2 = scmp.lt.s32.totalorder %s6014_s26, %s4861_s11 }
 0x2d5   : > { %p4858_p1 = pnand %p4857_p10, %p6615_p3  ;;  %p4864_p9 = scmp.lt.s32.totalorder %s4862_s7, %s4856_s0 }
 0x2d7   : > { %p4859_p8 = pneg %p4858_p1  ;;  %p4865_p12 = por %p4864_p9, %p4863_p2 }
 0x2d9   : > { %p4866_p4 = pnand %p4865_p12, %p4859_p8 }
 0x2db   : > { %4869 = shalt.err (!%p4866_p4)
}
 0x2dc   : > { %3994 = dma.hbm_to_vmem [thread:$0]  (%p6615_p3), %s6010_s23, 512, %s6014_s26, %s5390_s3, %s6622_s1, %s6622_s1, %s6627_s2  }
 0x2dd   : > { %s6640_s27 = sld [smem:[#allocation74_spill]]  ;;  %s1180_s30 = scalar_lea.vmem [#allocation30], %s5472_s28 }
 0x2de   : > { %s1187_s0 = sshll.u32 %s1180_s30, 4  ;;  %s1188_s0 = int_to_ptr.vmem [resolvable:$true] %s1187_s0 }
 0x2e3   : > { %s6641_s5 = smov %s6640_s27  ;;  %s6045_s4 = scalar_lea.hbm %s6640_s27, %s5493_s24 }
 0x2e4   : > { %s4870_s29 = scalar_lea.hbm %s6045_s4, 16  ;;  %s4874_s1 = scalar_lea.hbm %s6641_s5, 32 }
 0x2e5   : > { %p4871_p6 = scmp.ne.s32.totalorder %s6045_s4, %s4870_s29  ;;  %p4875_p0 = scmp.lt.u32.totalorder %s6045_s4, %s6641_s5 }
 0x2e6   : > { %p4876_p7 = scmp.lt.u32.totalorder %s4874_s1, %s4870_s29  ;;  %p4878_p10 = scmp.lt.u32.totalorder %s4870_s29, %s6045_s4 }
 0x2e7   : > { %p4872_p13 = pnand %p4871_p6, %p6615_p3 }
 0x2e8   : > { %p4877_p11 = por %p4876_p7, %p4875_p0 }
 0x2e9   : > { %p4873_p5 = pneg %p4872_p13 }
 0x2ea   : > { %p4879_p1 = por %p4878_p10, %p4877_p11 }
 0x2ec   : > { %p4880_p8 = pnand %p4879_p1, %p4873_p5 }
 0x2ee   : > { %4883 = shalt.err (!%p4880_p8)
}
 0x2ef   : > { %s4884_s28 = scalar_lea.vmem %s1188_s0, 16  ;;  %s5060_s24 = smov [#allocation30]  }
 0x2f0   : > { %p4885_p2 = scmp.ne.s32.totalorder %s1188_s0, %s4884_s28  ;;  %s4888_s26 = sshll.u32 %s5060_s24, 4  ;;  %s4889_s26 = int_to_ptr.vmem [resolvable:$false] %s4888_s26 }
 0x2f1   : > { %s4890_s10 = scalar_lea.vmem %s4889_s26, 32  ;;  %p4891_p4 = scmp.lt.s32.totalorder %s1188_s0, %s4889_s26 }
 0x2f2   : > { %p4886_p9 = pnand %p4885_p2, %p6615_p3  ;;  %p4892_p6 = scmp.lt.s32.totalorder %s4890_s10, %s4884_s28 }
 0x2f4   : > { %p4887_p12 = pneg %p4886_p9  ;;  %p4893_p13 = por %p4892_p6, %p4891_p4 }
 0x2f6   : > { %p4894_p0 = pnand %p4893_p13, %p4887_p12 }
 0x2f8   : > { %4897 = shalt.err (!%p4894_p0)
}
 0x2f9   : > { %3995 = dma.hbm_to_vmem [thread:$0]  (%p6615_p3), %s6045_s4, 16, %s1188_s0, %s5390_s3  }
 0x2fa PF: > { %p6642_p5 = scmp.ne.s32.totalorder %s6602_s25, 0 }
 0x2fb   : > { %s6643_s22 = sld [smem:[#allocation45_spill]] (!%p6642_p5)  ;;  %s6644_s27 = sld [smem:[#allocation39_spill]] (!%p6642_p5) }
 0x2fc   : > { %1196 = sbr.rel (%p6642_p5) target bundleno = 5178 (0x143a), region = 120  ;;  %s6645_s30 = sld [smem:[#allocation48_spill]] (!%p6642_p5) }
 0x301   : > { %s1198_s29 = sand.u32 (!%p6642_p5), 1, %s6643_s22   ;;  %s6070_s11 = sand.u32 (!%p6642_p5), 1, %s6644_s27  }
 0x302   : > { %s6073_s7 = sshll.u32 (!%p6642_p5), %s6070_s11, 3  ;;  %s1199_s1 = scalar_lea.sflag (!%p6642_p5), [#allocation4], %s1198_s29 }
 0x303   : > { %p6646_p7 = scmp.ne.s32.totalorder %s6645_s30, 0 }
 0x305   : > { %4971 = dma.done.wait (%p6646_p7), %s1199_s1, 128  }
 0x306   : > { %4973 = vsyncadd (%p6646_p7), %s1199_s1, 4294967168  ;;  %p6647_p3 = scmp.eq.s32.totalorder %s6643_s22, 0 }
 0x308   : > { %4975 = dma.done.wait (%p6647_p3), [#allocation7], 128   ;;  %p6648_p11 = pmov %p6647_p3 }
 0x309   : > { %s3684_s20 = sshll.u32 %s6070_s11, 2 }
 0x30a   : > { %4977 = vsyncadd (%p6648_p11), [#allocation7], 4294967168  ;;  %s6085_s3 = scalar_lea.vmem [#allocation8], %s3684_s20 }
 0x30b   : > { %4979 = dma.done.wait (%p6646_p7), %s1199_s1, 320  }
 0x30c   : > { %4981 = vsyncadd (%p6646_p7), %s1199_s1, 4294966976  ;;  %s6649_s25 = sld [smem:[#allocation37_spill]]  ;;  %s6650_s4 = sld [smem:[#allocation51_spill]] }
 0x312   : > { %s6092_s0 = sand.u32 1, %s6649_s25   ;;  %p6651_p10 = scmp.ne.s32.totalorder %s6650_s4, 0 }
 0x314   : > { %4983 = dma.done.wait (%p6651_p10), %s1199_s1, 2256  }
 0x315   : > { %4985 = vsyncadd (%p6651_p10), %s1199_s1, 4294965040  ;;  %s6102_s26 = sshll.u32 %s6092_s0, 4  ;;  %s3693_s10 = sshll.u32 %s6092_s0, 5 }
 0x316   : > { %s1283_s1 = scalar_lea.vmem [#allocation16], %s6092_s0  ;;  %s1291_s20 = scalar_lea.vmem [#allocation17], %s6092_s0 }
 0x317   : > { %s1308_s4 = scalar_lea.vmem [#allocation19], %s6102_s26  ;;  %s1316_s28 = scalar_lea.vmem [#allocation20], %s6092_s0 }
 0x318   : > { %s1325_s23 = scalar_lea.vmem [#allocation21], %s6102_s26  ;;  %s1333_s24 = scalar_lea.vmem [#allocation22], %s6092_s0 }
 0x319   : > { %s6122_s22 = scalar_lea.vmem [#allocation29], %s3693_s10  ;;  %s6126_s30 = scalar_lea.vmem [#allocation31], %s6073_s7 }
 0x31a   : > { %s6652_s29 = sld [smem:[#allocation41_spill]] }
 0x320   : > { %p3695_p1 = scmp.ne.s32.totalorder %s6652_s29, 0 }
 0x321   : > { %s6653_s25 = scalar_lea.vmem (!%p3695_p1), [#allocation3], %s6073_s7  ;;  %v1576_v1 = vld [vmem:[#allocation6] sm:$0xff] (!%p3695_p1)  ;;  %vm1578_vm0 = vcmask (!%p3695_p1), 261120  }
 0x322   : > { %1573 = sbr.rel (%p3695_p1) target bundleno = 809 (0x329), region = 224  ;;  %v1574_v0 = vld [vmem:[%s6653_s25] sm:$0xff] (!%p3695_p1) }
 0x323   : > { %v1575_v2 = vmul.f32 (!%p3695_p1), 5.656854, %v1574_v0 }
 0x325   : > { %v1577_v3 = vadd.f32 (!%p3695_p1), %v1576_v1, %v1575_v2 }
 0x327   : > { %1579 = vst.msk [vmem:[%s6126_s30] sm:$0xff] (!%p3695_p1), %vm1578_vm0, %v1577_v3 }
 0x329 PF: > { %vm1583_vm1 = vcmask 261120   ;;  %s6654_s10 = scalar_lea.vmem [#allocation13], %s6102_s26  ;;  %v5061_v12 = vmov 0.0   ;;  %vm5062_vm2 = vmmov 0   ;;  %s6656_s25 = scalar_lea.vmem [#allocation11], %s6092_s0  ;;  %vm1684_vm3 = vcmask 64512  }
 0x32a   : > { %v4142_v11 = vld [vmem:[%s6654_s10] sm:$0xff]   ;;  %3814 = vmatprep.subr.bf16.mxu1 %v5061_v12  ;;  %3818 = vmatprep.mubr.msk.bf16.mxu1 %vm5062_vm2, %v5061_v12  ;;  %s6655_s29 = smov %s6654_s10  ;;  %s6657_s10 = scalar_lea.vmem [#allocation12], %s6092_s0  ;;  %vm1750_vm4 = vcmask 1043456   ;;  %vm1911_vm5 = vcmask 130112   ;;  %vm2029_vm6 = vcmask 195712   ;;  %vm2147_vm7 = vcmask 261312  }
 0x32b   : > { %3815 = vmatpush3.bf16.msra.mxu1 %v4142_v11  ;;  %v4143_v13 = vld [vmem:[%s6655_s29 + $0x8] sm:$0xff]   ;;  %3828 = vmatprep.subr.bf16.mxu0 %v5061_v12  ;;  %v3696_v18 = vld [vmem:[%s6656_s25] ss:$0 sm:$0xff]  ;;  %s6658_s29 = scalar_lea.vmem [#allocation14], %s6092_s0  ;;  %s5063_s25 = smov 120   ;;  %vm2434_vm8 = vcmask 31744  }
 0x32c   : > { %3816 = vmatprep.subr.bf16.mxu1 %v5061_v12  ;;  %3830 = vmatprep.mubr.msk.bf16.mxu0 %vm5062_vm2, %v5061_v12  ;;  %v3697_v20 = vld [vmem:[%s6657_s10] ss:$0 sm:$0xff]  ;;  %s5064_s10 = smov 96   ;;  %s5065_s27 = smov 88   ;;  %vm2453_vm9 = vcmask 1041408   ;;  %vm3054_vm10 = vcmask 523264  }
 0x32d   : > { %v3698_v24 = vld [vmem:[%s6658_s29] ss:$0 sm:$0xff]  ;;  %s6553_s29 = smov 80   ;;  %s5067_s14 = smov 112  }
 0x32e   : > { %v6133_v4 = vld [vmem:[%s6126_s30] sm:$0xff]  ;;  %s5068_s12 = smov 72   ;;  %s5069_s9 = smov 104  }
 0x32f   : > { %v1584_v5 = vsel %vm1583_vm1, %v6133_v4, 0.0  ;;  %3817 = vmatpush3.bf16.msra.mxu1 %v4143_v13  ;;  %s6659_s13 = scalar_lea.vmem [#allocation9], %s6073_s7  ;;  %s5071_s5 = smov 56  }
 0x330   : > { %1585 = vadd.xlane.f32.xlu0 %v1584_v5  ;;  %3822 = vmatprep.subr.bf16.mxu1 %v5061_v12  ;;  %v1679_v43 = vld [vmem:[%s6659_s13] sm:$0xff]  ;;  %s5070_s13 = smov 64   ;;  %s5072_s2 = smov 48  }
 0x3bd   : > { %v1586_v6 = vpop.xlane.xlu0 %1585 }
 0x3be   : > { %v1588_v7 = vmul.f32 0.03125, %v1586_v6 }
 0x3c0   : > { %v1589_v8 = vsub.f32 %v6133_v4, %v1588_v7 }
 0x3c2   : > { %v1590_v9 = vmul.f32 %v1589_v8, %v1589_v8 }
 0x3c4   : > { %v1591_v10 = vsel %vm1583_vm1, %v1590_v9, 0.0 }
 0x3c5   : > { %1592 = vadd.xlane.f32.xlu0 %v1591_v10 }
 0x452   : > { %v1593_v14 = vpop.xlane.xlu0 %1592 }
 0x453   : > { %v1594_v15 = vmul.f32 0.03125, %v1593_v14 }
 0x455   : > { %v1595_v16 = vadd.f32 1e-05, %v1594_v15 }
 0x457   : > { %4158 = vrsqrt.f32 %v1595_v16 }
 0x461   : > { %v4159_v17 = vpop.eup %4158 }
 0x462   : > { %v1597_v19 = vmul.f32 %v4159_v17, %v1589_v8 }
 0x464   : > { %v1604_v21 = vmul.f32 %v3696_v18, %v1597_v19 }
 0x466   : > { %v1611_v22 = vadd.f32 %v3697_v20, %v1604_v21 }
 0x468   : > { %v1612_v23 = vpack.c.bf16 %v1611_v22, %v1611_v22 }
 0x46a   : > { %3819 = vmatmul.mubr.msk.bf16.vlgmr.msra.gmra.mrb[0].mxu1 %vm1583_vm1, %v1612_v23 }
 0x46b   : > { %3824 = vmatprep.mubr.msk.bf16.mxu1 %vm5062_vm2, %v5061_v12 }
 0x53d   : > { %v1673_v25 = vpop.f32.mrb[0].mxu1 }
 0x53e   : > { %v1674_v26 = vadd.f32 %v3698_v24, %v1673_v25  ;;  %v3820_v27 = vpop.f32.mrb[1].mxu1 }
 0x53f   : > { %v1676_v28 = vpop.f32.mrb[2].mxu1 }
 0x540   : > { %v6160_v29 = vpack.c.bf16 %v1674_v26, %v1674_v26  ;;  %v3821_v30 = vpop.f32.mrb[3].mxu1 }
 0x542   : > { %1795 = vrot.lane.b32.xlu0 %v6160_v29, %s5063_s25  ;;  %1682 = vrot.lane.b32.xlu1 %v6160_v29, %s5064_s10 }
 0x546   : > { %1797 = vrot.lane.b32.xlu1 %v6160_v29, %s5065_s27 }
 0x54a   : > { %1915 = vrot.lane.b32.xlu1 %v6160_v29, %s6553_s29  ;;  %s5073_s29 = smov 40  }
 0x54e   : > { %1913 = vrot.lane.b32.xlu1 %v6160_v29, %s5067_s14 }
 0x552   : > { %2033 = vrot.lane.b32.xlu1 %v6160_v29, %s5068_s12 }
 0x556   : > { %2031 = vrot.lane.b32.xlu1 %v6160_v29, %s5069_s9 }
 0x5b4   : > { %v1683_v31 = vpop.permute.xlu1 %1682  ;;  %v1796_v36 = vpop.permute.xlu0 %1795 }
 0x5b5   : > { %v1689_v32 = vsel %vm1684_vm3, %v1683_v31, 0 }
 0x5b6   : > { %3823 = vmatpush3.bf16.xpose.msra.mxu1 %v1689_v32 }
 0x5b7   : > { %3834 = vmatprep.subr.bf16.mxu1 %v5061_v12 }
 0x5b8   : > { %v1798_v33 = vpop.permute.xlu1 %1797 }
 0x5b9   : > { %v1803_v34 = vsel %vm1684_vm3, %v1798_v33, 0 }
 0x5bc   : > { %v1916_v35 = vpop.permute.xlu1 %1915 }
 0x5bd   : > { %3825 = vmatmul.mubr.msk.bf16.vlgmr.msra.gmra.mrb[4].mxu1 %vm1684_vm3, %v6160_v29  ;;  %v1921_v38 = vsel %vm1684_vm3, %v1916_v35, 0 }
 0x5be   : > { %3835 = vmatpush3.bf16.xpose.msra.mxu1 %v1803_v34  ;;  %3836 = vmatprep.mubr.msk.bf16.mxu1 %vm5062_vm2, %v5061_v12 }
 0x5bf   : > { %3846 = vmatprep.subr.bf16.mxu1 %v5061_v12 }
 0x5c0   : > { %v1914_v37 = vpop.permute.xlu1 %1913 }
 0x5c4   : > { %v2034_v39 = vpop.permute.xlu1 %2033 }
 0x5c5   : > { %3837 = vmatmul.mubr.msk.bf16.vlgmr.msra.gmra.mrb[8].mxu1 %vm1684_vm3, %v1796_v36  ;;  %v2039_v40 = vsel %vm1684_vm3, %v2034_v39, 0 }
 0x5c6   : > { %3847 = vmatpush3.bf16.xpose.msra.mxu1 %v1921_v38  ;;  %3848 = vmatprep.mubr.msk.bf16.mxu1 %vm5062_vm2, %v5061_v12 }
 0x5c7   : > { %3858 = vmatprep.subr.bf16.mxu1 %v5061_v12 }
 0x5c8   : > { %v2032_v41 = vpop.permute.xlu1 %2031 }
 0x5cd   : > { %3849 = vmatmul.mubr.msk.bf16.vlgmr.msra.gmra.mrb[12].mxu1 %vm1684_vm3, %v1914_v37 }
 0x5ce   : > { %3859 = vmatpush3.bf16.xpose.msra.mxu1 %v2039_v40  ;;  %3860 = vmatprep.mubr.msk.bf16.mxu1 %vm5062_vm2, %v5061_v12 }
 0x5cf   : > { %3870 = vmatprep.subr.bf16.mxu1 %v5061_v12 }
 0x5d5   : > { %3861 = vmatmul.mubr.msk.bf16.vlgmr.msra.gmra.mrb[16].mxu1 %vm1684_vm3, %v2032_v41 }
 0x5d6   : > { %3874 = vmatprep.mubr.msk.bf16.mxu1 %vm5062_vm2, %v5061_v12 }
 0x690   : > { %v1725_v42 = vpop.f32.mrb[4].mxu1 }
 0x691   : > { %v1731_v44 = vmul.f32 0.35355338, %v1725_v42  ;;  %v3826_v45 = vpop.f32.mrb[5].mxu1 }
 0x692   : > { %v1728_v46 = vpop.f32.mrb[6].mxu1 }
 0x693   : > { %v3827_v47 = vpop.f32.mrb[7].mxu1  ;;  %v1732_v48 = vadd.f32 %v1731_v44, %v1679_v43 }
 0x695   : > { %v1733_v49 = vsel %vm1684_vm3, %v1732_v48, -inf }
 0x696   : > { %1734 = vmax.xlane.f32.xlu1 %v1733_v49 }
 0x698   : > { %v1839_v50 = vpop.f32.mrb[8].mxu1 }
 0x699   : > { %v1845_v51 = vmul.f32 0.35355338, %v1839_v50  ;;  %v3838_v52 = vpop.f32.mrb[9].mxu1 }
 0x69a   : > { %v1842_v53 = vpop.f32.mrb[10].mxu1 }
 0x69b   : > { %v3839_v54 = vpop.f32.mrb[11].mxu1  ;;  %v1846_v55 = vadd.f32 %v1845_v51, %v1679_v43 }
 0x69d   : > { %v1847_v56 = vsel %vm1684_vm3, %v1846_v55, -inf }
 0x69e   : > { %1848 = vmax.xlane.f32.xlu0 %v1847_v56 }
 0x6a0   : > { %v1957_v57 = vpop.f32.mrb[12].mxu1 }
 0x6a1   : > { %v1963_v58 = vmul.f32 0.35355338, %v1957_v57  ;;  %v3850_v59 = vpop.f32.mrb[13].mxu1 }
 0x6a2   : > { %v1960_v60 = vpop.f32.mrb[14].mxu1 }
 0x6a3   : > { %v3851_v61 = vpop.f32.mrb[15].mxu1  ;;  %v1964_v62 = vadd.f32 %v1963_v58, %v1679_v43 }
 0x6a5   : > { %v1965_v63 = vsel %vm1684_vm3, %v1964_v62, -inf }
 0x6a6   : > { %1966 = vmax.xlane.f32.xlu1 %v1965_v63 }
 0x6a8   : > { %v2075_v0 = vpop.f32.mrb[16].mxu1 }
 0x6a9   : > { %v2081_v1 = vmul.f32 0.35355338, %v2075_v0  ;;  %v3862_v2 = vpop.f32.mrb[17].mxu1 }
 0x6aa   : > { %v2078_v3 = vpop.f32.mrb[18].mxu1 }
 0x6ab   : > { %v3863_v5 = vpop.f32.mrb[19].mxu1  ;;  %v2082_v6 = vadd.f32 %v2081_v1, %v1679_v43 }
 0x6ad   : > { %v2083_v7 = vsel %vm1684_vm3, %v2082_v6, -inf }
 0x6ae   : > { %2084 = vmax.xlane.f32.xlu0 %v2083_v7 }
 0x723   : > { %v1735_v8 = vpop.xlane.xlu1 %1734 }
 0x724   : > { %v1736_v9 = vsub.f32 %v1732_v48, %v1735_v8 }
 0x726   : > { %v1737_v10 = vmul.f32 1.442695, %v1736_v9 }
 0x728   : > { %4160 = vpow2.f32 %v1737_v10 }
 0x72b   : > { %v1849_v11 = vpop.xlane.xlu0 %1848 }
 0x72c   : > { %v1850_v13 = vsub.f32 %v1846_v55, %v1849_v11 }
 0x72e   : > { %v1851_v14 = vmul.f32 1.442695, %v1850_v13 }
 0x730   : > { %4162 = vpow2.f32 %v1851_v14 }
 0x732   : > { %v4161_v15 = vpop.eup %4160 }
 0x733   : > { %v1739_v16 = vsel %vm1684_vm3, %v4161_v15, 0.0  ;;  %v1967_v24 = vpop.xlane.xlu1 %1966 }
 0x734   : > { %1740 = vadd.xlane.f32.xlu1 %v1739_v16  ;;  %v1968_v25 = vsub.f32 %v1964_v62, %v1967_v24 }
 0x736   : > { %v1969_v26 = vmul.f32 1.442695, %v1968_v25 }
 0x73a   : > { %v4163_v17 = vpop.eup %4162 }
 0x73b   : > { %v2085_v18 = vpop.xlane.xlu0 %2084  ;;  %v1853_v19 = vsel %vm1684_vm3, %v4163_v17, 0.0 }
 0x73c   : > { %v2086_v20 = vsub.f32 %v2082_v6, %v2085_v18  ;;  %1854 = vadd.xlane.f32.xlu0 %v1853_v19 }
 0x73e   : > { %v2087_v21 = vmul.f32 1.442695, %v2086_v20 }
 0x740   : > { %4164 = vpow2.f32 %v2087_v21 }
 0x741   : > { %4166 = vpow2.f32 %v1969_v26  ;;  %v4146_v26 = vld [vmem:[%s1325_s23] sm:$0xff]  }
 0x745   : > { %1745 = vrot.lane.b32.xlu1 %v6160_v29, %s5070_s13  ;;  %s5075_s13 = smov 16  }
 0x74a   : > { %v4165_v22 = vpop.eup %4164 }
 0x74b   : > { %v2089_v23 = vsel %vm1684_vm3, %v4165_v22, 0.0  ;;  %v4167_v27 = vpop.eup %4166 }
 0x74c   : > { %2090 = vadd.xlane.f32.xlu0 %v2089_v23  ;;  %v1971_v28 = vsel %vm1684_vm3, %v4167_v27, 0.0 }
 0x762   : > { %1859 = vrot.lane.b32.xlu0 %v6160_v29, %s5071_s5  ;;  %s6554_s5 = smov 8  }
 0x769   : > { %1972 = vadd.xlane.f32.xlu1 %v1971_v28  ;;  %v2315_v28 = vld [vmem:[%s6085_s3] sm:$0xf]  ;;  %s6662_s3 = scalar_lea.vmem [#allocation18], %s6092_s0 }
 0x77a   : > { %1977 = vrot.lane.b32.xlu1 %v6160_v29, %s5072_s2  ;;  %s6660_s2 = scalar_lea.vmem [#allocation15], %s6102_s26 }
 0x77b   : > { %v4144_v61 = vld [vmem:[%s6660_s2] sm:$0xff]  }
 0x77c   : > { %3871 = vmatpush3.bf16.msra.mxu1 %v4144_v61 }
 0x77d   : > { %3872 = vmatprep.subr.bf16.mxu1 %v5061_v12 }
 0x77e   : > { %2095 = vrot.lane.b32.xlu1 %v6160_v29, %s5073_s29  ;;  %s6661_s29 = smov %s6660_s2 }
 0x77f   : > { %v4145_v62 = vld [vmem:[%s6661_s29 + $0x8] sm:$0xff]  }
 0x780   : > { %3873 = vmatpush3.bf16.msra.mxu1 %v4145_v62 }
 0x781   : > { %3886 = vmatprep.subr.bf16.mxu1 %v5061_v12 }
 0x7c1   : > { %v1741_v30 = vpop.xlane.xlu1 %1740 }
 0x7c2   : > { %4168 = vrcp.f32 %v1741_v30  ;;  %v2316_v30 = vpack.c.bf16 %v2315_v28, %v2315_v28 }
 0x7c5   : > { %v1746_v31 = vpop.permute.xlu1 %1745 }
 0x7c6   : > { %v1752_v32 = vsel %vm1750_vm4, %v1746_v31, 0  ;;  %v4148_v31 = vld [vmem:[%s1308_s4] sm:$0xff]  }
 0x7c7   : > { %3829 = vmatpush3.bf16.msra.mxu0 %v1752_v32  ;;  %v4149_v32 = vld [vmem:[%s1308_s4 + $0x8] sm:$0xff]   ;;  %s6674_s4 = sld [smem:[#allocation42_spill]] }
 0x7c8   : > { %3840 = vmatprep.subr.bf16.mxu0 %v5061_v12 }
 0x7c9   : > { %v1855_v34 = vpop.xlane.xlu0 %1854 }
 0x7ca   : > { %4170 = vrcp.f32 %v1855_v34 }
 0x7cc   : > { %v4169_v33 = vpop.eup %4168 }
 0x7cd   : > { %v1743_v35 = vmul.f32 %v4169_v33, %v4161_v15  ;;  %v3713_v15 = vld [vmem:[%s1283_s1] ss:$0 sm:$0xff]  ;;  %s6671_s1 = scalar_lea.vmem [#allocation25], %s6092_s0 }
 0x7cf   : > { %v1744_v36 = vpack.c.bf16 %v1743_v35, %v1743_v35 }
 0x7d1   : > { %3831 = vmatmul.mubr.msk.bf16.vlgmr.msra.gmra.mrb[0].mxu0 %vm1684_vm3, %v1744_v36 }
 0x7d2   : > { %3842 = vmatprep.mubr.msk.bf16.mxu0 %vm5062_vm2, %v5061_v12 }
 0x7d4   : > { %v4171_v29 = vpop.eup %4170 }
 0x7d5   : > { %v1857_v38 = vmul.f32 %v4171_v29, %v4163_v17  ;;  %v3714_v29 = vld [vmem:[%s1291_s20] ss:$0 sm:$0xff]  ;;  %s6672_s20 = scalar_lea.vmem [#allocation26], %s6092_s0 }
 0x7d7   : > { %v1858_v41 = vpack.c.bf16 %v1857_v38, %v1857_v38  ;;  %v3715_v38 = vld [vmem:[%s6662_s3] ss:$0 sm:$0xff] }
 0x7d9   : > { %v2091_v37 = vpop.xlane.xlu0 %2090 }
 0x7dd   : > { %v1860_v39 = vpop.permute.xlu0 %1859 }
 0x7de   : > { %v1865_v40 = vsel %vm1750_vm4, %v1860_v39, 0 }
 0x7df   : > { %3841 = vmatpush3.bf16.msra.mxu0 %v1865_v40 }
 0x7e0   : > { %3852 = vmatprep.subr.bf16.mxu0 %v5061_v12 }
 0x7e2   : > { %3843 = vmatmul.mubr.msk.bf16.vlgmr.msra.gmra.mrb[4].mxu0 %vm1684_vm3, %v1858_v41 }
 0x7e3   : > { %3854 = vmatprep.mubr.msk.bf16.mxu0 %vm5062_vm2, %v5061_v12 }
 0x7f6   : > { %v1973_v42 = vpop.xlane.xlu1 %1972 }
 0x7f7   : > { %4172 = vrcp.f32 %v1973_v42  ;;  %v3720_v42 = vld [vmem:[%s1333_s24] ss:$0 sm:$0xff]  ;;  %s6669_s24 = scalar_lea.vmem [#allocation27], %s6102_s26 }
 0x7f8   : > { %4174 = vrcp.f32 %v2091_v37 }
 0x7fa   : > { %v1978_v43 = vpop.permute.xlu1 %1977 }
 0x7fb   : > { %v1983_v44 = vsel %vm1750_vm4, %v1978_v43, 0 }
 0x7fc   : > { %3853 = vmatpush3.bf16.msra.mxu0 %v1983_v44 }
 0x7fd   : > { %3864 = vmatprep.subr.bf16.mxu0 %v5061_v12 }
 0x7fe   : > { %v2096_v47 = vpop.permute.xlu1 %2095 }
 0x7ff   : > { %v2101_v50 = vsel %vm1750_vm4, %v2096_v47, 0 }
 0x801   : > { %v4173_v45 = vpop.eup %4172 }
 0x802   : > { %v1975_v46 = vmul.f32 %v4173_v45, %v4167_v27  ;;  %v4175_v49 = vpop.eup %4174  ;;  %v4147_v27 = vld [vmem:[%s1325_s23 + $0x8] sm:$0xff]  }
 0x803   : > { %v2093_v51 = vmul.f32 %v4175_v49, %v4165_v22 }
 0x804   : > { %v1976_v48 = vpack.c.bf16 %v1975_v46, %v1975_v46 }
 0x805   : > { %v2094_v52 = vpack.c.bf16 %v2093_v51, %v2093_v51 }
 0x806   : > { %3855 = vmatmul.mubr.msk.bf16.vlgmr.msra.gmra.mrb[8].mxu0 %vm1684_vm3, %v1976_v48 }
 0x807   : > { %3865 = vmatpush3.bf16.msra.mxu0 %v2101_v50  ;;  %3866 = vmatprep.mubr.msk.bf16.mxu0 %vm5062_vm2, %v5061_v12  ;;  %v3716_v50 = vld [vmem:[%s1316_s28] ss:$0 sm:$0xff]  ;;  %s6668_s28 = scalar_lea.vmem [#allocation24], %s6092_s0 }
 0x808   : > { %3878 = vmatprep.subr.bf16.mxu0 %v5061_v12 }
 0x80e   : > { %3867 = vmatmul.mubr.msk.bf16.vlgmr.msra.gmra.mrb[12].mxu0 %vm1684_vm3, %v2094_v52 }
 0x80f   : > { %3882 = vmatprep.mubr.msk.bf16.mxu0 %vm5062_vm2, %v5061_v12  ;;  %3879 = vmatpush3.bf16.msra.mxu0 %v4148_v31 }
 0x810   : > { %3880 = vmatprep.subr.bf16.mxu0 %v5061_v12 }
 0x813   : > { %3881 = vmatpush3.bf16.msra.mxu0 %v4149_v32 }
 0x814   : > { %3894 = vmatprep.subr.bf16.mxu0 %v5061_v12 }
 0x8a4   : > { %v1788_v53 = vpop.f32.mrb[0].mxu0 }
 0x8a5   : > { %1794 = vst.msk [vmem:[#allocation2] sm:$0xff] %vm1684_vm3, %v1788_v53  ;;  %v3832_v54 = vpop.f32.mrb[1].mxu0 }
 0x8a6   : > { %v1791_v55 = vpop.f32.mrb[2].mxu0 }
 0x8a7   : > { %v3833_v56 = vpop.f32.mrb[3].mxu0 }
 0x8b5   : > { %v1901_v57 = vpop.f32.mrb[4].mxu0 }
 0x8b6   : > { %1908 = vrot.lane.b32.xlu0 %v1901_v57, %s6554_s5  ;;  %v3844_v58 = vpop.f32.mrb[5].mxu0  ;;  %s5076_s5 = smov 24  }
 0x8b7   : > { %v1904_v59 = vpop.f32.mrb[6].mxu0 }
 0x8b8   : > { %v3845_v60 = vpop.f32.mrb[7].mxu0 }
 0x8d9   : > { %v2019_v63 = vpop.f32.mrb[8].mxu0 }
 0x8da   : > { %2026 = vrot.lane.b32.xlu1 %v2019_v63, %s5075_s13  ;;  %v3856_v0 = vpop.f32.mrb[9].mxu0 }
 0x8db   : > { %v2022_v1 = vpop.f32.mrb[10].mxu0 }
 0x8dc   : > { %v3857_v2 = vpop.f32.mrb[11].mxu0 }
 0x8e1   : > { %v2137_v3 = vpop.f32.mrb[12].mxu0 }
 0x8e2   : > { %2144 = vrot.lane.b32.xlu0 %v2137_v3, %s5076_s5  ;;  %v3868_v5 = vpop.f32.mrb[13].mxu0 }
 0x8e3   : > { %v2140_v6 = vpop.f32.mrb[14].mxu0 }
 0x8e4   : > { %v3869_v7 = vpop.f32.mrb[15].mxu0 }
 0x928   : > { %v1909_v8 = vpop.permute.xlu0 %1908 }
 0x929   : > { %1912 = vst.msk [vmem:[#allocation2] sm:$0xff] %vm1911_vm5, %v1909_v8 }
 0x94c   : > { %v2027_v9 = vpop.permute.xlu1 %2026 }
 0x94d   : > { %2030 = vst.msk [vmem:[#allocation2] sm:$0xff] %vm2029_vm6, %v2027_v9 }
 0x954   : > { %v2145_v10 = vpop.permute.xlu0 %2144 }
 0x955   : > { %2148 = vst.msk [vmem:[#allocation2] sm:$0xff] %vm2147_vm7, %v2145_v10 }
 0x95c   : > { %v2149_v11 = vld [vmem:[#allocation2] sm:$0xff] }
 0x95d   : > { %v2150_v13 = vpack.c.bf16 %v2149_v11, %v2149_v11 }
 0x95f   : > { %3875 = vmatmul.mubr.msk.bf16.vlgmr.msra.gmra.mrb[20].mxu1 %vm1583_vm1, %v2150_v13 }
 0x960   : > { %3890 = vmatprep.mubr.msk.bf16.mxu1 %vm5062_vm2, %v5061_v12  ;;  %3887 = vmatpush3.bf16.msra.mxu1 %v4146_v26 }
 0x961   : > { %3888 = vmatprep.subr.bf16.mxu1 %v5061_v12 }
 0x964   : > { %3889 = vmatpush3.bf16.msra.mxu1 %v4147_v27 }
 0x965   : > { %3900 = vmatprep.subr.bf16.mxu1 %v5061_v12 }
 0x967   : > { %3891 = vmatmul.mubr.msk.bf16.vlgmr.msra.gmra.mrb[24].mxu1 %vm1583_vm1, %v2316_v30 }
 0x968   : > { %3902 = vmatprep.mubr.msk.bf16.mxu1 %vm5062_vm2, %v5061_v12 }
 0xa32   : > { %v2204_v14 = vpop.f32.mrb[20].mxu1 }
 0xa33   : > { %v2210_v16 = vadd.f32 %v2204_v14, %v6133_v4  ;;  %v3876_v17 = vpop.f32.mrb[21].mxu1 }
 0xa34   : > { %v2207_v18 = vpop.f32.mrb[22].mxu1 }
 0xa35   : > { %v6250_v19 = vadd.f32 %v3713_v15, %v2210_v16  ;;  %v3877_v20 = vpop.f32.mrb[23].mxu1 }
 0xa37   : > { %v2221_v21 = vsel %vm1583_vm1, %v6250_v19, 0.0 }
 0xa38   : > { %2222 = vadd.xlane.f32.xlu1 %v2221_v21 }
 0xa3a   : > { %v2377_v43 = vpop.f32.mrb[24].mxu1 }
 0xa3b   : > { %v2378_v44 = vadd.f32 %v3720_v42, %v2377_v43  ;;  %v3892_v45 = vpop.f32.mrb[25].mxu1 }
 0xa3c   : > { %v2380_v46 = vpop.f32.mrb[26].mxu1 }
 0xa3d   : > { %v6281_v47 = vpack.c.bf16 %v2378_v44, %v2378_v44  ;;  %v3893_v48 = vpop.f32.mrb[27].mxu1 }
 0xa3f   : > { %v2390_v49 = vsel %vm1684_vm3, %v6281_v47, 0 }
 0xac5   : > { %v2223_v22 = vpop.xlane.xlu1 %2222 }
 0xac6   : > { %v2224_v23 = vmul.f32 0.03125, %v2223_v22 }
 0xac8   : > { %v2225_v24 = vsub.f32 %v6250_v19, %v2224_v23 }
 0xaca   : > { %v2226_v25 = vmul.f32 %v2225_v24, %v2225_v24 }
 0xacc   : > { %v2227_v4 = vsel %vm1583_vm1, %v2226_v25, 0.0 }
 0xacd   : > { %2228 = vadd.xlane.f32.xlu0 %v2227_v4 }
 0xae3   : > { %2501 = vrot.lane.b32.xlu0 %v6281_v47, %s5063_s25 }
 0xb5a   : > { %v2229_v33 = vpop.xlane.xlu0 %2228 }
 0xb5b   : > { %v2230_v34 = vmul.f32 0.03125, %v2229_v33 }
 0xb5d   : > { %v2231_v35 = vadd.f32 1e-05, %v2230_v34 }
 0xb5e   : > { %v2502_v54 = vpop.permute.xlu0 %2501 }
 0xb5f   : > { %4176 = vrsqrt.f32 %v2231_v35  ;;  %v2507_v58 = vsel %vm1684_vm3, %v2502_v54, 0 }
 0xb69   : > { %v4177_v36 = vpop.eup %4176 }
 0xb6a   : > { %v2233_v37 = vmul.f32 %v4177_v36, %v2225_v24 }
 0xb6c   : > { %v2240_v39 = vmul.f32 %v3714_v29, %v2233_v37 }
 0xb6e   : > { %v2247_v40 = vadd.f32 %v3715_v38, %v2240_v39 }
 0xb70   : > { %v2248_v41 = vpack.c.bf16 %v2247_v40, %v2247_v40 }
 0xb72   : > { %3883 = vmatmul.mubr.msk.bf16.vlgmr.msra.gmra.mrb[16].mxu0 %vm1583_vm1, %v2248_v41 }
 0xb73   : > { %3896 = vmatprep.mubr.msk.bf16.mxu0 %vm5062_vm2, %v5061_v12  ;;  %3895 = vmatpush3.bf16.xpose.msra.mxu0 %v2390_v49 }
 0xb74   : > { %3906 = vmatprep.subr.bf16.mxu0 %v5061_v12 }
 0xc45   : > { %v2309_v51 = vpop.f32.mrb[16].mxu0 }
 0xc46   : > { %v2310_v52 = vadd.f32 %v3716_v50, %v2309_v51  ;;  %v3884_v53 = vpop.f32.mrb[17].mxu0 }
 0xc47   : > { %v2312_v55 = vpop.f32.mrb[18].mxu0 }
 0xc48   : > { %v2384_v56 = vpack.c.bf16 %v2310_v52, %v2310_v52  ;;  %v3885_v57 = vpop.f32.mrb[19].mxu0 }
 0xc4a   : > { %2499 = vrot.lane.b32.xlu1 %v2384_v56, %s5063_s25  ;;  %2616 = vrot.lane.b32.xlu0 %v2384_v56, %s5067_s14  ;;  %s6676_s25 = scalar_lea.vmem [#allocation30], %s6092_s0 }
 0xc4b   : > { %3897 = vmatmul.mubr.msk.bf16.vlgmr.msra.gmra.mrb[20].mxu0 %vm1684_vm3, %v2384_v56 }
 0xc4c   : > { %3907 = vmatpush3.bf16.xpose.msra.mxu0 %v2507_v58  ;;  %3908 = vmatprep.mubr.msk.bf16.mxu0 %vm5062_vm2, %v5061_v12 }
 0xc4d   : > { %3918 = vmatprep.subr.bf16.mxu0 %v5061_v12 }
 0xc4e   : > { %2618 = vrot.lane.b32.xlu1 %v6281_v47, %s5067_s14  ;;  %2733 = vrot.lane.b32.xlu0 %v2384_v56, %s5069_s9  ;;  %s6663_s14 = scalar_lea.vmem [#allocation10], %s6073_s7  ;;  %s6666_s7 = scalar_lea.vmem [#allocation23], %s6102_s26 }
 0xc4f   : > { %v2383_v3 = vld [vmem:[%s6663_s14] sm:$0xff]  ;;  %s6667_s23 = smov %s6666_s7  ;;  %s6673_s26 = scalar_lea.vmem [#allocation28], %s6092_s0 }
 0xc50   : > { %s3109_s0 = scalar_lea.sflag [#allocation5], %s6070_s11 }
 0xc52   : > { %2735 = vrot.lane.b32.xlu1 %v6281_v47, %s5069_s9  ;;  %s6664_s9 = smov 80  }
 0xcbc   : > { %v2500_v59 = vpop.permute.xlu1 %2499  ;;  %v2617_v63 = vpop.permute.xlu0 %2616 }
 0xcbd   : > { %3909 = vmatmul.mubr.msk.bf16.vlgmr.msra.gmra.mrb[24].mxu0 %vm1684_vm3, %v2500_v59 }
 0xcbe   : > { %3920 = vmatprep.mubr.msk.bf16.mxu0 %vm5062_vm2, %v5061_v12 }
 0xcc0   : > { %v2619_v60 = vpop.permute.xlu1 %2618  ;;  %v2734_v1 = vpop.permute.xlu0 %2733 }
 0xcc1   : > { %v2624_v61 = vsel %vm1684_vm3, %v2619_v60, 0 }
 0xcc2   : > { %3919 = vmatpush3.bf16.xpose.msra.mxu0 %v2624_v61 }
 0xcc3   : > { %3930 = vmatprep.subr.bf16.mxu0 %v5061_v12 }
 0xcc4   : > { %v2736_v62 = vpop.permute.xlu1 %2735 }
 0xcc5   : > { %v2741_v0 = vsel %vm1684_vm3, %v2736_v62, 0 }
 0xcc9   : > { %3921 = vmatmul.mubr.msk.bf16.vlgmr.msra.gmra.mrb[28].mxu0 %vm1684_vm3, %v2617_v63 }
 0xcca   : > { %3931 = vmatpush3.bf16.xpose.msra.mxu0 %v2741_v0  ;;  %3932 = vmatprep.mubr.msk.bf16.mxu0 %vm5062_vm2, %v5061_v12 }
 0xccb   : > { %3942 = vmatprep.subr.bf16.mxu0 %v5061_v12 }
 0xcd1   : > { %3933 = vmatmul.mubr.msk.bf16.vlgmr.msra.gmra.mrb[32].mxu0 %vm1684_vm3, %v2734_v1 }
 0xcd2   : > { %3946 = vmatprep.mubr.msk.bf16.mxu0 %vm5062_vm2, %v5061_v12 }
 0xd1e   : > { %v2426_v2 = vpop.f32.mrb[20].mxu0 }
 0xd1f   : > { %v2432_v5 = vmul.f32 0.35355338, %v2426_v2  ;;  %v3898_v6 = vpop.f32.mrb[21].mxu0 }
 0xd20   : > { %v2429_v7 = vpop.f32.mrb[22].mxu0 }
 0xd21   : > { %v3899_v8 = vpop.f32.mrb[23].mxu0  ;;  %v2433_v9 = vadd.f32 %v2432_v5, %v2383_v3 }
 0xd23   : > { %v2435_v10 = vsel %vm2434_vm8, %v2433_v9, -inf }
 0xd24   : > { %2436 = vmax.xlane.f32.xlu1 %v2435_v10 }
 0xd90   : > { %v2543_v11 = vpop.f32.mrb[24].mxu0 }
 0xd91   : > { %v2549_v13 = vmul.f32 0.35355338, %v2543_v11  ;;  %v3910_v14 = vpop.f32.mrb[25].mxu0 }
 0xd92   : > { %v2546_v15 = vpop.f32.mrb[26].mxu0 }
 0xd93   : > { %v3911_v16 = vpop.f32.mrb[27].mxu0  ;;  %v2550_v17 = vadd.f32 %v2549_v13, %v2383_v3 }
 0xd95   : > { %v2551_v18 = vsel %vm2434_vm8, %v2550_v17, -inf }
 0xd96   : > { %2552 = vmax.xlane.f32.xlu0 %v2551_v18 }
 0xd9c   : > { %v2660_v20 = vpop.f32.mrb[28].mxu0 }
 0xd9d   : > { %v2666_v21 = vmul.f32 0.35355338, %v2660_v20  ;;  %v3922_v22 = vpop.f32.mrb[29].mxu0 }
 0xd9e   : > { %v2663_v23 = vpop.f32.mrb[30].mxu0 }
 0xd9f   : > { %v3923_v24 = vpop.f32.mrb[31].mxu0  ;;  %v2667_v25 = vadd.f32 %v2666_v21, %v2383_v3 }
 0xda0   : > { %v4150_v24 = vld [vmem:[%s6666_s7] sm:$0xff]  }
 0xda1   : > { %v2668_v4 = vsel %vm2434_vm8, %v2667_v25, -inf  ;;  %3943 = vmatpush3.bf16.msra.mxu0 %v4150_v24 }
 0xda2   : > { %2669 = vmax.xlane.f32.xlu0 %v2668_v4  ;;  %3944 = vmatprep.subr.bf16.mxu0 %v5061_v12 }
 0xda4   : > { %v2777_v26 = vpop.f32.mrb[32].mxu0 }
 0xda5   : > { %v2783_v27 = vmul.f32 0.35355338, %v2777_v26  ;;  %v3934_v28 = vpop.f32.mrb[33].mxu0 }
 0xda6   : > { %v2780_v30 = vpop.f32.mrb[34].mxu0 }
 0xda7   : > { %v3935_v31 = vpop.f32.mrb[35].mxu0  ;;  %v2784_v32 = vadd.f32 %v2783_v27, %v2383_v3 }
 0xda9   : > { %v2785_v33 = vsel %vm2434_vm8, %v2784_v32, -inf }
 0xdaa   : > { %2786 = vmax.xlane.f32.xlu1 %v2785_v33 }
 0xdb1   : > { %v2437_v34 = vpop.xlane.xlu1 %2436 }
 0xdb2   : > { %v2438_v35 = vsub.f32 %v2433_v9, %v2437_v34 }
 0xdb4   : > { %v2439_v36 = vmul.f32 1.442695, %v2438_v35 }
 0xdb6   : > { %4178 = vpow2.f32 %v2439_v36 }
 0xdc0   : > { %v4179_v29 = vpop.eup %4178 }
 0xdc1   : > { %v2441_v37 = vsel %vm2434_vm8, %v4179_v29, 0.0 }
 0xdc2   : > { %2442 = vadd.xlane.f32.xlu0 %v2441_v37 }
 0xe23   : > { %v2553_v38 = vpop.xlane.xlu0 %2552 }
 0xe24   : > { %v2554_v39 = vsub.f32 %v2550_v17, %v2553_v38 }
 0xe26   : > { %v2555_v40 = vmul.f32 1.442695, %v2554_v39  ;;  %v3735_v39 = vld [vmem:[%s6668_s28] ss:$0 sm:$0xff] }
 0xe28   : > { %4180 = vpow2.f32 %v2555_v40 }
 0xe2f   : > { %v2670_v41 = vpop.xlane.xlu0 %2669 }
 0xe30   : > { %v2671_v42 = vsub.f32 %v2667_v25, %v2670_v41  ;;  %v4151_v25 = vld [vmem:[%s6667_s23 + $0x8] sm:$0xff]  }
 0xe31   : > { %3945 = vmatpush3.bf16.msra.mxu0 %v4151_v25 }
 0xe32   : > { %v4181_v43 = vpop.eup %4180  ;;  %v2672_v44 = vmul.f32 1.442695, %v2671_v42  ;;  %3958 = vmatprep.subr.bf16.mxu0 %v5061_v12 }
 0xe33   : > { %v2557_v45 = vsel %vm2434_vm8, %v4181_v43, 0.0 }
 0xe34   : > { %4182 = vpow2.f32 %v2672_v44  ;;  %2558 = vadd.xlane.f32.xlu1 %v2557_v45 }
 0xe37   : > { %v2787_v49 = vpop.xlane.xlu1 %2786 }
 0xe38   : > { %v2788_v50 = vsub.f32 %v2784_v32, %v2787_v49 }
 0xe3a   : > { %v2789_v51 = vmul.f32 1.442695, %v2788_v50 }
 0xe3c   : > { %4184 = vpow2.f32 %v2789_v51 }
 0xe3e   : > { %v4183_v46 = vpop.eup %4182 }
 0xe3f   : > { %v2674_v48 = vsel %vm2434_vm8, %v4183_v46, 0.0 }
 0xe40   : > { %2675 = vadd.xlane.f32.xlu0 %v2674_v48 }
 0xe45   : > { %2563 = vrot.lane.b32.xlu1 %v6281_v47, %s5065_s27  ;;  %s6670_s27 = smov %s6669_s24 }
 0xe46   : > { %v4185_v52 = vpop.eup %4184 }
 0xe47   : > { %v2791_v53 = vsel %vm2434_vm8, %v4185_v52, 0.0 }
 0xe4f   : > { %v2443_v54 = vpop.xlane.xlu0 %2442 }
 0xe50   : > { %4186 = vrcp.f32 %v2443_v54 }
 0xe56   : > { %2448 = vrot.lane.b32.xlu0 %v6281_v47, %s5064_s10  ;;  %s3749_s10 = sshll.u32 %s6674_s4, 7 }
 0xe5a   : > { %2797 = vrot.lane.b32.xlu0 %v6281_v47, %s5068_s12  ;;  %v4187_v56 = vpop.eup %4186  ;;  %s6665_s12 = smov 8  }
 0xe5b   : > { %v2445_v58 = vmul.f32 %v4187_v56, %v4179_v29 }
 0xe5d   : > { %v2446_v62 = vpack.c.bf16 %v2445_v58, %v2445_v58 }
 0xe69   : > { %2792 = vadd.xlane.f32.xlu1 %v2791_v53 }
 0xe7a   : > { %2680 = vrot.lane.b32.xlu1 %v6281_v47, %s6664_s9  ;;  %s5077_s9 = smov [#allocation31]  }
 0xec1   : > { %v2559_v55 = vpop.xlane.xlu1 %2558 }
 0xec2   : > { %4188 = vrcp.f32 %v2559_v55 }
 0xec5   : > { %v2564_v61 = vpop.permute.xlu1 %2563 }
 0xec6   : > { %v2569_v0 = vsel %vm2453_vm9, %v2564_v61, 0 }
 0xecc   : > { %v4189_v63 = vpop.eup %4188 }
 0xecd   : > { %v2676_v57 = vpop.xlane.xlu0 %2675  ;;  %v2561_v47 = vmul.f32 %v4189_v63, %v4181_v43  ;;  %v4154_v63 = vld [vmem:[%s6122_s22] sm:$0xff]  }
 0xece   : > { %4190 = vrcp.f32 %v2676_v57  ;;  %v3736_v57 = vld [vmem:[%s6671_s1] ss:$0 sm:$0xff] }
 0xecf   : > { %v2562_v1 = vpack.c.bf16 %v2561_v47, %v2561_v47  ;;  %v4156_v47 = vld [vmem:[%s6122_s22 + $0x10] sm:$0xff]  }
 0xed1   : > { %v2449_v59 = vpop.permute.xlu0 %2448 }
 0xed2   : > { %v2455_v60 = vsel %vm2453_vm9, %v2449_v59, 0  ;;  %v3737_v59 = vld [vmem:[%s6672_s20] ss:$0 sm:$0xff] }
 0xed3   : > { %3901 = vmatpush3.bf16.msra.mxu1 %v2455_v60 }
 0xed4   : > { %3912 = vmatprep.subr.bf16.mxu1 %v5061_v12 }
 0xed5   : > { %v2798_v8 = vpop.permute.xlu0 %2797 }
 0xed6   : > { %3903 = vmatmul.mubr.msk.bf16.vlgmr.msra.gmra.mrb[28].mxu1 %vm2434_vm8, %v2446_v62  ;;  %v2803_v10 = vsel %vm2453_vm9, %v2798_v8, 0 }
 0xed7   : > { %3913 = vmatpush3.bf16.msra.mxu1 %v2569_v0  ;;  %3914 = vmatprep.mubr.msk.bf16.mxu1 %vm5062_vm2, %v5061_v12  ;;  %v4155_v0 = vld [vmem:[%s6122_s22 + $0x8] sm:$0xff]  }
 0xed8   : > { %3924 = vmatprep.subr.bf16.mxu1 %v5061_v12  ;;  %v4191_v2 = vpop.eup %4190 }
 0xed9   : > { %v2678_v5 = vmul.f32 %v4191_v2, %v4183_v46  ;;  %v3738_v2 = vld [vmem:[%s6673_s26] ss:$0 sm:$0xff] }
 0xedb   : > { %v2679_v9 = vpack.c.bf16 %v2678_v5, %v2678_v5 }
 0xede   : > { %3915 = vmatmul.mubr.msk.bf16.vlgmr.msra.gmra.mrb[32].mxu1 %vm2434_vm8, %v2562_v1  ;;  %v4157_v1 = vld [vmem:[%s6122_s22 + $0x18] sm:$0xff]   ;;  %s6675_s22 = sld [smem:[#allocation52_spill]] }
 0xedf   : > { %3926 = vmatprep.mubr.msk.bf16.mxu1 %vm5062_vm2, %v5061_v12 }
 0xee4   : > { %p6678_p2 = scmp.ne.s32.totalorder %s6675_s22, 0 }
 0xef6   : > { %v2793_v3 = vpop.xlane.xlu1 %2792 }
 0xef7   : > { %4192 = vrcp.f32 %v2793_v3 }
 0xefa   : > { %v2681_v6 = vpop.permute.xlu1 %2680 }
 0xefb   : > { %v2686_v7 = vsel %vm2453_vm9, %v2681_v6, 0 }
 0xefc   : > { %3925 = vmatpush3.bf16.msra.mxu1 %v2686_v7 }
 0xefd   : > { %3936 = vmatprep.subr.bf16.mxu1 %v5061_v12 }
 0xeff   : > { %3927 = vmatmul.mubr.msk.bf16.vlgmr.msra.gmra.mrb[36].mxu1 %vm2434_vm8, %v2679_v9 }
 0xf00   : > { %3937 = vmatpush3.bf16.msra.mxu1 %v2803_v10  ;;  %3938 = vmatprep.mubr.msk.bf16.mxu1 %vm5062_vm2, %v5061_v12 }
 0xf01   : > { %v4193_v11 = vpop.eup %4192  ;;  %3950 = vmatprep.subr.bf16.mxu1 %v5061_v12 }
 0xf02   : > { %v2795_v13 = vmul.f32 %v4193_v11, %v4185_v52  ;;  %v4152_v52 = vld [vmem:[%s6669_s24] sm:$0xff]  }
 0xf04   : > { %v2796_v14 = vpack.c.bf16 %v2795_v13, %v2795_v13 }
 0xf07   : > { %3939 = vmatmul.mubr.msk.bf16.vlgmr.msra.gmra.mrb[40].mxu1 %vm2434_vm8, %v2796_v14 }
 0xf08   : > { %3954 = vmatprep.mubr.msk.bf16.mxu1 %vm5062_vm2, %v5061_v12  ;;  %3951 = vmatpush3.bf16.msra.mxu1 %v4152_v52 }
 0xf09   : > { %3952 = vmatprep.subr.bf16.mxu1 %v5061_v12 }
 0xfa9   : > { %v2491_v15 = vpop.f32.mrb[28].mxu1 }
 0xfaa   : > { %2497 = vst.msk [vmem:[#allocation2] sm:$0xff] %vm1684_vm3, %v2491_v15  ;;  %v3904_v16 = vpop.f32.mrb[29].mxu1 }
 0xfab   : > { %v2494_v17 = vpop.f32.mrb[30].mxu1  ;;  %v3747_v16 = vld [vmem:[%s6676_s25] ss:$0 sm:$0xff] }
 0xfac   : > { %v3905_v18 = vpop.f32.mrb[31].mxu1 }
 0xfb1   : > { %v2605_v20 = vpop.f32.mrb[32].mxu1 }
 0xfb2   : > { %2612 = vrot.lane.b32.xlu1 %v2605_v20, %s6665_s12  ;;  %v3916_v21 = vpop.f32.mrb[33].mxu1  ;;  %s4902_s12 = sshll.u32 %s5077_s9, 4  ;;  %s4903_s12 = int_to_ptr.vmem [resolvable:$false] %s4902_s12 }
 0xfb3   : > { %v2608_v22 = vpop.f32.mrb[34].mxu1  ;;  %s4904_s7 = scalar_lea.vmem %s4903_s12, 256 }
 0xfb4   : > { %v3917_v23 = vpop.f32.mrb[35].mxu1 }
 0xfd2   : > { %v2722_v4 = vpop.f32.mrb[36].mxu1 }
 0xfd3   : > { %2729 = vrot.lane.b32.xlu0 %v2722_v4, %s5075_s13  ;;  %v3928_v26 = vpop.f32.mrb[37].mxu1  ;;  %s6677_s13 = sld [smem:[#allocation75_spill]] }
 0xfd4   : > { %v2725_v27 = vpop.f32.mrb[38].mxu1 }
 0xfd5   : > { %v3929_v28 = vpop.f32.mrb[39].mxu1 }
 0xfd9   : > { %s6400_s3 = scalar_lea.hbm %s6677_s13, %s3749_s10 }
 0xfda   : > { %v2839_v30 = vpop.f32.mrb[40].mxu1 }
 0xfdb   : > { %2846 = vrot.lane.b32.xlu1 %v2839_v30, %s5076_s5  ;;  %v3940_v31 = vpop.f32.mrb[41].mxu1  ;;  %s3122_s5 = sshll.u32 %s6126_s30, 4  ;;  %s6402_s5 = int_to_ptr.vmem [resolvable:$true] %s3122_s5 }
 0xfdc   : > { %v2842_v32 = vpop.f32.mrb[42].mxu1  ;;  %s4898_s14 = scalar_lea.vmem %s6402_s5, 128  ;;  %p4905_p4 = scmp.lt.s32.totalorder %s6402_s5, %s4903_s12 }
 0xfdd   : > { %v3941_v33 = vpop.f32.mrb[43].mxu1  ;;  %p4899_p8 = scmp.ne.s32.totalorder %s6402_s5, %s4898_s14  ;;  %p4906_p6 = scmp.lt.s32.totalorder %s4904_s7, %s4898_s14 }
 0xfdf   : > { %p4900_p9 = pnand %p4899_p8, %p6678_p2  ;;  %p4907_p13 = por %p4906_p6, %p4905_p4 }
 0xfe1   : > { %p4901_p12 = pneg %p4900_p9 }
 0xfe3   : > { %p4908_p0 = pnand %p4907_p13, %p4901_p12 }
0x1024   : > { %v2613_v34 = vpop.permute.xlu1 %2612 }
0x1025   : > { %2615 = vst.msk [vmem:[#allocation2] sm:$0xff] %vm1911_vm5, %v2613_v34 }
0x1045   : > { %v2730_v35 = vpop.permute.xlu0 %2729 }
0x1046   : > { %2732 = vst.msk [vmem:[#allocation2] sm:$0xff] %vm2029_vm6, %v2730_v35 }
0x104d   : > { %v2847_v36 = vpop.permute.xlu1 %2846 }
0x104e   : > { %2849 = vst.msk [vmem:[#allocation2] sm:$0xff] %vm2147_vm7, %v2847_v36 }
0x1055   : > { %v2850_v29 = vld [vmem:[#allocation2] sm:$0xff] }
0x1056   : > { %v2851_v37 = vpack.c.bf16 %v2850_v29, %v2850_v29 }
0x1058   : > { %3947 = vmatmul.mubr.msk.bf16.vlgmr.msra.gmra.mrb[36].mxu0 %vm1583_vm1, %v2851_v37 }
0x1059   : > { %3966 = vmatprep.mubr.msk.bf16.mxu0 %vm5062_vm2, %v5061_v12  ;;  %3959 = vmatpush3.bf16.msra.mxu0 %v4154_v63 }
0x105a   : > { %3960 = vmatprep.subr.bf16.mxu0 %v5061_v12 }
0x105d   : > { %3961 = vmatpush3.bf16.msra.mxu0 %v4155_v0 }
0x105e   : > { %3962 = vmatprep.subr.bf16.mxu0 %v5061_v12 }
0x1061   : > { %3963 = vmatpush3.bf16.msra.mxu0 %v4156_v47 }
0x1062   : > { %3964 = vmatprep.subr.bf16.mxu0 %v5061_v12 }
0x1065   : > { %3965 = vmatpush3.bf16.msra.mxu0 %v4157_v1 }
0x112b   : > { %v2905_v38 = vpop.f32.mrb[36].mxu0 }
0x112c   : > { %v2911_v40 = vadd.f32 %v2905_v38, %v6250_v19  ;;  %v3948_v41 = vpop.f32.mrb[37].mxu0  ;;  %v4153_v19 = vld [vmem:[%s6670_s27 + $0x8] sm:$0xff]  }
0x112d   : > { %v2908_v42 = vpop.f32.mrb[38].mxu0  ;;  %3953 = vmatpush3.bf16.msra.mxu1 %v4153_v19 }
0x112e   : > { %v2919_v43 = vadd.f32 %v3735_v39, %v2911_v40  ;;  %v3949_v44 = vpop.f32.mrb[39].mxu0 }
0x1130   : > { %v2922_v45 = vsel %vm1583_vm1, %v2919_v43, 0.0 }
0x1131   : > { %2923 = vadd.xlane.f32.xlu0 %v2922_v45 }
0x11be   : > { %v2924_v46 = vpop.xlane.xlu0 %2923 }
0x11bf   : > { %v2925_v48 = vmul.f32 0.03125, %v2924_v46 }
0x11c1   : > { %v2926_v49 = vsub.f32 %v2919_v43, %v2925_v48 }
0x11c3   : > { %v2927_v50 = vmul.f32 %v2926_v49, %v2926_v49 }
0x11c5   : > { %v2928_v51 = vsel %vm1583_vm1, %v2927_v50, 0.0 }
0x11c6   : > { %2929 = vadd.xlane.f32.xlu1 %v2928_v51 }
0x1253   : > { %v2930_v53 = vpop.xlane.xlu1 %2929 }
0x1254   : > { %v2931_v54 = vmul.f32 0.03125, %v2930_v53 }
0x1256   : > { %v2932_v55 = vadd.f32 1e-05, %v2931_v54 }
0x1258   : > { %4194 = vrsqrt.f32 %v2932_v55 }
0x1262   : > { %v4195_v56 = vpop.eup %4194 }
0x1263   : > { %v2934_v58 = vmul.f32 %v4195_v56, %v2926_v49 }
0x1265   : > { %v2941_v60 = vmul.f32 %v3736_v57, %v2934_v58 }
0x1267   : > { %v2948_v61 = vadd.f32 %v3737_v59, %v2941_v60 }
0x1269   : > { %v2949_v62 = vpack.c.bf16 %v2948_v61, %v2948_v61 }
0x126b   : > { %3955 = vmatmul.mubr.msk.bf16.vlgmr.msra.gmra.mrb[44].mxu1 %vm1583_vm1, %v2949_v62 }
0x133e   : > { %v3010_v3 = vpop.f32.mrb[44].mxu1 }
0x133f   : > { %v3011_v5 = vadd.f32 %v3738_v2, %v3010_v3  ;;  %v3956_v6 = vpop.f32.mrb[45].mxu1 }
0x1340   : > { %v3013_v7 = vpop.f32.mrb[46].mxu1 }
0x1341   : > { %v3017_v8 = vmul.f32 0.70710677, %v3011_v5  ;;  %v3957_v9 = vpop.f32.mrb[47].mxu1  ;;  %v3016_v11 = vmul.f32 0.5, %v3011_v5 }
0x1343   : > { %4196 = verf.f32 %v3017_v8 }
0x134d   : > { %v4197_v10 = vpop.eup %4196 }
0x134e   : > { %v3019_v13 = vadd.f32 1.0, %v4197_v10 }
0x1350   : > { %v3020_v14 = vmul.f32 %v3019_v13, %v3016_v11 }
0x1352   : > { %v3021_v12 = vpack.c.bf16 %v3020_v14, %v3020_v14 }
0x1354   : > { %3967 = vmatmul.mubr.msk.bf16.vlgmr.msra.gmra.mrb[40].mxu0 %vm3054_vm10, %v3021_v12 }
0x1427   : > { %v3092_v15 = vpop.f32.mrb[40].mxu0 }
0x1428   : > { %v3098_v17 = vadd.f32 %v3092_v15, %v2919_v43  ;;  %v3968_v18 = vpop.f32.mrb[41].mxu0 }
0x1429   : > { %v3095_v20 = vpop.f32.mrb[42].mxu0 }
0x142a   : > { %v3106_v21 = vadd.f32 %v3747_v16, %v3098_v17  ;;  %v3969_v22 = vpop.f32.mrb[43].mxu0 }
0x142c   : > { %3107 = vst.msk [vmem:[%s6126_s30] sm:$0xff] %vm1583_vm1, %v3106_v21 }
0x142d   : > { %4911 = shalt.err (!%p4908_p0)
}
0x142e   : > { %s4912_s11 = scalar_lea.hbm %s6400_s3, 128  ;;  %s4916_s28 = scalar_lea.hbm %s6677_s13, 256 }
0x142f   : > { %p4913_p5 = scmp.ne.s32.totalorder %s6400_s3, %s4912_s11  ;;  %p4917_p11 = scmp.lt.u32.totalorder %s6400_s3, %s6677_s13 }
0x1430   : > { %p4918_p10 = scmp.lt.u32.totalorder %s4916_s28, %s4912_s11  ;;  %p4920_p8 = scmp.lt.u32.totalorder %s4912_s11, %s6400_s3 }
0x1431   : > { %p4914_p7 = pnand %p4913_p5, %p6678_p2 }
0x1432   : > { %p4919_p1 = por %p4918_p10, %p4917_p11 }
0x1433   : > { %p4915_p3 = pneg %p4914_p7 }
0x1434   : > { %p4921_p9 = por %p4920_p8, %p4919_p1 }
0x1436   : > { %p4922_p12 = pnand %p4921_p9, %p4915_p3 }
0x1438   : > { %4925 = shalt.err (!%p4922_p12)
}
0x1439   : > { %4022 = dma.vmem_to_hbm [thread:$0]  (%p6678_p2), %s6402_s5, 128, %s6400_s3, %s3109_s0  }
0x143a PF: > { %s6679_s1 = sld [smem:[#allocation44_spill]]  ;;  %s6680_s20 = sld [smem:[#allocation38_spill]] }
0x143b   : > { %s6681_s26 = sld [smem:[#allocation53_spill]] }
0x1440   : > { %p4034_p4 = scmp.ge.s32.totalorder %s6679_s1, 2  ;;  %s3134_s4 = sand.u32 1, %s6680_s20  }
0x1441   : > { %p6682_p6 = scmp.ne.s32.totalorder %s6681_s26, 0  ;;  %s3135_s25 = scalar_lea.sflag [#allocation5], %s3134_s4 }
0x1443   : > { %p4029_p13 = pnand %p4034_p4, %p6682_p6 }
0x1445   : > { %4987 = dma.done.wait (!%p4029_p13), %s3135_s25, 128  }
0x1446   : > { %4989 = vsyncadd (!%p4029_p13), %s3135_s25, 4294967168  ;;  %s42_s4 = sadd.s32 1, %s6679_s1   ;;  %s6683_s29 = sld [smem:[#allocation37_spill]] }
0x1447   : > { %p39_p0 = scmp.ge.s32.totalorder %s42_s4, 6   ;;  %s6684_s22 = sld [smem:[#allocation49_spill]] }
0x1448   : > { %s6685_s30 = sld [smem:[#allocation39_spill]]  ;;  %s6686_s7 = sld [smem:[#allocation40_spill]] }
0x1449   : > { %s6687_s3 = sld [smem:[#allocation50_spill]]  ;;  %s6688_s1 = sld [smem:[#allocation43_spill]] }
0x144a   : > { %s6689_s10 = sld [smem:[#allocation46_spill]]  ;;  %s6690_s27 = sld [smem:[#allocation47_spill]] }
0x144b   : > { %s6691_s2 = smov %s5000_s6  ;;  %s6693_s26 = smov %s5024_s8 }
0x144c   :  { %41 = sbr.rel (!%p39_p0) target bundleno = 33 (0x21), region = 426 }
0x144d   : > { %s6692_s6 = smov %s6684_s22 }
0x1450   : > { %s6694_s8 = smov %s6689_s10 }
0x1453   :  { %3140 = vsyncpa [#allocation4], 1 }
0x1454   :  { %3142 = vsyncpa [#allocation4 + $0x1], 1 }
0x1455   :  { %3143 = vsyncpa [#allocation7], 1 }
0x1456   :  { %3144 = vsyncpa [#allocation5], 1 }
0x1457   :  { %3146 = vsyncpa [#allocation5 + $0x1], 1 }

</bundles_post_ra>
